<compile_context>
chip_gen: v7x
topology: tpu7x:2x2x1
jax: 0.10.0
libtpu: 0.0.40
codegen_flags: <defaults>
</compile_context>

<pallas_src>
import functools

import jax
import jax.numpy as jnp
import numpy as np
from jax.experimental import pallas as pl
from jax.experimental.pallas import tpu as pltpu

POOL_SIZES = (5, 9, 13)
PMAX = max(POOL_SIZES) // 2          # 6 -> rows/cols of -inf padding needed
PAD_H = PMAX                         # top/bottom -inf margin
PAD_WL = 8                           # left -inf margin (>=6, sublane aligned)
PAD_WR = 8                           # right -inf margin (>=6)
BN_EPS = 1e-5


def _round_up(x, m):
    return ((x + m - 1) // m) * m


# ---------------------------------------------------------------------------
# Kernel A: 1x1 conv (row-tiled matmul) + BatchNorm (batch stats) + Mish.
# grid = (2 passes, row tiles); the output stays resident in VMEM across the
# whole grid (constant block index), so pass 1 never re-reads x or re-matmuls.
# ---------------------------------------------------------------------------
def _conv_bn_mish_kernel(x_ref, w_ref, g_ref, b_ref, y_ref, sum_ref, sq_ref,
                         *, tm, inv_count):
    # NOTE: program_id must be read at the top level of the body, never inside
    # a pl.when branch (breaks the interpret/CPU fallback path).
    p = pl.program_id(0)            # pass: 0 = matmul + stats, 1 = BN + Mish
    t = pl.program_id(1)            # row-tile index
    row0 = t * tm

    @pl.when(jnp.logical_and(p == 0, t == 0))
    def _():
        sum_ref[...] = jnp.zeros_like(sum_ref)
        sq_ref[...] = jnp.zeros_like(sq_ref)

    @pl.when(p == 0)
    def _():
        z = jnp.dot(x_ref[...], w_ref[...], preferred_element_type=jnp.float32)
        sum_ref[...] += jnp.sum(z, axis=0, keepdims=True)
        sq_ref[...] += jnp.sum(z * z, axis=0, keepdims=True)
        y_ref[pl.ds(row0, tm), :] = z          # stash conv output in VMEM

    @pl.when(p == 1)
    def _():
        mean = sum_ref[...] * inv_count
        var = sq_ref[...] * inv_count - mean * mean     # biased batch variance
        scale = jax.lax.rsqrt(var + BN_EPS) * g_ref[...]
        shift = b_ref[...] - mean * scale
        z = y_ref[pl.ds(row0, tm), :]
        zbn = z * scale + shift
        # Mish: x * tanh(softplus(x)); tanh(softplus(x)) = 1 - 2/((1+e^x)^2+1)
        u = jnp.exp(jnp.minimum(zbn, 30.0))
        tsp = 1.0 - 2.0 / ((1.0 + u) * (1.0 + u) + 1.0)
        y_ref[pl.ds(row0, tm), :] = zbn * tsp


# ---------------------------------------------------------------------------
# Kernel B: three same-size max pools + identity, channel-last blocks so the
# channels sit on the 128-lane axis.  -inf padding is built in a VMEM scratch
# (no padded tensor ever hits HBM); 9/13 windows reuse the shared 5-tap max.
# ---------------------------------------------------------------------------
def _spp_pool_kernel(y_ref, o_ref, pad_ref):
    # y_ref:   (h, w, c) activation block (batch dim squeezed)
    # o_ref:   (4, h, w, c) -> [identity, pool5, pool9, pool13]
    # pad_ref: (h + 2*PAD_H, w + PAD_WL + PAD_WR, c) scratch, -inf border,
    #          interior at (PAD_H, PAD_WL) so the interior store is aligned.
    h, w, _ = y_ref.shape
    y = y_ref[...]
    o_ref[0] = y                                   # identity branch

    pad_ref[...] = jnp.full(pad_ref.shape, -jnp.inf, dtype=pad_ref.dtype)
    pad_ref[PAD_H:PAD_H + h, PAD_WL:PAD_WL + w, :] = y
    yp = pad_ref[...]

    # ---- H pass (third-minor axis: plain slices are cheap) -----------------
    # r5[a] = max(yp[a], ..., yp[a+4]) for a = 0 .. h+7
    r5 = yp[0:h + 8]
    for d in range(1, 5):
        r5 = jnp.maximum(r5, yp[d:d + h + 8])
    row5 = r5[4:4 + h]                                      # rows [i+4 , i+8 ]
    row9 = jnp.maximum(r5[2:2 + h], r5[6:6 + h])            # rows [i+2 , i+10]
    row13 = jnp.maximum(jnp.maximum(r5[0:h], r5[4:4 + h]),
                        r5[8:8 + h])                        # rows [i   , i+12]

    # ---- W pass (sublane axis): 5-tap windows, composed for 9 / 13 ---------
    # TODO(synk): these shifted sublane slices could become pltpu.roll (XLU)
    # on TPU, but roll has no CPU/interpret lowering, so plain slices are used.
    def win5(r, start, length):        # max over cols [start+j .. start+j+4]
        m = r[:, start:start + length]
        for d in range(1, 5):
            m = jnp.maximum(m, r[:, start + d:start + d + length])
        return m

    o_ref[1] = win5(row5, PAD_WL - 2, w)                            # pool 5
    c9 = win5(row9, PAD_WL - 4, w + 4)
    o_ref[2] = jnp.maximum(c9[:, 0:w], c9[:, 4:4 + w])              # pool 9
    c13 = win5(row13, PAD_WL - 6, w + 8)
    o_ref[3] = jnp.maximum(jnp.maximum(c13[:, 0:w], c13[:, 4:4 + w]),
                           c13[:, 8:8 + w])                         # pool 13


# ---------------------------------------------------------------------------
# Wrapper (NCHW public API; only glue reshapes/transposes live in XLA)
# ---------------------------------------------------------------------------
def spatial_pyramid_pooling(x, w, gamma, beta):
    # x: (N, Cin, H, W) f32; w: (Cout, Cin) 1x1 conv weight; gamma/beta: (Cout,)
    n, cin, h, ww = x.shape
    cout = w.shape[0]
    nhw = n * h * ww

    # ---- Kernel A: rows in NHWC order (feeds Kernel B channel-last) --------
    x2d = jnp.transpose(x, (0, 2, 3, 1)).reshape(nhw, cin)
    tm = min(512, _round_up(nhw, 8))
    nt = pl.cdiv(nhw, tm)
    nhw_pad = nt * tm
    if nhw_pad != nhw:
        # zero rows contribute nothing to the BN sums (divisor is the true nhw)
        x2d = jnp.pad(x2d, ((0, nhw_pad - nhw), (0, 0)))

    wt = jnp.transpose(w)                       # (Cin, Cout)
    g2 = gamma.reshape(1, cout)
    b2 = beta.reshape(1, cout)

    kern_a = functools.partial(_conv_bn_mish_kernel, tm=tm,
                               inv_count=1.0 / float(nhw))
    cost_a = pl.CostEstimate(
        flops=int(2 * nhw_pad * cin * cout + 12 * nhw_pad * cout),
        transcendentals=int(nhw_pad * cout),
        bytes_accessed=int(4 * (nhw_pad * cin + cin * cout + nhw_pad * cout)))
    # The conv output (nhw_pad x cout) stays resident in VMEM for the whole
    # grid; at SPP sizes this is << the scoped VMEM limit on v5e/v6e/v7x.
    y2d = pl.pallas_call(
        kern_a,
        out_shape=jax.ShapeDtypeStruct((nhw_pad, cout), jnp.float32),
        grid=(2, nt),
        in_specs=[
            # pass 1 never reads x: pin its block index to 0 so the pipeline
            # does not stream x from HBM a second time.
            pl.BlockSpec((tm, cin), lambda p, t: ((1 - p) * t, 0)),
            pl.BlockSpec((cin, cout), lambda p, t: (0, 0)),
            pl.BlockSpec((1, cout), lambda p, t: (0, 0)),
            pl.BlockSpec((1, cout), lambda p, t: (0, 0)),
        ],
        out_specs=pl.BlockSpec((nhw_pad, cout), lambda p, t: (0, 0)),
        scratch_shapes=[pltpu.VMEM((1, cout), jnp.float32),
                        pltpu.VMEM((1, cout), jnp.float32)],
        compiler_params=pltpu.CompilerParams(
            dimension_semantics=("arbitrary", "arbitrary")),
        cost_estimate=cost_a,
    )(x2d, wt, g2, b2)

    y_nhwc = y2d[:nhw].reshape(n, h, ww, cout)

    # ---- Kernel B: SPP max pools, channel-last (lanes = channels) ----------
    hp = h + 2 * PAD_H
    wp = ww + PAD_WL + PAD_WR

    def _vmem_bytes(tc):
        # padded scratch + double-buffered input block + double-buffered output
        return 4 * (hp * wp * tc + 2 * h * ww * tc + 2 * 4 * h * ww * tc)

    tc = cout
    # keep tc a multiple of 128 while shrinking; 12 MiB budget stays under the
    # default scoped-VMEM limit on every generation (incl. v5e's 16 MiB).
    while tc % 256 == 0 and _vmem_bytes(tc) > 12 * 1024 * 1024:
        tc //= 2
    nct = cout // tc

    cost_b = pl.CostEstimate(
        flops=int(25 * n * h * ww * cout),
        transcendentals=0,
        bytes_accessed=int(4 * 5 * n * h * ww * cout))
    out5 = pl.pallas_call(
        _spp_pool_kernel,
        out_shape=jax.ShapeDtypeStruct((n, 4, h, ww, cout), jnp.float32),
        grid=(n, nct),
        in_specs=[pl.BlockSpec((None, h, ww, tc), lambda b, cb: (b, 0, 0, cb))],
        out_specs=pl.BlockSpec((None, 4, h, ww, tc),
                               lambda b, cb: (b, 0, 0, 0, cb)),
        scratch_shapes=[pltpu.VMEM((hp, wp, tc), jnp.float32)],
        compiler_params=pltpu.CompilerParams(
            dimension_semantics=("parallel", "parallel")),
        cost_estimate=cost_b,
    )(y_nhwc)

    # (N, branch, H, W, C) -> (N, branch, C, H, W) -> (N, 4*C, H, W).
    # NCHW is the module's public layout, so this one transpose is required.
    return jnp.transpose(out5, (0, 1, 4, 2, 3)).reshape(n, 4 * cout, h, ww)


# ---------------------------------------------------------------------------
# Plain-JAX reference for a sanity check
# ---------------------------------------------------------------------------
def _reference(x, w, gamma, beta):
    n, cin, h, ww = x.shape
    cout = w.shape[0]
    z = jnp.einsum('oc,nchw->nohw', w, x)
    mean = z.mean(axis=(0, 2, 3), keepdims=True)
    var = ((z - mean) ** 2).mean(axis=(0, 2, 3), keepdims=True)
    zbn = (z - mean) / jnp.sqrt(var + BN_EPS)
    zbn = zbn * gamma.reshape(1, cout, 1, 1) + beta.reshape(1, cout, 1, 1)
    sp = jnp.where(zbn > 20.0, zbn,
                   jnp.log1p(jnp.exp(jnp.minimum(zbn, 20.0))))
    y = zbn * jnp.tanh(sp)
    feats = [y]
    for k in POOL_SIZES:
        p = k // 2
        feats.append(jax.lax.reduce_window(
            y, -jnp.inf, jax.lax.max,
            (1, 1, k, k), (1, 1, 1, 1),
            [(0, 0), (0, 0), (p, p), (p, p)]))
    return jnp.concatenate(feats, axis=1)


if __name__ == "__main__":
    key = jax.random.PRNGKey(0)
    kx, kw = jax.random.split(key)

    N, CIN, H, W = 2, 8, 16, 16          # feature_channels[-1] = 8
    COUT = CIN // 2

    x = jax.random.normal(kx, (N, CIN, H, W), dtype=jnp.float32)
    # Conv2d 1x1 weight ~ N(0, 0.01), no bias (bn_act=True); BN gamma=1, beta=0.
    w = 0.01 * jax.random.normal(kw, (COUT, CIN), dtype=jnp.float32)
    gamma = jnp.ones((COUT,), jnp.float32)
    beta = jnp.zeros((COUT,), jnp.float32)

    fn = jax.jit(spatial_pyramid_pooling)
    out = jax.block_until_ready(fn(x, w, gamma, beta))
    assert out.shape == (N, 2 * CIN, H, W), out.shape

    ref = _reference(x, w, gamma, beta)
    np.testing.assert_allclose(np.asarray(out), np.asarray(ref),
                               rtol=2e-2, atol=2e-2)
    print("KERNEL_OK")
</pallas_src>

<mosaic_0001>
module attributes {stable_mosaic.version = 11 : i64} {
  func.func @_spp_pool_kernel(%arg0: i32, %arg1: i32, %arg2: memref<1x16x16x4xf32, #tpu.memory_space<vmem>>, %arg3: memref<1x4x16x16x4xf32, #tpu.memory_space<vmem>>, %arg4: memref<28x32x4xf32, #tpu.memory_space<vmem>>) attributes {dimension_semantics = [#tpu.dimension_semantics<parallel>, #tpu.dimension_semantics<parallel>], iteration_bounds = array<i64: 2, 1>, scalar_prefetch = 0 : i64, scratch_operands = 1 : i64, tpu.core_type = #tpu.core_type<tc>, window_params = [{transform_indices = @transform_0, window_bounds = array<i64: 1, 16, 16, 4>}, {transform_indices = @transform_1, window_bounds = array<i64: 1, 4, 16, 16, 4>}]} {
    %c0 = arith.constant 0 : index
    %c0_0 = arith.constant 0 : index
    %c0_1 = arith.constant 0 : index
    %c0_2 = arith.constant 0 : index
    %0 = vector.load %arg2[%c0, %c0_0, %c0_1, %c0_2] : memref<1x16x16x4xf32, #tpu.memory_space<vmem>>, vector<1x16x16x4xf32>
    %1 = vector.shape_cast %0 : vector<1x16x16x4xf32> to vector<16x16x4xf32>
    %c0_3 = arith.constant 0 : index
    %c0_4 = arith.constant 0 : index
    %c0_5 = arith.constant 0 : index
    %c0_6 = arith.constant 0 : index
    %c0_7 = arith.constant 0 : index
    %2 = vector.load %arg3[%c0_3, %c0_4, %c0_5, %c0_6, %c0_7] : memref<1x4x16x16x4xf32, #tpu.memory_space<vmem>>, vector<1x1x16x16x4xf32>
    %3 = vector.shape_cast %2 : vector<1x1x16x16x4xf32> to vector<16x16x4xf32>
    %4 = vector.shape_cast %1 : vector<16x16x4xf32> to vector<1x1x16x16x4xf32>
    tpu.vector_store %arg3[%c0_3, %c0_4, %c0_5, %c0_6, %c0_7], %4 {strides = array<i32>} : memref<1x4x16x16x4xf32, #tpu.memory_space<vmem>>, vector<1x1x16x16x4xf32>,
    %cst = arith.constant 0xFF800000 : f32
    %5 = vector.broadcast %cst : f32 to vector<28x32x4xf32>
    %c0_8 = arith.constant 0 : index
    %c0_9 = arith.constant 0 : index
    %c0_10 = arith.constant 0 : index
    %6 = vector.load %arg4[%c0_8, %c0_9, %c0_10] : memref<28x32x4xf32, #tpu.memory_space<vmem>>, vector<28x32x4xf32>
    tpu.vector_store %arg4[%c0_8, %c0_9, %c0_10], %5 {strides = array<i32>} : memref<28x32x4xf32, #tpu.memory_space<vmem>>, vector<28x32x4xf32>,
    %c6 = arith.constant 6 : index
    %c8 = arith.constant 8 : index
    %c0_11 = arith.constant 0 : index
    %7 = vector.load %arg4[%c6, %c8, %c0_11] : memref<28x32x4xf32, #tpu.memory_space<vmem>>, vector<16x16x4xf32>
    tpu.vector_store %arg4[%c6, %c8, %c0_11], %1 {strides = array<i32>} : memref<28x32x4xf32, #tpu.memory_space<vmem>>, vector<16x16x4xf32>,
    %c0_12 = arith.constant 0 : index
    %c0_13 = arith.constant 0 : index
    %c0_14 = arith.constant 0 : index
    %8 = vector.load %arg4[%c0_12, %c0_13, %c0_14] : memref<28x32x4xf32, #tpu.memory_space<vmem>>, vector<28x32x4xf32>
    %9 = vector.extract_strided_slice %8 {offsets = [0, 0, 0], sizes = [24, 32, 4], strides = [1, 1, 1]} : vector<28x32x4xf32> to vector<24x32x4xf32>
    %10 = vector.extract_strided_slice %8 {offsets = [1, 0, 0], sizes = [24, 32, 4], strides = [1, 1, 1]} : vector<28x32x4xf32> to vector<24x32x4xf32>
    %11 = arith.maximumf %9, %10 : vector<24x32x4xf32>
    %12 = vector.extract_strided_slice %8 {offsets = [2, 0, 0], sizes = [24, 32, 4], strides = [1, 1, 1]} : vector<28x32x4xf32> to vector<24x32x4xf32>
    %13 = arith.maximumf %11, %12 : vector<24x32x4xf32>
    %14 = vector.extract_strided_slice %8 {offsets = [3, 0, 0], sizes = [24, 32, 4], strides = [1, 1, 1]} : vector<28x32x4xf32> to vector<24x32x4xf32>
    %15 = arith.maximumf %13, %14 : vector<24x32x4xf32>
    %16 = vector.extract_strided_slice %8 {offsets = [4, 0, 0], sizes = [24, 32, 4], strides = [1, 1, 1]} : vector<28x32x4xf32> to vector<24x32x4xf32>
    %17 = arith.maximumf %15, %16 : vector<24x32x4xf32>
    %18 = vector.extract_strided_slice %17 {offsets = [4, 0, 0], sizes = [16, 32, 4], strides = [1, 1, 1]} : vector<24x32x4xf32> to vector<16x32x4xf32>
    %19 = vector.extract_strided_slice %17 {offsets = [2, 0, 0], sizes = [16, 32, 4], strides = [1, 1, 1]} : vector<24x32x4xf32> to vector<16x32x4xf32>
    %20 = vector.extract_strided_slice %17 {offsets = [6, 0, 0], sizes = [16, 32, 4], strides = [1, 1, 1]} : vector<24x32x4xf32> to vector<16x32x4xf32>
    %21 = arith.maximumf %19, %20 : vector<16x32x4xf32>
    %22 = vector.extract_strided_slice %17 {offsets = [0, 0, 0], sizes = [16, 32, 4], strides = [1, 1, 1]} : vector<24x32x4xf32> to vector<16x32x4xf32>
    %23 = vector.extract_strided_slice %17 {offsets = [4, 0, 0], sizes = [16, 32, 4], strides = [1, 1, 1]} : vector<24x32x4xf32> to vector<16x32x4xf32>
    %24 = arith.maximumf %22, %23 : vector<16x32x4xf32>
    %25 = vector.extract_strided_slice %17 {offsets = [8, 0, 0], sizes = [16, 32, 4], strides = [1, 1, 1]} : vector<24x32x4xf32> to vector<16x32x4xf32>
    %26 = arith.maximumf %24, %25 : vector<16x32x4xf32>
    %27 = vector.extract_strided_slice %18 {offsets = [0, 6, 0], sizes = [16, 16, 4], strides = [1, 1, 1]} : vector<16x32x4xf32> to vector<16x16x4xf32>
    %28 = vector.extract_strided_slice %18 {offsets = [0, 7, 0], sizes = [16, 16, 4], strides = [1, 1, 1]} : vector<16x32x4xf32> to vector<16x16x4xf32>
    %29 = arith.maximumf %27, %28 : vector<16x16x4xf32>
    %30 = vector.extract_strided_slice %18 {offsets = [0, 8, 0], sizes = [16, 16, 4], strides = [1, 1, 1]} : vector<16x32x4xf32> to vector<16x16x4xf32>
    %31 = arith.maximumf %29, %30 : vector<16x16x4xf32>
    %32 = vector.extract_strided_slice %18 {offsets = [0, 9, 0], sizes = [16, 16, 4], strides = [1, 1, 1]} : vector<16x32x4xf32> to vector<16x16x4xf32>
    %33 = arith.maximumf %31, %32 : vector<16x16x4xf32>
    %34 = vector.extract_strided_slice %18 {offsets = [0, 10, 0], sizes = [16, 16, 4], strides = [1, 1, 1]} : vector<16x32x4xf32> to vector<16x16x4xf32>
    %35 = arith.maximumf %33, %34 : vector<16x16x4xf32>
    %c0_15 = arith.constant 0 : index
    %c1 = arith.constant 1 : index
    %c0_16 = arith.constant 0 : index
    %c0_17 = arith.constant 0 : index
    %c0_18 = arith.constant 0 : index
    %36 = vector.load %arg3[%c0_15, %c1, %c0_16, %c0_17, %c0_18] : memref<1x4x16x16x4xf32, #tpu.memory_space<vmem>>, vector<1x1x16x16x4xf32>
    %37 = vector.shape_cast %36 : vector<1x1x16x16x4xf32> to vector<16x16x4xf32>
    %38 = vector.shape_cast %35 : vector<16x16x4xf32> to vector<1x1x16x16x4xf32>
    tpu.vector_store %arg3[%c0_15, %c1, %c0_16, %c0_17, %c0_18], %38 {strides = array<i32>} : memref<1x4x16x16x4xf32, #tpu.memory_space<vmem>>, vector<1x1x16x16x4xf32>,
    %39 = vector.extract_strided_slice %21 {offsets = [0, 4, 0], sizes = [16, 20, 4], strides = [1, 1, 1]} : vector<16x32x4xf32> to vector<16x20x4xf32>
    %40 = vector.extract_strided_slice %21 {offsets = [0, 5, 0], sizes = [16, 20, 4], strides = [1, 1, 1]} : vector<16x32x4xf32> to vector<16x20x4xf32>
    %41 = arith.maximumf %39, %40 : vector<16x20x4xf32>
    %42 = vector.extract_strided_slice %21 {offsets = [0, 6, 0], sizes = [16, 20, 4], strides = [1, 1, 1]} : vector<16x32x4xf32> to vector<16x20x4xf32>
    %43 = arith.maximumf %41, %42 : vector<16x20x4xf32>
    %44 = vector.extract_strided_slice %21 {offsets = [0, 7, 0], sizes = [16, 20, 4], strides = [1, 1, 1]} : vector<16x32x4xf32> to vector<16x20x4xf32>
    %45 = arith.maximumf %43, %44 : vector<16x20x4xf32>
    %46 = vector.extract_strided_slice %21 {offsets = [0, 8, 0], sizes = [16, 20, 4], strides = [1, 1, 1]} : vector<16x32x4xf32> to vector<16x20x4xf32>
    %47 = arith.maximumf %45, %46 : vector<16x20x4xf32>
    %48 = vector.extract_strided_slice %47 {offsets = [0, 0, 0], sizes = [16, 16, 4], strides = [1, 1, 1]} : vector<16x20x4xf32> to vector<16x16x4xf32>
    %49 = vector.extract_strided_slice %47 {offsets = [0, 4, 0], sizes = [16, 16, 4], strides = [1, 1, 1]} : vector<16x20x4xf32> to vector<16x16x4xf32>
    %50 = arith.maximumf %48, %49 : vector<16x16x4xf32>
    %c0_19 = arith.constant 0 : index
    %c2 = arith.constant 2 : index
    %c0_20 = arith.constant 0 : index
    %c0_21 = arith.constant 0 : index
    %c0_22 = arith.constant 0 : index
    %51 = vector.load %arg3[%c0_19, %c2, %c0_20, %c0_21, %c0_22] : memref<1x4x16x16x4xf32, #tpu.memory_space<vmem>>, vector<1x1x16x16x4xf32>
    %52 = vector.shape_cast %51 : vector<1x1x16x16x4xf32> to vector<16x16x4xf32>
    %53 = vector.shape_cast %50 : vector<16x16x4xf32> to vector<1x1x16x16x4xf32>
    tpu.vector_store %arg3[%c0_19, %c2, %c0_20, %c0_21, %c0_22], %53 {strides = array<i32>} : memref<1x4x16x16x4xf32, #tpu.memory_space<vmem>>, vector<1x1x16x16x4xf32>,
    %54 = vector.extract_strided_slice %26 {offsets = [0, 2, 0], sizes = [16, 24, 4], strides = [1, 1, 1]} : vector<16x32x4xf32> to vector<16x24x4xf32>
    %55 = vector.extract_strided_slice %26 {offsets = [0, 3, 0], sizes = [16, 24, 4], strides = [1, 1, 1]} : vector<16x32x4xf32> to vector<16x24x4xf32>
    %56 = arith.maximumf %54, %55 : vector<16x24x4xf32>
    %57 = vector.extract_strided_slice %26 {offsets = [0, 4, 0], sizes = [16, 24, 4], strides = [1, 1, 1]} : vector<16x32x4xf32> to vector<16x24x4xf32>
    %58 = arith.maximumf %56, %57 : vector<16x24x4xf32>
    %59 = vector.extract_strided_slice %26 {offsets = [0, 5, 0], sizes = [16, 24, 4], strides = [1, 1, 1]} : vector<16x32x4xf32> to vector<16x24x4xf32>
    %60 = arith.maximumf %58, %59 : vector<16x24x4xf32>
    %61 = vector.extract_strided_slice %26 {offsets = [0, 6, 0], sizes = [16, 24, 4], strides = [1, 1, 1]} : vector<16x32x4xf32> to vector<16x24x4xf32>
    %62 = arith.maximumf %60, %61 : vector<16x24x4xf32>
    %63 = vector.extract_strided_slice %62 {offsets = [0, 0, 0], sizes = [16, 16, 4], strides = [1, 1, 1]} : vector<16x24x4xf32> to vector<16x16x4xf32>
    %64 = vector.extract_strided_slice %62 {offsets = [0, 4, 0], sizes = [16, 16, 4], strides = [1, 1, 1]} : vector<16x24x4xf32> to vector<16x16x4xf32>
    %65 = arith.maximumf %63, %64 : vector<16x16x4xf32>
    %66 = vector.extract_strided_slice %62 {offsets = [0, 8, 0], sizes = [16, 16, 4], strides = [1, 1, 1]} : vector<16x24x4xf32> to vector<16x16x4xf32>
    %67 = arith.maximumf %65, %66 : vector<16x16x4xf32>
    %c0_23 = arith.constant 0 : index
    %c3 = arith.constant 3 : index
    %c0_24 = arith.constant 0 : index
    %c0_25 = arith.constant 0 : index
    %c0_26 = arith.constant 0 : index
    %68 = vector.load %arg3[%c0_23, %c3, %c0_24, %c0_25, %c0_26] : memref<1x4x16x16x4xf32, #tpu.memory_space<vmem>>, vector<1x1x16x16x4xf32>
    %69 = vector.shape_cast %68 : vector<1x1x16x16x4xf32> to vector<16x16x4xf32>
    %70 = vector.shape_cast %67 : vector<16x16x4xf32> to vector<1x1x16x16x4xf32>
    tpu.vector_store %arg3[%c0_23, %c3, %c0_24, %c0_25, %c0_26], %70 {strides = array<i32>} : memref<1x4x16x16x4xf32, #tpu.memory_space<vmem>>, vector<1x1x16x16x4xf32>,
    return
  }
  func.func @transform_0(%arg0: i32, %arg1: i32) -> (i32, i32, i32, i32) {
    %c0_i32 = arith.constant 0 : i32
    %c0_i32_0 = arith.constant 0 : i32
    %c0_i32_1 = arith.constant 0 : i32
    return %arg0, %c0_i32, %c0_i32_0, %arg1 : i32, i32, i32, i32
  }
  func.func @transform_1(%arg0: i32, %arg1: i32) -> (i32, i32, i32, i32, i32) {
    %c0_i32 = arith.constant 0 : i32
    %c0_i32_0 = arith.constant 0 : i32
    %c0_i32_1 = arith.constant 0 : i32
    %c0_i32_2 = arith.constant 0 : i32
    return %arg0, %c0_i32, %c0_i32_0, %c0_i32_1, %arg1 : i32, i32, i32, i32, i32
  }
}

module attributes {stable_mosaic.version = 11 : i64} {
  func.func @_conv_bn_mish_kernel(%arg0: i32, %arg1: i32, %arg2: memref<512x8xf32, #tpu.memory_space<vmem>>, %arg3: memref<8x4xf32, #tpu.memory_space<vmem>>, %arg4: memref<1x4xf32, #tpu.memory_space<vmem>>, %arg5: memref<1x4xf32, #tpu.memory_space<vmem>>, %arg6: memref<512x4xf32, #tpu.memory_space<vmem>>, %arg7: memref<1x4xf32, #tpu.memory_space<vmem>>, %arg8: memref<1x4xf32, #tpu.memory_space<vmem>>) attributes {dimension_semantics = [#tpu.dimension_semantics<arbitrary>, #tpu.dimension_semantics<arbitrary>], iteration_bounds = array<i64: 2, 1>, scalar_prefetch = 0 : i64, scratch_operands = 2 : i64, tpu.core_type = #tpu.core_type<tc>, window_params = [{transform_indices = @transform_0, window_bounds = array<i64: 512, 8>}, {pipeline_mode = #tpu.pipeline_mode<synchronous>, transform_indices = @transform_1, window_bounds = array<i64: 8, 4>}, {pipeline_mode = #tpu.pipeline_mode<synchronous>, transform_indices = @transform_2, window_bounds = array<i64: 1, 4>}, {pipeline_mode = #tpu.pipeline_mode<synchronous>, transform_indices = @transform_3, window_bounds = array<i64: 1, 4>}, {pipeline_mode = #tpu.pipeline_mode<synchronous>, transform_indices = @transform_4, window_bounds = array<i64: 512, 4>}]} {
    %c512_i32 = arith.constant 512 : i32
    %0 = arith.muli %arg1, %c512_i32 : i32
    %c0_i32 = arith.constant 0 : i32
    %1 = arith.cmpi eq, %arg0, %c0_i32 : i32
    %c0_i32_0 = arith.constant 0 : i32
    %2 = arith.cmpi eq, %arg1, %c0_i32_0 : i32
    %3 = arith.andi %1, %2 : i1
    %4 = arith.extui %3 : i1 to i32
    %c0_i32_1 = arith.constant 0 : i32
    %5 = arith.cmpi ne, %4, %c0_i32_1 : i32
    scf.if %5 {
      %cst = arith.constant 0.000000e+00 : f32
      %12 = vector.broadcast %cst : f32 to vector<1x4xf32>
      %c0 = arith.constant 0 : index
      %c0_5 = arith.constant 0 : index
      %13 = vector.load %arg7[%c0, %c0_5] : memref<1x4xf32, #tpu.memory_space<vmem>>, vector<1x4xf32>
      tpu.vector_store %arg7[%c0, %c0_5], %12 {strides = array<i32>} : memref<1x4xf32, #tpu.memory_space<vmem>>, vector<1x4xf32>,
      %cst_6 = arith.constant 0.000000e+00 : f32
      %14 = vector.broadcast %cst_6 : f32 to vector<1x4xf32>
      %c0_7 = arith.constant 0 : index
      %c0_8 = arith.constant 0 : index
      %15 = vector.load %arg8[%c0_7, %c0_8] : memref<1x4xf32, #tpu.memory_space<vmem>>, vector<1x4xf32>
      tpu.vector_store %arg8[%c0_7, %c0_8], %14 {strides = array<i32>} : memref<1x4xf32, #tpu.memory_space<vmem>>, vector<1x4xf32>,
    } else {
    }
    %c0_i32_2 = arith.constant 0 : i32
    %6 = arith.cmpi eq, %arg0, %c0_i32_2 : i32
    %7 = arith.extui %6 : i1 to i32
    %c0_i32_3 = arith.constant 0 : i32
    %8 = arith.cmpi ne, %7, %c0_i32_3 : i32
    scf.if %8 {
      %c0 = arith.constant 0 : index
      %c0_5 = arith.constant 0 : index
      %12 = vector.load %arg2[%c0, %c0_5] : memref<512x8xf32, #tpu.memory_space<vmem>>, vector<512x8xf32>
      %c0_6 = arith.constant 0 : index
      %c0_7 = arith.constant 0 : index
      %13 = vector.load %arg3[%c0_6, %c0_7] : memref<8x4xf32, #tpu.memory_space<vmem>>, vector<8x4xf32>
      %cst = arith.constant dense<0.000000e+00> : vector<512x4xf32>
      %14 = tpu.matmul %12, %13, %cst {dimension_numbers = #tpu.dot_dimension_numbers<[1], [0], [0], [1], [0, 0, 1, 1], [], []>} : vector<512x8xf32>, vector<8x4xf32>, vector<512x4xf32> -> vector<512x4xf32>
      %c0_8 = arith.constant 0 : index
      %c0_9 = arith.constant 0 : index
      %15 = vector.load %arg7[%c0_8, %c0_9] : memref<1x4xf32, #tpu.memory_space<vmem>>, vector<1x4xf32>
      %cst_10 = arith.constant dense<0.000000e+00> : vector<4xf32>
      %16 = vector.multi_reduction <add>, %14, %cst_10 [0] : vector<512x4xf32> to vector<4xf32>
      %17 = vector.shape_cast %16 : vector<4xf32> to vector<1x4xf32>
      %18 = arith.addf %15, %17 : vector<1x4xf32>
      %c0_11 = arith.constant 0 : index
      %c0_12 = arith.constant 0 : index
      %19 = vector.load %arg7[%c0_11, %c0_12] : memref<1x4xf32, #tpu.memory_space<vmem>>, vector<1x4xf32>
      tpu.vector_store %arg7[%c0_11, %c0_12], %18 {strides = array<i32>} : memref<1x4xf32, #tpu.memory_space<vmem>>, vector<1x4xf32>,
      %c0_13 = arith.constant 0 : index
      %c0_14 = arith.constant 0 : index
      %20 = vector.load %arg8[%c0_13, %c0_14] : memref<1x4xf32, #tpu.memory_space<vmem>>, vector<1x4xf32>
      %21 = arith.mulf %14, %14 : vector<512x4xf32>
      %cst_15 = arith.constant dense<0.000000e+00> : vector<4xf32>
      %22 = vector.multi_reduction <add>, %21, %cst_15 [0] : vector<512x4xf32> to vector<4xf32>
      %23 = vector.shape_cast %22 : vector<4xf32> to vector<1x4xf32>
      %24 = arith.addf %20, %23 : vector<1x4xf32>
      %c0_16 = arith.constant 0 : index
      %c0_17 = arith.constant 0 : index
      %25 = vector.load %arg8[%c0_16, %c0_17] : memref<1x4xf32, #tpu.memory_space<vmem>>, vector<1x4xf32>
      tpu.vector_store %arg8[%c0_16, %c0_17], %24 {strides = array<i32>} : memref<1x4xf32, #tpu.memory_space<vmem>>, vector<1x4xf32>,
      %26 = arith.index_cast %0 : i32 to index
      %c0_18 = arith.constant 0 : index
      %27 = vector.load %arg6[%26, %c0_18] : memref<512x4xf32, #tpu.memory_space<vmem>>, vector<512x4xf32>
      tpu.vector_store %arg6[%26, %c0_18], %14 {strides = array<i32>} : memref<512x4xf32, #tpu.memory_space<vmem>>, vector<512x4xf32>,
    } else {
    }
    %c1_i32 = arith.constant 1 : i32
    %9 = arith.cmpi eq, %arg0, %c1_i32 : i32
    %10 = arith.extui %9 : i1 to i32
    %c0_i32_4 = arith.constant 0 : i32
    %11 = arith.cmpi ne, %10, %c0_i32_4 : i32
    scf.if %11 {
      %c0 = arith.constant 0 : index
      %c0_5 = arith.constant 0 : index
      %12 = vector.load %arg7[%c0, %c0_5] : memref<1x4xf32, #tpu.memory_space<vmem>>, vector<1x4xf32>
      %cst = arith.constant 0.001953125 : f32
      %13 = vector.broadcast %cst : f32 to vector<1x4xf32>
      %14 = arith.mulf %12, %13 : vector<1x4xf32>
      %c0_6 = arith.constant 0 : index
      %c0_7 = arith.constant 0 : index
      %15 = vector.load %arg8[%c0_6, %c0_7] : memref<1x4xf32, #tpu.memory_space<vmem>>, vector<1x4xf32>
      %cst_8 = arith.constant 0.001953125 : f32
      %16 = vector.broadcast %cst_8 : f32 to vector<1x4xf32>
      %17 = arith.mulf %15, %16 : vector<1x4xf32>
      %18 = arith.mulf %14, %14 : vector<1x4xf32>
      %19 = arith.subf %17, %18 : vector<1x4xf32>
      %cst_9 = arith.constant 9.99999974E-6 : f32
      %20 = vector.broadcast %cst_9 : f32 to vector<1x4xf32>
      %21 = arith.addf %19, %20 : vector<1x4xf32>
      %22 = math.rsqrt %21 : vector<1x4xf32>
      %c0_10 = arith.constant 0 : index
      %c0_11 = arith.constant 0 : index
      %23 = vector.load %arg4[%c0_10, %c0_11] : memref<1x4xf32, #tpu.memory_space<vmem>>, vector<1x4xf32>
      %24 = arith.mulf %22, %23 : vector<1x4xf32>
      %c0_12 = arith.constant 0 : index
      %c0_13 = arith.constant 0 : index
      %25 = vector.load %arg5[%c0_12, %c0_13] : memref<1x4xf32, #tpu.memory_space<vmem>>, vector<1x4xf32>
      %26 = arith.mulf %14, %24 : vector<1x4xf32>
      %27 = arith.subf %25, %26 : vector<1x4xf32>
      %28 = arith.index_cast %0 : i32 to index
      %c0_14 = arith.constant 0 : index
      %29 = vector.load %arg6[%28, %c0_14] : memref<512x4xf32, #tpu.memory_space<vmem>>, vector<512x4xf32>
      %30 = vector.broadcast %24 : vector<1x4xf32> to vector<512x4xf32>
      %31 = arith.mulf %29, %30 : vector<512x4xf32>
      %32 = vector.broadcast %27 : vector<1x4xf32> to vector<512x4xf32>
      %33 = arith.addf %31, %32 : vector<512x4xf32>
      %cst_15 = arith.constant 3.000000e+01 : f32
      %34 = vector.broadcast %cst_15 : f32 to vector<512x4xf32>
      %35 = arith.minimumf %33, %34 : vector<512x4xf32>
      %36 = math.exp %35 : vector<512x4xf32>
      %cst_16 = arith.constant 1.000000e+00 : f32
      %37 = vector.broadcast %cst_16 : f32 to vector<512x4xf32>
      %38 = arith.addf %37, %36 : vector<512x4xf32>
      %cst_17 = arith.constant 1.000000e+00 : f32
      %39 = vector.broadcast %cst_17 : f32 to vector<512x4xf32>
      %40 = arith.addf %39, %36 : vector<512x4xf32>
      %41 = arith.mulf %38, %40 : vector<512x4xf32>
      %cst_18 = arith.constant 1.000000e+00 : f32
      %42 = vector.broadcast %cst_18 : f32 to vector<512x4xf32>
      %43 = arith.addf %41, %42 : vector<512x4xf32>
      %cst_19 = arith.constant 2.000000e+00 : f32
      %44 = vector.broadcast %cst_19 : f32 to vector<512x4xf32>
      %45 = arith.divf %44, %43 : vector<512x4xf32>
      %cst_20 = arith.constant 1.000000e+00 : f32
      %46 = vector.broadcast %cst_20 : f32 to vector<512x4xf32>
      %47 = arith.subf %46, %45 : vector<512x4xf32>
      %48 = arith.mulf %33, %47 : vector<512x4xf32>
      %49 = arith.index_cast %0 : i32 to index
      %c0_21 = arith.constant 0 : index
      %50 = vector.load %arg6[%49, %c0_21] : memref<512x4xf32, #tpu.memory_space<vmem>>, vector<512x4xf32>
      tpu.vector_store %arg6[%49, %c0_21], %48 {strides = array<i32>} : memref<512x4xf32, #tpu.memory_space<vmem>>, vector<512x4xf32>,
    } else {
    }
    return
  }
  func.func @transform_0(%arg0: i32, %arg1: i32) -> (i32, i32) {
    %c1_i32 = arith.constant 1 : i32
    %0 = arith.subi %c1_i32, %arg0 : i32
    %1 = arith.muli %0, %arg1 : i32
    %c0_i32 = arith.constant 0 : i32
    %c0_i32_0 = arith.constant 0 : i32
    return %1, %c0_i32 : i32, i32
  }
  func.func @transform_1(%arg0: i32, %arg1: i32) -> (i32, i32) {
    %c0_i32 = arith.constant 0 : i32
    %c0_i32_0 = arith.constant 0 : i32
    %c0_i32_1 = arith.constant 0 : i32
    return %c0_i32, %c0_i32_0 : i32, i32
  }
  func.func @transform_2(%arg0: i32, %arg1: i32) -> (i32, i32) {
    %c0_i32 = arith.constant 0 : i32
    %c0_i32_0 = arith.constant 0 : i32
    %c0_i32_1 = arith.constant 0 : i32
    return %c0_i32, %c0_i32_0 : i32, i32
  }
  func.func @transform_3(%arg0: i32, %arg1: i32) -> (i32, i32) {
    %c0_i32 = arith.constant 0 : i32
    %c0_i32_0 = arith.constant 0 : i32
    %c0_i32_1 = arith.constant 0 : i32
    return %c0_i32, %c0_i32_0 : i32, i32
  }
  func.func @transform_4(%arg0: i32, %arg1: i32) -> (i32, i32) {
    %c0_i32 = arith.constant 0 : i32
    %c0_i32_0 = arith.constant 0 : i32
    %c0_i32_1 = arith.constant 0 : i32
    return %c0_i32, %c0_i32_0 : i32, i32
  }
}

</mosaic_0001>

<bundles_post_ra>
// kernel: spatial_pyramid_pooling.2
= control target key start
LH: loop header
LB: loop body
LE: loop exit
PB: predicated region body
PF: predicated region fallthrough
CT: control target
= control target key end

     0   :  { %s2810_s15 = smov 0   ;;  %s2812_s16 = smov 0   ;;  %s4524_s0 = inlined_call_operand.vmem [shape: f32[512,8], index: 0, kind: input, shape index: {}]   ;;  %s4525_s1 = inlined_call_operand.vmem [shape: f32[8,4], index: 1, kind: input, shape index: {}]   ;;  %s4526_s2 = inlined_call_operand.vmem [shape: f32[1,4], index: 2, kind: input, shape index: {}]   ;;  %s4527_s3 = inlined_call_operand.vmem [shape: f32[1,4], index: 3, kind: input, shape index: {}]   ;;  %s4528_s4 = inlined_call_operand.vmem [shape: f32[512,4], index: 4, kind: output, shape index: {}]  }
   0x1   :  { %s2814_s17 = smov 0  }
   0x2 LB: > { %s26_s18 = sadd.s32 1, %s2778_s16  ;;  %p2241_p0 = scmp.ge.s32.totalorder %s2782_s17, 1  ;;  %s2782_s17 = sphi %s2814_s17, %s14_s17   ;;  %s2778_s16 = sphi %s2812_s16, %s4530_s16   ;;  %s2774_s15 = sphi %s2810_s15, %s4529_s15  }
   0x3   : > { %p28_p1 = scmp.ge.s32.totalorder %s26_s18, 2  ;;  %p178_p2 = scmp.lt.s32.totalorder %s2782_s17, 3 }
   0x5   : > { %s4532_s18 = smov (%p28_p1, %s26_s18), 0  ;;  %p179_p3 = pnand %p2241_p0, %p178_p2 }
   0x6   : > { %p212_p4 = scmp.eq.s32.totalorder (!%p179_p3), %s2774_s15, 0 }
   0x7   : > { %182 = sbr.rel (%p179_p3) target bundleno = 627 (0x273), region = 36 }
   0xe   : > { %217 = sbr.rel (!%p212_p4) target bundleno = 21 (0x15), region = 40  ;;  %vm218_vm0 = vcmask (%p212_p4), 24576   ;;  %v2784_v0 = vmov (%p212_p4), 0.0  }
   0xf   : > { %219 = vst.msk [vmem:[#allocation2] sm:$0x1] (%p212_p4), %vm218_vm0, %v2784_v0  ;;  %220 = vst.msk [vmem:[#allocation3] sm:$0x1] (%p212_p4), %vm218_vm0, %v2784_v0 }
  0x15 PF: > { %p2243_p5 = scmp.ne.s32.totalorder %s2774_s15, 0 }
  0x16   : > { %v288_v1 = vld [vmem:[%s4525_s1] sm:$0xff] (!%p2243_p5)  ;;  %vm289_vm1 = vcmask (!%p2243_p5), 64512   ;;  %v225_v3 = vld [vmem:[%s4524_s0 + $0x8] sm:$0xff] (!%p2243_p5)  ;;  %v226_v4 = vld [vmem:[%s4524_s0 + $0x10] sm:$0xff] (!%p2243_p5)  ;;  %vm868_vm2 = vcmask (!%p2243_p5), 31744   ;;  %vm1003_vm3 = vcmask (!%p2243_p5), 24576  }
  0x17   : > { %223 = sbr.rel (%p2243_p5) target bundleno = 384 (0x180), region = 44  ;;  %v224_v2 = vld [vmem:[%s4524_s0] sm:$0xff] (!%p2243_p5)  ;;  %2377 = vmatprep.subr.mxu0 (!%p2243_p5), %v288_v1  ;;  %2475 = vmatprep.subr.mxu1 (!%p2243_p5), %v288_v1  ;;  %v227_v5 = vld [vmem:[%s4524_s0 + $0x18] sm:$0xff] (!%p2243_p5)  ;;  %v229_v7 = vld [vmem:[%s4524_s0 + $0x28] sm:$0xff] (!%p2243_p5) }
  0x18   : > { %2379 = vmatprep.mubr.msk.f32.mxu0 (!%p2243_p5), %vm289_vm1, %v224_v2  ;;  %2378 = vmatpush3.msra.mxu0 (!%p2243_p5), %v288_v1  ;;  %v228_v6 = vld [vmem:[%s4524_s0 + $0x20] sm:$0xff] (!%p2243_p5)  ;;  %v230_v8 = vld [vmem:[%s4524_s0 + $0x30] sm:$0xff] (!%p2243_p5)  ;;  %v257_v10 = vld [vmem:[%s4524_s0 + $0x108] sm:$0xff] (!%p2243_p5) }
  0x19   : > { %2380 = vmatmul.mubr.msk.f32.vlgmr.msra.gmra.mrb[0].mxu0 (!%p2243_p5), %vm289_vm1, %v225_v3  ;;  %2476 = vmatpush3.msra.mxu1 (!%p2243_p5), %v288_v1  ;;  %v256_v9 = vld [vmem:[%s4524_s0 + $0x100] sm:$0xff] (!%p2243_p5)  ;;  %v258_v11 = vld [vmem:[%s4524_s0 + $0x110] sm:$0xff] (!%p2243_p5)  ;;  %v231_v12 = vld [vmem:[%s4524_s0 + $0x38] sm:$0xff] (!%p2243_p5) }
  0x1a   : > { %2382 = vmatprep.mubr.msk.f32.mxu0 (!%p2243_p5), %vm289_vm1, %v226_v4  ;;  %2427 = vmatprep.mubr.msk.f32.mxu1 (!%p2243_p5), %vm289_vm1, %v256_v9  ;;  %v232_v13 = vld [vmem:[%s4524_s0 + $0x40] sm:$0xff] (!%p2243_p5)  ;;  %v259_v14 = vld [vmem:[%s4524_s0 + $0x118] sm:$0xff] (!%p2243_p5)  ;;  %v233_v16 = vld [vmem:[%s4524_s0 + $0x48] sm:$0xff] (!%p2243_p5) }
  0x1b   : > { %2428 = vmatmul.mubr.msk.f32.vlgmr.msra.gmra.mrb[0].mxu1 (!%p2243_p5), %vm289_vm1, %v257_v10  ;;  %v260_v15 = vld [vmem:[%s4524_s0 + $0x120] sm:$0xff] (!%p2243_p5)  ;;  %v234_v17 = vld [vmem:[%s4524_s0 + $0x50] sm:$0xff] (!%p2243_p5)  ;;  %v261_v18 = vld [vmem:[%s4524_s0 + $0x128] sm:$0xff] (!%p2243_p5) }
  0x1c   : > { %2430 = vmatprep.mubr.msk.f32.mxu1 (!%p2243_p5), %vm289_vm1, %v258_v11  ;;  %v262_v19 = vld [vmem:[%s4524_s0 + $0x130] sm:$0xff] (!%p2243_p5)  ;;  %v235_v20 = vld [vmem:[%s4524_s0 + $0x58] sm:$0xff] (!%p2243_p5)  ;;  %v236_v21 = vld [vmem:[%s4524_s0 + $0x60] sm:$0xff] (!%p2243_p5) }
  0x1d   : > { %2383 = vmatmul.mubr.msk.f32.gmra.mrb[2].mxu0 (!%p2243_p5), %vm289_vm1, %v227_v5  ;;  %v263_v22 = vld [vmem:[%s4524_s0 + $0x138] sm:$0xff] (!%p2243_p5)  ;;  %v264_v23 = vld [vmem:[%s4524_s0 + $0x140] sm:$0xff] (!%p2243_p5)  ;;  %v237_v24 = vld [vmem:[%s4524_s0 + $0x68] sm:$0xff] (!%p2243_p5) }
  0x1e   : > { %2385 = vmatprep.mubr.msk.f32.mxu0 %vm289_vm1, %v228_v6  ;;  %v238_v25 = vld [vmem:[%s4524_s0 + $0x70] sm:$0xff]  ;;  %v265_v26 = vld [vmem:[%s4524_s0 + $0x148] sm:$0xff]  ;;  %v239_v28 = vld [vmem:[%s4524_s0 + $0x78] sm:$0xff] }
  0x1f   : > { %2431 = vmatmul.mubr.msk.f32.gmra.mrb[2].mxu1 %vm289_vm1, %v259_v14  ;;  %v266_v27 = vld [vmem:[%s4524_s0 + $0x150] sm:$0xff]  ;;  %v240_v29 = vld [vmem:[%s4524_s0 + $0x80] sm:$0xff]  ;;  %v267_v30 = vld [vmem:[%s4524_s0 + $0x158] sm:$0xff] }
  0x20   : > { %2433 = vmatprep.mubr.msk.f32.mxu1 %vm289_vm1, %v260_v15  ;;  %v268_v31 = vld [vmem:[%s4524_s0 + $0x160] sm:$0xff]  ;;  %v241_v32 = vld [vmem:[%s4524_s0 + $0x88] sm:$0xff]  ;;  %v242_v33 = vld [vmem:[%s4524_s0 + $0x90] sm:$0xff] }
  0x21   : > { %2386 = vmatmul.mubr.msk.f32.gmra.mrb[4].mxu0 %vm289_vm1, %v229_v7  ;;  %v269_v34 = vld [vmem:[%s4524_s0 + $0x168] sm:$0xff]  ;;  %v270_v35 = vld [vmem:[%s4524_s0 + $0x170] sm:$0xff]  ;;  %v243_v36 = vld [vmem:[%s4524_s0 + $0x98] sm:$0xff] }
  0x22   : > { %2388 = vmatprep.mubr.msk.f32.mxu0 %vm289_vm1, %v230_v8  ;;  %v244_v37 = vld [vmem:[%s4524_s0 + $0xa0] sm:$0xff]  ;;  %v271_v38 = vld [vmem:[%s4524_s0 + $0x178] sm:$0xff]  ;;  %v245_v40 = vld [vmem:[%s4524_s0 + $0xa8] sm:$0xff] }
  0x23   : > { %2434 = vmatmul.mubr.msk.f32.gmra.mrb[4].mxu1 %vm289_vm1, %v261_v18  ;;  %v272_v39 = vld [vmem:[%s4524_s0 + $0x180] sm:$0xff]  ;;  %v246_v41 = vld [vmem:[%s4524_s0 + $0xb0] sm:$0xff]  ;;  %v273_v42 = vld [vmem:[%s4524_s0 + $0x188] sm:$0xff] }
  0x24   : > { %2436 = vmatprep.mubr.msk.f32.mxu1 %vm289_vm1, %v262_v19  ;;  %v274_v43 = vld [vmem:[%s4524_s0 + $0x190] sm:$0xff]  ;;  %v247_v44 = vld [vmem:[%s4524_s0 + $0xb8] sm:$0xff]  ;;  %v248_v45 = vld [vmem:[%s4524_s0 + $0xc0] sm:$0xff] }
  0x25   : > { %2389 = vmatmul.mubr.msk.f32.gmra.mrb[6].mxu0 %vm289_vm1, %v231_v12  ;;  %v275_v46 = vld [vmem:[%s4524_s0 + $0x198] sm:$0xff]  ;;  %v276_v47 = vld [vmem:[%s4524_s0 + $0x1a0] sm:$0xff]  ;;  %v249_v48 = vld [vmem:[%s4524_s0 + $0xc8] sm:$0xff] }
  0x26   : > { %2391 = vmatprep.mubr.msk.f32.mxu0 %vm289_vm1, %v232_v13  ;;  %v250_v49 = vld [vmem:[%s4524_s0 + $0xd0] sm:$0xff]  ;;  %v277_v50 = vld [vmem:[%s4524_s0 + $0x1a8] sm:$0xff]  ;;  %v251_v52 = vld [vmem:[%s4524_s0 + $0xd8] sm:$0xff] }
  0x27   : > { %2437 = vmatmul.mubr.msk.f32.gmra.mrb[6].mxu1 %vm289_vm1, %v263_v22  ;;  %v278_v51 = vld [vmem:[%s4524_s0 + $0x1b0] sm:$0xff]  ;;  %v252_v53 = vld [vmem:[%s4524_s0 + $0xe0] sm:$0xff]  ;;  %v279_v54 = vld [vmem:[%s4524_s0 + $0x1b8] sm:$0xff] }
  0x28   : > { %2439 = vmatprep.mubr.msk.f32.mxu1 %vm289_vm1, %v264_v23  ;;  %v280_v55 = vld [vmem:[%s4524_s0 + $0x1c0] sm:$0xff]  ;;  %v253_v56 = vld [vmem:[%s4524_s0 + $0xe8] sm:$0xff]  ;;  %v254_v57 = vld [vmem:[%s4524_s0 + $0xf0] sm:$0xff] }
  0x29   : > { %2392 = vmatmul.mubr.msk.f32.gmra.mrb[8].mxu0 %vm289_vm1, %v233_v16  ;;  %v281_v58 = vld [vmem:[%s4524_s0 + $0x1c8] sm:$0xff]  ;;  %v282_v59 = vld [vmem:[%s4524_s0 + $0x1d0] sm:$0xff]  ;;  %v255_v60 = vld [vmem:[%s4524_s0 + $0xf8] sm:$0xff] }
  0x2a   : > { %2394 = vmatprep.mubr.msk.f32.mxu0 %vm289_vm1, %v234_v17  ;;  %v283_v61 = vld [vmem:[%s4524_s0 + $0x1d8] sm:$0xff]  ;;  %v284_v62 = vld [vmem:[%s4524_s0 + $0x1e0] sm:$0xff]  ;;  %v285_v63 = vld [vmem:[%s4524_s0 + $0x1e8] sm:$0xff] }
  0x2b   : > { %2440 = vmatmul.mubr.msk.f32.gmra.mrb[8].mxu1 %vm289_vm1, %v265_v26  ;;  %v286_v0 = vld [vmem:[%s4524_s0 + $0x1f0] sm:$0xff]  ;;  %v287_v1 = vld [vmem:[%s4524_s0 + $0x1f8] sm:$0xff] }
  0x2c   : > { %2442 = vmatprep.mubr.msk.f32.mxu1 %vm289_vm1, %v266_v27 }
  0x2d   : > { %2395 = vmatmul.mubr.msk.f32.gmra.mrb[10].mxu0 %vm289_vm1, %v235_v20 }
  0x2e   : > { %2397 = vmatprep.mubr.msk.f32.mxu0 %vm289_vm1, %v236_v21 }
  0x2f   : > { %2443 = vmatmul.mubr.msk.f32.gmra.mrb[10].mxu1 %vm289_vm1, %v267_v30 }
  0x30   : > { %2445 = vmatprep.mubr.msk.f32.mxu1 %vm289_vm1, %v268_v31 }
  0x31   : > { %2398 = vmatmul.mubr.msk.f32.gmra.mrb[12].mxu0 %vm289_vm1, %v237_v24 }
  0x32   : > { %2400 = vmatprep.mubr.msk.f32.mxu0 %vm289_vm1, %v238_v25 }
  0x33   : > { %2446 = vmatmul.mubr.msk.f32.gmra.mrb[12].mxu1 %vm289_vm1, %v269_v34 }
  0x34   : > { %2448 = vmatprep.mubr.msk.f32.mxu1 %vm289_vm1, %v270_v35 }
  0x35   : > { %2401 = vmatmul.mubr.msk.f32.gmra.mrb[14].mxu0 %vm289_vm1, %v239_v28 }
  0x36   : > { %2403 = vmatprep.mubr.msk.f32.mxu0 %vm289_vm1, %v240_v29 }
  0x37   : > { %2449 = vmatmul.mubr.msk.f32.gmra.mrb[14].mxu1 %vm289_vm1, %v271_v38 }
  0x38   : > { %2451 = vmatprep.mubr.msk.f32.mxu1 %vm289_vm1, %v272_v39 }
  0x39   : > { %2404 = vmatmul.mubr.msk.f32.gmra.mrb[16].mxu0 %vm289_vm1, %v241_v32 }
  0x3a   : > { %2406 = vmatprep.mubr.msk.f32.mxu0 %vm289_vm1, %v242_v33 }
  0x3b   : > { %2452 = vmatmul.mubr.msk.f32.gmra.mrb[16].mxu1 %vm289_vm1, %v273_v42 }
  0x3c   : > { %2454 = vmatprep.mubr.msk.f32.mxu1 %vm289_vm1, %v274_v43 }
  0x3d   : > { %2407 = vmatmul.mubr.msk.f32.gmra.mrb[18].mxu0 %vm289_vm1, %v243_v36 }
  0x3e   : > { %2409 = vmatprep.mubr.msk.f32.mxu0 %vm289_vm1, %v244_v37 }
  0x3f   : > { %2455 = vmatmul.mubr.msk.f32.gmra.mrb[18].mxu1 %vm289_vm1, %v275_v46 }
  0x40   : > { %2457 = vmatprep.mubr.msk.f32.mxu1 %vm289_vm1, %v276_v47 }
  0x41   : > { %2410 = vmatmul.mubr.msk.f32.gmra.mrb[20].mxu0 %vm289_vm1, %v245_v40 }
  0x42   : > { %2412 = vmatprep.mubr.msk.f32.mxu0 %vm289_vm1, %v246_v41 }
  0x43   : > { %2458 = vmatmul.mubr.msk.f32.gmra.mrb[20].mxu1 %vm289_vm1, %v277_v50 }
  0x44   : > { %2460 = vmatprep.mubr.msk.f32.mxu1 %vm289_vm1, %v278_v51 }
  0x45   : > { %2413 = vmatmul.mubr.msk.f32.gmra.mrb[22].mxu0 %vm289_vm1, %v247_v44 }
  0x46   : > { %2415 = vmatprep.mubr.msk.f32.mxu0 %vm289_vm1, %v248_v45 }
  0x47   : > { %2461 = vmatmul.mubr.msk.f32.gmra.mrb[22].mxu1 %vm289_vm1, %v279_v54 }
  0x48   : > { %2463 = vmatprep.mubr.msk.f32.mxu1 %vm289_vm1, %v280_v55 }
  0x49   : > { %2416 = vmatmul.mubr.msk.f32.gmra.mrb[24].mxu0 %vm289_vm1, %v249_v48 }
  0x4a   : > { %2418 = vmatprep.mubr.msk.f32.mxu0 %vm289_vm1, %v250_v49 }
  0x4b   : > { %2464 = vmatmul.mubr.msk.f32.gmra.mrb[24].mxu1 %vm289_vm1, %v281_v58 }
  0x4c   : > { %2466 = vmatprep.mubr.msk.f32.mxu1 %vm289_vm1, %v282_v59 }
  0x4d   : > { %2419 = vmatmul.mubr.msk.f32.gmra.mrb[26].mxu0 %vm289_vm1, %v251_v52 }
  0x4e   : > { %2421 = vmatprep.mubr.msk.f32.mxu0 %vm289_vm1, %v252_v53 }
  0x4f   : > { %2467 = vmatmul.mubr.msk.f32.gmra.mrb[26].mxu1 %vm289_vm1, %v283_v61 }
  0x50   : > { %2469 = vmatprep.mubr.msk.f32.mxu1 %vm289_vm1, %v284_v62 }
  0x51   : > { %2422 = vmatmul.mubr.msk.f32.gmra.mrb[28].mxu0 %vm289_vm1, %v253_v56 }
  0x52   : > { %2424 = vmatprep.mubr.msk.f32.mxu0 %vm289_vm1, %v254_v57 }
  0x53   : > { %2470 = vmatmul.mubr.msk.f32.gmra.mrb[28].mxu1 %vm289_vm1, %v285_v63 }
  0x54   : > { %2472 = vmatprep.mubr.msk.f32.mxu1 %vm289_vm1, %v286_v0 }
  0x55   : > { %2425 = vmatmul.mubr.msk.f32.gmra.mrb[30].mxu0 %vm289_vm1, %v255_v60 }
  0x57   : > { %2473 = vmatmul.mubr.msk.f32.gmra.mrb[30].mxu1 %vm289_vm1, %v287_v1 }
  0xec   : > { %v2381_v2 = vpop.f32.mrb[0].mxu0 }
  0xed   : > { %v870_v3 = vsel %vm868_vm2, %v2381_v2, 0.0  ;;  %v1007_v4 = vmul.f32 %v2381_v2, %v2381_v2  ;;  %1207 = vst.msk [vmem:[%s4528_s4 + $0x8] sm:$0xff] %vm868_vm2, %v2381_v2  ;;  %v548_v5 = vpop.f32.mrb[1].mxu0 }
  0xee   : > { %v869_v6 = vsel %vm868_vm2, %v548_v5, 0.0  ;;  %v1006_v7 = vmul.f32 %v548_v5, %v548_v5  ;;  %1206 = vst.msk [vmem:[%s4528_s4] sm:$0xff] %vm868_vm2, %v548_v5  ;;  %v3124_v28 = vpop.f32.mrb[0].mxu1 }
  0xef   : > { %v1071_v8 = vsel %vm868_vm2, %v1007_v4, 0.0  ;;  %v871_v9 = vadd.f32 %v870_v3, %v869_v6  ;;  %1239 = vst.msk [vmem:[%s4528_s4 + $0x108] sm:$0xff] %vm868_vm2, %v3124_v28  ;;  %v3131_v31 = vpop.f32.mrb[1].mxu1 }
  0xf0   : > { %v1070_v10 = vsel %vm868_vm2, %v1006_v7, 0.0  ;;  %v2384_v11 = vpop.f32.mrb[2].mxu0  ;;  %1238 = vst.msk [vmem:[%s4528_s4 + $0x100] sm:$0xff] %vm868_vm2, %v3131_v31 }
  0xf1   : > { %v1072_v12 = vadd.f32 %v1071_v8, %v1070_v10  ;;  %1209 = vst.msk [vmem:[%s4528_s4 + $0x18] sm:$0xff] %vm868_vm2, %v2384_v11  ;;  %v558_v13 = vpop.f32.mrb[3].mxu0  ;;  %v1009_v14 = vmul.f32 %v2384_v11, %v2384_v11  ;;  %v874_v18 = vsel %vm868_vm2, %v2384_v11, 0.0 }
  0xf2   : > { %v872_v15 = vsel %vm868_vm2, %v558_v13, 0.0  ;;  %v1008_v16 = vmul.f32 %v558_v13, %v558_v13  ;;  %1208 = vst.msk [vmem:[%s4528_s4 + $0x10] sm:$0xff] %vm868_vm2, %v558_v13  ;;  %v3150_v42 = vpop.f32.mrb[2].mxu1 }
  0xf3   : > { %v873_v17 = vadd.f32 %v872_v15, %v871_v9  ;;  %v1075_v24 = vsel %vm868_vm2, %v1009_v14, 0.0  ;;  %1241 = vst.msk [vmem:[%s4528_s4 + $0x118] sm:$0xff] %vm868_vm2, %v3150_v42  ;;  %v3157_v45 = vpop.f32.mrb[3].mxu1 }
  0xf4   : > { %v1073_v19 = vsel %vm868_vm2, %v1008_v16, 0.0  ;;  %v2387_v20 = vpop.f32.mrb[4].mxu0  ;;  %1240 = vst.msk [vmem:[%s4528_s4 + $0x110] sm:$0xff] %vm868_vm2, %v3157_v45 }
  0xf5   : > { %v1074_v21 = vadd.f32 %v1073_v19, %v1072_v12  ;;  %1211 = vst.msk [vmem:[%s4528_s4 + $0x28] sm:$0xff] %vm868_vm2, %v2387_v20  ;;  %v568_v22 = vpop.f32.mrb[5].mxu0  ;;  %v875_v23 = vadd.f32 %v874_v18, %v873_v17  ;;  %v1011_v25 = vmul.f32 %v2387_v20, %v2387_v20  ;;  %v878_v32 = vsel %vm868_vm2, %v2387_v20, 0.0 }
  0xf6   : > { %v876_v26 = vsel %vm868_vm2, %v568_v22, 0.0  ;;  %v1010_v27 = vmul.f32 %v568_v22, %v568_v22  ;;  %1210 = vst.msk [vmem:[%s4528_s4 + $0x20] sm:$0xff] %vm868_vm2, %v568_v22  ;;  %v3176_v56 = vpop.f32.mrb[4].mxu1 }
  0xf7   : > { %v877_v29 = vadd.f32 %v876_v26, %v875_v23  ;;  %v1076_v30 = vadd.f32 %v1075_v24, %v1074_v21  ;;  %v1079_v38 = vsel %vm868_vm2, %v1011_v25, 0.0  ;;  %1243 = vst.msk [vmem:[%s4528_s4 + $0x128] sm:$0xff] %vm868_vm2, %v3176_v56  ;;  %v3183_v59 = vpop.f32.mrb[5].mxu1 }
  0xf8   : > { %v1077_v33 = vsel %vm868_vm2, %v1010_v27, 0.0  ;;  %v2390_v34 = vpop.f32.mrb[6].mxu0  ;;  %1242 = vst.msk [vmem:[%s4528_s4 + $0x120] sm:$0xff] %vm868_vm2, %v3183_v59 }
  0xf9   : > { %v1078_v35 = vadd.f32 %v1077_v33, %v1076_v30  ;;  %1213 = vst.msk [vmem:[%s4528_s4 + $0x38] sm:$0xff] %vm868_vm2, %v2390_v34  ;;  %v578_v36 = vpop.f32.mrb[7].mxu0  ;;  %v879_v37 = vadd.f32 %v878_v32, %v877_v29  ;;  %v1013_v39 = vmul.f32 %v2390_v34, %v2390_v34  ;;  %v882_v46 = vsel %vm868_vm2, %v2390_v34, 0.0 }
  0xfa   : > { %v880_v40 = vsel %vm868_vm2, %v578_v36, 0.0  ;;  %v1012_v41 = vmul.f32 %v578_v36, %v578_v36  ;;  %1212 = vst.msk [vmem:[%s4528_s4 + $0x30] sm:$0xff] %vm868_vm2, %v578_v36  ;;  %v3202_v6 = vpop.f32.mrb[6].mxu1 }
  0xfb   : > { %v881_v43 = vadd.f32 %v880_v40, %v879_v37  ;;  %v1080_v44 = vadd.f32 %v1079_v38, %v1078_v35  ;;  %v1083_v52 = vsel %vm868_vm2, %v1013_v39, 0.0  ;;  %1245 = vst.msk [vmem:[%s4528_s4 + $0x138] sm:$0xff] %vm868_vm2, %v3202_v6  ;;  %v3209_v9 = vpop.f32.mrb[7].mxu1 }
  0xfc   : > { %v1081_v47 = vsel %vm868_vm2, %v1012_v41, 0.0  ;;  %v2393_v48 = vpop.f32.mrb[8].mxu0  ;;  %1244 = vst.msk [vmem:[%s4528_s4 + $0x130] sm:$0xff] %vm868_vm2, %v3209_v9 }
  0xfd   : > { %v1082_v49 = vadd.f32 %v1081_v47, %v1080_v44  ;;  %1215 = vst.msk [vmem:[%s4528_s4 + $0x48] sm:$0xff] %vm868_vm2, %v2393_v48  ;;  %v588_v50 = vpop.f32.mrb[9].mxu0  ;;  %v883_v51 = vadd.f32 %v882_v46, %v881_v43  ;;  %v1015_v53 = vmul.f32 %v2393_v48, %v2393_v48  ;;  %v886_v60 = vsel %vm868_vm2, %v2393_v48, 0.0 }
  0xfe   : > { %v884_v54 = vsel %vm868_vm2, %v588_v50, 0.0  ;;  %v1014_v55 = vmul.f32 %v588_v50, %v588_v50  ;;  %1214 = vst.msk [vmem:[%s4528_s4 + $0x40] sm:$0xff] %vm868_vm2, %v588_v50  ;;  %v3228_v20 = vpop.f32.mrb[8].mxu1 }
  0xff   : > { %v885_v57 = vadd.f32 %v884_v54, %v883_v51  ;;  %v1084_v58 = vadd.f32 %v1083_v52, %v1082_v49  ;;  %v1087_v2 = vsel %vm868_vm2, %v1015_v53, 0.0  ;;  %1247 = vst.msk [vmem:[%s4528_s4 + $0x148] sm:$0xff] %vm868_vm2, %v3228_v20  ;;  %v3235_v23 = vpop.f32.mrb[9].mxu1 }
 0x100   : > { %v1085_v61 = vsel %vm868_vm2, %v1014_v55, 0.0  ;;  %v2396_v62 = vpop.f32.mrb[10].mxu0  ;;  %1246 = vst.msk [vmem:[%s4528_s4 + $0x140] sm:$0xff] %vm868_vm2, %v3235_v23 }
 0x101   : > { %v1086_v63 = vadd.f32 %v1085_v61, %v1084_v58  ;;  %1217 = vst.msk [vmem:[%s4528_s4 + $0x58] sm:$0xff] %vm868_vm2, %v2396_v62  ;;  %v598_v0 = vpop.f32.mrb[11].mxu0  ;;  %v887_v1 = vadd.f32 %v886_v60, %v885_v57  ;;  %v1017_v3 = vmul.f32 %v2396_v62, %v2396_v62  ;;  %v890_v10 = vsel %vm868_vm2, %v2396_v62, 0.0 }
 0x102   : > { %v888_v4 = vsel %vm868_vm2, %v598_v0, 0.0  ;;  %v1016_v5 = vmul.f32 %v598_v0, %v598_v0  ;;  %1216 = vst.msk [vmem:[%s4528_s4 + $0x50] sm:$0xff] %vm868_vm2, %v598_v0  ;;  %v3254_v36 = vpop.f32.mrb[10].mxu1 }
 0x103   : > { %v889_v7 = vadd.f32 %v888_v4, %v887_v1  ;;  %v1088_v8 = vadd.f32 %v1087_v2, %v1086_v63  ;;  %v1091_v16 = vsel %vm868_vm2, %v1017_v3, 0.0  ;;  %1249 = vst.msk [vmem:[%s4528_s4 + $0x158] sm:$0xff] %vm868_vm2, %v3254_v36  ;;  %v3261_v39 = vpop.f32.mrb[11].mxu1 }
 0x104   : > { %v1089_v11 = vsel %vm868_vm2, %v1016_v5, 0.0  ;;  %v2399_v12 = vpop.f32.mrb[12].mxu0  ;;  %1248 = vst.msk [vmem:[%s4528_s4 + $0x150] sm:$0xff] %vm868_vm2, %v3261_v39 }
 0x105   : > { %v1090_v13 = vadd.f32 %v1089_v11, %v1088_v8  ;;  %1219 = vst.msk [vmem:[%s4528_s4 + $0x68] sm:$0xff] %vm868_vm2, %v2399_v12  ;;  %v608_v14 = vpop.f32.mrb[13].mxu0  ;;  %v891_v15 = vadd.f32 %v890_v10, %v889_v7  ;;  %v1019_v17 = vmul.f32 %v2399_v12, %v2399_v12  ;;  %v894_v24 = vsel %vm868_vm2, %v2399_v12, 0.0 }
 0x106   : > { %v892_v18 = vsel %vm868_vm2, %v608_v14, 0.0  ;;  %v1018_v19 = vmul.f32 %v608_v14, %v608_v14  ;;  %1218 = vst.msk [vmem:[%s4528_s4 + $0x60] sm:$0xff] %vm868_vm2, %v608_v14  ;;  %v3280_v52 = vpop.f32.mrb[12].mxu1 }
 0x107   : > { %v893_v21 = vadd.f32 %v892_v18, %v891_v15  ;;  %v1092_v22 = vadd.f32 %v1091_v16, %v1090_v13  ;;  %v1095_v32 = vsel %vm868_vm2, %v1019_v17, 0.0  ;;  %1251 = vst.msk [vmem:[%s4528_s4 + $0x168] sm:$0xff] %vm868_vm2, %v3280_v52  ;;  %v3287_v55 = vpop.f32.mrb[13].mxu1 }
 0x108   : > { %v1093_v25 = vsel %vm868_vm2, %v1018_v19, 0.0  ;;  %v2402_v26 = vpop.f32.mrb[14].mxu0  ;;  %1250 = vst.msk [vmem:[%s4528_s4 + $0x160] sm:$0xff] %vm868_vm2, %v3287_v55 }
 0x109   : > { %v1094_v27 = vadd.f32 %v1093_v25, %v1092_v22  ;;  %1221 = vst.msk [vmem:[%s4528_s4 + $0x78] sm:$0xff] %vm868_vm2, %v2402_v26  ;;  %v618_v29 = vpop.f32.mrb[15].mxu0  ;;  %v895_v30 = vadd.f32 %v894_v24, %v893_v21  ;;  %v1021_v33 = vmul.f32 %v2402_v26, %v2402_v26  ;;  %v898_v40 = vsel %vm868_vm2, %v2402_v26, 0.0 }
 0x10a   : > { %v896_v34 = vsel %vm868_vm2, %v618_v29, 0.0  ;;  %v1020_v35 = vmul.f32 %v618_v29, %v618_v29  ;;  %1220 = vst.msk [vmem:[%s4528_s4 + $0x70] sm:$0xff] %vm868_vm2, %v618_v29  ;;  %v3306_v4 = vpop.f32.mrb[14].mxu1 }
 0x10b   : > { %v897_v37 = vadd.f32 %v896_v34, %v895_v30  ;;  %v1096_v38 = vadd.f32 %v1095_v32, %v1094_v27  ;;  %v1099_v48 = vsel %vm868_vm2, %v1021_v33, 0.0  ;;  %1253 = vst.msk [vmem:[%s4528_s4 + $0x178] sm:$0xff] %vm868_vm2, %v3306_v4  ;;  %v3313_v8 = vpop.f32.mrb[15].mxu1 }
 0x10c   : > { %v1097_v41 = vsel %vm868_vm2, %v1020_v35, 0.0  ;;  %v2405_v43 = vpop.f32.mrb[16].mxu0  ;;  %1252 = vst.msk [vmem:[%s4528_s4 + $0x170] sm:$0xff] %vm868_vm2, %v3313_v8 }
 0x10d   : > { %v1098_v44 = vadd.f32 %v1097_v41, %v1096_v38  ;;  %1223 = vst.msk [vmem:[%s4528_s4 + $0x88] sm:$0xff] %vm868_vm2, %v2405_v43  ;;  %v628_v46 = vpop.f32.mrb[17].mxu0  ;;  %v899_v47 = vadd.f32 %v898_v40, %v897_v37  ;;  %v1023_v49 = vmul.f32 %v2405_v43, %v2405_v43  ;;  %v902_v57 = vsel %vm868_vm2, %v2405_v43, 0.0 }
 0x10e   : > { %v900_v50 = vsel %vm868_vm2, %v628_v46, 0.0  ;;  %v1022_v51 = vmul.f32 %v628_v46, %v628_v46  ;;  %1222 = vst.msk [vmem:[%s4528_s4 + $0x80] sm:$0xff] %vm868_vm2, %v628_v46  ;;  %v3332_v21 = vpop.f32.mrb[16].mxu1 }
 0x10f   : > { %v901_v53 = vadd.f32 %v900_v50, %v899_v47  ;;  %v1100_v54 = vadd.f32 %v1099_v48, %v1098_v44  ;;  %v1103_v0 = vsel %vm868_vm2, %v1023_v49, 0.0  ;;  %1255 = vst.msk [vmem:[%s4528_s4 + $0x188] sm:$0xff] %vm868_vm2, %v3332_v21  ;;  %v3339_v25 = vpop.f32.mrb[17].mxu1 }
 0x110   : > { %v1101_v58 = vsel %vm868_vm2, %v1022_v51, 0.0  ;;  %v2408_v60 = vpop.f32.mrb[18].mxu0  ;;  %1254 = vst.msk [vmem:[%s4528_s4 + $0x180] sm:$0xff] %vm868_vm2, %v3339_v25 }
 0x111   : > { %v1102_v61 = vadd.f32 %v1101_v58, %v1100_v54  ;;  %1225 = vst.msk [vmem:[%s4528_s4 + $0x98] sm:$0xff] %vm868_vm2, %v2408_v60  ;;  %v638_v62 = vpop.f32.mrb[19].mxu0  ;;  %v903_v63 = vadd.f32 %v902_v57, %v901_v53  ;;  %v1025_v1 = vmul.f32 %v2408_v60, %v2408_v60  ;;  %v906_v10 = vsel %vm868_vm2, %v2408_v60, 0.0 }
 0x112   : > { %v904_v2 = vsel %vm868_vm2, %v638_v62, 0.0  ;;  %v1024_v3 = vmul.f32 %v638_v62, %v638_v62  ;;  %1224 = vst.msk [vmem:[%s4528_s4 + $0x90] sm:$0xff] %vm868_vm2, %v638_v62  ;;  %v3358_v40 = vpop.f32.mrb[18].mxu1 }
 0x113   : > { %v905_v5 = vadd.f32 %v904_v2, %v903_v63  ;;  %v1104_v7 = vadd.f32 %v1103_v0, %v1102_v61  ;;  %v1107_v16 = vsel %vm868_vm2, %v1025_v1, 0.0  ;;  %1257 = vst.msk [vmem:[%s4528_s4 + $0x198] sm:$0xff] %vm868_vm2, %v3358_v40  ;;  %v3365_v44 = vpop.f32.mrb[19].mxu1 }
 0x114   : > { %v1105_v11 = vsel %vm868_vm2, %v1024_v3, 0.0  ;;  %v2411_v12 = vpop.f32.mrb[20].mxu0  ;;  %1256 = vst.msk [vmem:[%s4528_s4 + $0x190] sm:$0xff] %vm868_vm2, %v3365_v44 }
 0x115   : > { %v1106_v13 = vadd.f32 %v1105_v11, %v1104_v7  ;;  %1227 = vst.msk [vmem:[%s4528_s4 + $0xa8] sm:$0xff] %vm868_vm2, %v2411_v12  ;;  %v648_v14 = vpop.f32.mrb[21].mxu0  ;;  %v907_v15 = vadd.f32 %v906_v10, %v905_v5  ;;  %v1027_v17 = vmul.f32 %v2411_v12, %v2411_v12  ;;  %v910_v26 = vsel %vm868_vm2, %v2411_v12, 0.0 }
 0x116   : > { %v908_v18 = vsel %vm868_vm2, %v648_v14, 0.0  ;;  %v1026_v19 = vmul.f32 %v648_v14, %v648_v14  ;;  %1226 = vst.msk [vmem:[%s4528_s4 + $0xa0] sm:$0xff] %vm868_vm2, %v648_v14  ;;  %v3384_v60 = vpop.f32.mrb[20].mxu1 }
 0x117   : > { %v909_v22 = vadd.f32 %v908_v18, %v907_v15  ;;  %v1108_v24 = vadd.f32 %v1107_v16, %v1106_v13  ;;  %v1111_v34 = vsel %vm868_vm2, %v1027_v17, 0.0  ;;  %1259 = vst.msk [vmem:[%s4528_s4 + $0x1a8] sm:$0xff] %vm868_vm2, %v3384_v60  ;;  %v3391_v63 = vpop.f32.mrb[21].mxu1 }
 0x118   : > { %v1109_v27 = vsel %vm868_vm2, %v1026_v19, 0.0  ;;  %v2414_v29 = vpop.f32.mrb[22].mxu0  ;;  %1258 = vst.msk [vmem:[%s4528_s4 + $0x1a0] sm:$0xff] %vm868_vm2, %v3391_v63 }
 0x119   : > { %v1110_v30 = vadd.f32 %v1109_v27, %v1108_v24  ;;  %1229 = vst.msk [vmem:[%s4528_s4 + $0xb8] sm:$0xff] %vm868_vm2, %v2414_v29  ;;  %v658_v32 = vpop.f32.mrb[23].mxu0  ;;  %v911_v33 = vadd.f32 %v910_v26, %v909_v22  ;;  %v1029_v35 = vmul.f32 %v2414_v29, %v2414_v29  ;;  %v914_v46 = vsel %vm868_vm2, %v2414_v29, 0.0 }
 0x11a   : > { %v912_v37 = vsel %vm868_vm2, %v658_v32, 0.0  ;;  %v1028_v38 = vmul.f32 %v658_v32, %v658_v32  ;;  %1228 = vst.msk [vmem:[%s4528_s4 + $0xb0] sm:$0xff] %vm868_vm2, %v658_v32  ;;  %v3410_v14 = vpop.f32.mrb[22].mxu1 }
 0x11b   : > { %v913_v41 = vadd.f32 %v912_v37, %v911_v33  ;;  %v1112_v43 = vadd.f32 %v1111_v34, %v1110_v30  ;;  %v1115_v53 = vsel %vm868_vm2, %v1029_v35, 0.0  ;;  %1261 = vst.msk [vmem:[%s4528_s4 + $0x1b8] sm:$0xff] %vm868_vm2, %v3410_v14  ;;  %v3417_v17 = vpop.f32.mrb[23].mxu1 }
 0x11c   : > { %v1113_v47 = vsel %vm868_vm2, %v1028_v38, 0.0  ;;  %v2417_v48 = vpop.f32.mrb[24].mxu0  ;;  %1260 = vst.msk [vmem:[%s4528_s4 + $0x1b0] sm:$0xff] %vm868_vm2, %v3417_v17 }
 0x11d   : > { %v1114_v49 = vadd.f32 %v1113_v47, %v1112_v43  ;;  %1231 = vst.msk [vmem:[%s4528_s4 + $0xc8] sm:$0xff] %vm868_vm2, %v2417_v48  ;;  %v668_v50 = vpop.f32.mrb[25].mxu0  ;;  %v915_v51 = vadd.f32 %v914_v46, %v913_v41  ;;  %v1031_v54 = vmul.f32 %v2417_v48, %v2417_v48  ;;  %v918_v0 = vsel %vm868_vm2, %v2417_v48, 0.0 }
 0x11e   : > { %v916_v57 = vsel %vm868_vm2, %v668_v50, 0.0  ;;  %v1030_v58 = vmul.f32 %v668_v50, %v668_v50  ;;  %1230 = vst.msk [vmem:[%s4528_s4 + $0xc0] sm:$0xff] %vm868_vm2, %v668_v50  ;;  %v3436_v34 = vpop.f32.mrb[24].mxu1  ;;  %v1038_v50 = vmul.f32 %v3131_v31, %v3131_v31 }
 0x11f   : > { %v917_v61 = vadd.f32 %v916_v57, %v915_v51  ;;  %v1116_v62 = vadd.f32 %v1115_v53, %v1114_v49  ;;  %v1119_v10 = vsel %vm868_vm2, %v1031_v54, 0.0  ;;  %1263 = vst.msk [vmem:[%s4528_s4 + $0x1c8] sm:$0xff] %vm868_vm2, %v3436_v34  ;;  %v3443_v38 = vpop.f32.mrb[25].mxu1 }
 0x120   : > { %v1117_v1 = vsel %vm868_vm2, %v1030_v58, 0.0  ;;  %v2420_v2 = vpop.f32.mrb[26].mxu0  ;;  %1262 = vst.msk [vmem:[%s4528_s4 + $0x1c0] sm:$0xff] %vm868_vm2, %v3443_v38 }
 0x121   : > { %v1118_v3 = vadd.f32 %v1117_v1, %v1116_v62  ;;  %1233 = vst.msk [vmem:[%s4528_s4 + $0xd8] sm:$0xff] %vm868_vm2, %v2420_v2  ;;  %v678_v5 = vpop.f32.mrb[27].mxu0  ;;  %v919_v7 = vadd.f32 %v918_v0, %v917_v61  ;;  %v1033_v11 = vmul.f32 %v2420_v2, %v2420_v2  ;;  %v922_v18 = vsel %vm868_vm2, %v2420_v2, 0.0 }
 0x122   : > { %v920_v12 = vsel %vm868_vm2, %v678_v5, 0.0  ;;  %v1032_v13 = vmul.f32 %v678_v5, %v678_v5  ;;  %1232 = vst.msk [vmem:[%s4528_s4 + $0xd0] sm:$0xff] %vm868_vm2, %v678_v5  ;;  %v3464_v58 = vpop.f32.mrb[26].mxu1 }
 0x123   : > { %v921_v15 = vadd.f32 %v920_v12, %v919_v7  ;;  %v1120_v16 = vadd.f32 %v1119_v10, %v1118_v3  ;;  %v1123_v29 = vsel %vm868_vm2, %v1033_v11, 0.0  ;;  %1265 = vst.msk [vmem:[%s4528_s4 + $0x1d8] sm:$0xff] %vm868_vm2, %v3464_v58  ;;  %v3471_v0 = vpop.f32.mrb[27].mxu1  ;;  %v932_v3 = vsel %vm868_vm2, %v3131_v31, 0.0 }
 0x124   : > { %v1121_v19 = vsel %vm868_vm2, %v1032_v13, 0.0  ;;  %v2423_v22 = vpop.f32.mrb[28].mxu0  ;;  %1264 = vst.msk [vmem:[%s4528_s4 + $0x1d0] sm:$0xff] %vm868_vm2, %v3471_v0  ;;  %v1039_v11 = vmul.f32 %v3124_v28, %v3124_v28  ;;  %v1133_v12 = vsel %vm868_vm2, %v1038_v50, 0.0  ;;  %v1040_v13 = vmul.f32 %v3157_v45, %v3157_v45 }
 0x125   : > { %v1122_v24 = vadd.f32 %v1121_v19, %v1120_v16  ;;  %1235 = vst.msk [vmem:[%s4528_s4 + $0xe8] sm:$0xff] %vm868_vm2, %v2423_v22  ;;  %v688_v26 = vpop.f32.mrb[29].mxu0  ;;  %v923_v27 = vadd.f32 %v922_v18, %v921_v15  ;;  %v1035_v30 = vmul.f32 %v2423_v22, %v2423_v22  ;;  %v926_v41 = vsel %vm868_vm2, %v2423_v22, 0.0 }
 0x126   : > { %v924_v32 = vsel %vm868_vm2, %v688_v26, 0.0  ;;  %v1034_v33 = vmul.f32 %v688_v26, %v688_v26  ;;  %1234 = vst.msk [vmem:[%s4528_s4 + $0xe0] sm:$0xff] %vm868_vm2, %v688_v26  ;;  %v3488_v15 = vpop.f32.mrb[28].mxu1  ;;  %v934_v19 = vsel %vm868_vm2, %v3124_v28, 0.0  ;;  %v936_v22 = vsel %vm868_vm2, %v3157_v45, 0.0 }
 0x127   : > { %v925_v35 = vadd.f32 %v924_v32, %v923_v27  ;;  %v1124_v37 = vadd.f32 %v1123_v29, %v1122_v24  ;;  %v1127_v51 = vsel %vm868_vm2, %v1035_v30, 0.0  ;;  %1267 = vst.msk [vmem:[%s4528_s4 + $0x1e8] sm:$0xff] %vm868_vm2, %v3488_v15  ;;  %v3495_v18 = vpop.f32.mrb[29].mxu1  ;;  %v1135_v27 = vsel %vm868_vm2, %v1039_v11, 0.0 }
 0x128   : > { %v1125_v43 = vsel %vm868_vm2, %v1034_v33, 0.0  ;;  %v2426_v46 = vpop.f32.mrb[30].mxu0  ;;  %1266 = vst.msk [vmem:[%s4528_s4 + $0x1e0] sm:$0xff] %vm868_vm2, %v3495_v18  ;;  %v1041_v29 = vmul.f32 %v3150_v42, %v3150_v42  ;;  %v1137_v30 = vsel %vm868_vm2, %v1040_v13, 0.0  ;;  %v1042_v28 = vmul.f32 %v3183_v59, %v3183_v59 }
 0x129   : > { %v1126_v47 = vadd.f32 %v1125_v43, %v1124_v37  ;;  %1237 = vst.msk [vmem:[%s4528_s4 + $0xf8] sm:$0xff] %vm868_vm2, %v2426_v46  ;;  %v698_v48 = vpop.f32.mrb[31].mxu0  ;;  %v927_v49 = vadd.f32 %v926_v41, %v925_v35  ;;  %v1037_v53 = vmul.f32 %v2426_v46, %v2426_v46  ;;  %v930_v1 = vsel %vm868_vm2, %v2426_v46, 0.0 }
 0x12a   : > { %v928_v54 = vsel %vm868_vm2, %v698_v48, 0.0  ;;  %v1036_v57 = vmul.f32 %v698_v48, %v698_v48  ;;  %1236 = vst.msk [vmem:[%s4528_s4 + $0xf0] sm:$0xff] %vm868_vm2, %v698_v48  ;;  %v3512_v32 = vpop.f32.mrb[30].mxu1  ;;  %v938_v37 = vsel %vm868_vm2, %v3150_v42, 0.0  ;;  %v940_v41 = vsel %vm868_vm2, %v3183_v59, 0.0 }
 0x12b   : > { %v929_v61 = vadd.f32 %v928_v54, %v927_v49  ;;  %v1128_v62 = vadd.f32 %v1127_v51, %v1126_v47  ;;  %v1131_v10 = vsel %vm868_vm2, %v1037_v53, 0.0  ;;  %1269 = vst.msk [vmem:[%s4528_s4 + $0x1f8] sm:$0xff] %vm868_vm2, %v3512_v32  ;;  %v3519_v35 = vpop.f32.mrb[31].mxu1  ;;  %v1139_v47 = vsel %vm868_vm2, %v1041_v29, 0.0 }
 0x12c   : > { %v1129_v2 = vsel %vm868_vm2, %v1036_v57, 0.0  ;;  %1268 = vst.msk [vmem:[%s4528_s4 + $0x1f0] sm:$0xff] %vm868_vm2, %v3519_v35  ;;  %v1043_v48 = vmul.f32 %v3176_v56, %v3176_v56  ;;  %v1141_v49 = vsel %vm868_vm2, %v1042_v28, 0.0  ;;  %v1044_v42 = vmul.f32 %v3209_v9, %v3209_v9 }
 0x12d   : > { %v931_v5 = vadd.f32 %v930_v1, %v929_v61  ;;  %v1130_v7 = vadd.f32 %v1129_v2, %v1128_v62  ;;  %v942_v51 = vsel %vm868_vm2, %v3176_v56, 0.0  ;;  %v944_v53 = vsel %vm868_vm2, %v3209_v9, 0.0 }
 0x12e   : > { %v1143_v61 = vsel %vm868_vm2, %v1043_v48, 0.0  ;;  %v1045_v62 = vmul.f32 %v3202_v6, %v3202_v6  ;;  %v1145_v1 = vsel %vm868_vm2, %v1044_v42, 0.0  ;;  %v1046_v2 = vmul.f32 %v3235_v23, %v3235_v23 }
 0x12f   : > { %v1132_v31 = vadd.f32 %v1131_v10, %v1130_v7  ;;  %v933_v16 = vadd.f32 %v932_v3, %v931_v5  ;;  %v946_v56 = vsel %vm868_vm2, %v3202_v6, 0.0  ;;  %v948_v9 = vsel %vm868_vm2, %v3235_v23, 0.0 }
 0x130   : > { %v1147_v11 = vsel %vm868_vm2, %v1045_v62, 0.0  ;;  %v1149_v13 = vsel %vm868_vm2, %v1046_v2, 0.0  ;;  %v950_v6 = vsel %vm868_vm2, %v3228_v20, 0.0  ;;  %v952_v23 = vsel %vm868_vm2, %v3261_v39, 0.0 }
 0x131   : > { %v1134_v24 = vadd.f32 %v1133_v12, %v1132_v31  ;;  %v935_v26 = vadd.f32 %v934_v19, %v933_v16  ;;  %v1047_v12 = vmul.f32 %v3228_v20, %v3228_v20  ;;  %v1048_v31 = vmul.f32 %v3261_v39, %v3261_v39 }
 0x132   : > { %v954_v20 = vsel %vm868_vm2, %v3254_v36, 0.0  ;;  %v956_v39 = vsel %vm868_vm2, %v3287_v55, 0.0 }
 0x133   : > { %v937_v45 = vadd.f32 %v936_v22, %v935_v26  ;;  %v1136_v33 = vadd.f32 %v1135_v27, %v1134_v24  ;;  %v1151_v26 = vsel %vm868_vm2, %v1047_v12, 0.0  ;;  %v1049_v27 = vmul.f32 %v3254_v36, %v3254_v36 }
 0x134   : > { %v1153_v29 = vsel %vm868_vm2, %v1048_v31, 0.0  ;;  %v958_v36 = vsel %vm868_vm2, %v3280_v52, 0.0 }
 0x135   : > { %v1138_v43 = vadd.f32 %v1137_v30, %v1136_v33  ;;  %v939_v46 = vadd.f32 %v938_v37, %v937_v45  ;;  %v1050_v30 = vmul.f32 %v3287_v55, %v3287_v55  ;;  %v960_v55 = vsel %vm868_vm2, %v3313_v8, 0.0 }
 0x137   : > { %v941_v50 = vadd.f32 %v940_v41, %v939_v46  ;;  %v1140_v59 = vadd.f32 %v1139_v47, %v1138_v43  ;;  %v1155_v41 = vsel %vm868_vm2, %v1049_v27, 0.0  ;;  %v1051_v43 = vmul.f32 %v3280_v52, %v3280_v52 }
 0x138   : > { %v1157_v46 = vsel %vm868_vm2, %v1050_v30, 0.0  ;;  %v1052_v47 = vmul.f32 %v3313_v8, %v3313_v8  ;;  %v962_v52 = vsel %vm868_vm2, %v3306_v4, 0.0  ;;  %v964_v8 = vsel %vm868_vm2, %v3339_v25, 0.0 }
 0x139   : > { %v1142_v54 = vadd.f32 %v1141_v49, %v1140_v59  ;;  %v943_v57 = vadd.f32 %v942_v51, %v941_v50  ;;  %v1159_v59 = vsel %vm868_vm2, %v1051_v43, 0.0  ;;  %v1053_v51 = vmul.f32 %v3306_v4, %v3306_v4 }
 0x13a   : > { %v966_v4 = vsel %vm868_vm2, %v3332_v21, 0.0 }
 0x13b   : > { %v945_v3 = vadd.f32 %v944_v53, %v943_v57  ;;  %v1144_v5 = vadd.f32 %v1143_v61, %v1142_v54  ;;  %v1161_v53 = vsel %vm868_vm2, %v1052_v47, 0.0  ;;  %v1054_v54 = vmul.f32 %v3339_v25, %v3339_v25 }
 0x13c   : > { %v1163_v2 = vsel %vm868_vm2, %v1053_v51, 0.0  ;;  %v968_v25 = vsel %vm868_vm2, %v3365_v44, 0.0 }
 0x13d   : > { %v1146_v7 = vadd.f32 %v1145_v1, %v1144_v5  ;;  %v947_v10 = vadd.f32 %v946_v56, %v945_v3  ;;  %v1055_v3 = vmul.f32 %v3332_v21, %v3332_v21  ;;  %v1165_v5 = vsel %vm868_vm2, %v1054_v54, 0.0 }
 0x13e   : > { %v1056_v56 = vmul.f32 %v3365_v44, %v3365_v44  ;;  %v970_v21 = vsel %vm868_vm2, %v3358_v40, 0.0  ;;  %v972_v44 = vsel %vm868_vm2, %v3391_v63, 0.0 }
 0x13f   : > { %v949_v16 = vadd.f32 %v948_v9, %v947_v10  ;;  %v1148_v19 = vadd.f32 %v1147_v11, %v1146_v7  ;;  %v1167_v12 = vsel %vm868_vm2, %v1055_v3, 0.0 }
 0x140   : > { %v1169_v31 = vsel %vm868_vm2, %v1056_v56, 0.0 }
 0x141   : > { %v1150_v22 = vadd.f32 %v1149_v13, %v1148_v19  ;;  %v951_v24 = vadd.f32 %v950_v6, %v949_v16  ;;  %v1057_v13 = vmul.f32 %v3358_v40, %v3358_v40  ;;  %v1058_v16 = vmul.f32 %v3391_v63, %v3391_v63 }
 0x142   : > { %v974_v40 = vsel %vm868_vm2, %v3384_v60, 0.0  ;;  %v976_v63 = vsel %vm868_vm2, %v3417_v17, 0.0 }
 0x143   : > { %v953_v28 = vadd.f32 %v952_v23, %v951_v24  ;;  %v1152_v45 = vadd.f32 %v1151_v26, %v1150_v22  ;;  %v1171_v24 = vsel %vm868_vm2, %v1057_v13, 0.0  ;;  %v1059_v26 = vmul.f32 %v3384_v60, %v3384_v60 }
 0x144   : > { %v1173_v27 = vsel %vm868_vm2, %v1058_v16, 0.0  ;;  %v978_v60 = vsel %vm868_vm2, %v3410_v14, 0.0 }
 0x145   : > { %v1154_v33 = vadd.f32 %v1153_v29, %v1152_v45  ;;  %v955_v37 = vadd.f32 %v954_v20, %v953_v28  ;;  %v1060_v29 = vmul.f32 %v3417_v17, %v3417_v17  ;;  %v980_v17 = vsel %vm868_vm2, %v3443_v38, 0.0 }
 0x147   : > { %v957_v48 = vadd.f32 %v956_v39, %v955_v37  ;;  %v1156_v49 = vadd.f32 %v1155_v41, %v1154_v33  ;;  %v1175_v39 = vsel %vm868_vm2, %v1059_v26, 0.0  ;;  %v1061_v33 = vmul.f32 %v3410_v14, %v3410_v14 }
 0x148   : > { %v1177_v37 = vsel %vm868_vm2, %v1060_v29, 0.0  ;;  %v1062_v41 = vmul.f32 %v3443_v38, %v3443_v38  ;;  %v982_v14 = vsel %vm868_vm2, %v3436_v34, 0.0  ;;  %v984_v38 = vsel %vm868_vm2, %v3471_v0, 0.0 }
 0x149   : > { %v1158_v42 = vadd.f32 %v1157_v46, %v1156_v49  ;;  %v959_v50 = vadd.f32 %v958_v36, %v957_v48  ;;  %v1179_v49 = vsel %vm868_vm2, %v1061_v33, 0.0  ;;  %v1063_v36 = vmul.f32 %v3436_v34, %v3436_v34 }
 0x14a   : > { %v986_v34 = vsel %vm868_vm2, %v3464_v58, 0.0 }
 0x14b   : > { %v961_v57 = vadd.f32 %v960_v55, %v959_v50  ;;  %v1160_v61 = vadd.f32 %v1159_v59, %v1158_v42  ;;  %v1181_v55 = vsel %vm868_vm2, %v1062_v41, 0.0  ;;  %v1064_v42 = vmul.f32 %v3471_v0, %v3471_v0 }
 0x14c   : > { %v1183_v54 = vsel %vm868_vm2, %v1063_v36, 0.0  ;;  %v988_v0 = vsel %vm868_vm2, %v3495_v18, 0.0 }
 0x14d   : > { %v1162_v62 = vadd.f32 %v1161_v53, %v1160_v61  ;;  %v963_v1 = vadd.f32 %v962_v52, %v961_v57  ;;  %v1065_v57 = vmul.f32 %v3464_v58, %v3464_v58  ;;  %v1185_v61 = vsel %vm868_vm2, %v1064_v42, 0.0 }
 0x14e   : > { %v1066_v52 = vmul.f32 %v3495_v18, %v3495_v18  ;;  %v990_v58 = vsel %vm868_vm2, %v3488_v15, 0.0  ;;  %v992_v18 = vsel %vm868_vm2, %v3519_v35, 0.0 }
 0x14f   : > { %v965_v9 = vadd.f32 %v964_v8, %v963_v1  ;;  %v1164_v7 = vadd.f32 %v1163_v2, %v1162_v62  ;;  %v1187_v3 = vsel %vm868_vm2, %v1065_v57, 0.0 }
 0x150   : > { %v1189_v56 = vsel %vm868_vm2, %v1066_v52, 0.0 }
 0x151   : > { %v1166_v10 = vadd.f32 %v1165_v5, %v1164_v7  ;;  %v967_v11 = vadd.f32 %v966_v4, %v965_v9  ;;  %v1067_v5 = vmul.f32 %v3488_v15, %v3488_v15  ;;  %v1068_v9 = vmul.f32 %v3519_v35, %v3519_v35 }
 0x153   : > { %v969_v19 = vadd.f32 %v968_v25, %v967_v11  ;;  %v1168_v6 = vadd.f32 %v1167_v12, %v1166_v10  ;;  %v1191_v11 = vsel %vm868_vm2, %v1067_v5, 0.0  ;;  %v1069_v12 = vmul.f32 %v3512_v32, %v3512_v32 }
 0x154   : > { %v1193_v13 = vsel %vm868_vm2, %v1068_v9, 0.0 }
 0x155   : > { %v1170_v23 = vadd.f32 %v1169_v31, %v1168_v6  ;;  %v971_v22 = vadd.f32 %v970_v21, %v969_v19  ;;  %v994_v19 = vsel %vm868_vm2, %v3512_v32, 0.0  ;;  %v1195_v15 = vsel %vm868_vm2, %v1069_v12, 0.0 }
 0x157   : > { %v973_v30 = vadd.f32 %v972_v44, %v971_v22  ;;  %v1172_v28 = vadd.f32 %v1171_v24, %v1170_v23 }
 0x159   : > { %v1174_v45 = vadd.f32 %v1173_v27, %v1172_v28  ;;  %v975_v20 = vadd.f32 %v974_v40, %v973_v30  ;;  %v867_v40 = vld [vmem:[#allocation2] sm:$0x1] }
 0x15b   : > { %v977_v43 = vadd.f32 %v976_v63, %v975_v20  ;;  %v1176_v46 = vadd.f32 %v1175_v39, %v1174_v45  ;;  %v1005_v20 = vld [vmem:[#allocation3] sm:$0x1] }
 0x15d   : > { %v1178_v47 = vadd.f32 %v1177_v37, %v1176_v46  ;;  %v979_v48 = vadd.f32 %v978_v60, %v977_v43 }
 0x15f   : > { %v981_v50 = vadd.f32 %v980_v17, %v979_v48  ;;  %v1180_v59 = vadd.f32 %v1179_v49, %v1178_v47 }
 0x161   : > { %v1182_v51 = vadd.f32 %v1181_v55, %v1180_v59  ;;  %v983_v53 = vadd.f32 %v982_v14, %v981_v50 }
 0x163   : > { %v985_v8 = vadd.f32 %v984_v38, %v983_v53  ;;  %v1184_v62 = vadd.f32 %v1183_v54, %v1182_v51 }
 0x165   : > { %v1186_v1 = vadd.f32 %v1185_v61, %v1184_v62  ;;  %v987_v2 = vadd.f32 %v986_v34, %v985_v8 }
 0x167   : > { %v989_v7 = vadd.f32 %v988_v0, %v987_v2  ;;  %v1188_v4 = vadd.f32 %v1187_v3, %v1186_v1 }
 0x169   : > { %v1190_v25 = vadd.f32 %v1189_v56, %v1188_v4  ;;  %v991_v10 = vadd.f32 %v990_v58, %v989_v7 }
 0x16b   : > { %v993_v31 = vadd.f32 %v992_v18, %v991_v10  ;;  %v1192_v16 = vadd.f32 %v1191_v11, %v1190_v25 }
 0x16d   : > { %v995_v6 = vadd.f32 %v994_v19, %v993_v31  ;;  %v1194_v21 = vadd.f32 %v1193_v13, %v1192_v16 }
 0x16f   : > { %v996_v44 = vrot.slane %v995_v6, 4  ;;  %v1196_v35 = vadd.f32 %v1195_v15, %v1194_v21 }
 0x171   : > { %v997_v23 = vadd.f32 %v996_v44, %v995_v6  ;;  %v1197_v22 = vrot.slane %v1196_v35, 4 }
 0x173   : > { %v998_v24 = vrot.slane %v997_v23, 2  ;;  %v1198_v26 = vadd.f32 %v1197_v22, %v1196_v35 }
 0x175   : > { %v999_v27 = vadd.f32 %v998_v24, %v997_v23  ;;  %v1199_v29 = vrot.slane %v1198_v26, 2 }
 0x177   : > { %v1000_v30 = vrot.slane %v999_v27, 1  ;;  %v1200_v28 = vadd.f32 %v1199_v29, %v1198_v26 }
 0x179   : > { %v1001_v63 = vadd.f32 %v1000_v30, %v999_v27  ;;  %v1201_v45 = vrot.slane %v1200_v28, 1 }
 0x17b   : > { %v1002_v32 = vadd.f32 %v1001_v63, %v867_v40  ;;  %v1202_v39 = vadd.f32 %v1201_v45, %v1200_v28 }
 0x17d   : > { %1004 = vst.msk [vmem:[#allocation2] sm:$0x1] %vm1003_vm3, %v1002_v32  ;;  %v1203_v33 = vadd.f32 %v1202_v39, %v1005_v20 }
 0x17f   : > { %1204 = vst.msk [vmem:[#allocation3] sm:$0x1] %vm1003_vm3, %v1203_v33 }
 0x180 PF: > { %p2308_p6 = scmp.ne.s32.totalorder %s2774_s15, 1 }
 0x181   : > { %v1353_v48 = vlaneseq (!%p2308_p6)  ;;  %v1282_v36 = vld [vmem:[%s4526_s2] sm:$0x1] (!%p2308_p6)  ;;  %v1289_v38 = vld [vmem:[%s4528_s4 + $0x8] sm:$0xff] (!%p2308_p6)  ;;  %v1290_v51 = vld [vmem:[%s4528_s4 + $0x10] sm:$0xff] (!%p2308_p6)  ;;  %vm2132_vm4 = vcmask (!%p2308_p6), 31744  }
 0x182   : > { %1273 = sbr.rel (%p2308_p6) target bundleno = 627 (0x273), region = 48  ;;  %v1284_v59 = vld [vmem:[%s4527_s3] sm:$0x1] (!%p2308_p6)  ;;  %v1291_v53 = vld [vmem:[%s4528_s4 + $0x18] sm:$0xff] (!%p2308_p6)  ;;  %v1293_v52 = vld [vmem:[%s4528_s4 + $0x28] sm:$0xff] (!%p2308_p6) }
 0x183   : > { %v1354_v49 = vshrl.u32 (!%p2308_p6), %v1353_v48, 7  ;;  %v1288_v14 = vld [vmem:[%s4528_s4] sm:$0xff] (!%p2308_p6)  ;;  %v1294_v8 = vld [vmem:[%s4528_s4 + $0x30] sm:$0xff] (!%p2308_p6)  ;;  %v1295_v62 = vld [vmem:[%s4528_s4 + $0x38] sm:$0xff] (!%p2308_p6) }
 0x184   : > { %v1274_v37 = vld [vmem:[#allocation2] sm:$0x1] (!%p2308_p6)  ;;  %v1297_v0 = vld [vmem:[%s4528_s4 + $0x48] sm:$0xff] (!%p2308_p6)  ;;  %v1298_v1 = vld [vmem:[%s4528_s4 + $0x50] sm:$0xff] (!%p2308_p6) }
 0x185   : > { %v1275_v43 = vmul.f32 (!%p2308_p6), 0.001953125, %v1274_v37  ;;  %v1355_v55 = vsub.s32 (!%p2308_p6), 0, %v1354_v49  ;;  %v1292_v54 = vld [vmem:[%s4528_s4 + $0x20] sm:$0xff] (!%p2308_p6)  ;;  %v1299_v9 = vld [vmem:[%s4528_s4 + $0x58] sm:$0xff] (!%p2308_p6)  ;;  %v1301_v4 = vld [vmem:[%s4528_s4 + $0x68] sm:$0xff] (!%p2308_p6) }
 0x186   : > { %v1276_v41 = vld [vmem:[#allocation3] sm:$0x1] (!%p2308_p6) }
 0x187   : > { %v1277_v46 = vmul.f32 (!%p2308_p6), 0.001953125, %v1276_v41  ;;  %v1278_v60 = vmul.f32 (!%p2308_p6), %v1275_v43, %v1275_v43  ;;  %v1296_v34 = vld [vmem:[%s4528_s4 + $0x40] sm:$0xff] (!%p2308_p6) }
 0x188   : > { %v1300_v7 = vld [vmem:[%s4528_s4 + $0x60] sm:$0xff] (!%p2308_p6) }
 0x189   : > { %v1279_v17 = vsub.f32 %v1277_v46, %v1278_v60 }
 0x18b   : > { %v1280_v47 = vadd.f32 1e-05, %v1279_v17 }
 0x18d   : > { %2502 = vrsqrt.f32 %v1280_v47 }
 0x197   : > { %v2503_v42 = vpop.eup %2502 }
 0x198   : > { %v1283_v50 = vmul.f32 %v2503_v42, %v1282_v36 }
 0x19a   : > { %v1285_v57 = vmul.f32 %v1283_v50, %v1275_v43  ;;  %v3689_v61 = vrot.slane %v1283_v50, %v1355_v55  ;;  %v1302_v50 = vld [vmem:[%s4528_s4 + $0x70] sm:$0xff] }
 0x19c   : > { %v1286_v2 = vsub.f32 %v1284_v59, %v1285_v57  ;;  %v1358_v3 = vmul.f32 %v3689_v61, %v1288_v14  ;;  %v1359_v5 = vmul.f32 %v3689_v61, %v1289_v38  ;;  %v1360_v56 = vmul.f32 %v3689_v61, %v1290_v51  ;;  %v1303_v51 = vld [vmem:[%s4528_s4 + $0x78] sm:$0xff] }
 0x19d   : > { %v1361_v58 = vmul.f32 %v3689_v61, %v1291_v53  ;;  %v1362_v18 = vmul.f32 %v3689_v61, %v1292_v54  ;;  %v1363_v25 = vmul.f32 %v3689_v61, %v1293_v52  ;;  %v1364_v10 = vmul.f32 %v3689_v61, %v1294_v8 }
 0x19e   : > { %v3725_v11 = vrot.slane %v1286_v2, %v1355_v55  ;;  %v1365_v12 = vmul.f32 %v3689_v61, %v1295_v62  ;;  %v1366_v13 = vmul.f32 %v3689_v61, %v1296_v34  ;;  %v1367_v31 = vmul.f32 %v3689_v61, %v1297_v0  ;;  %v1304_v34 = vld [vmem:[%s4528_s4 + $0x80] sm:$0xff]  ;;  %v1305_v0 = vld [vmem:[%s4528_s4 + $0x88] sm:$0xff] }
 0x19f   : > { %v1368_v16 = vmul.f32 %v3689_v61, %v1298_v1  ;;  %v1369_v19 = vmul.f32 %v3689_v61, %v1299_v9  ;;  %v1370_v6 = vmul.f32 %v3689_v61, %v1300_v7  ;;  %v1371_v21 = vmul.f32 %v3689_v61, %v1301_v4 }
 0x1a0   : > { %v3735_v15 = vadd.f32 %v3725_v11, %v1358_v3  ;;  %v3738_v44 = vadd.f32 %v3725_v11, %v1359_v5  ;;  %v3741_v35 = vadd.f32 %v3725_v11, %v1360_v56  ;;  %v3744_v23 = vadd.f32 %v3725_v11, %v1361_v58  ;;  %v1306_v5 = vld [vmem:[%s4528_s4 + $0x90] sm:$0xff]  ;;  %v1307_v56 = vld [vmem:[%s4528_s4 + $0x98] sm:$0xff] }
 0x1a1   : > { %v3747_v22 = vadd.f32 %v3725_v11, %v1362_v18  ;;  %v3750_v24 = vadd.f32 %v3725_v11, %v1363_v25  ;;  %v3753_v26 = vadd.f32 %v3725_v11, %v1364_v10  ;;  %v3756_v27 = vadd.f32 %v3725_v11, %v1365_v12 }
 0x1a2   : > { %v1492_v29 = vmin.f32 %v3735_v15, 30.0  ;;  %v1493_v30 = vmin.f32 %v3738_v44, 30.0  ;;  %v1494_v28 = vmin.f32 %v3741_v35, 30.0  ;;  %v1495_v40 = vmin.f32 %v3744_v23, 30.0 }
 0x1a3   : > { %v1496_v63 = vmin.f32 %v3747_v22, 30.0  ;;  %v1497_v45 = vmin.f32 %v3750_v24, 30.0  ;;  %v1498_v20 = vmin.f32 %v3753_v26, 30.0  ;;  %v1499_v32 = vmin.f32 %v3756_v27, 30.0 }
 0x1a4   : > { %v1556_v39 = vmul.f32 1.442695, %v1492_v29  ;;  %v1558_v33 = vmul.f32 1.442695, %v1493_v30  ;;  %v1560_v37 = vmul.f32 1.442695, %v1494_v28  ;;  %v3767_v41 = vadd.f32 %v3725_v11, %v1366_v13 }
 0x1a5   : > { %v1562_v43 = vmul.f32 1.442695, %v1495_v40  ;;  %v1564_v46 = vmul.f32 1.442695, %v1496_v63  ;;  %v1566_v60 = vmul.f32 1.442695, %v1497_v45  ;;  %v3770_v17 = vadd.f32 %v3725_v11, %v1367_v31 }
 0x1a6   : > { %2504 = vpow2.f32 %v1556_v39  ;;  %v1568_v47 = vmul.f32 1.442695, %v1498_v20  ;;  %v1570_v48 = vmul.f32 1.442695, %v1499_v32  ;;  %v1500_v49 = vmin.f32 %v3767_v41, 30.0 }
 0x1a7   : > { %2506 = vpow2.f32 %v1558_v33  ;;  %v1501_v36 = vmin.f32 %v3770_v17, 30.0  ;;  %v3775_v55 = vadd.f32 %v3725_v11, %v1368_v16  ;;  %v3778_v42 = vadd.f32 %v3725_v11, %v1369_v19 }
 0x1a8   : > { %2508 = vpow2.f32 %v1560_v37  ;;  %v1572_v59 = vmul.f32 1.442695, %v1500_v49  ;;  %v3784_v14 = vadd.f32 %v3725_v11, %v1370_v6  ;;  %v3787_v38 = vadd.f32 %v3725_v11, %v1371_v21 }
 0x1a9   : > { %2510 = vpow2.f32 %v1562_v43  ;;  %v1574_v53 = vmul.f32 1.442695, %v1501_v36  ;;  %v1502_v54 = vmin.f32 %v3775_v55, 30.0  ;;  %v1503_v57 = vmin.f32 %v3778_v42, 30.0 }
 0x1aa   : > { %2512 = vpow2.f32 %v1564_v46  ;;  %v1504_v52 = vmin.f32 %v3784_v14, 30.0  ;;  %v1505_v8 = vmin.f32 %v3787_v38, 30.0  ;;  %v1372_v62 = vmul.f32 %v3689_v61, %v1302_v50 }
 0x1ab   : > { %2514 = vpow2.f32 %v1566_v60  ;;  %v1576_v1 = vmul.f32 1.442695, %v1502_v54  ;;  %v1578_v2 = vmul.f32 1.442695, %v1503_v57  ;;  %v1373_v3 = vmul.f32 %v3689_v61, %v1303_v51 }
 0x1ac   : > { %2516 = vpow2.f32 %v1568_v47  ;;  %v1580_v9 = vmul.f32 1.442695, %v1504_v52  ;;  %v1582_v7 = vmul.f32 1.442695, %v1505_v8  ;;  %v3811_v4 = vadd.f32 %v3725_v11, %v1372_v62 }
 0x1ad   : > { %2518 = vpow2.f32 %v1570_v48  ;;  %v3814_v58 = vadd.f32 %v3725_v11, %v1373_v3  ;;  %v1374_v18 = vmul.f32 %v3689_v61, %v1304_v34  ;;  %v1375_v25 = vmul.f32 %v3689_v61, %v1305_v0 }
 0x1ae   : > { %2520 = vpow2.f32 %v1572_v59  ;;  %v1506_v10 = vmin.f32 %v3811_v4, 30.0  ;;  %v1376_v12 = vmul.f32 %v3689_v61, %v1306_v5  ;;  %v1377_v13 = vmul.f32 %v3689_v61, %v1307_v56 }
 0x1af   : > { %2522 = vpow2.f32 %v1574_v53  ;;  %v1507_v31 = vmin.f32 %v3814_v58, 30.0  ;;  %v3823_v16 = vadd.f32 %v3725_v11, %v1374_v18  ;;  %v3826_v19 = vadd.f32 %v3725_v11, %v1375_v25 }
 0x1b0   : > { %v2505_v6 = vpop.eup %2504  ;;  %2524 = vpow2.f32 %v1576_v1  ;;  %v1584_v21 = vmul.f32 1.442695, %v1506_v10  ;;  %v3829_v29 = vadd.f32 %v3725_v11, %v1376_v12  ;;  %v3832_v30 = vadd.f32 %v3725_v11, %v1377_v13 }
 0x1b1   : > { %v2507_v28 = vpop.eup %2506  ;;  %v1684_v40 = vadd.f32 1.0, %v2505_v6  ;;  %2526 = vpow2.f32 %v1578_v2  ;;  %v1586_v63 = vmul.f32 1.442695, %v1507_v31  ;;  %v1508_v45 = vmin.f32 %v3823_v16, 30.0 }
 0x1b2   : > { %v2509_v20 = vpop.eup %2508  ;;  %v1685_v32 = vadd.f32 1.0, %v2507_v28  ;;  %2528 = vpow2.f32 %v1580_v9  ;;  %v1509_v39 = vmin.f32 %v3826_v19, 30.0  ;;  %v1510_v33 = vmin.f32 %v3829_v29, 30.0 }
 0x1b3   : > { %v2511_v37 = vpop.eup %2510  ;;  %v1748_v43 = vmul.f32 %v1684_v40, %v1684_v40  ;;  %v1686_v46 = vadd.f32 1.0, %v2509_v20  ;;  %2530 = vpow2.f32 %v1582_v7  ;;  %v1588_v60 = vmul.f32 1.442695, %v1508_v45 }
 0x1b4   : > { %v2513_v47 = vpop.eup %2512  ;;  %v1749_v48 = vmul.f32 %v1685_v32, %v1685_v32  ;;  %v1687_v49 = vadd.f32 1.0, %v2511_v37  ;;  %2532 = vpow2.f32 %v1584_v21  ;;  %v3837_v36 = vmul.f32 1.442695, %v1509_v39 }
 0x1b5   : > { %v2515_v50 = vpop.eup %2514  ;;  %v1812_v59 = vadd.f32 1.0, %v1748_v43  ;;  %v1750_v51 = vmul.f32 %v1686_v46, %v1686_v46  ;;  %v1688_v53 = vadd.f32 1.0, %v2513_v47  ;;  %2534 = vpow2.f32 %v1586_v63 }
 0x1b6   : > { %v2517_v54 = vpop.eup %2516  ;;  %v1813_v57 = vadd.f32 1.0, %v1749_v48  ;;  %v1751_v52 = vmul.f32 %v1687_v49, %v1687_v49  ;;  %v1689_v8 = vadd.f32 1.0, %v2515_v50  ;;  %2536 = vpow2.f32 %v1588_v60 }
 0x1b7   : > { %v2519_v62 = vpop.eup %2518  ;;  %2538 = vrcp.f32 %v1812_v59  ;;  %v1814_v34 = vadd.f32 1.0, %v1750_v51  ;;  %v1752_v0 = vmul.f32 %v1688_v53, %v1688_v53  ;;  %v1690_v1 = vadd.f32 1.0, %v2517_v54 }
 0x1b8   : > { %v2521_v2 = vpop.eup %2520  ;;  %2540 = vrcp.f32 %v1813_v57  ;;  %v1815_v3 = vadd.f32 1.0, %v1751_v52  ;;  %v1753_v5 = vmul.f32 %v1689_v8, %v1689_v8  ;;  %v1691_v56 = vadd.f32 1.0, %v2519_v62 }
 0x1b9   : > { %v2523_v9 = vpop.eup %2522  ;;  %2542 = vrcp.f32 %v1814_v34  ;;  %v1816_v7 = vadd.f32 1.0, %v1752_v0  ;;  %v1754_v18 = vmul.f32 %v1690_v1, %v1690_v1  ;;  %v1692_v25 = vadd.f32 1.0, %v2521_v2 }
 0x1ba   : > { %v2525_v10 = vpop.eup %2524  ;;  %2544 = vrcp.f32 %v1815_v3  ;;  %v1817_v12 = vadd.f32 1.0, %v1753_v5  ;;  %v1755_v13 = vmul.f32 %v1691_v56, %v1691_v56  ;;  %v1693_v31 = vadd.f32 1.0, %v2523_v9 }
 0x1bb   : > { %v2527_v6 = vpop.eup %2526  ;;  %2546 = vrcp.f32 %v1816_v7  ;;  %v1818_v21 = vadd.f32 1.0, %v1754_v18  ;;  %v1756_v28 = vmul.f32 %v1692_v25, %v1692_v25  ;;  %v1694_v40 = vadd.f32 1.0, %v2525_v10 }
 0x1bc   : > { %v2529_v63 = vpop.eup %2528  ;;  %2548 = vrcp.f32 %v1817_v12  ;;  %v1819_v45 = vadd.f32 1.0, %v1755_v13  ;;  %v1757_v20 = vmul.f32 %v1693_v31, %v1693_v31  ;;  %v1695_v32 = vadd.f32 1.0, %v2527_v6 }
 0x1bd   : > { %v2531_v39 = vpop.eup %2530  ;;  %2550 = vrcp.f32 %v1818_v21  ;;  %v1820_v37 = vadd.f32 1.0, %v1756_v28  ;;  %v1758_v43 = vmul.f32 %v1694_v40, %v1694_v40  ;;  %v1696_v46 = vadd.f32 1.0, %v2529_v63 }
 0x1be   : > { %v2533_v60 = vpop.eup %2532  ;;  %2552 = vrcp.f32 %v1819_v45  ;;  %v1821_v47 = vadd.f32 1.0, %v1757_v20  ;;  %v1759_v48 = vmul.f32 %v1695_v32, %v1695_v32  ;;  %v1697_v49 = vadd.f32 1.0, %v2531_v39 }
 0x1bf   : > { %v2535_v50 = vpop.eup %2534  ;;  %2554 = vrcp.f32 %v1820_v37  ;;  %v1822_v59 = vadd.f32 1.0, %v1758_v43  ;;  %v1760_v51 = vmul.f32 %v1696_v46, %v1696_v46  ;;  %v1698_v53 = vadd.f32 1.0, %v2533_v60 }
 0x1c0   : > { %v2537_v54 = vpop.eup %2536  ;;  %2556 = vrcp.f32 %v1821_v47  ;;  %v1823_v57 = vadd.f32 1.0, %v1759_v48  ;;  %v1761_v52 = vmul.f32 %v1697_v49, %v1697_v49  ;;  %v1699_v8 = vadd.f32 1.0, %v2535_v50 }
 0x1c1   : > { %v2539_v62 = vpop.eup %2538  ;;  %2558 = vrcp.f32 %v1822_v59  ;;  %v1824_v34 = vadd.f32 1.0, %v1760_v51  ;;  %v1762_v0 = vmul.f32 %v1698_v53, %v1698_v53  ;;  %v1700_v1 = vadd.f32 1.0, %v2537_v54 }
 0x1c2   : > { %v2541_v2 = vpop.eup %2540  ;;  %v1877_v3 = vmul.f32 2.0, %v2539_v62  ;;  %2560 = vrcp.f32 %v1823_v57  ;;  %v1825_v5 = vadd.f32 1.0, %v1761_v52  ;;  %v1763_v56 = vmul.f32 %v1699_v8, %v1699_v8 }
 0x1c3   : > { %v2543_v9 = vpop.eup %2542  ;;  %v1879_v7 = vmul.f32 2.0, %v2541_v2  ;;  %2562 = vrcp.f32 %v1824_v34  ;;  %v1826_v18 = vadd.f32 1.0, %v1762_v0  ;;  %v1764_v25 = vmul.f32 %v1700_v1, %v1700_v1 }
 0x1c4   : > { %v2545_v10 = vpop.eup %2544  ;;  %v2004_v12 = vsub.f32 1.0, %v1877_v3  ;;  %v1881_v13 = vmul.f32 2.0, %v2543_v9  ;;  %2564 = vrcp.f32 %v1825_v5  ;;  %v1827_v31 = vadd.f32 1.0, %v1763_v56 }
 0x1c5   : > { %v2547_v6 = vpop.eup %2546  ;;  %v2005_v21 = vsub.f32 1.0, %v1879_v7  ;;  %v1883_v28 = vmul.f32 2.0, %v2545_v10  ;;  %2566 = vrcp.f32 %v1826_v18  ;;  %v1828_v40 = vadd.f32 1.0, %v1764_v25  ;;  %v1309_v7 = vld [vmem:[%s4528_s4 + $0xa8] sm:$0xff] }
 0x1c6   : > { %v2549_v63 = vpop.eup %2548  ;;  %v2068_v45 = vmul.f32 %v2004_v12, %v3735_v15  ;;  %v2006_v20 = vsub.f32 1.0, %v1881_v13  ;;  %v1885_v32 = vmul.f32 2.0, %v2547_v6  ;;  %2568 = vrcp.f32 %v1827_v31 }
 0x1c7   : > { %v2551_v39 = vpop.eup %2550  ;;  %v2069_v37 = vmul.f32 %v2005_v21, %v3738_v44  ;;  %v2007_v43 = vsub.f32 1.0, %v1883_v28  ;;  %v1887_v46 = vmul.f32 2.0, %v2549_v63  ;;  %2570 = vrcp.f32 %v1828_v40 }
 0x1c8   : > { %v2553_v60 = vpop.eup %2552  ;;  %2133 = vst.msk [vmem:[%s4528_s4] sm:$0xff] %vm2132_vm4, %v2068_v45  ;;  %v2070_v47 = vmul.f32 %v2006_v20, %v3741_v35  ;;  %v2008_v48 = vsub.f32 1.0, %v1885_v32  ;;  %v1889_v49 = vmul.f32 2.0, %v2551_v39  ;;  %2572 = vpow2.f32 %v3837_v36 }
 0x1c9   : > { %v2555_v15 = vpop.eup %2554  ;;  %2134 = vst.msk [vmem:[%s4528_s4 + $0x8] sm:$0xff] %vm2132_vm4, %v2069_v37  ;;  %v2071_v44 = vmul.f32 %v2007_v43, %v3744_v23  ;;  %v2009_v50 = vsub.f32 1.0, %v1887_v46  ;;  %v1891_v59 = vmul.f32 2.0, %v2553_v60  ;;  %v1592_v51 = vmul.f32 1.442695, %v1510_v33  ;;  %v1308_v23 = vld [vmem:[%s4528_s4 + $0xa0] sm:$0xff] }
 0x1ca   : > { %v2557_v53 = vpop.eup %2556  ;;  %2135 = vst.msk [vmem:[%s4528_s4 + $0x10] sm:$0xff] %vm2132_vm4, %v2070_v47  ;;  %v2072_v35 = vmul.f32 %v2008_v48, %v3747_v22  ;;  %v2010_v36 = vsub.f32 1.0, %v1889_v49  ;;  %v1893_v54 = vmul.f32 2.0, %v2555_v15  ;;  %v1511_v57 = vmin.f32 %v3832_v30, 30.0  ;;  %v1311_v47 = vld [vmem:[%s4528_s4 + $0xb8] sm:$0xff] }
 0x1cb   : > { %v2559_v52 = vpop.eup %2558  ;;  %2136 = vst.msk [vmem:[%s4528_s4 + $0x18] sm:$0xff] %vm2132_vm4, %v2071_v44  ;;  %v2073_v33 = vmul.f32 %v2009_v50, %v3750_v24  ;;  %v2011_v8 = vsub.f32 1.0, %v1891_v59  ;;  %v1895_v62 = vmul.f32 2.0, %v2557_v53  ;;  %2574 = vpow2.f32 %v1592_v51  ;;  %v1312_v53 = vld [vmem:[%s4528_s4 + $0xc0] sm:$0xff] }
 0x1cc   : > { %v2561_v22 = vpop.eup %2560  ;;  %2137 = vst.msk [vmem:[%s4528_s4 + $0x20] sm:$0xff] %vm2132_vm4, %v2072_v35  ;;  %v2074_v34 = vmul.f32 %v2010_v36, %v3753_v26  ;;  %v2012_v0 = vsub.f32 1.0, %v1893_v54  ;;  %v1897_v1 = vmul.f32 2.0, %v2559_v52  ;;  %v1594_v2 = vmul.f32 1.442695, %v1511_v57  ;;  %v1314_v57 = vld [vmem:[%s4528_s4 + $0xd0] sm:$0xff] }
 0x1cd   : > { %v2563_v3 = vpop.eup %2562  ;;  %2138 = vst.msk [vmem:[%s4528_s4 + $0x28] sm:$0xff] %vm2132_vm4, %v2073_v33  ;;  %v2075_v24 = vmul.f32 %v2011_v8, %v3756_v27  ;;  %v2013_v5 = vsub.f32 1.0, %v1895_v62  ;;  %v1899_v56 = vmul.f32 2.0, %v2561_v22  ;;  %v1378_v9 = vmul.f32 %v3689_v61, %v1308_v23 }
 0x1ce   : > { %v2565_v26 = vpop.eup %2564  ;;  %2139 = vst.msk [vmem:[%s4528_s4 + $0x30] sm:$0xff] %vm2132_vm4, %v2074_v34  ;;  %v2076_v18 = vmul.f32 %v2012_v0, %v3767_v41  ;;  %v2014_v25 = vsub.f32 1.0, %v1897_v1  ;;  %v1901_v10 = vmul.f32 2.0, %v2563_v3  ;;  %2576 = vpow2.f32 %v1594_v2  ;;  %v1315_v3 = vld [vmem:[%s4528_s4 + $0xd8] sm:$0xff] }
 0x1cf   : > { %v2567_v27 = vpop.eup %2566  ;;  %2140 = vst.msk [vmem:[%s4528_s4 + $0x38] sm:$0xff] %vm2132_vm4, %v2075_v24  ;;  %v2077_v12 = vmul.f32 %v2013_v5, %v3770_v17  ;;  %v2015_v13 = vsub.f32 1.0, %v1899_v56  ;;  %v1903_v31 = vmul.f32 2.0, %v2565_v26  ;;  %v3893_v6 = vadd.f32 %v3725_v11, %v1378_v9  ;;  %v1316_v9 = vld [vmem:[%s4528_s4 + $0xe0] sm:$0xff] }
 0x1d0   : > { %v2569_v21 = vpop.eup %2568  ;;  %2141 = vst.msk [vmem:[%s4528_s4 + $0x40] sm:$0xff] %vm2132_vm4, %v2076_v18  ;;  %v2078_v41 = vmul.f32 %v2014_v25, %v3775_v55  ;;  %v2016_v28 = vsub.f32 1.0, %v1901_v10  ;;  %v1905_v40 = vmul.f32 2.0, %v2567_v27  ;;  %v1379_v63 = vmul.f32 %v3689_v61, %v1309_v7  ;;  %v1310_v55 = vld [vmem:[%s4528_s4 + $0xb0] sm:$0xff] }
 0x1d1   : > { %v2571_v45 = vpop.eup %2570  ;;  %2142 = vst.msk [vmem:[%s4528_s4 + $0x48] sm:$0xff] %vm2132_vm4, %v2077_v12  ;;  %v2079_v17 = vmul.f32 %v2015_v13, %v3778_v42  ;;  %v2017_v20 = vsub.f32 1.0, %v1903_v31  ;;  %v1907_v32 = vmul.f32 2.0, %v2569_v21  ;;  %v1512_v39 = vmin.f32 %v3893_v6, 30.0 }
 0x1d2   : > { %v2573_v37 = vpop.eup %2572  ;;  %2143 = vst.msk [vmem:[%s4528_s4 + $0x50] sm:$0xff] %vm2132_vm4, %v2078_v41  ;;  %v2080_v43 = vmul.f32 %v2016_v28, %v3784_v14  ;;  %v2018_v46 = vsub.f32 1.0, %v1905_v40  ;;  %v1909_v60 = vmul.f32 2.0, %v2571_v45  ;;  %v3916_v42 = vadd.f32 %v3725_v11, %v1379_v63  ;;  %v1317_v28 = vld [vmem:[%s4528_s4 + $0xe8] sm:$0xff]  ;;  %v1318_v40 = vld [vmem:[%s4528_s4 + $0xf0] sm:$0xff] }
 0x1d3   : > { %2144 = vst.msk [vmem:[%s4528_s4 + $0x58] sm:$0xff] %vm2132_vm4, %v2079_v17  ;;  %v2081_v48 = vmul.f32 %v2017_v20, %v3787_v38  ;;  %v2019_v49 = vsub.f32 1.0, %v1907_v32  ;;  %v1701_v15 = vadd.f32 1.0, %v2573_v37  ;;  %v1596_v44 = vmul.f32 1.442695, %v1512_v39  ;;  %v1313_v38 = vld [vmem:[%s4528_s4 + $0xc8] sm:$0xff] }
 0x1d4   : > { %2145 = vst.msk [vmem:[%s4528_s4 + $0x60] sm:$0xff] %vm2132_vm4, %v2080_v43  ;;  %v2082_v14 = vmul.f32 %v2018_v46, %v3811_v4  ;;  %v2020_v50 = vsub.f32 1.0, %v1909_v60  ;;  %v1513_v59 = vmin.f32 %v3916_v42, 30.0  ;;  %v1380_v51 = vmul.f32 %v3689_v61, %v1310_v55  ;;  %v1319_v20 = vld [vmem:[%s4528_s4 + $0xf8] sm:$0xff] }
 0x1d5   : > { %v2575_v35 = vpop.eup %2574  ;;  %2146 = vst.msk [vmem:[%s4528_s4 + $0x68] sm:$0xff] %vm2132_vm4, %v2081_v48  ;;  %v2083_v4 = vmul.f32 %v2019_v49, %v3814_v58  ;;  %v1765_v36 = vmul.f32 %v1701_v15, %v1701_v15  ;;  %2578 = vpow2.f32 %v1596_v44  ;;  %v1381_v54 = vmul.f32 %v3689_v61, %v1311_v47 }
 0x1d6   : > { %2147 = vst.msk [vmem:[%s4528_s4 + $0x70] sm:$0xff] %vm2132_vm4, %v2082_v14  ;;  %v2084_v23 = vmul.f32 %v2020_v50, %v3823_v16  ;;  %v1702_v52 = vadd.f32 1.0, %v2575_v35  ;;  %v1598_v33 = vmul.f32 1.442695, %v1513_v59  ;;  %v3954_v8 = vadd.f32 %v3725_v11, %v1380_v51 }
 0x1d7   : > { %2148 = vst.msk [vmem:[%s4528_s4 + $0x78] sm:$0xff] %vm2132_vm4, %v2083_v4  ;;  %v1829_v58 = vadd.f32 1.0, %v1765_v36  ;;  %v3961_v62 = vadd.f32 %v3725_v11, %v1381_v54  ;;  %v1382_v22 = vmul.f32 %v3689_v61, %v1312_v53  ;;  %v1383_v34 = vmul.f32 %v3689_v61, %v1313_v38  ;;  %v1320_v38 = vld [vmem:[%s4528_s4 + $0x100] sm:$0xff] }
 0x1d8   : > { %v2577_v0 = vpop.eup %2576  ;;  %2149 = vst.msk [vmem:[%s4528_s4 + $0x80] sm:$0xff] %vm2132_vm4, %v2084_v23  ;;  %v1766_v16 = vmul.f32 %v1702_v52, %v1702_v52  ;;  %2580 = vpow2.f32 %v1598_v33  ;;  %v1514_v1 = vmin.f32 %v3954_v8, 30.0  ;;  %v1384_v2 = vmul.f32 %v3689_v61, %v1314_v57  ;;  %v1321_v57 = vld [vmem:[%s4528_s4 + $0x108] sm:$0xff] }
 0x1d9   : > { %2582 = vrcp.f32 %v1829_v58  ;;  %v1703_v24 = vadd.f32 1.0, %v2577_v0  ;;  %v1515_v5 = vmin.f32 %v3961_v62, 30.0  ;;  %v3976_v56 = vadd.f32 %v3725_v11, %v1382_v22 }
 0x1da   : > { %v1830_v7 = vadd.f32 1.0, %v1766_v16  ;;  %v1600_v26 = vmul.f32 1.442695, %v1514_v1  ;;  %v3982_v18 = vadd.f32 %v3725_v11, %v1383_v34  ;;  %v3985_v25 = vadd.f32 %v3725_v11, %v1384_v2 }
 0x1db   : > { %v1767_v10 = vmul.f32 %v1703_v24, %v1703_v24  ;;  %v1602_v27 = vmul.f32 1.442695, %v1515_v5  ;;  %v1516_v12 = vmin.f32 %v3976_v56, 30.0  ;;  %v1385_v13 = vmul.f32 %v3689_v61, %v1315_v3 }
 0x1dc   : > { %2584 = vrcp.f32 %v1830_v7  ;;  %v1517_v31 = vmin.f32 %v3982_v18, 30.0  ;;  %v1518_v21 = vmin.f32 %v3985_v25, 30.0  ;;  %v1386_v41 = vmul.f32 %v3689_v61, %v1316_v9 }
 0x1dd   : > { %v1831_v63 = vadd.f32 1.0, %v1767_v10  ;;  %2586 = vpow2.f32 %v1600_v26  ;;  %v1604_v45 = vmul.f32 1.442695, %v1516_v12  ;;  %v3999_v17 = vadd.f32 %v3725_v11, %v1385_v13 }
 0x1de   : > { %2588 = vpow2.f32 %v1602_v27  ;;  %v1606_v32 = vmul.f32 1.442695, %v1517_v31  ;;  %v1608_v39 = vmul.f32 1.442695, %v1518_v21  ;;  %v4005_v55 = vadd.f32 %v3725_v11, %v1386_v41 }
 0x1df   : > { %v2579_v37 = vpop.eup %2578  ;;  %2590 = vrcp.f32 %v1831_v63  ;;  %v1519_v43 = vmin.f32 %v3999_v17, 30.0  ;;  %v1387_v46 = vmul.f32 %v3689_v61, %v1317_v28  ;;  %v1388_v60 = vmul.f32 %v3689_v61, %v1318_v40 }
 0x1e0   : > { %v1704_v47 = vadd.f32 1.0, %v2579_v37  ;;  %2592 = vpow2.f32 %v1604_v45  ;;  %v1520_v48 = vmin.f32 %v4005_v55, 30.0  ;;  %v1389_v49 = vmul.f32 %v3689_v61, %v1319_v20 }
 0x1e1   : > { %2594 = vpow2.f32 %v1606_v32  ;;  %v1610_v15 = vmul.f32 1.442695, %v1519_v43  ;;  %v4013_v44 = vadd.f32 %v3725_v11, %v1387_v46  ;;  %v4016_v14 = vadd.f32 %v3725_v11, %v1388_v60 }
 0x1e2   : > { %v2581_v50 = vpop.eup %2580  ;;  %v1768_v59 = vmul.f32 %v1704_v47, %v1704_v47  ;;  %2596 = vpow2.f32 %v1608_v39  ;;  %v1612_v51 = vmul.f32 1.442695, %v1520_v48  ;;  %v4019_v53 = vadd.f32 %v3725_v11, %v1389_v49 }
 0x1e3   : > { %v2583_v35 = vpop.eup %2582  ;;  %v1705_v4 = vadd.f32 1.0, %v2581_v50  ;;  %2598 = vpow2.f32 %v1610_v15  ;;  %v1521_v36 = vmin.f32 %v4013_v44, 30.0  ;;  %v1522_v54 = vmin.f32 %v4016_v14, 30.0 }
 0x1e4   : > { %v1911_v23 = vmul.f32 2.0, %v2583_v35  ;;  %v1832_v52 = vadd.f32 1.0, %v1768_v59  ;;  %2600 = vpow2.f32 %v1612_v51  ;;  %v1523_v33 = vmin.f32 %v4019_v53, 30.0 }
 0x1e5   : > { %v1769_v58 = vmul.f32 %v1705_v4, %v1705_v4  ;;  %v1614_v22 = vmul.f32 1.442695, %v1521_v36  ;;  %v1616_v34 = vmul.f32 1.442695, %v1522_v54  ;;  %v1390_v0 = vmul.f32 %v3689_v61, %v1320_v38 }
 0x1e6   : > { %v2585_v16 = vpop.eup %2584  ;;  %v2021_v1 = vsub.f32 1.0, %v1911_v23  ;;  %2602 = vrcp.f32 %v1832_v52  ;;  %v1618_v2 = vmul.f32 1.442695, %v1523_v33  ;;  %v1391_v3 = vmul.f32 %v3689_v61, %v1321_v57 }
 0x1e7   : > { %v2587_v24 = vpop.eup %2586  ;;  %v1913_v5 = vmul.f32 2.0, %v2585_v16  ;;  %v1833_v9 = vadd.f32 1.0, %v1769_v58  ;;  %2604 = vpow2.f32 %v1614_v22  ;;  %v4033_v7 = vadd.f32 %v3725_v11, %v1390_v0 }
 0x1e8   : > { %v2589_v26 = vpop.eup %2588  ;;  %v2085_v10 = vmul.f32 %v2021_v1, %v3826_v19  ;;  %v1706_v27 = vadd.f32 1.0, %v2587_v24  ;;  %2606 = vpow2.f32 %v1616_v34  ;;  %v4037_v12 = vadd.f32 %v3725_v11, %v1391_v3 }
 0x1e9   : > { %v2591_v13 = vpop.eup %2590  ;;  %v2022_v31 = vsub.f32 1.0, %v1913_v5  ;;  %2608 = vrcp.f32 %v1833_v9  ;;  %v1707_v21 = vadd.f32 1.0, %v2589_v26  ;;  %v1524_v41 = vmin.f32 %v4033_v7, 30.0 }
 0x1ea   : > { %v2593_v28 = vpop.eup %2592  ;;  %2150 = vst.msk [vmem:[%s4528_s4 + $0x88] sm:$0xff] %vm2132_vm4, %v2085_v10  ;;  %v1915_v40 = vmul.f32 2.0, %v2591_v13  ;;  %v1770_v63 = vmul.f32 %v1706_v27, %v1706_v27  ;;  %2610 = vpow2.f32 %v1618_v2  ;;  %v1525_v19 = vmin.f32 %v4037_v12, 30.0  ;;  %v1323_v10 = vld [vmem:[%s4528_s4 + $0x118] sm:$0xff] }
 0x1eb   : > { %v2595_v45 = vpop.eup %2594  ;;  %v2086_v20 = vmul.f32 %v2022_v31, %v3829_v29  ;;  %v1771_v32 = vmul.f32 %v1707_v21, %v1707_v21  ;;  %v1708_v39 = vadd.f32 1.0, %v2593_v28  ;;  %v1620_v37 = vmul.f32 1.442695, %v1524_v41  ;;  %v1322_v29 = vld [vmem:[%s4528_s4 + $0x110] sm:$0xff]  ;;  %v1324_v41 = vld [vmem:[%s4528_s4 + $0x120] sm:$0xff]  ;;  %v1325_v28 = vld [vmem:[%s4528_s4 + $0x128] sm:$0xff] }
 0x1ec   : > { %v2597_v43 = vpop.eup %2596  ;;  %v2023_v46 = vsub.f32 1.0, %v1915_v40  ;;  %v1834_v60 = vadd.f32 1.0, %v1770_v63  ;;  %v1709_v47 = vadd.f32 1.0, %v2595_v45  ;;  %v1622_v48 = vmul.f32 1.442695, %v1525_v19 }
 0x1ed   : > { %v2599_v49 = vpop.eup %2598  ;;  %2151 = vst.msk [vmem:[%s4528_s4 + $0x90] sm:$0xff] %vm2132_vm4, %v2086_v20  ;;  %v1835_v15 = vadd.f32 1.0, %v1771_v32  ;;  %v1772_v50 = vmul.f32 %v1708_v39, %v1708_v39  ;;  %v1710_v59 = vadd.f32 1.0, %v2597_v43  ;;  %2612 = vpow2.f32 %v1620_v37 }
 0x1ee   : > { %v2601_v51 = vpop.eup %2600  ;;  %v2087_v38 = vmul.f32 %v2023_v46, %v3832_v30  ;;  %2614 = vrcp.f32 %v1834_v60  ;;  %v1773_v35 = vmul.f32 %v1709_v47, %v1709_v47  ;;  %v1711_v4 = vadd.f32 1.0, %v2599_v49 }
 0x1ef   : > { %2616 = vrcp.f32 %v1835_v15  ;;  %v1836_v36 = vadd.f32 1.0, %v1772_v50  ;;  %v1774_v54 = vmul.f32 %v1710_v59, %v1710_v59  ;;  %v1712_v57 = vadd.f32 1.0, %v2601_v51 }
 0x1f0   : > { %v2603_v23 = vpop.eup %2602  ;;  %2152 = vst.msk [vmem:[%s4528_s4 + $0x98] sm:$0xff] %vm2132_vm4, %v2087_v38  ;;  %v1837_v52 = vadd.f32 1.0, %v1773_v35  ;;  %v1775_v33 = vmul.f32 %v1711_v4, %v1711_v4  ;;  %2618 = vpow2.f32 %v1622_v48  ;;  %v1392_v58 = vmul.f32 %v3689_v61, %v1322_v29 }
 0x1f1   : > { %v2605_v22 = vpop.eup %2604  ;;  %v1917_v30 = vmul.f32 2.0, %v2603_v23  ;;  %2620 = vrcp.f32 %v1836_v36  ;;  %v1838_v34 = vadd.f32 1.0, %v1774_v54  ;;  %v1776_v0 = vmul.f32 %v1712_v57, %v1712_v57 }
 0x1f2   : > { %v2607_v16 = vpop.eup %2606  ;;  %2622 = vrcp.f32 %v1837_v52  ;;  %v1839_v1 = vadd.f32 1.0, %v1775_v33  ;;  %v1713_v2 = vadd.f32 1.0, %v2605_v22  ;;  %v4060_v3 = vadd.f32 %v3725_v11, %v1392_v58 }
 0x1f3   : > { %v2609_v24 = vpop.eup %2608  ;;  %v2024_v5 = vsub.f32 1.0, %v1917_v30  ;;  %2624 = vrcp.f32 %v1838_v34  ;;  %v1840_v9 = vadd.f32 1.0, %v1776_v0  ;;  %v1714_v26 = vadd.f32 1.0, %v2607_v16 }
 0x1f4   : > { %v2611_v27 = vpop.eup %2610  ;;  %v1919_v13 = vmul.f32 2.0, %v2609_v24  ;;  %2626 = vrcp.f32 %v1839_v1  ;;  %v1777_v31 = vmul.f32 %v1713_v2, %v1713_v2  ;;  %v1526_v21 = vmin.f32 %v4060_v3, 30.0 }
 0x1f5   : > { %v2088_v40 = vmul.f32 %v2024_v5, %v3893_v6  ;;  %2628 = vrcp.f32 %v1840_v9  ;;  %v1778_v63 = vmul.f32 %v1714_v26, %v1714_v26  ;;  %v1715_v19 = vadd.f32 1.0, %v2611_v27 }
 0x1f6   : > { %v2025_v45 = vsub.f32 1.0, %v1919_v13  ;;  %v1841_v20 = vadd.f32 1.0, %v1777_v31  ;;  %v1624_v32 = vmul.f32 1.442695, %v1526_v21  ;;  %v1393_v39 = vmul.f32 %v3689_v61, %v1323_v10 }
 0x1f7   : > { %v2613_v37 = vpop.eup %2612  ;;  %2153 = vst.msk [vmem:[%s4528_s4 + $0xa0] sm:$0xff] %vm2132_vm4, %v2088_v40  ;;  %v1842_v43 = vadd.f32 1.0, %v1778_v63  ;;  %v1779_v46 = vmul.f32 %v1715_v19, %v1715_v19  ;;  %v1394_v60 = vmul.f32 %v3689_v61, %v1324_v41  ;;  %v1395_v6 = vmul.f32 %v3689_v61, %v1325_v28  ;;  %v1328_v40 = vld [vmem:[%s4528_s4 + $0x140] sm:$0xff] }
 0x1f8   : > { %v2615_v47 = vpop.eup %2614  ;;  %v2089_v48 = vmul.f32 %v2025_v45, %v3916_v42  ;;  %2630 = vrcp.f32 %v1841_v20  ;;  %v1716_v49 = vadd.f32 1.0, %v2613_v37  ;;  %v4082_v15 = vadd.f32 %v3725_v11, %v1393_v39 }
 0x1f9   : > { %v2617_v50 = vpop.eup %2616  ;;  %v1921_v59 = vmul.f32 2.0, %v2615_v47  ;;  %2632 = vrcp.f32 %v1842_v43  ;;  %v1843_v29 = vadd.f32 1.0, %v1779_v46  ;;  %v4085_v51 = vadd.f32 %v3725_v11, %v1394_v60 }
 0x1fa   : > { %v2619_v38 = vpop.eup %2618  ;;  %2154 = vst.msk [vmem:[%s4528_s4 + $0xa8] sm:$0xff] %vm2132_vm4, %v2089_v48  ;;  %v1923_v35 = vmul.f32 2.0, %v2617_v50  ;;  %v1780_v42 = vmul.f32 %v1716_v49, %v1716_v49  ;;  %2634 = vpow2.f32 %v1624_v32  ;;  %v1527_v4 = vmin.f32 %v4082_v15, 30.0 }
 0x1fb   : > { %v2621_v36 = vpop.eup %2620  ;;  %v2026_v54 = vsub.f32 1.0, %v1921_v59  ;;  %2636 = vrcp.f32 %v1843_v29  ;;  %v1717_v57 = vadd.f32 1.0, %v2619_v38  ;;  %v1528_v23 = vmin.f32 %v4085_v51, 30.0 }
 0x1fc   : > { %v2623_v52 = vpop.eup %2622  ;;  %v2027_v33 = vsub.f32 1.0, %v1923_v35  ;;  %v1925_v58 = vmul.f32 2.0, %v2621_v36  ;;  %v1844_v22 = vadd.f32 1.0, %v1780_v42  ;;  %v1626_v30 = vmul.f32 1.442695, %v1527_v4 }
 0x1fd   : > { %v2625_v34 = vpop.eup %2624  ;;  %v2090_v0 = vmul.f32 %v2026_v54, %v3954_v8  ;;  %v1927_v16 = vmul.f32 2.0, %v2623_v52  ;;  %v1781_v1 = vmul.f32 %v1717_v57, %v1717_v57  ;;  %v1628_v2 = vmul.f32 1.442695, %v1528_v23  ;;  %v1326_v8 = vld [vmem:[%s4528_s4 + $0x130] sm:$0xff]  ;;  %v1329_v54 = vld [vmem:[%s4528_s4 + $0x148] sm:$0xff] }
 0x1fe   : > { %v2627_v24 = vpop.eup %2626  ;;  %v2091_v5 = vmul.f32 %v2027_v33, %v3961_v62  ;;  %v2028_v9 = vsub.f32 1.0, %v1925_v58  ;;  %v1929_v26 = vmul.f32 2.0, %v2625_v34  ;;  %2638 = vrcp.f32 %v1844_v22  ;;  %v1327_v62 = vld [vmem:[%s4528_s4 + $0x138] sm:$0xff]  ;;  %v1330_v33 = vld [vmem:[%s4528_s4 + $0x150] sm:$0xff] }
 0x1ff   : > { %v2629_v10 = vpop.eup %2628  ;;  %2155 = vst.msk [vmem:[%s4528_s4 + $0xb0] sm:$0xff] %vm2132_vm4, %v2090_v0  ;;  %v2029_v27 = vsub.f32 1.0, %v1927_v16  ;;  %v1931_v13 = vmul.f32 2.0, %v2627_v24  ;;  %v1845_v31 = vadd.f32 1.0, %v1781_v1  ;;  %2640 = vpow2.f32 %v1626_v30 }
 0x200   : > { %2156 = vst.msk [vmem:[%s4528_s4 + $0xb8] sm:$0xff] %vm2132_vm4, %v2091_v5  ;;  %v2092_v21 = vmul.f32 %v2028_v9, %v3976_v56  ;;  %v2030_v41 = vsub.f32 1.0, %v1929_v26  ;;  %v1933_v28 = vmul.f32 2.0, %v2629_v10  ;;  %2642 = vpow2.f32 %v1628_v2 }
 0x201   : > { %v2093_v63 = vmul.f32 %v2029_v27, %v3982_v18  ;;  %v2031_v19 = vsub.f32 1.0, %v1931_v13  ;;  %2644 = vrcp.f32 %v1845_v31  ;;  %v4115_v45 = vadd.f32 %v3725_v11, %v1395_v6 }
 0x202   : > { %v2631_v20 = vpop.eup %2630  ;;  %2157 = vst.msk [vmem:[%s4528_s4 + $0xc0] sm:$0xff] %vm2132_vm4, %v2092_v21  ;;  %v2094_v56 = vmul.f32 %v2030_v41, %v3985_v25  ;;  %v2032_v32 = vsub.f32 1.0, %v1933_v28  ;;  %v1396_v39 = vmul.f32 %v3689_v61, %v1326_v8  ;;  %v1397_v37 = vmul.f32 %v3689_v61, %v1327_v62  ;;  %v1331_v8 = vld [vmem:[%s4528_s4 + $0x158] sm:$0xff]  ;;  %v1332_v41 = vld [vmem:[%s4528_s4 + $0x160] sm:$0xff]  ;;  %v1333_v28 = vld [vmem:[%s4528_s4 + $0x168] sm:$0xff] }
 0x203   : > { %v2633_v43 = vpop.eup %2632  ;;  %2158 = vst.msk [vmem:[%s4528_s4 + $0xc8] sm:$0xff] %vm2132_vm4, %v2093_v63  ;;  %v2095_v18 = vmul.f32 %v2031_v19, %v3999_v17  ;;  %v1935_v46 = vmul.f32 2.0, %v2631_v20  ;;  %v1529_v60 = vmin.f32 %v4115_v45, 30.0  ;;  %v1398_v6 = vmul.f32 %v3689_v61, %v1328_v40 }
 0x204   : > { %v2635_v47 = vpop.eup %2634  ;;  %2159 = vst.msk [vmem:[%s4528_s4 + $0xd0] sm:$0xff] %vm2132_vm4, %v2094_v56  ;;  %v2096_v25 = vmul.f32 %v2032_v32, %v4005_v55  ;;  %v1937_v48 = vmul.f32 2.0, %v2633_v43  ;;  %v4137_v49 = vadd.f32 %v3725_v11, %v1396_v39  ;;  %v4140_v50 = vadd.f32 %v3725_v11, %v1397_v37  ;;  %v1334_v37 = vld [vmem:[%s4528_s4 + $0x170] sm:$0xff] }
 0x205   : > { %v2637_v17 = vpop.eup %2636  ;;  %2160 = vst.msk [vmem:[%s4528_s4 + $0xd8] sm:$0xff] %vm2132_vm4, %v2095_v18  ;;  %v2033_v59 = vsub.f32 1.0, %v1935_v46  ;;  %v1718_v29 = vadd.f32 1.0, %v2635_v47  ;;  %v1630_v38 = vmul.f32 1.442695, %v1529_v60  ;;  %v4147_v35 = vadd.f32 %v3725_v11, %v1398_v6  ;;  %v1335_v60 = vld [vmem:[%s4528_s4 + $0x178] sm:$0xff] }
 0x206   : > { %2161 = vst.msk [vmem:[%s4528_s4 + $0xe0] sm:$0xff] %vm2132_vm4, %v2096_v25  ;;  %v2034_v55 = vsub.f32 1.0, %v1937_v48  ;;  %v1939_v42 = vmul.f32 2.0, %v2637_v17  ;;  %v1530_v4 = vmin.f32 %v4137_v49, 30.0  ;;  %v1531_v36 = vmin.f32 %v4140_v50, 30.0 }
 0x207   : > { %v2097_v57 = vmul.f32 %v2033_v59, %v4013_v44  ;;  %v1782_v23 = vmul.f32 %v1718_v29, %v1718_v29  ;;  %2646 = vpow2.f32 %v1630_v38  ;;  %v1532_v52 = vmin.f32 %v4147_v35, 30.0  ;;  %v1336_v38 = vld [vmem:[%s4528_s4 + $0x180] sm:$0xff] }
 0x208   : > { %v2639_v58 = vpop.eup %2638  ;;  %v2098_v22 = vmul.f32 %v2034_v55, %v4016_v14  ;;  %v2035_v30 = vsub.f32 1.0, %v1939_v42  ;;  %v1632_v34 = vmul.f32 1.442695, %v1530_v4  ;;  %v1634_v0 = vmul.f32 1.442695, %v1531_v36 }
 0x209   : > { %v2641_v16 = vpop.eup %2640  ;;  %2162 = vst.msk [vmem:[%s4528_s4 + $0xe8] sm:$0xff] %vm2132_vm4, %v2097_v57  ;;  %v1941_v44 = vmul.f32 2.0, %v2639_v58  ;;  %v1846_v1 = vadd.f32 1.0, %v1782_v23  ;;  %v1636_v2 = vmul.f32 1.442695, %v1532_v52  ;;  %v1399_v24 = vmul.f32 %v3689_v61, %v1329_v54 }
 0x20a   : > { %v2643_v5 = vpop.eup %2642  ;;  %2163 = vst.msk [vmem:[%s4528_s4 + $0xf0] sm:$0xff] %vm2132_vm4, %v2098_v22  ;;  %v2099_v14 = vmul.f32 %v2035_v30, %v4019_v53  ;;  %v1719_v9 = vadd.f32 1.0, %v2641_v16  ;;  %2648 = vpow2.f32 %v1632_v34  ;;  %v1400_v26 = vmul.f32 %v3689_v61, %v1330_v33 }
 0x20b   : > { %v2645_v10 = vpop.eup %2644  ;;  %v2036_v27 = vsub.f32 1.0, %v1941_v44  ;;  %2650 = vrcp.f32 %v1846_v1  ;;  %v1720_v13 = vadd.f32 1.0, %v2643_v5  ;;  %v4176_v31 = vadd.f32 %v3725_v11, %v1399_v24 }
 0x20c   : > { %2164 = vst.msk [vmem:[%s4528_s4 + $0xf8] sm:$0xff] %vm2132_vm4, %v2099_v14  ;;  %v1943_v53 = vmul.f32 2.0, %v2645_v10  ;;  %v1783_v62 = vmul.f32 %v1719_v9, %v1719_v9  ;;  %2652 = vpow2.f32 %v1634_v0  ;;  %v4186_v21 = vadd.f32 %v3725_v11, %v1400_v26  ;;  %v1337_v10 = vld [vmem:[%s4528_s4 + $0x188] sm:$0xff] }
 0x20d   : > { %v2100_v40 = vmul.f32 %v2036_v27, %v4033_v7  ;;  %v1784_v63 = vmul.f32 %v1720_v13, %v1720_v13  ;;  %2654 = vpow2.f32 %v1636_v2  ;;  %v1533_v19 = vmin.f32 %v4176_v31, 30.0 }
 0x20e   : > { %v2037_v20 = vsub.f32 1.0, %v1943_v53  ;;  %v1847_v56 = vadd.f32 1.0, %v1783_v62  ;;  %v1534_v32 = vmin.f32 %v4186_v21, 30.0  ;;  %v1401_v39 = vmul.f32 %v3689_v61, %v1331_v8 }
 0x20f   : > { %2165 = vst.msk [vmem:[%s4528_s4 + $0x100] sm:$0xff] %vm2132_vm4, %v2100_v40  ;;  %v1848_v7 = vadd.f32 1.0, %v1784_v63  ;;  %v1638_v43 = vmul.f32 1.442695, %v1533_v19  ;;  %v1402_v18 = vmul.f32 %v3689_v61, %v1332_v41  ;;  %v1403_v46 = vmul.f32 %v3689_v61, %v1333_v28 }
 0x210   : > { %v2101_v6 = vmul.f32 %v2037_v20, %v4037_v12  ;;  %2656 = vrcp.f32 %v1847_v56  ;;  %v1640_v47 = vmul.f32 1.442695, %v1534_v32  ;;  %v4212_v25 = vadd.f32 %v3725_v11, %v1401_v39 }
 0x211   : > { %v2647_v48 = vpop.eup %2646  ;;  %2658 = vrcp.f32 %v1848_v7  ;;  %v4215_v17 = vadd.f32 %v3725_v11, %v1402_v18  ;;  %v4218_v59 = vadd.f32 %v3725_v11, %v1403_v46  ;;  %v1404_v29 = vmul.f32 %v3689_v61, %v1334_v37  ;;  %v1338_v18 = vld [vmem:[%s4528_s4 + $0x190] sm:$0xff] }
 0x212   : > { %2166 = vst.msk [vmem:[%s4528_s4 + $0x108] sm:$0xff] %vm2132_vm4, %v2101_v6  ;;  %v1721_v12 = vadd.f32 1.0, %v2647_v48  ;;  %2660 = vpow2.f32 %v1638_v43  ;;  %v1535_v55 = vmin.f32 %v4212_v25, 30.0  ;;  %v1405_v42 = vmul.f32 %v3689_v61, %v1335_v60  ;;  %v1339_v48 = vld [vmem:[%s4528_s4 + $0x198] sm:$0xff] }
 0x213   : > { %2662 = vpow2.f32 %v1640_v47  ;;  %v1536_v4 = vmin.f32 %v4215_v17, 30.0  ;;  %v1537_v36 = vmin.f32 %v4218_v59, 30.0  ;;  %v4233_v54 = vadd.f32 %v3725_v11, %v1404_v29 }
 0x214   : > { %v2649_v57 = vpop.eup %2648  ;;  %v1785_v23 = vmul.f32 %v1721_v12, %v1721_v12  ;;  %v1642_v52 = vmul.f32 1.442695, %v1535_v55  ;;  %v4236_v33 = vadd.f32 %v3725_v11, %v1405_v42  ;;  %v1406_v58 = vmul.f32 %v3689_v61, %v1336_v38  ;;  %v1340_v55 = vld [vmem:[%s4528_s4 + $0x1a0] sm:$0xff] }
 0x215   : > { %v2651_v22 = vpop.eup %2650  ;;  %v1722_v30 = vadd.f32 1.0, %v2649_v57  ;;  %v1644_v34 = vmul.f32 1.442695, %v1536_v4  ;;  %v1646_v0 = vmul.f32 1.442695, %v1537_v36  ;;  %v1538_v16 = vmin.f32 %v4233_v54, 30.0 }
 0x216   : > { %v2653_v44 = vpop.eup %2652  ;;  %v1945_v1 = vmul.f32 2.0, %v2651_v22  ;;  %v1849_v2 = vadd.f32 1.0, %v1785_v23  ;;  %2664 = vpow2.f32 %v1642_v52  ;;  %v1539_v24 = vmin.f32 %v4236_v33, 30.0 }
 0x217   : > { %v2655_v5 = vpop.eup %2654  ;;  %v1786_v14 = vmul.f32 %v1722_v30, %v1722_v30  ;;  %v1723_v9 = vadd.f32 1.0, %v2653_v44  ;;  %2666 = vpow2.f32 %v1644_v34  ;;  %v1648_v26 = vmul.f32 1.442695, %v1538_v16 }
 0x218   : > { %v2038_v27 = vsub.f32 1.0, %v1945_v1  ;;  %2668 = vrcp.f32 %v1849_v2  ;;  %v1724_v13 = vadd.f32 1.0, %v2655_v5  ;;  %v1650_v8 = vmul.f32 1.442695, %v1539_v24 }
 0x219   : > { %v1850_v53 = vadd.f32 1.0, %v1786_v14  ;;  %v1787_v62 = vmul.f32 %v1723_v9, %v1723_v9  ;;  %2670 = vpow2.f32 %v1646_v0  ;;  %v4245_v41 = vadd.f32 %v3725_v11, %v1406_v58 }
 0x21a   : > { %v2657_v28 = vpop.eup %2656  ;;  %v2102_v40 = vmul.f32 %v2038_v27, %v4060_v3  ;;  %v1788_v63 = vmul.f32 %v1724_v13, %v1724_v13  ;;  %2672 = vpow2.f32 %v1648_v26  ;;  %v1407_v19 = vmul.f32 %v3689_v61, %v1337_v10 }
 0x21b   : > { %v2659_v20 = vpop.eup %2658  ;;  %v1947_v56 = vmul.f32 2.0, %v2657_v28  ;;  %2674 = vrcp.f32 %v1850_v53  ;;  %v1851_v32 = vadd.f32 1.0, %v1787_v62  ;;  %v1540_v39 = vmin.f32 %v4245_v41, 30.0 }
 0x21c   : > { %v2661_v37 = vpop.eup %2660  ;;  %2167 = vst.msk [vmem:[%s4528_s4 + $0x110] sm:$0xff] %vm2132_vm4, %v2102_v40  ;;  %v1949_v7 = vmul.f32 2.0, %v2659_v20  ;;  %v1852_v43 = vadd.f32 1.0, %v1788_v63  ;;  %2676 = vpow2.f32 %v1650_v8  ;;  %v4255_v3 = vadd.f32 %v3725_v11, %v1407_v19 }
 0x21d   : > { %v2663_v46 = vpop.eup %2662  ;;  %v2039_v60 = vsub.f32 1.0, %v1947_v56  ;;  %2678 = vrcp.f32 %v1851_v32  ;;  %v1725_v6 = vadd.f32 1.0, %v2661_v37  ;;  %v1652_v47 = vmul.f32 1.442695, %v1540_v39 }
 0x21e   : > { %v2040_v29 = vsub.f32 1.0, %v1949_v7  ;;  %2680 = vrcp.f32 %v1852_v43  ;;  %v1726_v38 = vadd.f32 1.0, %v2663_v46  ;;  %v1541_v12 = vmin.f32 %v4255_v3, 30.0 }
 0x21f   : > { %v2103_v42 = vmul.f32 %v2039_v60, %v4082_v15  ;;  %v1789_v4 = vmul.f32 %v1725_v6, %v1725_v6  ;;  %2682 = vpow2.f32 %v1652_v47  ;;  %v1408_v36 = vmul.f32 %v3689_v61, %v1338_v18 }
 0x220   : > { %v2665_v57 = vpop.eup %2664  ;;  %v2104_v23 = vmul.f32 %v2040_v29, %v4085_v51  ;;  %v1790_v52 = vmul.f32 %v1726_v38, %v1726_v38  ;;  %v1654_v58 = vmul.f32 1.442695, %v1541_v12  ;;  %v1409_v22 = vmul.f32 %v3689_v61, %v1339_v48 }
 0x221   : > { %v2667_v30 = vpop.eup %2666  ;;  %2168 = vst.msk [vmem:[%s4528_s4 + $0x118] sm:$0xff] %vm2132_vm4, %v2103_v42  ;;  %v1853_v34 = vadd.f32 1.0, %v1789_v4  ;;  %v1727_v0 = vadd.f32 1.0, %v2665_v57  ;;  %v4276_v15 = vadd.f32 %v3725_v11, %v1408_v36  ;;  %v1410_v16 = vmul.f32 %v3689_v61, %v1340_v55 }
 0x222   : > { %v2669_v44 = vpop.eup %2668  ;;  %2169 = vst.msk [vmem:[%s4528_s4 + $0x120] sm:$0xff] %vm2132_vm4, %v2104_v23  ;;  %v1854_v51 = vadd.f32 1.0, %v1790_v52  ;;  %v1728_v1 = vadd.f32 1.0, %v2667_v30  ;;  %2684 = vpow2.f32 %v1654_v58  ;;  %v4284_v2 = vadd.f32 %v3725_v11, %v1409_v22  ;;  %v1342_v23 = vld [vmem:[%s4528_s4 + $0x1b0] sm:$0xff]  ;;  %v1343_v30 = vld [vmem:[%s4528_s4 + $0x1b8] sm:$0xff] }
 0x223   : > { %v2671_v24 = vpop.eup %2670  ;;  %v1951_v5 = vmul.f32 2.0, %v2669_v44  ;;  %2686 = vrcp.f32 %v1853_v34  ;;  %v1791_v14 = vmul.f32 %v1727_v0, %v1727_v0  ;;  %v1542_v9 = vmin.f32 %v4276_v15, 30.0 }
 0x224   : > { %v2673_v26 = vpop.eup %2672  ;;  %2688 = vrcp.f32 %v1854_v51  ;;  %v1792_v10 = vmul.f32 %v1728_v1, %v1728_v1  ;;  %v1729_v27 = vadd.f32 1.0, %v2671_v24  ;;  %v1543_v13 = vmin.f32 %v4284_v2, 30.0 }
 0x225   : > { %v2675_v8 = vpop.eup %2674  ;;  %v2041_v53 = vsub.f32 1.0, %v1951_v5  ;;  %v1855_v62 = vadd.f32 1.0, %v1791_v14  ;;  %v1730_v28 = vadd.f32 1.0, %v2673_v26  ;;  %v1656_v40 = vmul.f32 1.442695, %v1542_v9 }
 0x226   : > { %v2677_v63 = vpop.eup %2676  ;;  %v1953_v19 = vmul.f32 2.0, %v2675_v8  ;;  %v1856_v20 = vadd.f32 1.0, %v1792_v10  ;;  %v1793_v56 = vmul.f32 %v1729_v27, %v1729_v27  ;;  %v1658_v32 = vmul.f32 1.442695, %v1543_v13 }
 0x227   : > { %v2679_v39 = vpop.eup %2678  ;;  %v2105_v37 = vmul.f32 %v2041_v53, %v4115_v45  ;;  %2690 = vrcp.f32 %v1855_v62  ;;  %v1794_v7 = vmul.f32 %v1730_v28, %v1730_v28  ;;  %v1731_v43 = vadd.f32 1.0, %v2677_v63  ;;  %v1341_v45 = vld [vmem:[%s4528_s4 + $0x1a8] sm:$0xff] }
 0x228   : > { %v2681_v18 = vpop.eup %2680  ;;  %v2042_v46 = vsub.f32 1.0, %v1953_v19  ;;  %v1955_v60 = vmul.f32 2.0, %v2679_v39  ;;  %2692 = vrcp.f32 %v1856_v20  ;;  %v1857_v6 = vadd.f32 1.0, %v1793_v56 }
 0x229   : > { %v2683_v47 = vpop.eup %2682  ;;  %2170 = vst.msk [vmem:[%s4528_s4 + $0x128] sm:$0xff] %vm2132_vm4, %v2105_v37  ;;  %v1957_v48 = vmul.f32 2.0, %v2681_v18  ;;  %v1858_v29 = vadd.f32 1.0, %v1794_v7  ;;  %v1795_v38 = vmul.f32 %v1731_v43, %v1731_v43  ;;  %2694 = vpow2.f32 %v1656_v40 }
 0x22a   : > { %v2106_v12 = vmul.f32 %v2042_v46, %v4137_v49  ;;  %v2043_v55 = vsub.f32 1.0, %v1955_v60  ;;  %2696 = vrcp.f32 %v1857_v6  ;;  %v1732_v42 = vadd.f32 1.0, %v2683_v47 }
 0x22b   : > { %v2044_v4 = vsub.f32 1.0, %v1957_v48  ;;  %2698 = vrcp.f32 %v1858_v29  ;;  %v1859_v36 = vadd.f32 1.0, %v1795_v38  ;;  %v4298_v57 = vadd.f32 %v3725_v11, %v1410_v16 }
 0x22c   : > { %v2685_v52 = vpop.eup %2684  ;;  %2171 = vst.msk [vmem:[%s4528_s4 + $0x130] sm:$0xff] %vm2132_vm4, %v2106_v12  ;;  %v2107_v49 = vmul.f32 %v2043_v55, %v4140_v50  ;;  %v1796_v58 = vmul.f32 %v1732_v42, %v1732_v42  ;;  %2700 = vpow2.f32 %v1658_v32  ;;  %v1411_v22 = vmul.f32 %v3689_v61, %v1341_v45  ;;  %v1344_v32 = vld [vmem:[%s4528_s4 + $0x1c0] sm:$0xff]  ;;  %v1345_v42 = vld [vmem:[%s4528_s4 + $0x1c8] sm:$0xff] }
 0x22d   : > { %v2687_v34 = vpop.eup %2686  ;;  %v2108_v0 = vmul.f32 %v2044_v4, %v4147_v35  ;;  %2702 = vrcp.f32 %v1859_v36  ;;  %v1733_v16 = vadd.f32 1.0, %v2685_v52  ;;  %v1544_v44 = vmin.f32 %v4298_v57, 30.0  ;;  %v1346_v4 = vld [vmem:[%s4528_s4 + $0x1d0] sm:$0xff] }
 0x22e   : > { %v2689_v51 = vpop.eup %2688  ;;  %2172 = vst.msk [vmem:[%s4528_s4 + $0x138] sm:$0xff] %vm2132_vm4, %v2107_v49  ;;  %v1959_v50 = vmul.f32 2.0, %v2687_v34  ;;  %v1860_v1 = vadd.f32 1.0, %v1796_v58  ;;  %v4319_v24 = vadd.f32 %v3725_v11, %v1411_v22  ;;  %v1412_v5 = vmul.f32 %v3689_v61, %v1342_v23 }
 0x22f   : > { %2173 = vst.msk [vmem:[%s4528_s4 + $0x140] sm:$0xff] %vm2132_vm4, %v2108_v0  ;;  %v1961_v35 = vmul.f32 2.0, %v2689_v51  ;;  %v1797_v14 = vmul.f32 %v1733_v16, %v1733_v16  ;;  %v1660_v9 = vmul.f32 1.442695, %v1544_v44  ;;  %v1413_v26 = vmul.f32 %v3689_v61, %v1343_v30  ;;  %v1347_v44 = vld [vmem:[%s4528_s4 + $0x1d8] sm:$0xff] }
 0x230   : > { %v2045_v10 = vsub.f32 1.0, %v1959_v50  ;;  %2704 = vrcp.f32 %v1860_v1  ;;  %v1545_v27 = vmin.f32 %v4319_v24, 30.0  ;;  %v4329_v13 = vadd.f32 %v3725_v11, %v1412_v5 }
 0x231   : > { %v2691_v8 = vpop.eup %2690  ;;  %v2046_v53 = vsub.f32 1.0, %v1961_v35  ;;  %v1861_v62 = vadd.f32 1.0, %v1797_v14  ;;  %2706 = vpow2.f32 %v1660_v9  ;;  %v4332_v28 = vadd.f32 %v3725_v11, %v1413_v26 }
 0x232   : > { %v2693_v40 = vpop.eup %2692  ;;  %v2109_v63 = vmul.f32 %v2045_v10, %v4176_v31  ;;  %v1963_v19 = vmul.f32 2.0, %v2691_v8  ;;  %v1662_v20 = vmul.f32 1.442695, %v1545_v27  ;;  %v1546_v56 = vmin.f32 %v4329_v13, 30.0 }
 0x233   : > { %v2695_v39 = vpop.eup %2694  ;;  %v2110_v37 = vmul.f32 %v2046_v53, %v4186_v21  ;;  %v1965_v7 = vmul.f32 2.0, %v2693_v40  ;;  %2708 = vrcp.f32 %v1861_v62  ;;  %v1547_v43 = vmin.f32 %v4332_v28, 30.0 }
 0x234   : > { %v2697_v18 = vpop.eup %2696  ;;  %2174 = vst.msk [vmem:[%s4528_s4 + $0x148] sm:$0xff] %vm2132_vm4, %v2109_v63  ;;  %v2047_v31 = vsub.f32 1.0, %v1963_v19  ;;  %v1734_v46 = vadd.f32 1.0, %v2695_v39  ;;  %2710 = vpow2.f32 %v1662_v20  ;;  %v1664_v60 = vmul.f32 1.442695, %v1546_v56  ;;  %v1348_v19 = vld [vmem:[%s4528_s4 + $0x1e0] sm:$0xff] }
 0x235   : > { %v2699_v6 = vpop.eup %2698  ;;  %2175 = vst.msk [vmem:[%s4528_s4 + $0x150] sm:$0xff] %vm2132_vm4, %v2110_v37  ;;  %v2048_v21 = vsub.f32 1.0, %v1965_v7  ;;  %v1967_v47 = vmul.f32 2.0, %v2697_v18  ;;  %v1666_v48 = vmul.f32 1.442695, %v1547_v43  ;;  %v1414_v29 = vmul.f32 %v3689_v61, %v1344_v32  ;;  %v1349_v39 = vld [vmem:[%s4528_s4 + $0x1e8] sm:$0xff] }
 0x236   : > { %v2701_v38 = vpop.eup %2700  ;;  %v2111_v45 = vmul.f32 %v2047_v31, %v4212_v25  ;;  %v1969_v12 = vmul.f32 2.0, %v2699_v6  ;;  %v1798_v55 = vmul.f32 %v1734_v46, %v1734_v46  ;;  %2712 = vpow2.f32 %v1664_v60 }
 0x237   : > { %v2703_v36 = vpop.eup %2702  ;;  %v2112_v23 = vmul.f32 %v2048_v21, %v4215_v17  ;;  %v2049_v52 = vsub.f32 1.0, %v1967_v47  ;;  %v1735_v49 = vadd.f32 1.0, %v2701_v38  ;;  %2714 = vpow2.f32 %v1666_v48  ;;  %v1350_v38 = vld [vmem:[%s4528_s4 + $0x1f0] sm:$0xff] }
 0x238   : > { %2176 = vst.msk [vmem:[%s4528_s4 + $0x158] sm:$0xff] %vm2132_vm4, %v2111_v45  ;;  %v2050_v25 = vsub.f32 1.0, %v1969_v12  ;;  %v1971_v58 = vmul.f32 2.0, %v2703_v36  ;;  %v1862_v22 = vadd.f32 1.0, %v1798_v55  ;;  %v4363_v30 = vadd.f32 %v3725_v11, %v1414_v29 }
 0x239   : > { %2177 = vst.msk [vmem:[%s4528_s4 + $0x160] sm:$0xff] %vm2132_vm4, %v2112_v23  ;;  %v2113_v17 = vmul.f32 %v2049_v52, %v4218_v59  ;;  %v1799_v34 = vmul.f32 %v1735_v49, %v1735_v49  ;;  %v1415_v0 = vmul.f32 %v3689_v61, %v1345_v42  ;;  %v1416_v16 = vmul.f32 %v3689_v61, %v1346_v4  ;;  %v1351_v23 = vld [vmem:[%s4528_s4 + $0x1f8] sm:$0xff] }
 0x23a   : > { %v2705_v51 = vpop.eup %2704  ;;  %v2114_v50 = vmul.f32 %v2050_v25, %v4233_v54  ;;  %v2051_v1 = vsub.f32 1.0, %v1971_v58  ;;  %2716 = vrcp.f32 %v1862_v22  ;;  %v1548_v5 = vmin.f32 %v4363_v30, 30.0 }
 0x23b   : > { %v2707_v35 = vpop.eup %2706  ;;  %2178 = vst.msk [vmem:[%s4528_s4 + $0x168] sm:$0xff] %vm2132_vm4, %v2113_v17  ;;  %v1973_v59 = vmul.f32 2.0, %v2705_v51  ;;  %v1863_v14 = vadd.f32 1.0, %v1799_v34  ;;  %v4382_v9 = vadd.f32 %v3725_v11, %v1415_v0  ;;  %v4385_v26 = vadd.f32 %v3725_v11, %v1416_v16 }
 0x23c   : > { %2179 = vst.msk [vmem:[%s4528_s4 + $0x170] sm:$0xff] %vm2132_vm4, %v2114_v50  ;;  %v2115_v54 = vmul.f32 %v2051_v1, %v4236_v33  ;;  %v1736_v10 = vadd.f32 1.0, %v2707_v35  ;;  %v1668_v27 = vmul.f32 1.442695, %v1548_v5  ;;  %v1417_v8 = vmul.f32 %v3689_v61, %v1347_v44 }
 0x23d   : > { %v2709_v53 = vpop.eup %2708  ;;  %v2052_v62 = vsub.f32 1.0, %v1973_v59  ;;  %2718 = vrcp.f32 %v1863_v14  ;;  %v1549_v40 = vmin.f32 %v4382_v9, 30.0  ;;  %v1550_v63 = vmin.f32 %v4385_v26, 30.0 }
 0x23e   : > { %v2711_v20 = vpop.eup %2710  ;;  %2180 = vst.msk [vmem:[%s4528_s4 + $0x178] sm:$0xff] %vm2132_vm4, %v2115_v54  ;;  %v1975_v33 = vmul.f32 2.0, %v2709_v53  ;;  %v1800_v56 = vmul.f32 %v1736_v10, %v1736_v10  ;;  %2720 = vpow2.f32 %v1668_v27  ;;  %v4403_v32 = vadd.f32 %v3725_v11, %v1417_v8 }
 0x23f   : > { %v2116_v37 = vmul.f32 %v2052_v62, %v4245_v41  ;;  %v1737_v7 = vadd.f32 1.0, %v2711_v20  ;;  %v1670_v43 = vmul.f32 1.442695, %v1549_v40  ;;  %v1672_v18 = vmul.f32 1.442695, %v1550_v63 }
 0x240   : > { %v2713_v31 = vpop.eup %2712  ;;  %v2053_v46 = vsub.f32 1.0, %v1975_v33  ;;  %v1864_v60 = vadd.f32 1.0, %v1800_v56  ;;  %v1551_v6 = vmin.f32 %v4403_v32, 30.0  ;;  %v1418_v21 = vmul.f32 %v3689_v61, %v1348_v19 }
 0x241   : > { %v2715_v47 = vpop.eup %2714  ;;  %2181 = vst.msk [vmem:[%s4528_s4 + $0x180] sm:$0xff] %vm2132_vm4, %v2116_v37  ;;  %v1801_v48 = vmul.f32 %v1737_v7, %v1737_v7  ;;  %v1738_v29 = vadd.f32 1.0, %v2713_v31  ;;  %2722 = vpow2.f32 %v1670_v43  ;;  %v1419_v41 = vmul.f32 %v3689_v61, %v1349_v39 }
 0x242   : > { %v2117_v45 = vmul.f32 %v2053_v46, %v4255_v3  ;;  %2724 = vrcp.f32 %v1864_v60  ;;  %v1739_v12 = vadd.f32 1.0, %v2715_v47  ;;  %v1674_v55 = vmul.f32 1.442695, %v1551_v6 }
 0x243   : > { %v1865_v42 = vadd.f32 1.0, %v1801_v48  ;;  %v1802_v4 = vmul.f32 %v1738_v29, %v1738_v29  ;;  %2726 = vpow2.f32 %v1672_v18  ;;  %v4421_v36 = vadd.f32 %v3725_v11, %v1418_v21 }
 0x244   : > { %v2717_v52 = vpop.eup %2716  ;;  %2182 = vst.msk [vmem:[%s4528_s4 + $0x188] sm:$0xff] %vm2132_vm4, %v2117_v45  ;;  %v1803_v3 = vmul.f32 %v1739_v12, %v1739_v12  ;;  %2728 = vpow2.f32 %v1674_v55  ;;  %v4431_v49 = vadd.f32 %v3725_v11, %v1419_v41  ;;  %v1420_v25 = vmul.f32 %v3689_v61, %v1350_v38 }
 0x245   : > { %v1977_v58 = vmul.f32 2.0, %v2717_v52  ;;  %2730 = vrcp.f32 %v1865_v42  ;;  %v1866_v22 = vadd.f32 1.0, %v1802_v4  ;;  %v1552_v17 = vmin.f32 %v4421_v36, 30.0 }
 0x246   : > { %v1867_v34 = vadd.f32 1.0, %v1803_v3  ;;  %v1553_v0 = vmin.f32 %v4431_v49, 30.0  ;;  %v4437_v16 = vadd.f32 %v3725_v11, %v1420_v25  ;;  %v1421_v44 = vmul.f32 %v3689_v61, %v1351_v23 }
 0x247   : > { %v2719_v51 = vpop.eup %2718  ;;  %v2054_v50 = vsub.f32 1.0, %v1977_v58  ;;  %2732 = vrcp.f32 %v1866_v22  ;;  %v1676_v1 = vmul.f32 1.442695, %v1552_v17 }
 0x248   : > { %v2721_v5 = vpop.eup %2720  ;;  %v1979_v35 = vmul.f32 2.0, %v2719_v51  ;;  %2734 = vrcp.f32 %v1867_v34  ;;  %v1678_v59 = vmul.f32 1.442695, %v1553_v0  ;;  %v1554_v14 = vmin.f32 %v4437_v16, 30.0 }
 0x249   : > { %v2118_v54 = vmul.f32 %v2054_v50, %v4276_v15  ;;  %v1740_v10 = vadd.f32 1.0, %v2721_v5  ;;  %2736 = vpow2.f32 %v1676_v1  ;;  %v4443_v27 = vadd.f32 %v3725_v11, %v1421_v44 }
 0x24a   : > { %v2055_v8 = vsub.f32 1.0, %v1979_v35  ;;  %2738 = vpow2.f32 %v1678_v59  ;;  %v1680_v61 = vmul.f32 1.442695, %v1554_v14 }
 0x24b   : > { %v2723_v53 = vpop.eup %2722  ;;  %2183 = vst.msk [vmem:[%s4528_s4 + $0x190] sm:$0xff] %vm2132_vm4, %v2118_v54  ;;  %v1804_v62 = vmul.f32 %v1740_v10, %v1740_v10  ;;  %v1555_v40 = vmin.f32 %v4443_v27, 30.0 }
 0x24c   : > { %v2725_v63 = vpop.eup %2724  ;;  %v2119_v15 = vmul.f32 %v2055_v8, %v4284_v2  ;;  %v1741_v19 = vadd.f32 1.0, %v2723_v53  ;;  %2740 = vpow2.f32 %v1680_v61 }
 0x24d   : > { %v2727_v20 = vpop.eup %2726  ;;  %v1981_v11 = vmul.f32 2.0, %v2725_v63  ;;  %v1868_v33 = vadd.f32 1.0, %v1804_v62  ;;  %v1682_v56 = vmul.f32 1.442695, %v1555_v40 }
 0x24e   : > { %v2729_v39 = vpop.eup %2728  ;;  %2184 = vst.msk [vmem:[%s4528_s4 + $0x198] sm:$0xff] %vm2132_vm4, %v2119_v15  ;;  %v1805_v37 = vmul.f32 %v1741_v19, %v1741_v19  ;;  %v1742_v7 = vadd.f32 1.0, %v2727_v20 }
 0x24f   : > { %v2731_v43 = vpop.eup %2730  ;;  %v2056_v18 = vsub.f32 1.0, %v1981_v11  ;;  %2742 = vrcp.f32 %v1868_v33  ;;  %v1743_v31 = vadd.f32 1.0, %v2729_v39 }
 0x250   : > { %v1983_v46 = vmul.f32 2.0, %v2731_v43  ;;  %v1869_v2 = vadd.f32 1.0, %v1805_v37  ;;  %v1806_v60 = vmul.f32 %v1742_v7, %v1742_v7  ;;  %2744 = vpow2.f32 %v1682_v56 }
 0x251   : > { %v2733_v6 = vpop.eup %2732  ;;  %v2120_v21 = vmul.f32 %v2056_v18, %v4298_v57  ;;  %v1807_v47 = vmul.f32 %v1743_v31, %v1743_v31 }
 0x252   : > { %v2735_v48 = vpop.eup %2734  ;;  %v2057_v29 = vsub.f32 1.0, %v1983_v46  ;;  %v1985_v41 = vmul.f32 2.0, %v2733_v6  ;;  %2746 = vrcp.f32 %v1869_v2  ;;  %v1870_v38 = vadd.f32 1.0, %v1806_v60 }
 0x253   : > { %v2737_v45 = vpop.eup %2736  ;;  %2185 = vst.msk [vmem:[%s4528_s4 + $0x1a0] sm:$0xff] %vm2132_vm4, %v2120_v21  ;;  %v1987_v12 = vmul.f32 2.0, %v2735_v48  ;;  %v1871_v55 = vadd.f32 1.0, %v1807_v47 }
 0x254   : > { %v2739_v42 = vpop.eup %2738  ;;  %v2121_v4 = vmul.f32 %v2057_v29, %v4319_v24  ;;  %v2058_v23 = vsub.f32 1.0, %v1985_v41  ;;  %2748 = vrcp.f32 %v1870_v38  ;;  %v1744_v57 = vadd.f32 1.0, %v2737_v45 }
 0x255   : > { %v2059_v52 = vsub.f32 1.0, %v1987_v12  ;;  %2750 = vrcp.f32 %v1871_v55  ;;  %v1745_v3 = vadd.f32 1.0, %v2739_v42 }
 0x256   : > { %v2741_v25 = vpop.eup %2740  ;;  %2186 = vst.msk [vmem:[%s4528_s4 + $0x1a8] sm:$0xff] %vm2132_vm4, %v2121_v4  ;;  %v2122_v58 = vmul.f32 %v2058_v23, %v4329_v13  ;;  %v1808_v22 = vmul.f32 %v1744_v57, %v1744_v57 }
 0x257   : > { %v2123_v17 = vmul.f32 %v2059_v52, %v4332_v28  ;;  %v1809_v34 = vmul.f32 %v1745_v3, %v1745_v3  ;;  %v1746_v0 = vadd.f32 1.0, %v2741_v25 }
 0x258   : > { %2187 = vst.msk [vmem:[%s4528_s4 + $0x1b0] sm:$0xff] %vm2132_vm4, %v2122_v58  ;;  %v1872_v24 = vadd.f32 1.0, %v1808_v22 }
 0x259   : > { %v2743_v44 = vpop.eup %2742  ;;  %2188 = vst.msk [vmem:[%s4528_s4 + $0x1b8] sm:$0xff] %vm2132_vm4, %v2123_v17  ;;  %v1873_v51 = vadd.f32 1.0, %v1809_v34  ;;  %v1810_v50 = vmul.f32 %v1746_v0, %v1746_v0 }
 0x25a   : > { %v2745_v13 = vpop.eup %2744  ;;  %v1989_v1 = vmul.f32 2.0, %v2743_v44  ;;  %2752 = vrcp.f32 %v1872_v24 }
 0x25b   : > { %2754 = vrcp.f32 %v1873_v51  ;;  %v1874_v28 = vadd.f32 1.0, %v1810_v50  ;;  %v1747_v5 = vadd.f32 1.0, %v2745_v13 }
 0x25c   : > { %v2747_v35 = vpop.eup %2746  ;;  %v2060_v59 = vsub.f32 1.0, %v1989_v1 }
 0x25d   : > { %v1991_v14 = vmul.f32 2.0, %v2747_v35  ;;  %2756 = vrcp.f32 %v1874_v28  ;;  %v1811_v54 = vmul.f32 %v1747_v5, %v1747_v5 }
 0x25e   : > { %v2749_v10 = vpop.eup %2748  ;;  %v2124_v8 = vmul.f32 %v2060_v59, %v4363_v30 }
 0x25f   : > { %v2751_v61 = vpop.eup %2750  ;;  %v2061_v53 = vsub.f32 1.0, %v1991_v14  ;;  %v1993_v62 = vmul.f32 2.0, %v2749_v10  ;;  %v1875_v40 = vadd.f32 1.0, %v1811_v54 }
 0x260   : > { %2189 = vst.msk [vmem:[%s4528_s4 + $0x1c0] sm:$0xff] %vm2132_vm4, %v2124_v8  ;;  %v1995_v63 = vmul.f32 2.0, %v2751_v61 }
 0x261   : > { %v2125_v15 = vmul.f32 %v2061_v53, %v4382_v9  ;;  %v2062_v19 = vsub.f32 1.0, %v1993_v62  ;;  %2758 = vrcp.f32 %v1875_v40 }
 0x262   : > { %v2063_v20 = vsub.f32 1.0, %v1995_v63 }
 0x263   : > { %2190 = vst.msk [vmem:[%s4528_s4 + $0x1c8] sm:$0xff] %vm2132_vm4, %v2125_v15  ;;  %v2126_v30 = vmul.f32 %v2062_v19, %v4385_v26 }
 0x264   : > { %v2753_v11 = vpop.eup %2752  ;;  %v2127_v33 = vmul.f32 %v2063_v20, %v4403_v32 }
 0x265   : > { %v2755_v56 = vpop.eup %2754  ;;  %2191 = vst.msk [vmem:[%s4528_s4 + $0x1d0] sm:$0xff] %vm2132_vm4, %v2126_v30  ;;  %v1997_v9 = vmul.f32 2.0, %v2753_v11 }
 0x266   : > { %2192 = vst.msk [vmem:[%s4528_s4 + $0x1d8] sm:$0xff] %vm2132_vm4, %v2127_v33  ;;  %v1999_v39 = vmul.f32 2.0, %v2755_v56 }
 0x267   : > { %v2757_v37 = vpop.eup %2756  ;;  %v2064_v7 = vsub.f32 1.0, %v1997_v9 }
 0x268   : > { %v2065_v43 = vsub.f32 1.0, %v1999_v39  ;;  %v2001_v26 = vmul.f32 2.0, %v2757_v37 }
 0x269   : > { %v2128_v18 = vmul.f32 %v2064_v7, %v4421_v36 }
 0x26a   : > { %v2129_v32 = vmul.f32 %v2065_v43, %v4431_v49  ;;  %v2066_v31 = vsub.f32 1.0, %v2001_v26 }
 0x26b   : > { %v2759_v46 = vpop.eup %2758  ;;  %2193 = vst.msk [vmem:[%s4528_s4 + $0x1e0] sm:$0xff] %vm2132_vm4, %v2128_v18 }
 0x26c   : > { %2194 = vst.msk [vmem:[%s4528_s4 + $0x1e8] sm:$0xff] %vm2132_vm4, %v2129_v32  ;;  %v2130_v2 = vmul.f32 %v2066_v31, %v4437_v16  ;;  %v2003_v60 = vmul.f32 2.0, %v2759_v46 }
 0x26e   : > { %2195 = vst.msk [vmem:[%s4528_s4 + $0x1f0] sm:$0xff] %vm2132_vm4, %v2130_v2  ;;  %v2067_v36 = vsub.f32 1.0, %v2003_v60 }
 0x270   : > { %v2131_v49 = vmul.f32 %v2067_v36, %v4443_v27 }
 0x272   : > { %2196 = vst.msk [vmem:[%s4528_s4 + $0x1f8] sm:$0xff] %vm2132_vm4, %v2131_v49 }
 0x273 PF: > { %s14_s17 = sadd.s32 1, %s2782_s17   ;;  %s4529_s15 = smov %s2778_s16 }
 0x274   : > { %p11_p7 = scmp.ge.s32.totalorder %s14_s17, 4   ;;  %s4530_s16 = smov %s4532_s18 }
 0x276   :  { %13 = sbr.rel (!%p11_p7) target bundleno = 2 (0x2), region = 76 }

// kernel: spatial_pyramid_pooling.3
= control target key start
LH: loop header
LB: loop body
LE: loop exit
PB: predicated region body
PF: predicated region fallthrough
CT: control target
= control target key end

     0   :  { %s4577_s6 = smov 0   ;;  %s4579_s7 = smov 0   ;;  %s8455_s0 = inlined_call_operand.vmem [shape: f32[2,16,16,4], index: 0, kind: input, shape index: {}]   ;;  %s8456_s1 = inlined_call_operand.vmem [shape: f32[2,4,16,16,4], index: 1, kind: output, shape index: {}]  }
   0x1   :  { %s4581_s8 = smov 0  }
   0x2 LB: > { %s23_s9 = sadd.s32 1, %s4560_s7  ;;  %p4306_p0 = scmp.ge.s32.totalorder %s4564_s8, 1  ;;  %s4564_s8 = sphi %s4581_s8, %s11_s8   ;;  %s4560_s7 = sphi %s4579_s7, %s9386_s7   ;;  %s4556_s6 = sphi %s4577_s6, %s9385_s6  }
   0x3   : > { %p25_p1 = scmp.ge.s32.totalorder %s23_s9, 2  ;;  %p106_p2 = scmp.lt.s32.totalorder %s4564_s8, 3 }
   0x5   : > { %s9388_s9 = smov (%p25_p1, %s23_s9), 0  ;;  %p107_p3 = pnand %p4306_p0, %p106_p2 }
   0x7   : > { %110 = sbr.rel (%p107_p3) target bundleno = 795 (0x31b), region = 24 }
   0xe   : > { %vm180_vm0 = vcmask 31744   ;;  %p132_p4 = scmp.lt.s32.totalorder %s4556_s6, 1  ;;  %v4566_v0 = vmov -inf   ;;  %vm1376_vm1 = vcmask 1044480   ;;  %vm1038_vm2 = vcmask 1046528  }
   0xf   : > { %213 = vst.msk [vmem:[#allocation2] sm:$0xff] %vm180_vm0, %v4566_v0  ;;  %214 = vst.msk [vmem:[#allocation2 + $0x8] sm:$0xff] %vm180_vm0, %v4566_v0  ;;  %vm1215_vm3 = vcmask 1045504   ;;  %vm1553_vm4 = vcmask 1043456   ;;  %vm1734_vm5 = vcmask 29696   ;;  %vm1731_vm6 = vcmask 31750  }
  0x10   : > { %215 = vst.msk [vmem:[#allocation2 + $0x10] sm:$0xff] %vm180_vm0, %v4566_v0  ;;  %216 = vst.msk [vmem:[#allocation2 + $0x18] sm:$0xff] %vm180_vm0, %v4566_v0  ;;  %s9390_s6 = smov (!%p132_p4, %s4556_s6), 1  ;;  %vm2822_vm7 = vcmask 31748   ;;  %vm2825_vm8 = vcmask 27648   ;;  %vm4169_vm9 = vcmask 31746  }
  0x11   : > { %217 = vst.msk [vmem:[#allocation2 + $0x20] sm:$0xff] %vm180_vm0, %v4566_v0  ;;  %218 = vst.msk [vmem:[#allocation2 + $0x28] sm:$0xff] %vm180_vm0, %v4566_v0  ;;  %s4457_s10 = sshll.u32 %s9390_s6, 8  ;;  %s4458_s11 = sshll.u32 %s9390_s6, 10  ;;  %vm4172_vm10 = vcmask 25600  }
  0x12   : > { %219 = vst.msk [vmem:[#allocation2 + $0x30] sm:$0xff] %vm180_vm0, %v4566_v0  ;;  %220 = vst.msk [vmem:[#allocation2 + $0x38] sm:$0xff] %vm180_vm0, %v4566_v0  ;;  %s4828_s14 = scalar_lea.vmem %s8455_s0, %s4457_s10  ;;  %s4833_s17 = scalar_lea.vmem %s8456_s1, %s4458_s11 }
  0x13   : > { %221 = vst.msk [vmem:[#allocation2 + $0x40] sm:$0xff] %vm180_vm0, %v4566_v0  ;;  %222 = vst.msk [vmem:[#allocation2 + $0x48] sm:$0xff] %vm180_vm0, %v4566_v0  ;;  %v148_v1 = vld [vmem:[%s4828_s14] sm:$0xff]  ;;  %v149_v2 = vld [vmem:[%s4828_s14 + $0x8] sm:$0xff] }
  0x14   : > { %223 = vst.msk [vmem:[#allocation2 + $0x50] sm:$0xff] %vm180_vm0, %v4566_v0  ;;  %224 = vst.msk [vmem:[#allocation2 + $0x58] sm:$0xff] %vm180_vm0, %v4566_v0  ;;  %v150_v3 = vld [vmem:[%s4828_s14 + $0x10] sm:$0xff]  ;;  %v151_v4 = vld [vmem:[%s4828_s14 + $0x18] sm:$0xff] }
  0x15   : > { %225 = vst.msk [vmem:[#allocation2 + $0x60] sm:$0xff] %vm180_vm0, %v4566_v0  ;;  %226 = vst.msk [vmem:[#allocation2 + $0x68] sm:$0xff] %vm180_vm0, %v4566_v0  ;;  %v152_v5 = vld [vmem:[%s4828_s14 + $0x20] sm:$0xff]  ;;  %v153_v6 = vld [vmem:[%s4828_s14 + $0x28] sm:$0xff] }
  0x16   : > { %227 = vst.msk [vmem:[#allocation2 + $0x70] sm:$0xff] %vm180_vm0, %v4566_v0  ;;  %228 = vst.msk [vmem:[#allocation2 + $0x78] sm:$0xff] %vm180_vm0, %v4566_v0  ;;  %v358_v7 = vld [vmem:[#allocation2] sm:$0xff]  ;;  %v359_v8 = vld [vmem:[#allocation2 + $0x8] sm:$0xff] }
  0x17   : > { %229 = vst.msk [vmem:[#allocation2 + $0x80] sm:$0xff] %vm180_vm0, %v4566_v0  ;;  %230 = vst.msk [vmem:[#allocation2 + $0x88] sm:$0xff] %vm180_vm0, %v4566_v0  ;;  %v360_v9 = vld [vmem:[#allocation2 + $0x10] sm:$0xff]  ;;  %v155_v42 = vld [vmem:[%s4828_s14 + $0x38] sm:$0xff] }
  0x18   : > { %231 = vst.msk [vmem:[#allocation2 + $0x90] sm:$0xff] %vm180_vm0, %v4566_v0  ;;  %232 = vst.msk [vmem:[#allocation2 + $0x98] sm:$0xff] %vm180_vm0, %v4566_v0  ;;  %v4859_v10 = vld [vmem:[#allocation2 + $0x20] sm:$0xff]  ;;  %v4861_v11 = vld [vmem:[#allocation2 + $0x28] sm:$0xff] }
  0x19   : > { %233 = vst.msk [vmem:[#allocation2 + $0xa0] sm:$0xff] %vm180_vm0, %v4566_v0  ;;  %234 = vst.msk [vmem:[#allocation2 + $0xa8] sm:$0xff] %vm180_vm0, %v4566_v0  ;;  %v364_v12 = vld [vmem:[#allocation2 + $0x30] sm:$0xff]  ;;  %v471_v19 = vmax.f32 %v359_v8, %v4861_v11  ;;  %v470_v23 = vmax.f32 %v358_v7, %v4859_v10  ;;  %v156_v43 = vld [vmem:[%s4828_s14 + $0x40] sm:$0xff] }
  0x1a   : > { %235 = vst.msk [vmem:[#allocation2 + $0xb0] sm:$0xff] %vm180_vm0, %v4566_v0  ;;  %236 = vst.msk [vmem:[#allocation2 + $0xb8] sm:$0xff] %vm180_vm0, %v4566_v0  ;;  %v4869_v18 = vld [vmem:[#allocation2 + $0x40] sm:$0xff]  ;;  %v4874_v22 = vld [vmem:[#allocation2 + $0x48] sm:$0xff]  ;;  %v472_v24 = vmax.f32 %v360_v9, %v364_v12 }
  0x1b   : > { %237 = vst.msk [vmem:[#allocation2 + $0xc0] sm:$0xff] %vm180_vm0, %v4566_v0  ;;  %238 = vst.msk [vmem:[#allocation2 + $0xc8] sm:$0xff] %vm180_vm0, %v4566_v0  ;;  %v4863_v13 = vld [vmem:[#allocation2 + $0x50] sm:$0xff]  ;;  %v474_v31 = vmax.f32 %v4859_v10, %v4869_v18  ;;  %v4903_v40 = vmax.f32 %v471_v19, %v4874_v22  ;;  %v157_v44 = vld [vmem:[%s4828_s14 + $0x48] sm:$0xff]  ;;  %v4933_v52 = vmax.f32 %v470_v23, %v4869_v18 }
  0x1c   : > { %239 = vst.msk [vmem:[#allocation2 + $0xd0] sm:$0xff] %vm180_vm0, %v4566_v0  ;;  %240 = vst.msk [vmem:[#allocation2 + $0xd8] sm:$0xff] %vm180_vm0, %v4566_v0  ;;  %v476_v27 = vmax.f32 %v364_v12, %v4863_v13  ;;  %v154_v36 = vld [vmem:[%s4828_s14 + $0x30] sm:$0xff]  ;;  %v4898_v38 = vld [vmem:[#allocation2 + $0x60] sm:$0xff]  ;;  %v4917_v47 = vmax.f32 %v472_v24, %v4863_v13 }
  0x1d   : > { %241 = vst.msk [vmem:[#allocation2 + $0xe0] sm:$0xff] %vm180_vm0, %v4566_v0  ;;  %242 = vst.msk [vmem:[#allocation2 + $0xe8] sm:$0xff] %vm180_vm0, %v4566_v0  ;;  %v4879_v26 = vld [vmem:[#allocation2 + $0x70] sm:$0xff]  ;;  %v159_v49 = vld [vmem:[%s4828_s14 + $0x58] sm:$0xff] }
  0x1e   : > { %243 = vst.msk [vmem:[#allocation2 + $0xf0] sm:$0xff] %vm180_vm0, %v4566_v0  ;;  %244 = vst.msk [vmem:[#allocation2 + $0xf8] sm:$0xff] %vm180_vm0, %v4566_v0  ;;  %v375_v14 = vld [vmem:[#allocation2 + $0x88] sm:$0xff]  ;;  %v158_v48 = vld [vmem:[%s4828_s14 + $0x50] sm:$0xff]  ;;  %v4936_v53 = vmax.f32 %v476_v27, %v4879_v26 }
  0x1f   : > { %245 = vst.msk [vmem:[#allocation2 + $0x100] sm:$0xff] %vm180_vm0, %v4566_v0  ;;  %246 = vst.msk [vmem:[#allocation2 + $0x108] sm:$0xff] %vm180_vm0, %v4566_v0  ;;  %v4865_v15 = vld [vmem:[#allocation2 + $0x90] sm:$0xff]  ;;  %v160_v50 = vld [vmem:[%s4828_s14 + $0x60] sm:$0xff] }
  0x20   : > { %247 = vst.msk [vmem:[#allocation2 + $0x110] sm:$0xff] %vm180_vm0, %v4566_v0  ;;  %248 = vst.msk [vmem:[#allocation2 + $0x118] sm:$0xff] %vm180_vm0, %v4566_v0  ;;  %v4867_v16 = vld [vmem:[#allocation2 + $0xa8] sm:$0xff]  ;;  %v162_v56 = vld [vmem:[%s4828_s14 + $0x70] sm:$0xff] }
  0x21   : > { %249 = vst.msk [vmem:[#allocation2 + $0x120] sm:$0xff] %vm180_vm0, %v4566_v0  ;;  %250 = vst.msk [vmem:[#allocation2 + $0x128] sm:$0xff] %vm180_vm0, %v4566_v0  ;;  %v380_v17 = vld [vmem:[#allocation2 + $0xb0] sm:$0xff]  ;;  %v487_v21 = vmax.f32 %v375_v14, %v4867_v16  ;;  %v161_v55 = vld [vmem:[%s4828_s14 + $0x68] sm:$0xff] }
  0x22   : > { %251 = vst.msk [vmem:[#allocation2 + $0x130] sm:$0xff] %vm180_vm0, %v4566_v0  ;;  %252 = vst.msk [vmem:[#allocation2 + $0x138] sm:$0xff] %vm180_vm0, %v4566_v0  ;;  %v488_v20 = vmax.f32 %v4865_v15, %v380_v17  ;;  %v163_v57 = vld [vmem:[%s4828_s14 + $0x78] sm:$0xff]  ;;  %v164_v61 = vld [vmem:[%s4828_s14 + $0x80] sm:$0xff] }
  0x23   : > { %253 = vst.msk [vmem:[#allocation2 + $0x140] sm:$0xff] %vm180_vm0, %v4566_v0  ;;  %254 = vst.msk [vmem:[#allocation2 + $0x148] sm:$0xff] %vm180_vm0, %v4566_v0  ;;  %v165_v62 = vld [vmem:[%s4828_s14 + $0x88] sm:$0xff]  ;;  %v166_v63 = vld [vmem:[%s4828_s14 + $0x90] sm:$0xff] }
  0x24   : > { %255 = vst.msk [vmem:[#allocation2 + $0x150] sm:$0xff] %vm180_vm0, %v4566_v0  ;;  %256 = vst.msk [vmem:[#allocation2 + $0x158] sm:$0xff] %vm180_vm0, %v4566_v0  ;;  %v170_v10 = vld [vmem:[%s4828_s14 + $0xb0] sm:$0xff]  ;;  %v171_v12 = vld [vmem:[%s4828_s14 + $0xb8] sm:$0xff] }
  0x25   : > { %257 = vst.msk [vmem:[#allocation2 + $0x160] sm:$0xff] %vm180_vm0, %v4566_v0  ;;  %258 = vst.msk [vmem:[#allocation2 + $0x168] sm:$0xff] %vm180_vm0, %v4566_v0  ;;  %v172_v14 = vld [vmem:[%s4828_s14 + $0xc0] sm:$0xff]  ;;  %v173_v23 = vld [vmem:[%s4828_s14 + $0xc8] sm:$0xff] }
  0x26   : > { %259 = vst.msk [vmem:[#allocation2 + $0x170] sm:$0xff] %vm180_vm0, %v4566_v0  ;;  %260 = vst.msk [vmem:[#allocation2 + $0x178] sm:$0xff] %vm180_vm0, %v4566_v0  ;;  %v174_v24 = vld [vmem:[%s4828_s14 + $0xd0] sm:$0xff] }
  0x27   : > { %261 = vst.msk [vmem:[#allocation2 + $0x180] sm:$0xff] %vm180_vm0, %v4566_v0  ;;  %262 = vst.msk [vmem:[#allocation2 + $0x188] sm:$0xff] %vm180_vm0, %v4566_v0 }
  0x28   : > { %263 = vst.msk [vmem:[#allocation2 + $0x190] sm:$0xff] %vm180_vm0, %v4566_v0  ;;  %264 = vst.msk [vmem:[#allocation2 + $0x198] sm:$0xff] %vm180_vm0, %v4566_v0 }
  0x29   : > { %265 = vst.msk [vmem:[#allocation2 + $0x1a0] sm:$0xff] %vm180_vm0, %v4566_v0  ;;  %266 = vst.msk [vmem:[#allocation2 + $0x1a8] sm:$0xff] %vm180_vm0, %v4566_v0 }
  0x2a   : > { %267 = vst.msk [vmem:[#allocation2 + $0x1b0] sm:$0xff] %vm180_vm0, %v4566_v0  ;;  %268 = vst.msk [vmem:[#allocation2 + $0x1b8] sm:$0xff] %vm180_vm0, %v4566_v0 }
  0x2b   : > { %269 = vst.msk [vmem:[#allocation2 + $0x1c0] sm:$0xff] %vm180_vm0, %v4566_v0  ;;  %270 = vst.msk [vmem:[#allocation2 + $0x1c8] sm:$0xff] %vm180_vm0, %v4566_v0 }
  0x2c   : > { %271 = vst.msk [vmem:[#allocation2 + $0x1d0] sm:$0xff] %vm180_vm0, %v4566_v0  ;;  %272 = vst.msk [vmem:[#allocation2 + $0x1d8] sm:$0xff] %vm180_vm0, %v4566_v0 }
  0x2d   : > { %273 = vst.msk [vmem:[#allocation2 + $0x1e0] sm:$0xff] %vm180_vm0, %v4566_v0  ;;  %274 = vst.msk [vmem:[#allocation2 + $0x1e8] sm:$0xff] %vm180_vm0, %v4566_v0 }
  0x2e   : > { %275 = vst.msk [vmem:[#allocation2 + $0x1f0] sm:$0xff] %vm180_vm0, %v4566_v0  ;;  %276 = vst.msk [vmem:[#allocation2 + $0x1f8] sm:$0xff] %vm180_vm0, %v4566_v0 }
  0x2f   : > { %277 = vst.msk [vmem:[#allocation2 + $0x200] sm:$0xff] %vm180_vm0, %v4566_v0  ;;  %278 = vst.msk [vmem:[#allocation2 + $0x208] sm:$0xff] %vm180_vm0, %v4566_v0 }
  0x30   : > { %279 = vst.msk [vmem:[#allocation2 + $0x210] sm:$0xff] %vm180_vm0, %v4566_v0  ;;  %280 = vst.msk [vmem:[#allocation2 + $0x218] sm:$0xff] %vm180_vm0, %v4566_v0 }
  0x31   : > { %281 = vst.msk [vmem:[#allocation2 + $0x220] sm:$0xff] %vm180_vm0, %v4566_v0  ;;  %282 = vst.msk [vmem:[#allocation2 + $0x228] sm:$0xff] %vm180_vm0, %v4566_v0 }
  0x32   : > { %283 = vst.msk [vmem:[#allocation2 + $0x230] sm:$0xff] %vm180_vm0, %v4566_v0  ;;  %284 = vst.msk [vmem:[#allocation2 + $0x238] sm:$0xff] %vm180_vm0, %v4566_v0 }
  0x33   : > { %285 = vst.msk [vmem:[#allocation2 + $0x240] sm:$0xff] %vm180_vm0, %v4566_v0  ;;  %286 = vst.msk [vmem:[#allocation2 + $0x248] sm:$0xff] %vm180_vm0, %v4566_v0 }
  0x34   : > { %287 = vst.msk [vmem:[#allocation2 + $0x250] sm:$0xff] %vm180_vm0, %v4566_v0  ;;  %288 = vst.msk [vmem:[#allocation2 + $0x258] sm:$0xff] %vm180_vm0, %v4566_v0 }
  0x35   : > { %289 = vst.msk [vmem:[#allocation2 + $0x260] sm:$0xff] %vm180_vm0, %v4566_v0  ;;  %290 = vst.msk [vmem:[#allocation2 + $0x268] sm:$0xff] %vm180_vm0, %v4566_v0 }
  0x36   : > { %291 = vst.msk [vmem:[#allocation2 + $0x270] sm:$0xff] %vm180_vm0, %v4566_v0  ;;  %292 = vst.msk [vmem:[#allocation2 + $0x278] sm:$0xff] %vm180_vm0, %v4566_v0 }
  0x37   : > { %293 = vst.msk [vmem:[#allocation2 + $0x280] sm:$0xff] %vm180_vm0, %v4566_v0  ;;  %294 = vst.msk [vmem:[#allocation2 + $0x288] sm:$0xff] %vm180_vm0, %v4566_v0 }
  0x38   : > { %295 = vst.msk [vmem:[#allocation2 + $0x290] sm:$0xff] %vm180_vm0, %v4566_v0  ;;  %296 = vst.msk [vmem:[#allocation2 + $0x298] sm:$0xff] %vm180_vm0, %v4566_v0 }
  0x39   : > { %297 = vst.msk [vmem:[#allocation2 + $0x2a0] sm:$0xff] %vm180_vm0, %v4566_v0  ;;  %298 = vst.msk [vmem:[#allocation2 + $0x2a8] sm:$0xff] %vm180_vm0, %v4566_v0 }
  0x3a   : > { %299 = vst.msk [vmem:[#allocation2 + $0x2b0] sm:$0xff] %vm180_vm0, %v4566_v0  ;;  %300 = vst.msk [vmem:[#allocation2 + $0x2b8] sm:$0xff] %vm180_vm0, %v4566_v0 }
  0x3b   : > { %301 = vst.msk [vmem:[#allocation2 + $0x2c0] sm:$0xff] %vm180_vm0, %v4566_v0  ;;  %302 = vst.msk [vmem:[#allocation2 + $0x2c8] sm:$0xff] %vm180_vm0, %v4566_v0 }
  0x3c   : > { %303 = vst.msk [vmem:[#allocation2 + $0x2d0] sm:$0xff] %vm180_vm0, %v4566_v0  ;;  %304 = vst.msk [vmem:[#allocation2 + $0x2d8] sm:$0xff] %vm180_vm0, %v4566_v0 }
  0x3d   : > { %305 = vst.msk [vmem:[#allocation2 + $0x2e0] sm:$0xff] %vm180_vm0, %v4566_v0  ;;  %306 = vst.msk [vmem:[#allocation2 + $0x2e8] sm:$0xff] %vm180_vm0, %v4566_v0 }
  0x3e   : > { %307 = vst.msk [vmem:[#allocation2 + $0x2f0] sm:$0xff] %vm180_vm0, %v4566_v0  ;;  %308 = vst.msk [vmem:[#allocation2 + $0x2f8] sm:$0xff] %vm180_vm0, %v4566_v0 }
  0x3f   : > { %309 = vst.msk [vmem:[#allocation2 + $0x300] sm:$0xff] %vm180_vm0, %v4566_v0  ;;  %310 = vst.msk [vmem:[#allocation2 + $0x308] sm:$0xff] %vm180_vm0, %v4566_v0 }
  0x40   : > { %311 = vst.msk [vmem:[#allocation2 + $0x310] sm:$0xff] %vm180_vm0, %v4566_v0  ;;  %312 = vst.msk [vmem:[#allocation2 + $0x318] sm:$0xff] %vm180_vm0, %v4566_v0 }
  0x41   : > { %313 = vst.msk [vmem:[#allocation2 + $0x320] sm:$0xff] %vm180_vm0, %v4566_v0  ;;  %314 = vst.msk [vmem:[#allocation2 + $0x328] sm:$0xff] %vm180_vm0, %v4566_v0 }
  0x42   : > { %315 = vst.msk [vmem:[#allocation2 + $0x330] sm:$0xff] %vm180_vm0, %v4566_v0  ;;  %316 = vst.msk [vmem:[#allocation2 + $0x338] sm:$0xff] %vm180_vm0, %v4566_v0 }
  0x43   : > { %317 = vst.msk [vmem:[#allocation2 + $0x340] sm:$0xff] %vm180_vm0, %v4566_v0  ;;  %318 = vst.msk [vmem:[#allocation2 + $0x348] sm:$0xff] %vm180_vm0, %v4566_v0 }
  0x44   : > { %319 = vst.msk [vmem:[#allocation2 + $0x350] sm:$0xff] %vm180_vm0, %v4566_v0  ;;  %320 = vst.msk [vmem:[#allocation2 + $0x358] sm:$0xff] %vm180_vm0, %v4566_v0 }
  0x45   : > { %321 = vst.msk [vmem:[#allocation2 + $0x360] sm:$0xff] %vm180_vm0, %v4566_v0  ;;  %322 = vst.msk [vmem:[#allocation2 + $0x368] sm:$0xff] %vm180_vm0, %v4566_v0 }
  0x46   : > { %323 = vst.msk [vmem:[#allocation2 + $0x370] sm:$0xff] %vm180_vm0, %v4566_v0  ;;  %324 = vst.msk [vmem:[#allocation2 + $0x378] sm:$0xff] %vm180_vm0, %v4566_v0 }
  0x47   : > { %326 = vst.msk [vmem:[#allocation2 + $0xc8] sm:$0xff] %vm180_vm0, %v148_v1  ;;  %181 = vst.msk [vmem:[%s4833_s17] sm:$0xff] %vm180_vm0, %v148_v1  ;;  %v4976_v1 = vmax.f32 %v474_v31, %v4898_v38  ;;  %v176_v31 = vld [vmem:[%s4828_s14 + $0xe0] sm:$0xff] }
  0x48   : > { %327 = vst.msk [vmem:[#allocation2 + $0xd0] sm:$0xff] %vm180_vm0, %v149_v2  ;;  %182 = vst.msk [vmem:[%s4833_s17 + $0x8] sm:$0xff] %vm180_vm0, %v149_v2 }
  0x49   : > { %328 = vst.msk [vmem:[#allocation2 + $0xe8] sm:$0xff] %vm180_vm0, %v150_v3  ;;  %183 = vst.msk [vmem:[%s4833_s17 + $0x10] sm:$0xff] %vm180_vm0, %v150_v3 }
  0x4a   : > { %329 = vst.msk [vmem:[#allocation2 + $0xf0] sm:$0xff] %vm180_vm0, %v151_v4  ;;  %184 = vst.msk [vmem:[%s4833_s17 + $0x18] sm:$0xff] %vm180_vm0, %v151_v4  ;;  %v167_v4 = vld [vmem:[%s4828_s14 + $0x98] sm:$0xff] }
  0x4b   : > { %330 = vst.msk [vmem:[#allocation2 + $0x108] sm:$0xff] %vm180_vm0, %v152_v5  ;;  %185 = vst.msk [vmem:[%s4833_s17 + $0x20] sm:$0xff] %vm180_vm0, %v152_v5  ;;  %v168_v5 = vld [vmem:[%s4828_s14 + $0xa0] sm:$0xff] }
  0x4c   : > { %331 = vst.msk [vmem:[#allocation2 + $0x110] sm:$0xff] %vm180_vm0, %v153_v6  ;;  %186 = vst.msk [vmem:[%s4833_s17 + $0x28] sm:$0xff] %vm180_vm0, %v153_v6  ;;  %v169_v6 = vld [vmem:[%s4828_s14 + $0xa8] sm:$0xff] }
  0x4d   : > { %8829 = vst [vmem:[#allocation3_spill] sm:$0xff] %v4861_v11  ;;  %8830 = vst [vmem:[#allocation4_spill] sm:$0xff] %v4863_v13 }
  0x4e   : > { %8831 = vst [vmem:[#allocation5_spill] sm:$0xff] %v4865_v15  ;;  %8832 = vst [vmem:[#allocation6_spill] sm:$0xff] %v4874_v22  ;;  %v4877_v25 = vld [vmem:[#allocation2 + $0xc8] sm:$0xff] }
  0x4f   : > { %8833 = vst [vmem:[#allocation7_spill] sm:$0xff] %v4879_v26  ;;  %v4882_v28 = vld [vmem:[#allocation2 + $0xd0] sm:$0xff]  ;;  %v583_v30 = vmax.f32 %v487_v21, %v4877_v25  ;;  %v491_v37 = vmax.f32 %v4867_v16, %v4877_v25  ;;  %8834 = vst [vmem:[#allocation8_spill] sm:$0xff] %v4898_v38 }
  0x50   : > { %v4884_v29 = vld [vmem:[#allocation2 + $0xe8] sm:$0xff]  ;;  %v492_v32 = vmax.f32 %v380_v17, %v4882_v28  ;;  %v584_v33 = vmax.f32 %v488_v20, %v4882_v28  ;;  %8835 = vst [vmem:[#allocation9_spill] sm:$0xff] %v4903_v40  ;;  %332 = vst.msk [vmem:[#allocation2 + $0x128] sm:$0xff] %vm180_vm0, %v154_v36 }
  0x51   : > { %v4891_v34 = vld [vmem:[#allocation2 + $0xf0] sm:$0xff]  ;;  %187 = vst.msk [vmem:[%s4833_s17 + $0x30] sm:$0xff] %vm180_vm0, %v154_v36  ;;  %v679_v45 = vmax.f32 %v583_v30, %v4884_v29  ;;  %8836 = vst [vmem:[#allocation10_spill] sm:$0xff] %v4917_v47  ;;  %v495_v59 = vmax.f32 %v4877_v25, %v4884_v29  ;;  %v4979_v2 = vmax.f32 %v491_v37, %v4884_v29  ;;  %v175_v25 = vld [vmem:[%s4828_s14 + $0xd8] sm:$0xff] }
  0x52   : > { %v4893_v35 = vld [vmem:[#allocation2 + $0x108] sm:$0xff]  ;;  %333 = vst.msk [vmem:[#allocation2 + $0x130] sm:$0xff] %vm180_vm0, %v155_v42  ;;  %188 = vst.msk [vmem:[%s4833_s17 + $0x38] sm:$0xff] %vm180_vm0, %v155_v42  ;;  %v680_v51 = vmax.f32 %v584_v33, %v4891_v34  ;;  %v496_v54 = vmax.f32 %v4882_v28, %v4891_v34  ;;  %v4958_v60 = vmax.f32 %v492_v32, %v4891_v34 }
  0x53   : > { %v4905_v41 = vld [vmem:[#allocation2 + $0x110] sm:$0xff]  ;;  %334 = vst.msk [vmem:[#allocation2 + $0x148] sm:$0xff] %vm180_vm0, %v156_v43  ;;  %189 = vst.msk [vmem:[%s4833_s17 + $0x40] sm:$0xff] %vm180_vm0, %v156_v43  ;;  %v4953_v58 = vmax.f32 %v679_v45, %v4893_v35  ;;  %v5033_v27 = vmax.f32 %v495_v59, %v4893_v35  ;;  %v177_v32 = vld [vmem:[%s4828_s14 + $0xe8] sm:$0xff]  ;;  %v683_v42 = vmax.f32 %v4979_v2, %v4893_v35 }
  0x54   : > { %335 = vst.msk [vmem:[#allocation2 + $0x150] sm:$0xff] %vm180_vm0, %v157_v44  ;;  %190 = vst.msk [vmem:[%s4833_s17 + $0x48] sm:$0xff] %vm180_vm0, %v157_v44  ;;  %v4973_v0 = vmax.f32 %v680_v51, %v4905_v41  ;;  %v500_v20 = vmax.f32 %v4891_v34, %v4905_v41  ;;  %v5018_v21 = vmax.f32 %v496_v54, %v4905_v41 }
  0x55   : > { %8837 = vst [vmem:[#allocation11_spill] sm:$0xff] %v4933_v52  ;;  %8838 = vst [vmem:[#allocation12_spill] sm:$0xff] %v4936_v53  ;;  %v8460_v7 = vrot.slane %v4953_v58, 1  ;;  %v8459_v8 = vrot.slane %v4953_v58, 2  ;;  %v8458_v9 = vrot.slane %v4953_v58, 3  ;;  %v8457_v36 = vrot.slane %v4953_v58, 4 }
  0x56   : > { %336 = vst.msk [vmem:[#allocation2 + $0x168] sm:$0xff] %vm180_vm0, %v158_v48  ;;  %191 = vst.msk [vmem:[%s4833_s17 + $0x50] sm:$0xff] %vm180_vm0, %v158_v48  ;;  %v1042_v16 = vrot.slane %v4973_v0, 1  ;;  %v8463_v17 = vrot.slane %v4973_v0, 2  ;;  %v8462_v18 = vrot.slane %v4973_v0, 3  ;;  %v8461_v33 = vrot.slane %v4973_v0, 4 }
  0x57   : > { %337 = vst.msk [vmem:[#allocation2 + $0x170] sm:$0xff] %vm180_vm0, %v159_v49  ;;  %192 = vst.msk [vmem:[%s4833_s17 + $0x58] sm:$0xff] %vm180_vm0, %v159_v49  ;;  %v5037_v30 = vld [vmem:[#allocation2 + $0x128] sm:$0xff]  ;;  %v5186_v52 = vld [vmem:[#allocation2 + $0xf8] sm:$0xff] }
  0x58   : > { %338 = vst.msk [vmem:[#allocation2 + $0x188] sm:$0xff] %vm180_vm0, %v160_v50  ;;  %193 = vst.msk [vmem:[%s4833_s17 + $0x60] sm:$0xff] %vm180_vm0, %v160_v50  ;;  %v503_v43 = vmax.f32 %v4893_v35, %v5037_v30  ;;  %v5071_v49 = vmax.f32 %v4973_v0, %v1042_v16  ;;  %v5076_v50 = vsel %vm1038_vm2, %v8460_v7, %v1042_v16 }
  0x59   : > { %8839 = vst [vmem:[#allocation13_spill] sm:$0xff] %v4953_v58  ;;  %339 = vst.msk [vmem:[#allocation2 + $0x190] sm:$0xff] %vm180_vm0, %v161_v55  ;;  %v5058_v44 = vld [vmem:[#allocation2 + $0x130] sm:$0xff]  ;;  %v5083_v51 = vsel %vm1215_vm3, %v8459_v8, %v8463_v17 }
  0x5a   : > { %194 = vst.msk [vmem:[%s4833_s17 + $0x68] sm:$0xff] %vm180_vm0, %v161_v55  ;;  %340 = vst.msk [vmem:[#allocation2 + $0x1a8] sm:$0xff] %vm180_vm0, %v162_v56  ;;  %v5060_v45 = vld [vmem:[#allocation2 + $0x148] sm:$0xff]  ;;  %v504_v54 = vmax.f32 %v4905_v41, %v5058_v44 }
  0x5b   : > { %195 = vst.msk [vmem:[%s4833_s17 + $0x70] sm:$0xff] %vm180_vm0, %v162_v56  ;;  %341 = vst.msk [vmem:[#allocation2 + $0x1b0] sm:$0xff] %vm180_vm0, %v163_v57  ;;  %v5062_v48 = vld [vmem:[#allocation2 + $0x150] sm:$0xff]  ;;  %v507_v55 = vmax.f32 %v5037_v30, %v5060_v45 }
  0x5c   : > { %196 = vst.msk [vmem:[%s4833_s17 + $0x78] sm:$0xff] %vm180_vm0, %v163_v57  ;;  %8840 = vst [vmem:[#allocation14_spill] sm:$0xff] %v4973_v0  ;;  %v508_v56 = vmax.f32 %v5058_v44, %v5062_v48 }
  0x5d   : > { %342 = vst.msk [vmem:[#allocation2 + $0x1c8] sm:$0xff] %vm180_vm0, %v164_v61  ;;  %197 = vst.msk [vmem:[%s4833_s17 + $0x80] sm:$0xff] %vm180_vm0, %v164_v61  ;;  %v5091_v57 = vld [vmem:[#allocation2 + $0x168] sm:$0xff] }
  0x5e   : > { %343 = vst.msk [vmem:[#allocation2 + $0x1d0] sm:$0xff] %vm180_vm0, %v165_v62  ;;  %198 = vst.msk [vmem:[%s4833_s17 + $0x88] sm:$0xff] %vm180_vm0, %v165_v62  ;;  %v5093_v59 = vld [vmem:[#allocation2 + $0x170] sm:$0xff]  ;;  %v5100_v62 = vsel %vm1376_vm1, %v8458_v9, %v8462_v18  ;;  %v511_v2 = vmax.f32 %v5060_v45, %v5091_v57 }
  0x5f   : > { %344 = vst.msk [vmem:[#allocation2 + $0x1e8] sm:$0xff] %vm180_vm0, %v166_v63  ;;  %199 = vst.msk [vmem:[%s4833_s17 + $0x90] sm:$0xff] %vm180_vm0, %v166_v63  ;;  %v407_v61 = vld [vmem:[#allocation2 + $0x188] sm:$0xff]  ;;  %v599_v63 = vmax.f32 %v503_v43, %v5060_v45  ;;  %v604_v16 = vmax.f32 %v508_v56, %v5093_v59 }
  0x60   : > { %345 = vst.msk [vmem:[#allocation2 + $0x1f0] sm:$0xff] %vm180_vm0, %v167_v4  ;;  %200 = vst.msk [vmem:[%s4833_s17 + $0x98] sm:$0xff] %vm180_vm0, %v167_v4  ;;  %v512_v4 = vmax.f32 %v5062_v48, %v5093_v59 }
  0x61   : > { %346 = vst.msk [vmem:[#allocation2 + $0x208] sm:$0xff] %vm180_vm0, %v168_v5  ;;  %201 = vst.msk [vmem:[%s4833_s17 + $0xa0] sm:$0xff] %vm180_vm0, %v168_v5  ;;  %v515_v5 = vmax.f32 %v5091_v57, %v407_v61 }
  0x62   : > { %347 = vst.msk [vmem:[#allocation2 + $0x210] sm:$0xff] %vm180_vm0, %v169_v6  ;;  %202 = vst.msk [vmem:[%s4833_s17 + $0xa8] sm:$0xff] %vm180_vm0, %v169_v6  ;;  %v408_v6 = vld [vmem:[#allocation2 + $0x190] sm:$0xff] }
  0x63   : > { %348 = vst.msk [vmem:[#allocation2 + $0x228] sm:$0xff] %vm180_vm0, %v170_v10  ;;  %203 = vst.msk [vmem:[%s4833_s17 + $0xb0] sm:$0xff] %vm180_vm0, %v170_v10  ;;  %v411_v10 = vld [vmem:[#allocation2 + $0x1a8] sm:$0xff]  ;;  %v700_v28 = vmax.f32 %v604_v16, %v408_v6 }
  0x64   : > { %349 = vst.msk [vmem:[#allocation2 + $0x230] sm:$0xff] %vm180_vm0, %v171_v12  ;;  %204 = vst.msk [vmem:[%s4833_s17 + $0xb8] sm:$0xff] %vm180_vm0, %v171_v12  ;;  %v600_v12 = vmax.f32 %v504_v54, %v5062_v48  ;;  %v519_v43 = vmax.f32 %v407_v61, %v411_v10  ;;  %v611_v3 = vmax.f32 %v515_v5, %v411_v10  ;;  %v415_v46 = vld [vmem:[#allocation2 + $0x1c8] sm:$0xff] }
  0x65   : > { %350 = vst.msk [vmem:[#allocation2 + $0x248] sm:$0xff] %vm180_vm0, %v172_v14  ;;  %205 = vst.msk [vmem:[%s4833_s17 + $0xc0] sm:$0xff] %vm180_vm0, %v172_v14  ;;  %v603_v14 = vmax.f32 %v507_v55, %v5091_v57  ;;  %v5121_v55 = vsel %vm1553_vm4, %v8457_v36, %v8461_v33  ;;  %v5130_v5 = vmax.f32 %v500_v20, %v5058_v44 }
  0x66   : > { %351 = vst.msk [vmem:[#allocation2 + $0x250] sm:$0xff] %vm180_vm0, %v173_v23  ;;  %206 = vst.msk [vmem:[%s4833_s17 + $0xc8] sm:$0xff] %vm180_vm0, %v173_v23  ;;  %v516_v23 = vmax.f32 %v5093_v59, %v408_v6  ;;  %v696_v39 = vmax.f32 %v600_v12, %v5093_v59  ;;  %v5124_v12 = vmax.f32 %v683_v42, %v5037_v30  ;;  %v419_v9 = vld [vmem:[#allocation2 + $0x1e8] sm:$0xff]  ;;  %v179_v42 = vld [vmem:[%s4828_s14 + $0xf8] sm:$0xff] }
  0x67   : > { %352 = vst.msk [vmem:[#allocation2 + $0x268] sm:$0xff] %vm180_vm0, %v174_v24  ;;  %207 = vst.msk [vmem:[%s4833_s17 + $0xd0] sm:$0xff] %vm180_vm0, %v174_v24  ;;  %v412_v24 = vld [vmem:[#allocation2 + $0x1b0] sm:$0xff]  ;;  %v699_v56 = vmax.f32 %v603_v14, %v407_v61  ;;  %v615_v7 = vmax.f32 %v519_v43, %v415_v46  ;;  %v707_v33 = vmax.f32 %v611_v3, %v415_v46 }
  0x68   : > { %353 = vst.msk [vmem:[#allocation2 + $0x270] sm:$0xff] %vm180_vm0, %v175_v25  ;;  %208 = vst.msk [vmem:[%s4833_s17 + $0xd8] sm:$0xff] %vm180_vm0, %v175_v25  ;;  %v695_v25 = vmax.f32 %v599_v63, %v5091_v57  ;;  %v520_v63 = vmax.f32 %v408_v6, %v412_v24  ;;  %v178_v14 = vld [vmem:[%s4828_s14 + $0xf0] sm:$0xff]  ;;  %v5139_v34 = vmax.f32 %v696_v39, %v408_v6  ;;  %v423_v16 = vld [vmem:[#allocation2 + $0x208] sm:$0xff] }
  0x69   : > { %354 = vst.msk [vmem:[#allocation2 + $0x288] sm:$0xff] %vm180_vm0, %v176_v31  ;;  %209 = vst.msk [vmem:[%s4833_s17 + $0xe0] sm:$0xff] %vm180_vm0, %v176_v31  ;;  %v607_v31 = vmax.f32 %v511_v2, %v407_v61  ;;  %v612_v2 = vmax.f32 %v516_v23, %v412_v24  ;;  %v523_v23 = vmax.f32 %v411_v10, %v415_v46  ;;  %v420_v18 = vld [vmem:[#allocation2 + $0x1f0] sm:$0xff] }
  0x6a   : > { %355 = vst.msk [vmem:[#allocation2 + $0x290] sm:$0xff] %vm180_vm0, %v177_v32  ;;  %210 = vst.msk [vmem:[%s4833_s17 + $0xe8] sm:$0xff] %vm180_vm0, %v177_v32  ;;  %v608_v32 = vmax.f32 %v512_v4, %v408_v6  ;;  %v416_v4 = vld [vmem:[#allocation2 + $0x1d0] sm:$0xff]  ;;  %v5132_v19 = vmax.f32 %v695_v25, %v407_v61  ;;  %v711_v43 = vmax.f32 %v615_v7, %v419_v9  ;;  %v427_v54 = vld [vmem:[#allocation2 + $0x228] sm:$0xff] }
  0x6b   : > { %8841 = vst [vmem:[#allocation15_spill] sm:$0xff] %v5124_v12  ;;  %v703_v36 = vmax.f32 %v607_v31, %v411_v10  ;;  %356 = vst.msk [vmem:[#allocation2 + $0x2a8] sm:$0xff] %vm180_vm0, %v178_v14  ;;  %v524_v20 = vmax.f32 %v412_v24, %v416_v4  ;;  %v616_v61 = vmax.f32 %v520_v63, %v416_v4  ;;  %v424_v17 = vld [vmem:[#allocation2 + $0x210] sm:$0xff] }
  0x6c   : > { %8842 = vst [vmem:[#allocation16_spill] sm:$0xff] %v5132_v19  ;;  %v704_v8 = vmax.f32 %v608_v32, %v412_v24  ;;  %211 = vst.msk [vmem:[%s4833_s17 + $0xf0] sm:$0xff] %vm180_vm0, %v178_v14  ;;  %v708_v25 = vmax.f32 %v612_v2, %v416_v4  ;;  %v5144_v31 = vmax.f32 %v699_v56, %v411_v10  ;;  %v431_v53 = vld [vmem:[#allocation2 + $0x248] sm:$0xff] }
  0x6d   : > { %8843 = vst [vmem:[#allocation17_spill] sm:$0xff] %v5139_v34  ;;  %357 = vst.msk [vmem:[#allocation2 + $0x2b0] sm:$0xff] %vm180_vm0, %v179_v42  ;;  %v527_v32 = vmax.f32 %v415_v46, %v419_v9  ;;  %v619_v3 = vmax.f32 %v523_v23, %v419_v9  ;;  %v5146_v37 = vmax.f32 %v700_v28, %v412_v24 }
  0x6e   : > { %212 = vst.msk [vmem:[%s4833_s17 + $0xf8] sm:$0xff] %vm180_vm0, %v179_v42  ;;  %8844 = vst [vmem:[#allocation18_spill] sm:$0xff] %v5144_v31  ;;  %v5148_v14 = vmax.f32 %v703_v36, %v415_v46  ;;  %v528_v39 = vmax.f32 %v416_v4, %v420_v18  ;;  %v620_v6 = vmax.f32 %v524_v20, %v420_v18  ;;  %v428_v42 = vld [vmem:[#allocation2 + $0x230] sm:$0xff]  ;;  %v435_v26 = vld [vmem:[#allocation2 + $0x268] sm:$0xff] }
  0x6f   : > { %8845 = vst [vmem:[#allocation19_spill] sm:$0xff] %v5146_v37  ;;  %v5150_v63 = vmax.f32 %v704_v8, %v416_v4  ;;  %v5152_v2 = vmax.f32 %v707_v33, %v419_v9  ;;  %v531_v22 = vmax.f32 %v419_v9, %v423_v16  ;;  %v623_v11 = vmax.f32 %v527_v32, %v423_v16  ;;  %v432_v20 = vld [vmem:[#allocation2 + $0x250] sm:$0xff] }
  0x70   : > { %8846 = vst [vmem:[#allocation20_spill] sm:$0xff] %v5148_v14  ;;  %v712_v10 = vmax.f32 %v616_v61, %v420_v18  ;;  %v5154_v56 = vmax.f32 %v708_v25, %v420_v18  ;;  %v532_v23 = vmax.f32 %v420_v18, %v424_v17  ;;  %v624_v7 = vmax.f32 %v528_v39, %v424_v17  ;;  %v436_v47 = vld [vmem:[#allocation2 + $0x270] sm:$0xff] }
  0x71   : > { %8847 = vst [vmem:[#allocation21_spill] sm:$0xff] %v5150_v63  ;;  %8848 = vst [vmem:[#allocation22_spill] sm:$0xff] %v5152_v2  ;;  %v715_v28 = vmax.f32 %v619_v3, %v423_v16  ;;  %v5156_v24 = vmax.f32 %v711_v43, %v423_v16  ;;  %v535_v46 = vmax.f32 %v423_v16, %v427_v54  ;;  %v5158_v25 = vld [vmem:[#allocation2 + $0x290] sm:$0xff]  ;;  %v377_v16 = vld [vmem:[#allocation2 + $0x98] sm:$0xff] }
  0x72   : > { %8849 = vst [vmem:[#allocation23_spill] sm:$0xff] %v5154_v56  ;;  %v627_v36 = vmax.f32 %v531_v22, %v427_v54  ;;  %v716_v40 = vmax.f32 %v620_v6, %v424_v17  ;;  %v719_v8 = vmax.f32 %v623_v11, %v427_v54  ;;  %v536_v4 = vmax.f32 %v424_v17, %v428_v42  ;;  %v381_v22 = vld [vmem:[#allocation2 + $0xb8] sm:$0xff] }
  0x73   : > { %8850 = vst [vmem:[#allocation24_spill] sm:$0xff] %v5156_v24  ;;  %v628_v33 = vmax.f32 %v532_v23, %v428_v42  ;;  %v720_v9 = vmax.f32 %v624_v7, %v428_v42  ;;  %v539_v32 = vmax.f32 %v427_v54, %v431_v53  ;;  %v631_v15 = vmax.f32 %v535_v46, %v431_v53 }
  0x74   : > { %v723_v61 = vmax.f32 %v627_v36, %v431_v53  ;;  %v5160_v18 = vmax.f32 %v712_v10, %v424_v17  ;;  %v540_v39 = vmax.f32 %v428_v42, %v432_v20  ;;  %v632_v3 = vmax.f32 %v536_v4, %v432_v20  ;;  %v5169_v17 = vld [vmem:[#allocation2 + $0x80] sm:$0xff] }
  0x75   : > { %v724_v43 = vmax.f32 %v628_v33, %v432_v20  ;;  %v5162_v13 = vmax.f32 %v715_v28, %v427_v54  ;;  %v635_v11 = vmax.f32 %v539_v32, %v435_v26  ;;  %v727_v6 = vmax.f32 %v631_v15, %v435_v26  ;;  %v5171_v10 = vld [vmem:[#allocation2 + $0xa0] sm:$0xff]  ;;  %v439_v28 = vld [vmem:[#allocation2 + $0x288] sm:$0xff]  ;;  %v385_v15 = vld [vmem:[#allocation2 + $0xd8] sm:$0xff] }
  0x76   : > { %8851 = vst [vmem:[#allocation25_spill] sm:$0xff] %v5160_v18  ;;  %v544_v23 = vmax.f32 %v432_v20, %v436_v47  ;;  %v5164_v38 = vmax.f32 %v716_v40, %v428_v42  ;;  %v5166_v7 = vmax.f32 %v540_v39, %v436_v47  ;;  %v728_v46 = vmax.f32 %v632_v3, %v436_v47 }
  0x77   : > { %8852 = vst [vmem:[#allocation26_spill] sm:$0xff] %v5162_v13  ;;  %v548_v36 = vmax.f32 %v436_v47, %v5158_v25  ;;  %v5173_v4 = vmax.f32 %v719_v8, %v431_v53  ;;  %v5175_v33 = vmax.f32 %v720_v9, %v432_v20  ;;  %v5177_v54 = vmax.f32 %v723_v61, %v435_v26  ;;  %v5193_v26 = vld [vmem:[#allocation2 + $0x2b0] sm:$0xff]  ;;  %v5200_v61 = vld [vmem:[#allocation2 + $0xc0] sm:$0xff]  ;;  %v443_v53 = vld [vmem:[#allocation2 + $0x2a8] sm:$0xff] }
  0x78   : > { %8853 = vst [vmem:[#allocation27_spill] sm:$0xff] %v5164_v38  ;;  %v489_v32 = vmax.f32 %v377_v16, %v381_v22  ;;  %v5179_v40 = vmax.f32 %v724_v43, %v436_v47  ;;  %v731_v42 = vmax.f32 %v635_v11, %v439_v28  ;;  %v5181_v39 = vmax.f32 %v727_v6, %v439_v28 }
  0x79   : > { %8854 = vst [vmem:[#allocation28_spill] sm:$0xff] %v5173_v4  ;;  %8855 = vst [vmem:[#allocation29_spill] sm:$0xff] %v5175_v33  ;;  %v5184_v3 = vmax.f32 %v544_v23, %v5158_v25  ;;  %v5191_v20 = vmax.f32 %v728_v46, %v5158_v25  ;;  %v486_v47 = vmax.f32 %v5169_v17, %v5171_v10 }
  0x7a   : > { %8856 = vst [vmem:[#allocation30_spill] sm:$0xff] %v5177_v54  ;;  %8857 = vst [vmem:[#allocation31_spill] sm:$0xff] %v5179_v40  ;;  %v585_v8 = vmax.f32 %v489_v32, %v385_v15  ;;  %v5198_v9 = vmax.f32 %v548_v36, %v5193_v26  ;;  %v8860_v43 = vmax.f32 %v4953_v58, %v5076_v50  ;;  %v5217_v50 = vld [vmem:[#allocation2 + $0x118] sm:$0xff] }
  0x7b   : > { %8858 = vst [vmem:[#allocation32_spill] sm:$0xff] %v5181_v39  ;;  %8859 = vst [vmem:[#allocation33_spill] sm:$0xff] %v5191_v20  ;;  %v493_v11 = vmax.f32 %v381_v22, %v385_v15  ;;  %v8861_v6 = vmax.f32 %v4958_v60, %v4905_v41  ;;  %v582_v36 = vmax.f32 %v486_v47, %v5200_v61  ;;  %v5222_v41 = vld [vmem:[#allocation2 + $0xe0] sm:$0xff] }
  0x7c   : > { %v1313_v16 = vmax.f32 %v8860_v43, %v5083_v51  ;;  %v681_v46 = vmax.f32 %v585_v8, %v5186_v52  ;;  %v497_v28 = vmax.f32 %v385_v15, %v5186_v52  ;;  %v688_v32 = vmax.f32 %v5018_v21, %v5058_v44 }
  0x7d   : > { %v5210_v23 = vmax.f32 %v8861_v6, %v5058_v44  ;;  %v8863_v51 = vrot.slane %v4973_v0, 2  ;;  %v589_v8 = vmax.f32 %v493_v11, %v5186_v52  ;;  %v5227_v15 = vmax.f32 %v731_v42, %v443_v53  ;;  %v5234_v6 = vld [vmem:[#allocation2 + $0x100] sm:$0xff] }
  0x7e   : > { %v1506_v60 = vmax.f32 %v1313_v16, %v5100_v62  ;;  %v5230_v21 = vmax.f32 %v681_v46, %v5217_v50  ;;  %v678_v44 = vmax.f32 %v582_v36, %v5222_v41  ;;  %v593_v42 = vmax.f32 %v497_v28, %v5217_v50  ;;  %v5246_v46 = vld [vmem:[#allocation2 + $0x138] sm:$0xff] }
  0x7f   : > { %8862 = vst [vmem:[#allocation34_spill] sm:$0xff] %v5210_v23  ;;  %v1314_v22 = vmax.f32 %v5071_v49, %v8863_v51  ;;  %v8472_v47 = vrot.slane %v5210_v23, 1  ;;  %8864 = vst [vmem:[#allocation35_spill] sm:$0xff] %v5227_v15  ;;  %v8476_v43 = vrot.slane %v5210_v23, 2  ;;  %v685_v62 = vmax.f32 %v589_v8, %v5217_v50 }
  0x80   : > { %8865 = vst [vmem:[#allocation36_spill] sm:$0xff] %v5230_v21  ;;  %v1683_v49 = vmax.f32 %v1506_v60, %v5121_v55  ;;  %v1380_v53 = vrot.slane %v5230_v21, 3  ;;  %v5244_v11 = vmax.f32 %v678_v44, %v5234_v6  ;;  %v5250_v51 = vmax.f32 %v688_v32, %v5062_v48 }
  0x81   : > { %v1172_v16 = vmax.f32 %v5210_v23, %v8472_v47  ;;  %v1557_v55 = vrot.slane %v5230_v21, 4  ;;  %v5256_v60 = vmax.f32 %v685_v62, %v5246_v46  ;;  %v689_v8 = vmax.f32 %v593_v42, %v5246_v46  ;;  %v5266_v21 = vld [vmem:[#allocation2 + $0x158] sm:$0xff] }
  0x82   : > { %8866 = vst [vmem:[#allocation37_spill] sm:$0xff] %v5244_v11  ;;  %4312 = vst.msk [vmem:[%s4833_s17 + $0x102] sm:$0xff] %vm180_vm0, %v1683_v49  ;;  %v8868_v44 = vrot.slane %v4973_v0, 3  ;;  %v1039_v36 = vrot.slane %v5244_v11, 1  ;;  %v501_v49 = vmax.f32 %v5186_v52, %v5217_v50  ;;  %v8869_v28 = vrot.slane %v4973_v0, 4 }
  0x83   : > { %8867 = vst [vmem:[#allocation38_spill] sm:$0xff] %v5256_v60  ;;  %v1317_v32 = vmax.f32 %v1172_v16, %v8476_v43  ;;  %v1385_v15 = vrot.slane %v5256_v60, 3  ;;  %v1562_v43 = vrot.slane %v5256_v60, 4  ;;  %v8481_v39 = vrot.slane %v5250_v51, 1 }
  0x84   : > { %v1381_v47 = vsel %vm1376_vm1, %v8868_v44, %v1380_v53  ;;  %v1558_v42 = vsel %vm1553_vm4, %v8869_v28, %v1557_v55  ;;  %v5275_v53 = vmax.f32 %v689_v8, %v5266_v21  ;;  %v8870_v44 = vrot.slane %v4953_v58, 1 }
  0x85   : > { %v1507_v62 = vmax.f32 %v1314_v22, %v1381_v47  ;;  %v8489_v52 = vrot.slane %v5250_v51, 2  ;;  %v8871_v55 = vrot.slane %v5210_v23, 3  ;;  %v8872_v54 = vrot.slane %v5210_v23, 4 }
  0x86   : > { %v1041_v16 = vsel %vm1038_vm2, %v1039_v36, %v8870_v44  ;;  %v1175_v44 = vmax.f32 %v5250_v51, %v8481_v39  ;;  %v505_v39 = vmax.f32 %v5217_v50, %v5246_v46 }
  0x87   : > { %v1684_v22 = vmax.f32 %v1507_v62, %v1558_v42  ;;  %v1167_v47 = vmax.f32 %v5244_v11, %v1041_v16  ;;  %v1386_v28 = vsel %vm1376_vm1, %v8871_v55, %v1385_v15  ;;  %v1563_v36 = vsel %vm1553_vm4, %v8872_v54, %v1562_v43 }
  0x88   : > { %v1510_v0 = vmax.f32 %v1317_v32, %v1386_v28  ;;  %v1390_v62 = vrot.slane %v5275_v53, 3  ;;  %v8873_v42 = vrot.slane %v4953_v58, 2  ;;  %v8484_v15 = vrot.slane %v5250_v51, 4 }
  0x89   : > { %4313 = vst.msk [vmem:[%s4833_s17 + $0x10a] sm:$0x3f] %vm1734_vm5, %v1684_v22  ;;  %v597_v32 = vmax.f32 %v501_v49, %v5246_v46  ;;  %v692_v55 = vmax.f32 %v5130_v5, %v5062_v48  ;;  %v1320_v43 = vmax.f32 %v1175_v44, %v8489_v52  ;;  %v1567_v28 = vrot.slane %v5275_v53, 4 }
  0x8a   : > { %v1312_v16 = vmax.f32 %v1167_v47, %v8873_v42  ;;  %v1687_v54 = vmax.f32 %v1510_v0, %v1563_v36  ;;  %v8874_v22 = vrot.slane %v4953_v58, 3  ;;  %v8875_v47 = vrot.slane %v5250_v51, 3  ;;  %v5325_v36 = vld [vmem:[#allocation2 + $0x178] sm:$0xff] }
  0x8b   : > { %v693_v49 = vmax.f32 %v597_v32, %v5266_v21  ;;  %v5315_v0 = vmax.f32 %v692_v55, %v5093_v59  ;;  %v8876_v48 = vmax.f32 %v5166_v7, %v5158_v25  ;;  %v601_v44 = vmax.f32 %v505_v39, %v5266_v21 }
  0x8c   : > { %v1505_v8 = vmax.f32 %v1312_v16, %v8874_v22  ;;  %v1391_v42 = vsel %vm1376_vm1, %v8875_v47, %v1390_v62  ;;  %4316 = vst.msk [vmem:[%s4833_s17 + $0x11a] sm:$0x3f] %vm1734_vm5, %v1687_v54  ;;  %v8482_v62 = vrot.slane %v5139_v34, 1  ;;  %v8878_v16 = vrot.slane %v4953_v58, 4  ;;  %v5348_v47 = vld [vmem:[#allocation2 + $0x198] sm:$0xff] }
  0x8d   : > { %v5321_v5 = vmax.f32 %v8876_v48, %v5193_v26  ;;  %v1513_v50 = vmax.f32 %v1320_v43, %v1391_v42  ;;  %v1568_v32 = vsel %vm1553_vm4, %v8484_v15, %v1567_v28  ;;  %v5335_v25 = vmax.f32 %v693_v49, %v5325_v36 }
  0x8e   : > { %v1682_v59 = vmax.f32 %v1505_v8, %v8878_v16  ;;  %v8483_v7 = vrot.slane %v5315_v0, 1  ;;  %v8486_v54 = vrot.slane %v5315_v0, 3  ;;  %v697_v39 = vmax.f32 %v601_v44, %v5325_v36 }
  0x8f   : > { %8877 = vst [vmem:[#allocation39_spill] sm:$0xff] %v5321_v5  ;;  %v1690_v55 = vmax.f32 %v1513_v50, %v1568_v32  ;;  %v8485_v43 = vrot.slane %v5139_v34, 2  ;;  %v8487_v28 = vrot.slane %v5315_v0, 2  ;;  %v8488_v22 = vrot.slane %v5315_v0, 4 }
  0x90   : > { %4311 = vst.msk [vmem:[%s4833_s17 + $0xfa] sm:$0xc0] %vm1731_vm6, %v1682_v59  ;;  %v1178_v8 = vmax.f32 %v5315_v0, %v8483_v7  ;;  %v1181_v42 = vmax.f32 %v5139_v34, %v8482_v62  ;;  %v1395_v49 = vrot.slane %v5335_v25, 3  ;;  %v5357_v48 = vmax.f32 %v697_v39, %v5348_v47 }
  0x91   : > { %4319 = vst.msk [vmem:[%s4833_s17 + $0x12a] sm:$0x3f] %vm1734_vm5, %v1690_v55  ;;  %v8491_v50 = vrot.slane %v5139_v34, 3  ;;  %v509_v44 = vmax.f32 %v5246_v46, %v5266_v21  ;;  %v1572_v59 = vrot.slane %v5335_v25, 4  ;;  %v8494_v55 = vrot.slane %v5139_v34, 4 }
  0x92   : > { %8879 = vst [vmem:[#allocation40_spill] sm:$0xff] %v5357_v48  ;;  %v1323_v16 = vmax.f32 %v1178_v8, %v8487_v28  ;;  %v1326_v32 = vmax.f32 %v1181_v42, %v8485_v43  ;;  %v1396_v39 = vsel %vm1376_vm1, %v8486_v54, %v1395_v49  ;;  %v1400_v62 = vrot.slane %v5357_v48, 3 }
  0x93   : > { %v605_v7 = vmax.f32 %v509_v44, %v5325_v36  ;;  %v8490_v46 = vrot.slane %v5146_v37, 1  ;;  %v1573_v8 = vsel %vm1553_vm4, %v8488_v22, %v1572_v59  ;;  %v1577_v42 = vrot.slane %v5357_v48, 4  ;;  %v413_v59 = vld [vmem:[#allocation2 + $0x1b8] sm:$0xff] }
  0x94   : > { %v1516_v15 = vmax.f32 %v1323_v16, %v1396_v39  ;;  %v8493_v43 = vrot.slane %v5146_v37, 2  ;;  %v1401_v49 = vsel %vm1376_vm1, %v8491_v50, %v1400_v62  ;;  %v8496_v16 = vrot.slane %v5146_v37, 3 }
  0x95   : > { %v701_v54 = vmax.f32 %v605_v7, %v5348_v47  ;;  %v1184_v44 = vmax.f32 %v5146_v37, %v8490_v46  ;;  %v1519_v28 = vmax.f32 %v1326_v32, %v1401_v49  ;;  %v513_v22 = vmax.f32 %v5266_v21, %v5325_v36 }
  0x96   : > { %v1693_v39 = vmax.f32 %v1516_v15, %v1573_v8  ;;  %v8492_v52 = vrot.slane %v5150_v63, 1  ;;  %v1578_v62 = vsel %vm1553_vm4, %v8494_v55, %v1577_v42  ;;  %v8495_v8 = vrot.slane %v5150_v63, 2 }
  0x97   : > { %v5393_v7 = vmax.f32 %v701_v54, %v413_v59  ;;  %v1329_v46 = vmax.f32 %v1184_v44, %v8493_v43  ;;  %v1696_v15 = vmax.f32 %v1519_v28, %v1578_v62  ;;  %v609_v32 = vmax.f32 %v513_v22, %v5348_v47  ;;  %v417_v43 = vld [vmem:[#allocation2 + $0x1d8] sm:$0xff] }
  0x98   : > { %4322 = vst.msk [vmem:[%s4833_s17 + $0x13a] sm:$0x3f] %vm1734_vm5, %v1693_v39  ;;  %v1187_v21 = vmax.f32 %v5150_v63, %v8492_v52  ;;  %v517_v49 = vmax.f32 %v5325_v36, %v5348_v47  ;;  %v8497_v44 = vrot.slane %v5154_v56, 1  ;;  %v8500_v62 = vrot.slane %v5160_v18, 1 }
  0x99   : > { %8880 = vst [vmem:[#allocation41_spill] sm:$0xff] %v5393_v7  ;;  %v1405_v42 = vrot.slane %v5393_v7, 3  ;;  %4325 = vst.msk [vmem:[%s4833_s17 + $0x14a] sm:$0x3f] %vm1734_vm5, %v1696_v15  ;;  %v1582_v28 = vrot.slane %v5393_v7, 4  ;;  %v705_v22 = vmax.f32 %v609_v32, %v413_v59 }
  0x9a   : > { %v1332_v39 = vmax.f32 %v1187_v21, %v8495_v8  ;;  %v613_v55 = vmax.f32 %v517_v49, %v413_v59  ;;  %v1190_v36 = vmax.f32 %v5154_v56, %v8497_v44  ;;  %v521_v21 = vmax.f32 %v5348_v47, %v413_v59 }
  0x9b   : > { %v1406_v52 = vsel %vm1376_vm1, %v8496_v16, %v1405_v42  ;;  %v5423_v50 = vmax.f32 %v705_v22, %v417_v43  ;;  %v8882_v8 = vrot.slane %v5146_v37, 4 }
  0x9c   : > { %v1522_v54 = vmax.f32 %v1329_v46, %v1406_v52  ;;  %v709_v16 = vmax.f32 %v613_v55, %v417_v43  ;;  %v421_v52 = vld [vmem:[#allocation2 + $0x1f8] sm:$0xff]  ;;  %v8883_v46 = vrot.slane %v5154_v56, 2  ;;  %v617_v60 = vmax.f32 %v521_v21, %v417_v43 }
  0x9d   : > { %8881 = vst [vmem:[#allocation42_spill] sm:$0xff] %v5423_v50  ;;  %v1583_v42 = vsel %vm1553_vm4, %v8882_v8, %v1582_v28  ;;  %v1410_v15 = vrot.slane %v5423_v50, 3  ;;  %v1587_v32 = vrot.slane %v5423_v50, 4  ;;  %v1193_v55 = vmax.f32 %v5160_v18, %v8500_v62  ;;  %v425_v50 = vld [vmem:[#allocation2 + $0x218] sm:$0xff] }
  0x9e   : > { %v1699_v44 = vmax.f32 %v1522_v54, %v1583_v42  ;;  %v1335_v22 = vmax.f32 %v1190_v36, %v8883_v46  ;;  %v5436_v47 = vmax.f32 %v709_v16, %v421_v52  ;;  %v8885_v54 = vrot.slane %v5150_v63, 3 }
  0x9f   : > { %v713_v42 = vmax.f32 %v617_v60, %v421_v52  ;;  %v525_v21 = vmax.f32 %v413_v59, %v417_v43  ;;  %v8886_v16 = vrot.slane %v5150_v63, 4  ;;  %v8507_v60 = vrot.slane %v5164_v38, 1 }
  0xa0   : > { %8884 = vst [vmem:[#allocation43_spill] sm:$0xff] %v5436_v47  ;;  %4328 = vst.msk [vmem:[%s4833_s17 + $0x15a] sm:$0x3f] %vm1734_vm5, %v1699_v44  ;;  %v1411_v28 = vsel %vm1376_vm1, %v8885_v54, %v1410_v15  ;;  %v1415_v62 = vrot.slane %v5436_v47, 3  ;;  %v1592_v44 = vrot.slane %v5436_v47, 4  ;;  %v8888_v59 = vrot.slane %v5154_v56, 3 }
  0xa1   : > { %v1525_v46 = vmax.f32 %v1332_v39, %v1411_v28  ;;  %v1588_v49 = vsel %vm1553_vm4, %v8886_v16, %v1587_v32  ;;  %v5454_v7 = vmax.f32 %v713_v42, %v425_v50  ;;  %v621_v15 = vmax.f32 %v525_v21, %v421_v52 }
  0xa2   : > { %v1416_v39 = vsel %vm1376_vm1, %v8888_v59, %v1415_v62  ;;  %v8889_v32 = vrot.slane %v5160_v18, 2  ;;  %v8508_v16 = vrot.slane %v5164_v38, 2  ;;  %v8890_v8 = vrot.slane %v5154_v56, 4 }
  0xa3   : > { %8887 = vst [vmem:[#allocation44_spill] sm:$0xff] %v5454_v7  ;;  %v1702_v54 = vmax.f32 %v1525_v46, %v1588_v49  ;;  %v1528_v36 = vmax.f32 %v1335_v22, %v1416_v39  ;;  %v1420_v42 = vrot.slane %v5454_v7, 3  ;;  %v717_v21 = vmax.f32 %v621_v15, %v425_v50  ;;  %v5469_v49 = vld [vmem:[#allocation2 + $0x238] sm:$0xff] }
  0xa4   : > { %v1338_v28 = vmax.f32 %v1193_v55, %v8889_v32  ;;  %v1593_v47 = vsel %vm1553_vm4, %v8890_v8, %v1592_v44  ;;  %v1196_v62 = vmax.f32 %v5164_v38, %v8507_v60  ;;  %v8510_v55 = vrot.slane %v5164_v38, 3 }
  0xa5   : > { %4331 = vst.msk [vmem:[%s4833_s17 + $0x16a] sm:$0x3f] %vm1734_vm5, %v1702_v54  ;;  %v529_v46 = vmax.f32 %v417_v43, %v421_v52  ;;  %v8509_v22 = vrot.slane %v5175_v33, 1  ;;  %v1705_v59 = vmax.f32 %v1528_v36, %v1593_v47  ;;  %v8891_v8 = vrot.slane %v5160_v18, 3 }
  0xa6   : > { %v1597_v15 = vrot.slane %v5454_v7, 4  ;;  %v5481_v54 = vmax.f32 %v717_v21, %v5469_v49  ;;  %v1341_v32 = vmax.f32 %v1196_v62, %v8508_v16  ;;  %v8893_v47 = vrot.slane %v5160_v18, 4  ;;  %v433_v16 = vld [vmem:[#allocation2 + $0x258] sm:$0xff] }
  0xa7   : > { %v1421_v44 = vsel %vm1376_vm1, %v8891_v8, %v1420_v42  ;;  %v625_v43 = vmax.f32 %v529_v46, %v425_v50  ;;  %4334 = vst.msk [vmem:[%s4833_s17 + $0x17a] sm:$0x3f] %vm1734_vm5, %v1705_v59  ;;  %v533_v46 = vmax.f32 %v421_v52, %v425_v50  ;;  %v8512_v60 = vrot.slane %v5179_v40, 1 }
  0xa8   : > { %8892 = vst [vmem:[#allocation45_spill] sm:$0xff] %v5481_v54  ;;  %v1531_v39 = vmax.f32 %v1338_v28, %v1421_v44  ;;  %v1598_v36 = vsel %vm1553_vm4, %v8893_v47, %v1597_v15  ;;  %v1425_v42 = vrot.slane %v5481_v54, 3  ;;  %v1602_v8 = vrot.slane %v5481_v54, 4 }
  0xa9   : > { %v1199_v28 = vmax.f32 %v5175_v33, %v8509_v22  ;;  %v721_v62 = vmax.f32 %v625_v43, %v5469_v49  ;;  %v8511_v44 = vrot.slane %v5175_v33, 2  ;;  %v8515_v47 = vrot.slane %v5179_v40, 2 }
  0xaa   : > { %v1708_v21 = vmax.f32 %v1531_v39, %v1598_v36  ;;  %v1426_v59 = vsel %vm1376_vm1, %v8510_v55, %v1425_v42  ;;  %v8894_v39 = vrot.slane %v5164_v38, 4  ;;  %v629_v36 = vmax.f32 %v533_v46, %v5469_v49  ;;  %v5522_v46 = vld [vmem:[#allocation2 + $0x278] sm:$0xff] }
  0xab   : > { %v1534_v22 = vmax.f32 %v1341_v32, %v1426_v59  ;;  %v5509_v52 = vmax.f32 %v721_v62, %v433_v16  ;;  %v1344_v42 = vmax.f32 %v1199_v28, %v8511_v44  ;;  %v1202_v55 = vmax.f32 %v5179_v40, %v8512_v60 }
  0xac   : > { %4337 = vst.msk [vmem:[%s4833_s17 + $0x18a] sm:$0x3f] %vm1734_vm5, %v1708_v21  ;;  %v1603_v43 = vsel %vm1553_vm4, %v8894_v39, %v1602_v8  ;;  %v537_v32 = vmax.f32 %v425_v50, %v5469_v49  ;;  %v725_v8 = vmax.f32 %v629_v36, %v433_v16  ;;  %v8516_v15 = vrot.slane %v5191_v20, 1 }
  0xad   : > { %8895 = vst [vmem:[#allocation46_spill] sm:$0xff] %v5509_v52  ;;  %v1711_v21 = vmax.f32 %v1534_v22, %v1603_v43  ;;  %v1430_v59 = vrot.slane %v5509_v52, 3  ;;  %v1607_v39 = vrot.slane %v5509_v52, 4  ;;  %v8896_v60 = vrot.slane %v5175_v33, 3 }
  0xae   : > { %v633_v44 = vmax.f32 %v537_v32, %v433_v16  ;;  %v5532_v22 = vmax.f32 %v725_v8, %v5522_v46  ;;  %v1347_v43 = vmax.f32 %v1202_v55, %v8515_v47  ;;  %v8519_v36 = vrot.slane %v5191_v20, 2  ;;  %v441_v8 = vld [vmem:[#allocation2 + $0x298] sm:$0xff] }
  0xaf   : > { %4340 = vst.msk [vmem:[%s4833_s17 + $0x19a] sm:$0x3f] %vm1734_vm5, %v1711_v21  ;;  %v1431_v50 = vsel %vm1376_vm1, %v8896_v60, %v1430_v59  ;;  %v8898_v28 = vrot.slane %v5175_v33, 4  ;;  %v1205_v60 = vmax.f32 %v5191_v20, %v8516_v15  ;;  %v541_v55 = vmax.f32 %v5469_v49, %v433_v16 }
  0xb0   : > { %8897 = vst [vmem:[#allocation47_spill] sm:$0xff] %v5532_v22  ;;  %v1537_v62 = vmax.f32 %v1344_v42, %v1431_v50  ;;  %v729_v21 = vmax.f32 %v633_v44, %v5522_v46  ;;  %v1435_v59 = vrot.slane %v5532_v22, 3  ;;  %v8520_v42 = vrot.slane %v5321_v5, 1 }
  0xb1   : > { %v1608_v32 = vsel %vm1553_vm4, %v8898_v28, %v1607_v39  ;;  %v1612_v47 = vrot.slane %v5532_v22, 4  ;;  %v8900_v28 = vrot.slane %v5179_v40, 3  ;;  %v1350_v54 = vmax.f32 %v1205_v60, %v8519_v36  ;;  %v448_v22 = vld [vmem:[#allocation2 + $0x2d0] sm:$0xff] }
  0xb2   : > { %v1714_v50 = vmax.f32 %v1537_v62, %v1608_v32  ;;  %v5549_v39 = vmax.f32 %v729_v21, %v441_v8  ;;  %v637_v52 = vmax.f32 %v541_v55, %v5522_v46  ;;  %v1208_v49 = vmax.f32 %v5321_v5, %v8520_v42 }
  0xb3   : > { %v1436_v15 = vsel %vm1376_vm1, %v8900_v28, %v1435_v59  ;;  %v8901_v32 = vrot.slane %v5179_v40, 4  ;;  %v8536_v59 = vrot.slane %v5321_v5, 2  ;;  %v545_v36 = vmax.f32 %v433_v16, %v5522_v46 }
  0xb4   : > { %8899 = vst [vmem:[#allocation48_spill] sm:$0xff] %v5549_v39  ;;  %4343 = vst.msk [vmem:[%s4833_s17 + $0x1aa] sm:$0x3f] %vm1734_vm5, %v1714_v50  ;;  %v1540_v62 = vmax.f32 %v1347_v43, %v1436_v15  ;;  %v1440_v44 = vrot.slane %v5549_v39, 3  ;;  %v1617_v60 = vrot.slane %v5549_v39, 4  ;;  %v733_v28 = vmax.f32 %v637_v52, %v441_v8  ;;  %v445_v43 = vld [vmem:[#allocation2 + $0x2b8] sm:$0xff] }
  0xb5   : > { %v1613_v21 = vsel %vm1553_vm4, %v8901_v32, %v1612_v47  ;;  %v8902_v50 = vrot.slane %v5191_v20, 3  ;;  %v1353_v47 = vmax.f32 %v1208_v49, %v8536_v59  ;;  %v736_v32 = vmax.f32 %v5184_v3, %v5193_v26 }
  0xb6   : > { %v1717_v42 = vmax.f32 %v1540_v62, %v1613_v21  ;;  %v5578_v39 = vmax.f32 %v733_v28, %v445_v43  ;;  %v641_v52 = vmax.f32 %v545_v36, %v441_v8  ;;  %v549_v55 = vmax.f32 %v5522_v46, %v441_v8 }
  0xb7   : > { %v1441_v15 = vsel %vm1376_vm1, %v8902_v50, %v1440_v44  ;;  %v8904_v16 = vrot.slane %v5191_v20, 4  ;;  %v5586_v62 = vmax.f32 %v736_v32, %v448_v22  ;;  %v740_v49 = vmax.f32 %v5198_v9, %v448_v22  ;;  %v452_v50 = vld [vmem:[#allocation2 + $0x2f0] sm:$0xff] }
  0xb8   : > { %v1543_v7 = vmax.f32 %v1350_v54, %v1441_v15  ;;  %8903 = vst [vmem:[#allocation49_spill] sm:$0xff] %v5578_v39  ;;  %4346 = vst.msk [vmem:[%s4833_s17 + $0x1ba] sm:$0x3f] %vm1734_vm5, %v1717_v42  ;;  %v490_v3 = vmax.f32 %v5171_v10, %v5200_v61  ;;  %v1445_v54 = vrot.slane %v5578_v39, 3  ;;  %v8535_v36 = vrot.slane %v5321_v5, 4  ;;  %v449_v42 = vld [vmem:[#allocation2 + $0x2d8] sm:$0xff] }
  0xb9   : > { %v1618_v44 = vsel %vm1553_vm4, %v8904_v16, %v1617_v60  ;;  %8905 = vst [vmem:[#allocation50_spill] sm:$0xff] %v5586_v62  ;;  %v737_v46 = vmax.f32 %v641_v52, %v445_v43  ;;  %v1622_v8 = vrot.slane %v5578_v39, 4  ;;  %v8531_v21 = vrot.slane %v5586_v62, 1 }
  0xba   : > { %v1720_v26 = vmax.f32 %v1543_v7, %v1618_v44  ;;  %v8530_v60 = vrot.slane %v5586_v62, 2  ;;  %v8529_v28 = vrot.slane %v5586_v62, 3  ;;  %v8906_v10 = vrot.slane %v5321_v5, 3 }
  0xbb   : > { %v5602_v7 = vmax.f32 %v737_v46, %v449_v42  ;;  %v8527_v22 = vrot.slane %v5586_v62, 4  ;;  %v645_v15 = vmax.f32 %v549_v55, %v445_v43  ;;  %v1211_v52 = vmax.f32 %v5586_v62, %v8531_v21 }
  0xbc   : > { %4349 = vst.msk [vmem:[%s4833_s17 + $0x1ca] sm:$0x3f] %vm1734_vm5, %v1720_v26  ;;  %v1446_v9 = vsel %vm1376_vm1, %v8906_v10, %v1445_v54  ;;  %v5608_v16 = vmax.f32 %v740_v49, %v452_v50  ;;  %v586_v44 = vmax.f32 %v490_v3, %v5222_v41  ;;  %v1623_v26 = vsel %vm1553_vm4, %v8535_v36, %v1622_v8 }
  0xbd   : > { %8907 = vst [vmem:[#allocation51_spill] sm:$0xff] %v5602_v7  ;;  %v1546_v32 = vmax.f32 %v1353_v47, %v1446_v9  ;;  %v1450_v54 = vrot.slane %v5602_v7, 3  ;;  %v1627_v46 = vrot.slane %v5602_v7, 4  ;;  %v741_v10 = vmax.f32 %v645_v15, %v449_v42  ;;  %v453_v47 = vld [vmem:[#allocation2 + $0x2f8] sm:$0xff] }
  0xbe   : > { %8908 = vst [vmem:[#allocation52_spill] sm:$0xff] %v5608_v16  ;;  %v1356_v43 = vmax.f32 %v1211_v52, %v8530_v60  ;;  %v8528_v9 = vrot.slane %v5608_v16, 1  ;;  %v8533_v49 = vrot.slane %v5608_v16, 2  ;;  %v8532_v42 = vrot.slane %v5608_v16, 3 }
  0xbf   : > { %v1723_v55 = vmax.f32 %v1546_v32, %v1623_v26  ;;  %v1451_v3 = vsel %vm1376_vm1, %v8529_v28, %v1450_v54  ;;  %v1628_v8 = vsel %vm1553_vm4, %v8527_v22, %v1627_v46  ;;  %v5626_v50 = vmax.f32 %v741_v10, %v453_v47  ;;  %v5638_v10 = vld [vmem:[#allocation2 + $0x120] sm:$0xff] }
  0xc0   : > { %v1549_v15 = vmax.f32 %v1356_v43, %v1451_v3  ;;  %v1214_v32 = vmax.f32 %v5608_v16, %v8528_v9  ;;  %v8534_v52 = vrot.slane %v5608_v16, 4  ;;  %v682_v26 = vmax.f32 %v586_v44, %v5234_v6 }
  0xc1   : > { %8909 = vst [vmem:[#allocation53_spill] sm:$0xff] %v5626_v50  ;;  %4352 = vst.msk [vmem:[%s4833_s17 + $0x1da] sm:$0x3f] %vm1734_vm5, %v1723_v55  ;;  %v1455_v54 = vrot.slane %v5626_v50, 3  ;;  %v1632_v46 = vrot.slane %v5626_v50, 4  ;;  %v1045_v47 = vrot.slane %v5124_v12, 1 }
  0xc2   : > { %v1219_v55 = vrot.slane %v5124_v12, 2  ;;  %v1726_v43 = vmax.f32 %v1549_v15, %v1628_v8  ;;  %v1359_v3 = vmax.f32 %v1214_v32, %v8533_v49  ;;  %v5645_v22 = vmax.f32 %v682_v26, %v5638_v10 }
  0xc3   : > { %v1382_v9 = vrot.slane %v5124_v12, 3  ;;  %v1456_v44 = vsel %vm1376_vm1, %v8532_v42, %v1455_v54  ;;  %v1559_v60 = vrot.slane %v5124_v12, 4  ;;  %v8911_v21 = vrot.slane %v5210_v23, 1 }
  0xc4   : > { %8910 = vst [vmem:[#allocation54_spill] sm:$0xff] %v5645_v22  ;;  %4355 = vst.msk [vmem:[%s4833_s17 + $0x1ea] sm:$0x3f] %vm1734_vm5, %v1726_v43  ;;  %v1552_v15 = vmax.f32 %v1359_v3, %v1456_v44  ;;  %v1633_v32 = vsel %vm1553_vm4, %v8534_v52, %v1632_v46  ;;  %v1044_v26 = vrot.slane %v5645_v22, 1  ;;  %v8912_v42 = vrot.slane %v5210_v23, 2 }
  0xc5   : > { %v1048_v8 = vsel %vm1038_vm2, %v1045_v47, %v8911_v21  ;;  %v8913_v28 = vrot.slane %v5210_v23, 3  ;;  %v8914_v43 = vrot.slane %v5210_v23, 4  ;;  %v494_v44 = vmax.f32 %v5200_v61, %v5222_v41 }
  0xc6   : > { %v1171_v54 = vmax.f32 %v5124_v12, %v1048_v8  ;;  %v1221_v49 = vsel %vm1215_vm3, %v1219_v55, %v8912_v42  ;;  %v1729_v46 = vmax.f32 %v1552_v15, %v1633_v32  ;;  %v1046_v52 = vsel %vm1038_vm2, %v1044_v26, %v1045_v47 }
  0xc7   : > { %v1384_v21 = vsel %vm1376_vm1, %v1382_v9, %v8913_v28  ;;  %v1561_v3 = vsel %vm1553_vm4, %v1559_v60, %v8914_v43  ;;  %v687_v8 = vmax.f32 %v5033_v27, %v5037_v30  ;;  %v1170_v42 = vmax.f32 %v5645_v22, %v1046_v52 }
  0xc8   : > { %v1316_v36 = vmax.f32 %v1171_v54, %v1221_v49  ;;  %v590_v59 = vmax.f32 %v494_v44, %v5234_v6  ;;  %v498_v28 = vmax.f32 %v5222_v41, %v5234_v6  ;;  %v8915_v43 = vmax.f32 %v4884_v29, %v4893_v35  ;;  %4358 = vst.msk [vmem:[%s4833_s17 + $0x1fa] sm:$0x3f] %vm1734_vm5, %v1729_v46 }
  0xc9   : > { %v5689_v49 = vmax.f32 %v687_v8, %v5060_v45  ;;  %v502_v27 = vmax.f32 %v5234_v6, %v5638_v10  ;;  %v1315_v47 = vmax.f32 %v1170_v42, %v1219_v55  ;;  %v1228_v39 = vrot.slane %v5132_v19, 2 }
  0xca   : > { %v595_v50 = vmax.f32 %v8915_v43, %v5037_v30  ;;  %v1509_v61 = vmax.f32 %v1316_v36, %v1384_v21  ;;  %v686_v41 = vmax.f32 %v590_v59, %v5638_v10  ;;  %v594_v15 = vmax.f32 %v498_v28, %v5638_v10  ;;  %v5697_v30 = vld [vmem:[#allocation2 + $0x140] sm:$0xff] }
  0xcb   : > { %v1050_v36 = vrot.slane %v5689_v49, 1  ;;  %v1222_v32 = vrot.slane %v5689_v49, 2  ;;  %v1387_v26 = vrot.slane %v5689_v49, 3  ;;  %v1508_v54 = vmax.f32 %v1315_v47, %v1382_v9  ;;  %v5726_v47 = vld [vmem:[#allocation2 + $0x160] sm:$0xff] }
  0xcc   : > { %v691_v29 = vmax.f32 %v595_v50, %v5060_v45  ;;  %v1686_v35 = vmax.f32 %v1509_v61, %v1561_v3  ;;  %v5703_v6 = vmax.f32 %v686_v41, %v5697_v30  ;;  %v1564_v55 = vrot.slane %v5689_v49, 4 }
  0xcd   : > { %v690_v59 = vmax.f32 %v594_v15, %v5697_v30  ;;  %v8916_v45 = vrot.slane %v5250_v51, 1  ;;  %v8917_v21 = vrot.slane %v5250_v51, 2  ;;  %v8918_v9 = vrot.slane %v5250_v51, 3 }
  0xce   : > { %4315 = vst.msk [vmem:[%s4833_s17 + $0x112] sm:$0xff] %vm180_vm0, %v1686_v35  ;;  %v5719_v46 = vmax.f32 %v691_v29, %v5091_v57  ;;  %v1685_v8 = vmax.f32 %v1508_v54, %v1559_v60  ;;  %v1049_v42 = vrot.slane %v5703_v6, 1  ;;  %v8919_v43 = vrot.slane %v5250_v51, 4 }
  0xcf   : > { %v1053_v50 = vsel %vm1038_vm2, %v1050_v36, %v8916_v45  ;;  %v1224_v3 = vsel %vm1215_vm3, %v1222_v32, %v8917_v21  ;;  %v1389_v44 = vsel %vm1376_vm1, %v1387_v26, %v8918_v9  ;;  %v5729_v41 = vmax.f32 %v690_v59, %v5726_v47 }
  0xd0   : > { %v1174_v28 = vmax.f32 %v5689_v49, %v1053_v50  ;;  %v1566_v61 = vsel %vm1553_vm4, %v1564_v55, %v8919_v43  ;;  %v1055_v15 = vrot.slane %v5719_v46, 1  ;;  %v1225_v35 = vrot.slane %v5719_v46, 2  ;;  %4314 = vst.msk [vmem:[%s4833_s17 + $0x10a] sm:$0xc0] %vm1731_vm6, %v1685_v8 }
  0xd1   : > { %v1392_v57 = vrot.slane %v5719_v46, 3  ;;  %v1051_v60 = vsel %vm1038_vm2, %v1049_v42, %v1050_v36  ;;  %v1569_v54 = vrot.slane %v5719_v46, 4  ;;  %v598_v45 = vmax.f32 %v502_v27, %v5697_v30 }
  0xd2   : > { %v1319_v29 = vmax.f32 %v1174_v28, %v1224_v3  ;;  %v1173_v50 = vmax.f32 %v5703_v6, %v1051_v60  ;;  %v1054_v59 = vrot.slane %v5729_v41, 1  ;;  %v8920_v21 = vrot.slane %v5315_v0, 1 }
  0xd3   : > { %v8921_v43 = vrot.slane %v5315_v0, 2  ;;  %v8922_v3 = vrot.slane %v5315_v0, 3  ;;  %v8923_v42 = vrot.slane %v5315_v0, 4  ;;  %v1397_v23 = vrot.slane %v5132_v19, 3 }
  0xd4   : > { %v1058_v9 = vsel %vm1038_vm2, %v1055_v15, %v8920_v21  ;;  %v1512_v8 = vmax.f32 %v1319_v29, %v1389_v44  ;;  %v1318_v60 = vmax.f32 %v1173_v50, %v1222_v32  ;;  %v1056_v7 = vsel %vm1038_vm2, %v1054_v59, %v1055_v15 }
  0xd5   : > { %v1227_v52 = vsel %vm1215_vm3, %v1225_v35, %v8921_v43  ;;  %v1177_v36 = vmax.f32 %v5719_v46, %v1058_v9  ;;  %v1394_v27 = vsel %vm1376_vm1, %v1392_v57, %v8922_v3  ;;  %v1571_v28 = vsel %vm1553_vm4, %v1569_v54, %v8923_v42  ;;  %v5758_v9 = vld [vmem:[#allocation2 + $0x180] sm:$0xff] }
  0xd6   : > { %v694_v21 = vmax.f32 %v598_v45, %v5726_v47  ;;  %v1689_v43 = vmax.f32 %v1512_v8, %v1566_v61  ;;  %v1176_v44 = vmax.f32 %v5729_v41, %v1056_v7  ;;  %v1511_v3 = vmax.f32 %v1318_v60, %v1387_v26 }
  0xd7   : > { %v1322_v29 = vmax.f32 %v1177_v36, %v1227_v52  ;;  %v1574_v32 = vrot.slane %v5132_v19, 4  ;;  %v8925_v15 = vrot.slane %v5139_v34, 1  ;;  %v8926_v45 = vrot.slane %v5132_v19, 1 }
  0xd8   : > { %v5762_v12 = vmax.f32 %v694_v21, %v5758_v9  ;;  %4318 = vst.msk [vmem:[%s4833_s17 + $0x122] sm:$0xff] %vm180_vm0, %v1689_v43  ;;  %v1321_v7 = vmax.f32 %v1176_v44, %v1225_v35  ;;  %v8927_v26 = vrot.slane %v5139_v34, 2  ;;  %v1688_v8 = vmax.f32 %v1511_v3, %v1564_v55 }
  0xd9   : > { %v1063_v61 = vsel %vm1038_vm2, %v8926_v45, %v8925_v15  ;;  %v1515_v52 = vmax.f32 %v1322_v29, %v1394_v27  ;;  %v8928_v42 = vrot.slane %v5139_v34, 3  ;;  %v8929_v21 = vrot.slane %v5139_v34, 4 }
  0xda   : > { %8924 = vst [vmem:[#allocation55_spill] sm:$0xff] %v5762_v12  ;;  %v1180_v50 = vmax.f32 %v5132_v19, %v1063_v61  ;;  %v1230_v59 = vsel %vm1215_vm3, %v1228_v39, %v8927_v26  ;;  %v1059_v36 = vrot.slane %v5762_v12, 1  ;;  %v1514_v35 = vmax.f32 %v1321_v7, %v1392_v57  ;;  %4317 = vst.msk [vmem:[%s4833_s17 + $0x11a] sm:$0xc0] %vm1731_vm6, %v1688_v8 }
  0xdb   : > { %v1399_v60 = vsel %vm1376_vm1, %v1397_v23, %v8928_v42  ;;  %v1576_v43 = vsel %vm1553_vm4, %v1574_v32, %v8929_v21  ;;  %v1692_v27 = vmax.f32 %v1515_v52, %v1571_v28  ;;  %v506_v29 = vmax.f32 %v5638_v10, %v5697_v30 }
  0xdc   : > { %v1325_v44 = vmax.f32 %v1180_v50, %v1230_v59  ;;  %v8930_v55 = vmov %v8926_v45  ;;  %v1065_v15 = vrot.slane %v5144_v31, 1  ;;  %v1231_v45 = vrot.slane %v5144_v31, 2 }
  0xdd   : > { %v1061_v3 = vsel %vm1038_vm2, %v1059_v36, %v8930_v55  ;;  %v1402_v61 = vrot.slane %v5144_v31, 3  ;;  %v1691_v26 = vmax.f32 %v1514_v35, %v1569_v54  ;;  %4321 = vst.msk [vmem:[%s4833_s17 + $0x132] sm:$0xff] %vm180_vm0, %v1692_v27  ;;  %v602_v10 = vmax.f32 %v506_v29, %v5726_v47  ;;  %v5811_v27 = vld [vmem:[#allocation2 + $0x1a0] sm:$0xff] }
  0xde   : > { %v1179_v57 = vmax.f32 %v5762_v12, %v1061_v3  ;;  %v1518_v28 = vmax.f32 %v1325_v44, %v1399_v60  ;;  %v8548_v7 = vrot.slane %v5144_v31, 4  ;;  %v8931_v52 = vrot.slane %v5146_v37, 1 }
  0xdf   : > { %v8932_v59 = vrot.slane %v5146_v37, 2  ;;  %v8933_v54 = vrot.slane %v5146_v37, 3  ;;  %4320 = vst.msk [vmem:[%s4833_s17 + $0x12a] sm:$0xc0] %vm1731_vm6, %v1691_v26  ;;  %v698_v21 = vmax.f32 %v602_v10, %v5758_v9  ;;  %v8934_v44 = vrot.slane %v5146_v37, 4 }
  0xe0   : > { %v1068_v50 = vsel %vm1038_vm2, %v1065_v15, %v8931_v52  ;;  %v1324_v42 = vmax.f32 %v1179_v57, %v1228_v39  ;;  %v1695_v60 = vmax.f32 %v1518_v28, %v1576_v43  ;;  %v510_v55 = vmax.f32 %v5697_v30, %v5726_v47 }
  0xe1   : > { %v1233_v8 = vsel %vm1215_vm3, %v1231_v45, %v8932_v59  ;;  %v1404_v36 = vsel %vm1376_vm1, %v1402_v61, %v8933_v54  ;;  %v1183_v35 = vmax.f32 %v5144_v31, %v1068_v50  ;;  %v1581_v29 = vsel %vm1553_vm4, %v8548_v7, %v8934_v44 }
  0xe2   : > { %v1070_v3 = vrot.slane %v5148_v14, 1  ;;  %v1234_v39 = vrot.slane %v5148_v14, 2  ;;  %v1517_v43 = vmax.f32 %v1324_v42, %v1397_v23  ;;  %4324 = vst.msk [vmem:[%s4833_s17 + $0x142] sm:$0xff] %vm180_vm0, %v1695_v60  ;;  %v5825_v26 = vmax.f32 %v698_v21, %v5811_v27 }
  0xe3   : > { %v1328_v57 = vmax.f32 %v1183_v35, %v1233_v8  ;;  %v1407_v28 = vrot.slane %v5148_v14, 3  ;;  %v606_v10 = vmax.f32 %v510_v55, %v5758_v9  ;;  %v8547_v52 = vrot.slane %v5148_v14, 4 }
  0xe4   : > { %8935 = vst [vmem:[#allocation56_spill] sm:$0xff] %v5825_v26  ;;  %v8936_v30 = vrot.slane %v5150_v63, 1  ;;  %v8937_v59 = vrot.slane %v5150_v63, 2  ;;  %v1694_v54 = vmax.f32 %v1517_v43, %v1574_v32  ;;  %v1064_v42 = vrot.slane %v5825_v26, 1 }
  0xe5   : > { %v1521_v60 = vmax.f32 %v1328_v57, %v1404_v36  ;;  %v702_v21 = vmax.f32 %v606_v10, %v5811_v27  ;;  %v8938_v35 = vrot.slane %v5150_v63, 3  ;;  %v8939_v55 = vrot.slane %v5150_v63, 4  ;;  %v5852_v57 = vld [vmem:[#allocation2 + $0x1c0] sm:$0xff] }
  0xe6   : > { %v1073_v50 = vsel %vm1038_vm2, %v1070_v3, %v8936_v30  ;;  %v1236_v23 = vsel %vm1215_vm3, %v1234_v39, %v8937_v59  ;;  %v514_v32 = vmax.f32 %v5726_v47, %v5758_v9  ;;  %4323 = vst.msk [vmem:[%s4833_s17 + $0x13a] sm:$0xc0] %vm1731_vm6, %v1694_v54  ;;  %v1066_v36 = vsel %vm1038_vm2, %v1064_v42, %v1065_v15 }
  0xe7   : > { %v1186_v8 = vmax.f32 %v5148_v14, %v1073_v50  ;;  %v1409_v44 = vsel %vm1376_vm1, %v1407_v28, %v8938_v35  ;;  %v1586_v30 = vsel %vm1553_vm4, %v8547_v52, %v8939_v55  ;;  %v1698_v43 = vmax.f32 %v1521_v60, %v1581_v29 }
  0xe8   : > { %v1075_v50 = vrot.slane %v5152_v2, 1  ;;  %v1182_v59 = vmax.f32 %v5825_v26, %v1066_v36  ;;  %v5857_v35 = vmax.f32 %v702_v21, %v5852_v57  ;;  %v610_v55 = vmax.f32 %v514_v32, %v5811_v27  ;;  %v5871_v36 = vld [vmem:[#allocation2 + $0x1e0] sm:$0xff] }
  0xe9   : > { %v1331_v10 = vmax.f32 %v1186_v8, %v1236_v23  ;;  %v1237_v52 = vrot.slane %v5152_v2, 2  ;;  %4327 = vst.msk [vmem:[%s4833_s17 + $0x152] sm:$0xff] %vm180_vm0, %v1698_v43  ;;  %v1412_v15 = vrot.slane %v5152_v2, 3  ;;  %v1589_v29 = vrot.slane %v5152_v2, 4 }
  0xea   : > { %8940 = vst [vmem:[#allocation57_spill] sm:$0xff] %v5857_v35  ;;  %v8941_v23 = vrot.slane %v5154_v56, 1  ;;  %v1327_v42 = vmax.f32 %v1182_v59, %v1231_v45  ;;  %v1069_v60 = vrot.slane %v5857_v35, 1  ;;  %v706_v8 = vmax.f32 %v610_v55, %v5852_v57 }
  0xeb   : > { %v1524_v47 = vmax.f32 %v1331_v10, %v1409_v44  ;;  %v8942_v44 = vrot.slane %v5154_v56, 2  ;;  %v8943_v10 = vrot.slane %v5154_v56, 3 }
  0xec   : > { %v1078_v54 = vsel %vm1038_vm2, %v1075_v50, %v8941_v23  ;;  %v8944_v23 = vrot.slane %v5154_v56, 4  ;;  %v1520_v59 = vmax.f32 %v1327_v42, %v1402_v61  ;;  %v1071_v55 = vsel %vm1038_vm2, %v1069_v60, %v1070_v3 }
  0xed   : > { %v1189_v21 = vmax.f32 %v5152_v2, %v1078_v54  ;;  %v1701_v32 = vmax.f32 %v1524_v47, %v1586_v30  ;;  %v1239_v43 = vsel %vm1215_vm3, %v1237_v52, %v8942_v44  ;;  %v1414_v7 = vsel %vm1376_vm1, %v1412_v15, %v8943_v10 }
  0xee   : > { %v1591_v45 = vsel %vm1553_vm4, %v1589_v29, %v8944_v23  ;;  %v5884_v30 = vmax.f32 %v706_v8, %v5871_v36  ;;  %v1185_v54 = vmax.f32 %v5857_v35, %v1071_v55  ;;  %v518_v44 = vmax.f32 %v5758_v9, %v5811_v27 }
  0xef   : > { %v1334_v47 = vmax.f32 %v1189_v21, %v1239_v43  ;;  %4330 = vst.msk [vmem:[%s4833_s17 + $0x162] sm:$0xff] %vm180_vm0, %v1701_v32  ;;  %v1080_v10 = vrot.slane %v5156_v24, 1  ;;  %v1240_v56 = vrot.slane %v5156_v24, 2  ;;  %v8946_v61 = vrot.slane %v5144_v31, 4 }
  0xf0   : > { %8945 = vst [vmem:[#allocation58_spill] sm:$0xff] %v5884_v30  ;;  %v1074_v3 = vrot.slane %v5884_v30, 1  ;;  %v1417_v8 = vrot.slane %v5156_v24, 3  ;;  %v1330_v21 = vmax.f32 %v1185_v54, %v1234_v39  ;;  %v614_v43 = vmax.f32 %v518_v44, %v5852_v57 }
  0xf1   : > { %v1697_v42 = vmax.f32 %v1520_v59, %v8946_v61  ;;  %v1527_v60 = vmax.f32 %v1334_v47, %v1414_v7  ;;  %v8947_v9 = vrot.slane %v5160_v18, 1  ;;  %v8948_v7 = vrot.slane %v5160_v18, 2 }
  0xf2   : > { %v1076_v55 = vsel %vm1038_vm2, %v1074_v3, %v1075_v50  ;;  %v1523_v39 = vmax.f32 %v1330_v21, %v1407_v28  ;;  %v710_v44 = vmax.f32 %v614_v43, %v5871_v36  ;;  %v8949_v32 = vrot.slane %v5160_v18, 3  ;;  %v5916_v50 = vld [vmem:[#allocation2 + $0x200] sm:$0xff] }
  0xf3   : > { %v1083_v23 = vsel %vm1038_vm2, %v1080_v10, %v8947_v9  ;;  %4326 = vst.msk [vmem:[%s4833_s17 + $0x14a] sm:$0xc0] %vm1731_vm6, %v1697_v42  ;;  %v1704_v59 = vmax.f32 %v1527_v60, %v1591_v45  ;;  %v1242_v47 = vsel %vm1215_vm3, %v1240_v56, %v8948_v7  ;;  %v1188_v54 = vmax.f32 %v5884_v30, %v1076_v55 }
  0xf4   : > { %v1192_v61 = vmax.f32 %v5156_v24, %v1083_v23  ;;  %v1419_v9 = vsel %vm1376_vm1, %v1417_v8, %v8949_v32  ;;  %v8950_v42 = vrot.slane %v5160_v18, 4  ;;  %v8951_v3 = vrot.slane %v5156_v24, 4 }
  0xf5   : > { %4333 = vst.msk [vmem:[%s4833_s17 + $0x172] sm:$0xff] %vm180_vm0, %v1704_v59  ;;  %v522_v60 = vmax.f32 %v5811_v27, %v5852_v57  ;;  %v1085_v21 = vrot.slane %v5162_v13, 1  ;;  %v8952_v43 = vrot.slane %v5148_v14, 4  ;;  %v1333_v32 = vmax.f32 %v1188_v54, %v1237_v52 }
  0xf6   : > { %v1337_v45 = vmax.f32 %v1192_v61, %v1242_v47  ;;  %v1596_v28 = vsel %vm1553_vm4, %v8951_v3, %v8950_v42  ;;  %v5929_v55 = vmax.f32 %v710_v44, %v5916_v50  ;;  %v1243_v59 = vrot.slane %v5162_v13, 2  ;;  %v5950_v42 = vld [vmem:[#allocation2 + $0x220] sm:$0xff] }
  0xf7   : > { %v1700_v23 = vmax.f32 %v1523_v39, %v8952_v43  ;;  %v618_v7 = vmax.f32 %v522_v60, %v5871_v36  ;;  %v1422_v47 = vrot.slane %v5162_v13, 3  ;;  %v1526_v27 = vmax.f32 %v1333_v32, %v1412_v15 }
  0xf8   : > { %8953 = vst [vmem:[#allocation59_spill] sm:$0xff] %v5929_v55  ;;  %v1530_v61 = vmax.f32 %v1337_v45, %v1419_v9  ;;  %v1079_v3 = vrot.slane %v5929_v55, 1  ;;  %v8954_v52 = vrot.slane %v5164_v38, 1  ;;  %v8955_v54 = vrot.slane %v5164_v38, 2 }
  0xf9   : > { %4329 = vst.msk [vmem:[%s4833_s17 + $0x15a] sm:$0xc0] %vm1731_vm6, %v1700_v23  ;;  %v714_v45 = vmax.f32 %v618_v7, %v5916_v50  ;;  %v8956_v43 = vrot.slane %v5164_v38, 3  ;;  %v1703_v23 = vmax.f32 %v1526_v27, %v1589_v29  ;;  %v8958_v18 = vrot.slane %v5162_v13, 4 }
  0xfa   : > { %v1088_v39 = vsel %vm1038_vm2, %v1085_v21, %v8954_v52  ;;  %v1245_v44 = vsel %vm1215_vm3, %v1243_v59, %v8955_v54  ;;  %v1707_v9 = vmax.f32 %v1530_v61, %v1596_v28  ;;  %v1081_v32 = vsel %vm1038_vm2, %v1079_v3, %v1080_v10 }
  0xfb   : > { %v1195_v60 = vmax.f32 %v5162_v13, %v1088_v39  ;;  %v1424_v15 = vsel %vm1376_vm1, %v1422_v47, %v8956_v43  ;;  %v8957_v52 = vrot.slane %v5164_v38, 4  ;;  %v526_v28 = vmax.f32 %v5852_v57, %v5871_v36  ;;  %4332 = vst.msk [vmem:[%s4833_s17 + $0x16a] sm:$0xc0] %vm1731_vm6, %v1703_v23  ;;  %v5985_v57 = vld [vmem:[#allocation2 + $0x240] sm:$0xff] }
  0xfc   : > { %v1191_v61 = vmax.f32 %v5929_v55, %v1081_v32  ;;  %4336 = vst.msk [vmem:[%s4833_s17 + $0x182] sm:$0xff] %vm180_vm0, %v1707_v9  ;;  %v5963_v7 = vmax.f32 %v714_v45, %v5950_v42  ;;  %v1090_v10 = vrot.slane %v5173_v4, 1  ;;  %v1246_v3 = vrot.slane %v5173_v4, 2 }
  0xfd   : > { %v1601_v54 = vsel %vm1553_vm4, %v8958_v18, %v8957_v52  ;;  %v1340_v29 = vmax.f32 %v1195_v60, %v1245_v44  ;;  %v622_v27 = vmax.f32 %v526_v28, %v5916_v50  ;;  %v1427_v18 = vrot.slane %v5173_v4, 3 }
  0xfe   : > { %8959 = vst [vmem:[#allocation60_spill] sm:$0xff] %v5963_v7  ;;  %v1336_v39 = vmax.f32 %v1191_v61, %v1240_v56  ;;  %v1084_v43 = vrot.slane %v5963_v7, 1  ;;  %v8960_v45 = vrot.slane %v5175_v33, 1  ;;  %v8961_v32 = vrot.slane %v5175_v33, 2 }
  0xff   : > { %v1533_v9 = vmax.f32 %v1340_v29, %v1424_v15  ;;  %v718_v60 = vmax.f32 %v622_v27, %v5950_v42  ;;  %v8962_v28 = vrot.slane %v5175_v33, 3  ;;  %v8964_v27 = vrot.slane %v5173_v4, 4 }
 0x100   : > { %v1093_v44 = vsel %vm1038_vm2, %v1090_v10, %v8960_v45  ;;  %v1248_v52 = vsel %vm1215_vm3, %v1246_v3, %v8961_v32  ;;  %v1529_v61 = vmax.f32 %v1336_v39, %v1417_v8  ;;  %v1086_v15 = vsel %vm1038_vm2, %v1084_v43, %v1085_v21  ;;  %v8967_v39 = vld [vmem:[#allocation30_spill] sm:$0xff] }
 0x101   : > { %v1198_v23 = vmax.f32 %v5173_v4, %v1093_v44  ;;  %v1429_v56 = vsel %vm1376_vm1, %v1427_v18, %v8962_v28  ;;  %v1710_v29 = vmax.f32 %v1533_v9, %v1601_v54  ;;  %v8963_v45 = vrot.slane %v5175_v33, 4 }
 0x102   : > { %v1194_v38 = vmax.f32 %v5963_v7, %v1086_v15  ;;  %v5994_v32 = vmax.f32 %v718_v60, %v5985_v57  ;;  %v530_v8 = vmax.f32 %v5871_v36, %v5916_v50  ;;  %v8966_v21 = vrot.slane %v5156_v24, 4  ;;  %v6022_v36 = vld [vmem:[#allocation2 + $0x260] sm:$0xff] }
 0x103   : > { %v1606_v44 = vsel %vm1553_vm4, %v8964_v27, %v8963_v45  ;;  %v1343_v55 = vmax.f32 %v1198_v23, %v1248_v52  ;;  %4339 = vst.msk [vmem:[%s4833_s17 + $0x192] sm:$0xff] %vm180_vm0, %v1710_v29  ;;  %v1095_v43 = vrot.slane %v8967_v39, 1  ;;  %v1249_v9 = vrot.slane %v8967_v39, 2 }
 0x104   : > { %8965 = vst [vmem:[#allocation61_spill] sm:$0xff] %v5994_v32  ;;  %v1706_v54 = vmax.f32 %v1529_v61, %v8966_v21  ;;  %v1432_v28 = vrot.slane %v8967_v39, 3  ;;  %v1339_v45 = vmax.f32 %v1194_v38, %v1243_v59  ;;  %v1089_v15 = vrot.slane %v5994_v32, 1 }
 0x105   : > { %v1536_v60 = vmax.f32 %v1343_v55, %v1429_v56  ;;  %v626_v23 = vmax.f32 %v530_v8, %v5950_v42  ;;  %v8968_v52 = vrot.slane %v5179_v40, 1  ;;  %v8969_v29 = vrot.slane %v5179_v40, 2 }
 0x106   : > { %4335 = vst.msk [vmem:[%s4833_s17 + $0x17a] sm:$0xc0] %vm1731_vm6, %v1706_v54  ;;  %v8970_v38 = vrot.slane %v5179_v40, 3  ;;  %v1532_v55 = vmax.f32 %v1339_v45, %v1422_v47  ;;  %v1091_v56 = vsel %vm1038_vm2, %v1089_v15, %v1090_v10  ;;  %v8971_v33 = vrot.slane %v5179_v40, 4  ;;  %v8975_v15 = vld [vmem:[#allocation32_spill] sm:$0xff] }
 0x107   : > { %v1098_v61 = vsel %vm1038_vm2, %v1095_v43, %v8968_v52  ;;  %v1251_v27 = vsel %vm1215_vm3, %v1249_v9, %v8969_v29  ;;  %v1713_v8 = vmax.f32 %v1536_v60, %v1606_v44  ;;  %v722_v21 = vmax.f32 %v626_v23, %v5985_v57 }
 0x108   : > { %v1434_v59 = vsel %vm1376_vm1, %v1432_v28, %v8970_v38  ;;  %v1197_v54 = vmax.f32 %v5994_v32, %v1091_v56  ;;  %v1201_v52 = vmax.f32 %v8967_v39, %v1098_v61  ;;  %v8972_v29 = vrot.slane %v8967_v39, 4 }
 0x109   : > { %v534_v47 = vmax.f32 %v5916_v50, %v5950_v42  ;;  %v8973_v10 = vrot.slane %v5162_v13, 4  ;;  %4342 = vst.msk [vmem:[%s4833_s17 + $0x1a2] sm:$0xff] %vm180_vm0, %v1713_v8  ;;  %v6037_v45 = vmax.f32 %v722_v21, %v6022_v36  ;;  %v1100_v60 = vrot.slane %v8975_v15, 1 }
 0x10a   : > { %v1611_v7 = vsel %vm1553_vm4, %v8972_v29, %v8971_v33  ;;  %v1252_v23 = vrot.slane %v8975_v15, 2  ;;  %v1342_v61 = vmax.f32 %v1197_v54, %v1246_v3  ;;  %v1346_v38 = vmax.f32 %v1201_v52, %v1251_v27 }
 0x10b   : > { %v1709_v44 = vmax.f32 %v1532_v55, %v8973_v10  ;;  %8974 = vst [vmem:[#allocation62_spill] sm:$0xff] %v6037_v45  ;;  %v630_v56 = vmax.f32 %v534_v47, %v5985_v57  ;;  %v1437_v33 = vrot.slane %v8975_v15, 3  ;;  %v1094_v50 = vrot.slane %v6037_v45, 1 }
 0x10c   : > { %v8976_v8 = vrot.slane %v5191_v20, 1  ;;  %v8977_v29 = vrot.slane %v5191_v20, 2  ;;  %v1535_v3 = vmax.f32 %v1342_v61, %v1427_v18  ;;  %v1539_v27 = vmax.f32 %v1346_v38, %v1434_v59 }
 0x10d   : > { %4338 = vst.msk [vmem:[%s4833_s17 + $0x18a] sm:$0xc0] %vm1731_vm6, %v1709_v44  ;;  %v726_v54 = vmax.f32 %v630_v56, %v6022_v36  ;;  %v1096_v47 = vsel %vm1038_vm2, %v1094_v50, %v1095_v43  ;;  %v438_v44 = vld [vmem:[#allocation2 + $0x280] sm:$0xff]  ;;  %v8978_v55 = vrot.slane %v5191_v20, 3  ;;  %v8980_v32 = vrot.slane %v8975_v15, 4 }
 0x10e   : > { %v1103_v21 = vsel %vm1038_vm2, %v1100_v60, %v8976_v8  ;;  %v1254_v10 = vsel %vm1215_vm3, %v1252_v23, %v8977_v29  ;;  %v8979_v8 = vrot.slane %v5191_v20, 4  ;;  %v538_v59 = vmax.f32 %v5950_v42, %v5985_v57  ;;  %v8983_v29 = vld [vmem:[#allocation35_spill] sm:$0xff] }
 0x10f   : > { %v1204_v52 = vmax.f32 %v8975_v15, %v1103_v21  ;;  %v1439_v40 = vsel %vm1376_vm1, %v1437_v33, %v8978_v55  ;;  %v8981_v61 = vrot.slane %v5173_v4, 4  ;;  %v1200_v56 = vmax.f32 %v6037_v45, %v1096_v47  ;;  %v6203_v45 = vld [vmem:[#allocation2 + $0xc0] sm:$0xff] }
 0x110   : > { %v1616_v18 = vsel %vm1553_vm4, %v8980_v32, %v8979_v8  ;;  %v1716_v43 = vmax.f32 %v1539_v27, %v1611_v7  ;;  %v6069_v50 = vmax.f32 %v726_v54, %v438_v44  ;;  %v634_v55 = vmax.f32 %v538_v59, %v6022_v36 }
 0x111   : > { %v1712_v38 = vmax.f32 %v1535_v3, %v8981_v61  ;;  %v1349_v21 = vmax.f32 %v1204_v52, %v1254_v10  ;;  %v1105_v20 = vrot.slane %v8983_v29, 1  ;;  %v1255_v13 = vrot.slane %v8983_v29, 2  ;;  %v442_v61 = vld [vmem:[#allocation2 + $0x2a0] sm:$0xff] }
 0x112   : > { %8982 = vst [vmem:[#allocation63_spill] sm:$0xff] %v6069_v50  ;;  %v1345_v32 = vmax.f32 %v1200_v56, %v1249_v9  ;;  %4345 = vst.msk [vmem:[%s4833_s17 + $0x1b2] sm:$0xff] %vm180_vm0, %v1716_v43  ;;  %v1099_v42 = vrot.slane %v6069_v50, 1  ;;  %v8569_v3 = vrot.slane %v8983_v29, 3  ;;  %v8572_v7 = vrot.slane %v8983_v29, 4 }
 0x113   : > { %4341 = vst.msk [vmem:[%s4833_s17 + $0x19a] sm:$0xc0] %vm1731_vm6, %v1712_v38  ;;  %v1542_v27 = vmax.f32 %v1349_v21, %v1439_v40  ;;  %v730_v54 = vmax.f32 %v634_v55, %v438_v44  ;;  %v8984_v10 = vrot.slane %v5321_v5, 1  ;;  %v8985_v47 = vrot.slane %v5321_v5, 2 }
 0x114   : > { %v1538_v59 = vmax.f32 %v1345_v32, %v1432_v28  ;;  %v1101_v9 = vsel %vm1038_vm2, %v1099_v42, %v1100_v60  ;;  %v8986_v56 = vrot.slane %v5321_v5, 3  ;;  %v8988_v28 = vrot.slane %v5321_v5, 4 }
 0x115   : > { %v1108_v52 = vsel %vm1038_vm2, %v1105_v20, %v8984_v10  ;;  %v1257_v8 = vsel %vm1215_vm3, %v1255_v13, %v8985_v47  ;;  %v1203_v43 = vmax.f32 %v6069_v50, %v1101_v9  ;;  %v1719_v21 = vmax.f32 %v1542_v27, %v1616_v18  ;;  %v4484_v47 = vld [vmem:[#allocation2 + $0x248] sm:$0xff] }
 0x116   : > { %v1207_v38 = vmax.f32 %v8983_v29, %v1108_v52  ;;  %v1444_v40 = vsel %vm1376_vm1, %v8569_v3, %v8986_v56  ;;  %v6095_v55 = vmax.f32 %v730_v54, %v442_v61  ;;  %v1621_v60 = vsel %vm1553_vm4, %v8572_v7, %v8988_v28  ;;  %v4485_v56 = vld [vmem:[#allocation2 + $0x268] sm:$0xff] }
 0x117   : > { %v8989_v32 = vrot.slane %v8967_v39, 4  ;;  %v542_v52 = vmax.f32 %v5985_v57, %v6022_v36  ;;  %v543_v9 = vmax.f32 %v4484_v47, %v4485_v56  ;;  %v1348_v18 = vmax.f32 %v1203_v43, %v1252_v23  ;;  %4348 = vst.msk [vmem:[%s4833_s17 + $0x1c2] sm:$0xff] %vm180_vm0, %v1719_v21  ;;  %v4486_v3 = vld [vmem:[#allocation2 + $0x288] sm:$0xff]  ;;  %v4487_v57 = vld [vmem:[#allocation2 + $0x40] sm:$0xff] }
 0x118   : > { %8987 = vst [vmem:[#allocation64_spill] sm:$0xff] %v6095_v55  ;;  %v1352_v10 = vmax.f32 %v1207_v38, %v1257_v8  ;;  %v1104_v27 = vrot.slane %v6095_v55, 1  ;;  %v546_v54 = vmax.f32 %v6022_v36, %v438_v44  ;;  %v547_v5 = vmax.f32 %v4485_v56, %v4486_v3  ;;  %v6110_v28 = vld [vmem:[#allocation2 + $0x68] sm:$0xff] }
 0x119   : > { %v1715_v42 = vmax.f32 %v1538_v59, %v8989_v32  ;;  %v638_v59 = vmax.f32 %v542_v52, %v438_v44  ;;  %v639_v38 = vmax.f32 %v543_v9, %v4486_v3  ;;  %v6114_v32 = vld [vmem:[#allocation2 + $0x60] sm:$0xff]  ;;  %v1541_v43 = vmax.f32 %v1348_v18, %v1437_v33  ;;  %v4489_v7 = vld [vmem:[#allocation2 + $0x2a8] sm:$0xff] }
 0x11a   : > { %v1545_v8 = vmax.f32 %v1352_v10, %v1444_v40  ;;  %v478_v23 = vmax.f32 %v4487_v57, %v6114_v32  ;;  %v1106_v21 = vsel %vm1038_vm2, %v1104_v27, %v1105_v20  ;;  %v642_v47 = vmax.f32 %v546_v54, %v442_v61  ;;  %v447_v56 = vld [vmem:[#allocation2 + $0x2c8] sm:$0xff]  ;;  %v6122_v27 = vld [vmem:[#allocation2 + $0x80] sm:$0xff] }
 0x11b   : > { %4344 = vst.msk [vmem:[%s4833_s17 + $0x1aa] sm:$0xc0] %vm1731_vm6, %v1715_v42  ;;  %v643_v36 = vmax.f32 %v547_v5, %v4489_v7  ;;  %v1206_v50 = vmax.f32 %v6095_v55, %v1106_v21  ;;  %v446_v42 = vld [vmem:[#allocation2 + $0x2c0] sm:$0xff]  ;;  %v734_v40 = vmax.f32 %v638_v59, %v442_v61  ;;  %v735_v44 = vmax.f32 %v639_v38, %v4489_v7  ;;  %v4490_v33 = vld [vmem:[#allocation2 + $0x48] sm:$0xff] }
 0x11c   : > { %v1722_v39 = vmax.f32 %v1545_v8, %v1621_v60  ;;  %v8990_v3 = vrot.slane %v8975_v15, 4  ;;  %v738_v52 = vmax.f32 %v642_v47, %v446_v42  ;;  %v479_v20 = vmax.f32 %v4490_v33, %v6110_v28  ;;  %v451_v18 = vld [vmem:[#allocation2 + $0x2e8] sm:$0xff]  ;;  %v8991_v5 = vld [vmem:[#allocation11_spill] sm:$0xff] }
 0x11d   : > { %v739_v9 = vmax.f32 %v643_v36, %v447_v56  ;;  %v8992_v54 = vld [vmem:[#allocation8_spill] sm:$0xff]  ;;  %v1351_v61 = vmax.f32 %v1206_v50, %v1255_v13  ;;  %v6132_v7 = vmax.f32 %v734_v40, %v446_v42  ;;  %v6134_v8 = vmax.f32 %v735_v44, %v447_v56  ;;  %v450_v59 = vld [vmem:[#allocation2 + $0x2e0] sm:$0xff] }
 0x11e   : > { %v1718_v10 = vmax.f32 %v1541_v43, %v8990_v3  ;;  %v8993_v57 = vmax.f32 %v8991_v5, %v8992_v54  ;;  %4351 = vst.msk [vmem:[%s4833_s17 + $0x1d2] sm:$0xff] %vm180_vm0, %v1722_v39  ;;  %v6136_v38 = vld [vmem:[#allocation2 + $0xa0] sm:$0xff]  ;;  %v8997_v43 = vmax.f32 %v4976_v1, %v5169_v17  ;;  %v6146_v47 = vmax.f32 %v738_v52, %v450_v59  ;;  %v6159_v3 = vld [vmem:[#allocation2 + $0x88] sm:$0xff] }
 0x11f   : > { %8995 = vst [vmem:[#allocation8_spill] sm:$0xff] %v6132_v7  ;;  %8996 = vst [vmem:[#allocation65_spill] sm:$0xff] %v6134_v8  ;;  %v6148_v13 = vmax.f32 %v739_v9, %v451_v18  ;;  %v574_v39 = vmax.f32 %v478_v23, %v6122_v27  ;;  %v9001_v50 = vrot.slane %v8983_v29, 3  ;;  %v1109_v56 = vrot.slane %v6132_v7, 1 }
 0x120   : > { %v6128_v60 = vmax.f32 %v8993_v57, %v6122_v27  ;;  %v6142_v21 = vmax.f32 %v8997_v43, %v6136_v38  ;;  %4347 = vst.msk [vmem:[%s4833_s17 + $0x1ba] sm:$0xc0] %vm1731_vm6, %v1718_v10  ;;  %8999 = vst [vmem:[#allocation67_spill] sm:$0xff] %v6146_v47  ;;  %v1110_v42 = vrot.slane %v6134_v8, 1  ;;  %v1258_v1 = vrot.slane %v6134_v8, 2  ;;  %v9005_v43 = vld [vmem:[#allocation4_spill] sm:$0xff] }
 0x121   : > { %9000 = vst [vmem:[#allocation68_spill] sm:$0xff] %v6148_v13  ;;  %v1544_v36 = vmax.f32 %v1351_v61, %v9001_v50  ;;  %v1447_v17 = vrot.slane %v6134_v8, 3  ;;  %v1624_v40 = vrot.slane %v6134_v8, 4  ;;  %v1115_v44 = vrot.slane %v6148_v13, 1  ;;  %v9006_v50 = vld [vmem:[#allocation7_spill] sm:$0xff] }
 0x122   : > { %8994 = vst [vmem:[#allocation11_spill] sm:$0xff] %v6128_v60  ;;  %8998 = vst [vmem:[#allocation66_spill] sm:$0xff] %v6142_v21  ;;  %v575_v23 = vmax.f32 %v479_v20, %v6159_v3  ;;  %v9002_v10 = vrot.slane %v8983_v29, 4  ;;  %v1111_v9 = vsel %vm1038_vm2, %v1109_v56, %v1110_v42  ;;  %v9003_v33 = vrot.slane %v5586_v62, 1  ;;  %v4494_v20 = vld [vmem:[#allocation2 + $0x90] sm:$0xff] }
 0x123   : > { %v1114_v5 = vrot.slane %v6146_v47, 1  ;;  %v1209_v54 = vmax.f32 %v6132_v7, %v1111_v9  ;;  %v9004_v61 = vrot.slane %v5586_v62, 2  ;;  %v9008_v56 = vrot.slane %v5586_v62, 3 }
 0x124   : > { %v1721_v52 = vmax.f32 %v1544_v36, %v9002_v10  ;;  %v1113_v18 = vsel %vm1038_vm2, %v1110_v42, %v9003_v33  ;;  %v9007_v36 = vmax.f32 %v9005_v43, %v9006_v50  ;;  %v1261_v9 = vrot.slane %v6148_v13, 2 }
 0x125   : > { %v1210_v57 = vmax.f32 %v6134_v8, %v1113_v18  ;;  %v1260_v59 = vsel %vm1215_vm3, %v1258_v1, %v9004_v61  ;;  %v1449_v42 = vsel %vm1376_vm1, %v1447_v17, %v9008_v56  ;;  %v1116_v33 = vsel %vm1038_vm2, %v1114_v5, %v1115_v44 }
 0x126   : > { %v576_v10 = vmax.f32 %v9007_v36, %v4494_v20  ;;  %4350 = vst.msk [vmem:[%s4833_s17 + $0x1ca] sm:$0xc0] %vm1731_vm6, %v1721_v52  ;;  %v1452_v18 = vrot.slane %v6148_v13, 3  ;;  %v1354_v21 = vmax.f32 %v1209_v54, %v1258_v1  ;;  %v1212_v61 = vmax.f32 %v6146_v47, %v1116_v33  ;;  %v369_v1 = vld [vmem:[#allocation2 + $0x58] sm:$0xff] }
 0x127   : > { %v1355_v60 = vmax.f32 %v1210_v57, %v1260_v59  ;;  %v9009_v8 = vrot.slane %v5608_v16, 1  ;;  %v9010_v52 = vrot.slane %v5586_v62, 4  ;;  %v1629_v36 = vrot.slane %v6148_v13, 4  ;;  %v6197_v54 = vld [vmem:[#allocation2 + $0x78] sm:$0xff]  ;;  %v4495_v62 = vld [vmem:[#allocation2 + $0xa8] sm:$0xff] }
 0x128   : > { %v9011_v56 = vrot.slane %v5608_v16, 2  ;;  %v1547_v57 = vmax.f32 %v1354_v21, %v1447_v17  ;;  %v1357_v33 = vmax.f32 %v1212_v61, %v1261_v9  ;;  %v9012_v47 = vrot.slane %v5608_v16, 3  ;;  %v6206_v17 = vld [vmem:[#allocation2 + $0xd0] sm:$0xff] }
 0x129   : > { %v1118_v20 = vsel %vm1038_vm2, %v1115_v44, %v9009_v8  ;;  %v1626_v43 = vsel %vm1553_vm4, %v1624_v40, %v9010_v52  ;;  %v1548_v59 = vmax.f32 %v1355_v60, %v1449_v42  ;;  %v670_v8 = vmax.f32 %v574_v39, %v6136_v38  ;;  %v4498_v39 = vld [vmem:[#allocation2 + $0xc8] sm:$0xff] }
 0x12a   : > { %v1213_v5 = vmax.f32 %v6148_v13, %v1118_v20  ;;  %v1263_v7 = vsel %vm1215_vm3, %v1261_v9, %v9011_v56  ;;  %v1454_v52 = vsel %vm1376_vm1, %v1452_v18, %v9012_v47  ;;  %v671_v20 = vmax.f32 %v575_v23, %v4495_v62  ;;  %v4496_v13 = vld [vmem:[#allocation2 + $0xb0] sm:$0xff] }
 0x12b   : > { %v672_v29 = vmax.f32 %v576_v10, %v4496_v13  ;;  %v1724_v56 = vmax.f32 %v1547_v57, %v1624_v40  ;;  %v1725_v55 = vmax.f32 %v1548_v59, %v1626_v43  ;;  %v1550_v15 = vmax.f32 %v1357_v33, %v1452_v18 }
 0x12c   : > { %v1358_v44 = vmax.f32 %v1213_v5, %v1263_v7  ;;  %v766_v60 = vmax.f32 %v670_v8, %v6203_v45  ;;  %v767_v7 = vmax.f32 %v671_v20, %v4498_v39  ;;  %v481_v42 = vmax.f32 %v369_v1, %v6197_v54  ;;  %v4500_v5 = vld [vmem:[#allocation2 + $0x98] sm:$0xff] }
 0x12d   : > { %v768_v47 = vmax.f32 %v672_v29, %v6206_v17  ;;  %4353 = vst.msk [vmem:[%s4833_s17 + $0x1da] sm:$0xc0] %vm1731_vm6, %v1724_v56  ;;  %v1727_v40 = vmax.f32 %v1550_v15, %v1629_v36  ;;  %v9013_v23 = vrot.slane %v5608_v16, 4  ;;  %v482_v18 = vmax.f32 %v6114_v32, %v6122_v27 }
 0x12e   : > { %v1551_v21 = vmax.f32 %v1358_v44, %v1454_v52  ;;  %4354 = vst.msk [vmem:[%s4833_s17 + $0x1e2] sm:$0xff] %vm180_vm0, %v1725_v55  ;;  %v6218_v9 = vmax.f32 %v766_v60, %v5703_v6  ;;  %v6223_v29 = vmax.f32 %v767_v7, %v5689_v49  ;;  %v577_v55 = vmax.f32 %v481_v42, %v4500_v5 }
 0x12f   : > { %v1631_v10 = vsel %vm1553_vm4, %v1629_v36, %v9013_v23  ;;  %v6226_v43 = vmax.f32 %v768_v47, %v5250_v51  ;;  %4356 = vst.msk [vmem:[%s4833_s17 + $0x1ea] sm:$0xc0] %vm1731_vm6, %v1727_v40  ;;  %v483_v32 = vmax.f32 %v6110_v28, %v6159_v3  ;;  %v4501_v23 = vld [vmem:[#allocation2 + $0xb8] sm:$0xff]  ;;  %v6262_v4 = vmax.f32 %v5244_v11, %v5762_v12 }
 0x130   : > { %9014 = vst [vmem:[#allocation4_spill] sm:$0xff] %v6218_v9  ;;  %v1728_v61 = vmax.f32 %v1551_v21, %v1631_v10  ;;  %9015 = vst [vmem:[#allocation7_spill] sm:$0xff] %v6223_v29  ;;  %v1845_v15 = vrot.slane %v6218_v9, 1  ;;  %v2053_v36 = vrot.slane %v6218_v9, 2  ;;  %v2261_v1 = vrot.slane %v6218_v9, 3 }
 0x131   : > { %9016 = vst [vmem:[#allocation69_spill] sm:$0xff] %v6226_v43  ;;  %v1846_v27 = vrot.slane %v6223_v29, 1  ;;  %v1848_v57 = vrot.slane %v6226_v43, 1  ;;  %v2054_v59 = vrot.slane %v6223_v29, 2  ;;  %v2056_v33 = vrot.slane %v6226_v43, 2 }
 0x132   : > { %4357 = vst.msk [vmem:[%s4833_s17 + $0x1f2] sm:$0xff] %vm180_vm0, %v1728_v61  ;;  %v2262_v8 = vrot.slane %v6223_v29, 3  ;;  %v2264_v44 = vrot.slane %v6226_v43, 3  ;;  %v2469_v52 = vrot.slane %v6223_v29, 4  ;;  %v2470_v20 = vrot.slane %v6226_v43, 4 }
 0x133   : > { %v1847_v28 = vsel %vm1038_vm2, %v1845_v15, %v1846_v27  ;;  %v1849_v3 = vsel %vm1038_vm2, %v1846_v27, %v1848_v57  ;;  %v2055_v56 = vsel %vm1215_vm3, %v2053_v36, %v2054_v59  ;;  %v2057_v60 = vsel %vm1215_vm3, %v2054_v59, %v2056_v33  ;;  %v9017_v59 = vld [vmem:[#allocation5_spill] sm:$0xff] }
 0x134   : > { %v2005_v21 = vmax.f32 %v6218_v9, %v1847_v28  ;;  %v2006_v7 = vmax.f32 %v6223_v29, %v1849_v3  ;;  %v2263_v47 = vsel %vm1376_vm1, %v2261_v1, %v2262_v8  ;;  %v2265_v42 = vsel %vm1376_vm1, %v2262_v8, %v2264_v44  ;;  %v4502_v29 = vld [vmem:[#allocation2 + $0xd8] sm:$0xff]  ;;  %9019 = vst [vmem:[#allocation5_spill] sm:$0xff] %v6262_v4 }
 0x135   : > { %v2471_v40 = vsel %vm1553_vm4, %v2469_v52, %v2470_v20  ;;  %v673_v10 = vmax.f32 %v577_v55, %v4501_v23  ;;  %v578_v61 = vmax.f32 %v482_v18, %v6136_v38  ;;  %v579_v15 = vmax.f32 %v483_v32, %v4495_v62 }
 0x136   : > { %v2213_v27 = vmax.f32 %v2005_v21, %v2055_v56  ;;  %v2214_v36 = vmax.f32 %v2006_v7, %v2057_v60  ;;  %v9018_v16 = vmax.f32 %v9006_v50, %v9017_v59  ;;  %v485_v3 = vmax.f32 %v6197_v54, %v4500_v5  ;;  %v4504_v50 = vld [vmem:[#allocation2 + $0xe8] sm:$0xff]  ;;  %v4505_v56 = vld [vmem:[#allocation2 + $0xf0] sm:$0xff] }
 0x137   : > { %v769_v1 = vmax.f32 %v673_v10, %v4502_v29  ;;  %v674_v8 = vmax.f32 %v578_v61, %v6203_v45  ;;  %v675_v9 = vmax.f32 %v579_v15, %v4498_v39  ;;  %v6270_v45 = vmax.f32 %v4953_v58, %v5132_v19 }
 0x138   : > { %v580_v28 = vmax.f32 %v9018_v16, %v4496_v13  ;;  %v2421_v55 = vmax.f32 %v2213_v27, %v2263_v47  ;;  %v2422_v38 = vmax.f32 %v2214_v36, %v2265_v42  ;;  %v581_v18 = vmax.f32 %v485_v3, %v4501_v23  ;;  %v4503_v16 = vld [vmem:[#allocation2 + $0xe0] sm:$0xff] }
 0x139   : > { %v6266_v32 = vmax.f32 %v769_v1, %v5275_v53  ;;  %v770_v13 = vmax.f32 %v674_v8, %v4503_v16  ;;  %v771_v54 = vmax.f32 %v675_v9, %v4504_v50  ;;  %9021 = vst [vmem:[#allocation71_spill] sm:$0xff] %v6270_v45 }
 0x13a   : > { %v676_v62 = vmax.f32 %v580_v28, %v6206_v17  ;;  %v2597_v39 = vmax.f32 %v2421_v55, %v2469_v52  ;;  %v6272_v5 = vmax.f32 %v2422_v38, %v2471_v40  ;;  %v677_v21 = vmax.f32 %v581_v18, %v4502_v29 }
 0x13b   : > { %9020 = vst [vmem:[#allocation70_spill] sm:$0xff] %v6266_v32  ;;  %v1850_v17 = vrot.slane %v6266_v32, 1  ;;  %v2058_v7 = vrot.slane %v6266_v32, 2  ;;  %v2266_v47 = vrot.slane %v6266_v32, 3  ;;  %v2472_v42 = vrot.slane %v6266_v32, 4 }
 0x13c   : > { %v772_v60 = vmax.f32 %v676_v62, %v4505_v56  ;;  %v8601_v9 = vrot.slane %v6272_v5, 4  ;;  %v6280_v23 = vmax.f32 %v770_v13, %v5729_v41  ;;  %v6283_v52 = vmax.f32 %v771_v54, %v5719_v46 }
 0x13d   : > { %v1851_v29 = vsel %vm1038_vm2, %v1848_v57, %v1850_v17  ;;  %v2059_v10 = vsel %vm1215_vm3, %v2056_v33, %v2058_v7  ;;  %v2267_v61 = vsel %vm1376_vm1, %v2264_v44, %v2266_v47  ;;  %v2473_v15 = vsel %vm1553_vm4, %v2470_v20, %v2472_v42  ;;  %v4506_v7 = vld [vmem:[#allocation2 + $0xf8] sm:$0xff] }
 0x13e   : > { %9022 = vst [vmem:[#allocation72_spill] sm:$0xff] %v6280_v23  ;;  %9023 = vst [vmem:[#allocation73_spill] sm:$0xff] %v6283_v52  ;;  %v6286_v40 = vmax.f32 %v772_v60, %v5315_v0  ;;  %v2773_v27 = vmax.f32 %v2597_v39, %v8601_v9  ;;  %v2007_v36 = vmax.f32 %v6226_v43, %v1851_v29  ;;  %v1852_v59 = vrot.slane %v6280_v23, 1 }
 0x13f   : > { %v1853_v28 = vrot.slane %v6283_v52, 1  ;;  %v2060_v57 = vrot.slane %v6280_v23, 2  ;;  %v2061_v33 = vrot.slane %v6283_v52, 2  ;;  %v2268_v8 = vrot.slane %v6280_v23, 3 }
 0x140   : > { %9024 = vst [vmem:[#allocation74_spill] sm:$0xff] %v6286_v40  ;;  %v1855_v3 = vrot.slane %v6286_v40, 1  ;;  %v2063_v44 = vrot.slane %v6286_v40, 2  ;;  %4359 = vst.msk [vmem:[%s4833_s17 + $0x1fc] sm:$0xf0] %vm2822_vm7, %v2773_v27  ;;  %v2215_v20 = vmax.f32 %v2007_v36, %v2059_v10  ;;  %v2269_v55 = vrot.slane %v6283_v52, 3 }
 0x141   : > { %v1854_v1 = vsel %vm1038_vm2, %v1852_v59, %v1853_v28  ;;  %v2062_v18 = vsel %vm1215_vm3, %v2060_v57, %v2061_v33  ;;  %v2271_v39 = vrot.slane %v6286_v40, 3  ;;  %v2474_v60 = vrot.slane %v6283_v52, 4 }
 0x142   : > { %v1856_v38 = vsel %vm1038_vm2, %v1853_v28, %v1855_v3  ;;  %v2008_v62 = vmax.f32 %v6280_v23, %v1854_v1  ;;  %v2064_v16 = vsel %vm1215_vm3, %v2061_v33, %v2063_v44  ;;  %v2423_v13 = vmax.f32 %v2215_v20, %v2267_v61  ;;  %v9025_v61 = vld [vmem:[#allocation14_spill] sm:$0xff] }
 0x143   : > { %v2009_v50 = vmax.f32 %v6283_v52, %v1856_v38  ;;  %v2270_v54 = vsel %vm1376_vm1, %v2268_v8, %v2269_v55  ;;  %v2475_v17 = vrot.slane %v6286_v40, 4  ;;  %v773_v47 = vmax.f32 %v677_v21, %v4506_v7 }
 0x144   : > { %v2216_v56 = vmax.f32 %v2008_v62, %v2062_v18  ;;  %v6315_v42 = vmax.f32 %v2423_v13, %v2473_v15  ;;  %v2272_v10 = vsel %vm1376_vm1, %v2269_v55, %v2271_v39  ;;  %v6320_v27 = vmax.f32 %v9025_v61, %v5139_v34 }
 0x145   : > { %v2217_v29 = vmax.f32 %v2009_v50, %v2064_v16  ;;  %v2476_v59 = vsel %vm1553_vm4, %v2474_v60, %v2475_v17  ;;  %v6324_v28 = vmax.f32 %v773_v47, %v5335_v25  ;;  %v1859_v57 = vrot.slane %v6262_v4, 1 }
 0x146   : > { %9026 = vst [vmem:[#allocation75_spill] sm:$0xff] %v6320_v27  ;;  %v2424_v36 = vmax.f32 %v2216_v56, %v2270_v54  ;;  %v8602_v33 = vrot.slane %v6315_v42, 4  ;;  %v1860_v15 = vrot.slane %v6270_v45, 1  ;;  %v1862_v20 = vrot.slane %v6320_v27, 1 }
 0x147   : > { %9027 = vst [vmem:[#allocation76_spill] sm:$0xff] %v6324_v28  ;;  %v2425_v21 = vmax.f32 %v2217_v29, %v2272_v10  ;;  %v1857_v8 = vrot.slane %v6324_v28, 1  ;;  %v2065_v55 = vrot.slane %v6324_v28, 2  ;;  %v2273_v38 = vrot.slane %v6324_v28, 3 }
 0x148   : > { %v2600_v1 = vmax.f32 %v2424_v36, %v2474_v60  ;;  %v2775_v62 = vmax.f32 %v6315_v42, %v8602_v33  ;;  %v2477_v16 = vrot.slane %v6324_v28, 4  ;;  %v1861_v13 = vsel %vm1038_vm2, %v1859_v57, %v1860_v15 }
 0x149   : > { %v6336_v18 = vmax.f32 %v2425_v21, %v2476_v59  ;;  %v1858_v50 = vsel %vm1038_vm2, %v1855_v3, %v1857_v8  ;;  %v2066_v54 = vsel %vm1215_vm3, %v2063_v44, %v2065_v55  ;;  %v2274_v56 = vsel %vm1376_vm1, %v2271_v39, %v2273_v38 }
 0x14a   : > { %v1863_v60 = vsel %vm1038_vm2, %v1860_v15, %v1862_v20  ;;  %4361 = vst.msk [vmem:[%s4833_s17 + $0x20c] sm:$0xf] %vm2825_vm8, %v2775_v62  ;;  %v2010_v47 = vmax.f32 %v6286_v40, %v1858_v50  ;;  %v2478_v29 = vsel %vm1553_vm4, %v2475_v17, %v2477_v16  ;;  %v2011_v10 = vmax.f32 %v6262_v4, %v1861_v13 }
 0x14b   : > { %v8600_v7 = vrot.slane %v6336_v18, 4  ;;  %v2012_v36 = vmax.f32 %v6270_v45, %v1863_v60  ;;  %v2067_v3 = vrot.slane %v6262_v4, 2  ;;  %v2068_v44 = vrot.slane %v6270_v45, 2  ;;  %v9028_v60 = vld [vmem:[#allocation36_spill] sm:$0xff] }
 0x14c   : > { %v2070_v39 = vrot.slane %v6320_v27, 2  ;;  %v2218_v57 = vmax.f32 %v2010_v47, %v2066_v54  ;;  %v2275_v21 = vrot.slane %v6262_v4, 3  ;;  %v2276_v15 = vrot.slane %v6270_v45, 3 }
 0x14d   : > { %v2776_v59 = vmax.f32 %v2600_v1, %v8600_v7  ;;  %v2069_v17 = vsel %vm1215_vm3, %v2067_v3, %v2068_v44  ;;  %v2278_v55 = vrot.slane %v6320_v27, 3  ;;  %v2479_v38 = vrot.slane %v6270_v45, 4 }
 0x14e   : > { %v2071_v8 = vsel %vm1215_vm3, %v2068_v44, %v2070_v39  ;;  %v2426_v62 = vmax.f32 %v2218_v57, %v2274_v56  ;;  %v2219_v16 = vmax.f32 %v2011_v10, %v2069_v17  ;;  %v2277_v1 = vsel %vm1376_vm1, %v2275_v21, %v2276_v15  ;;  %v9031_v10 = vld [vmem:[#allocation15_spill] sm:$0xff] }
 0x14f   : > { %4362 = vst.msk [vmem:[%s4833_s17 + $0x20c] sm:$0xf0] %vm2822_vm7, %v2776_v59  ;;  %v2220_v13 = vmax.f32 %v2012_v36, %v2071_v8  ;;  %v2279_v50 = vsel %vm1376_vm1, %v2276_v15, %v2278_v55  ;;  %v2480_v54 = vrot.slane %v6320_v27, 4  ;;  %v6369_v47 = vmax.f32 %v9028_v60, %v5357_v48 }
 0x150   : > { %v6373_v3 = vmax.f32 %v5645_v22, %v5825_v26  ;;  %v6375_v44 = vmax.f32 %v2426_v62, %v2478_v29  ;;  %v2427_v59 = vmax.f32 %v2219_v16, %v2277_v1  ;;  %v6379_v36 = vmax.f32 %v9031_v10, %v5144_v31 }
 0x151   : > { %9029 = vst [vmem:[#allocation77_spill] sm:$0xff] %v6369_v47  ;;  %v2428_v56 = vmax.f32 %v2220_v13, %v2279_v50  ;;  %v2481_v57 = vsel %vm1553_vm4, %v2479_v38, %v2480_v54  ;;  %v1864_v21 = vrot.slane %v6369_v47, 1  ;;  %v2072_v15 = vrot.slane %v6369_v47, 2  ;;  %v9033_v50 = vld [vmem:[#allocation34_spill] sm:$0xff] }
 0x152   : > { %9030 = vst [vmem:[#allocation78_spill] sm:$0xff] %v6373_v3  ;;  %9032 = vst [vmem:[#allocation79_spill] sm:$0xff] %v6379_v36  ;;  %v2280_v17 = vrot.slane %v6369_v47, 3  ;;  %v8603_v8 = vrot.slane %v6375_v44, 4  ;;  %v2603_v7 = vmax.f32 %v2427_v59, %v2479_v38  ;;  %v2482_v62 = vrot.slane %v6369_v47, 4 }
 0x153   : > { %v6386_v29 = vmax.f32 %v2428_v56, %v2481_v57  ;;  %v1865_v16 = vsel %vm1038_vm2, %v1862_v20, %v1864_v21  ;;  %v2073_v13 = vsel %vm1215_vm3, %v2070_v39, %v2072_v15  ;;  %v6394_v9 = vmax.f32 %v9033_v50, %v5146_v37 }
 0x154   : > { %v2281_v1 = vsel %vm1376_vm1, %v2278_v55, %v2280_v17  ;;  %v2778_v33 = vmax.f32 %v6375_v44, %v8603_v8  ;;  %v2013_v59 = vmax.f32 %v6320_v27, %v1865_v16  ;;  %v2483_v56 = vsel %vm1553_vm4, %v2480_v54, %v2482_v62 }
 0x155   : > { %9034 = vst [vmem:[#allocation80_spill] sm:$0xff] %v6394_v9  ;;  %v8606_v38 = vrot.slane %v6386_v29, 4  ;;  %v1866_v20 = vrot.slane %v6373_v3, 1  ;;  %v1867_v39 = vrot.slane %v6379_v36, 1  ;;  %v1869_v55 = vrot.slane %v6394_v9, 1 }
 0x156   : > { %v2074_v57 = vrot.slane %v6373_v3, 2  ;;  %4364 = vst.msk [vmem:[%s4833_s17 + $0x21c] sm:$0xf] %vm2825_vm8, %v2778_v33  ;;  %v2221_v15 = vmax.f32 %v2013_v59, %v2073_v13  ;;  %v2075_v17 = vrot.slane %v6379_v36, 2  ;;  %v2077_v16 = vrot.slane %v6394_v9, 2 }
 0x157   : > { %v2779_v21 = vmax.f32 %v2603_v7, %v8606_v38  ;;  %v1868_v54 = vsel %vm1038_vm2, %v1866_v20, %v1867_v39  ;;  %v1870_v62 = vsel %vm1038_vm2, %v1867_v39, %v1869_v55  ;;  %v2282_v8 = vrot.slane %v6373_v3, 3 }
 0x158   : > { %v2283_v45 = vrot.slane %v6379_v36, 3  ;;  %v2429_v4 = vmax.f32 %v2221_v15, %v2281_v1  ;;  %v2014_v33 = vmax.f32 %v6373_v3, %v1868_v54  ;;  %v2015_v7 = vmax.f32 %v6379_v36, %v1870_v62  ;;  %v9035_v15 = vld [vmem:[#allocation41_spill] sm:$0xff]  ;;  %v9036_v54 = vld [vmem:[#allocation38_spill] sm:$0xff] }
 0x159   : > { %4365 = vst.msk [vmem:[%s4833_s17 + $0x21c] sm:$0xf0] %vm2822_vm7, %v2779_v21  ;;  %v2076_v13 = vsel %vm1215_vm3, %v2074_v57, %v2075_v17  ;;  %v2078_v59 = vsel %vm1215_vm3, %v2075_v17, %v2077_v16  ;;  %v2285_v20 = vrot.slane %v6394_v9, 3  ;;  %v2484_v39 = vrot.slane %v6379_v36, 4 }
 0x15a   : > { %v2284_v38 = vsel %vm1376_vm1, %v2282_v8, %v2283_v45  ;;  %v6425_v52 = vmax.f32 %v2429_v4, %v2483_v56  ;;  %v2222_v23 = vmax.f32 %v2014_v33, %v2076_v13  ;;  %v2223_v10 = vmax.f32 %v2015_v7, %v2078_v59 }
 0x15b   : > { %v2485_v1 = vrot.slane %v6394_v9, 4  ;;  %v2286_v21 = vsel %vm1376_vm1, %v2283_v45, %v2285_v20  ;;  %v6431_v62 = vmax.f32 %v9036_v54, %v9035_v15  ;;  %v6435_v57 = vmax.f32 %v5703_v6, %v5857_v35 }
 0x15c   : > { %v6439_v8 = vmax.f32 %v5689_v49, %v5148_v14  ;;  %v8612_v4 = vrot.slane %v6425_v52, 4  ;;  %v2430_v56 = vmax.f32 %v2222_v23, %v2284_v38  ;;  %v2431_v17 = vmax.f32 %v2223_v10, %v2286_v21 }
 0x15d   : > { %9037 = vst [vmem:[#allocation81_spill] sm:$0xff] %v6431_v62  ;;  %9038 = vst [vmem:[#allocation82_spill] sm:$0xff] %v6435_v57  ;;  %v2486_v33 = vsel %vm1553_vm4, %v2484_v39, %v2485_v1  ;;  %v1871_v45 = vrot.slane %v6431_v62, 1  ;;  %v2079_v7 = vrot.slane %v6431_v62, 2  ;;  %v2287_v13 = vrot.slane %v6431_v62, 3 }
 0x15e   : > { %9039 = vst [vmem:[#allocation83_spill] sm:$0xff] %v6439_v8  ;;  %v2487_v6 = vrot.slane %v6431_v62, 4  ;;  %v2781_v49 = vmax.f32 %v6425_v52, %v8612_v4  ;;  %v2606_v59 = vmax.f32 %v2430_v56, %v2484_v39  ;;  %v6450_v36 = vmax.f32 %v2431_v17, %v2486_v33 }
 0x15f   : > { %v6454_v23 = vmax.f32 %v5250_v51, %v5150_v63  ;;  %v1872_v10 = vsel %vm1038_vm2, %v1869_v55, %v1871_v45  ;;  %v2080_v38 = vsel %vm1215_vm3, %v2077_v16, %v2079_v7  ;;  %v2288_v21 = vsel %vm1376_vm1, %v2285_v20, %v2287_v13 }
 0x160   : > { %v2488_v3 = vsel %vm1553_vm4, %v2485_v1, %v2487_v6  ;;  %4367 = vst.msk [vmem:[%s4833_s17 + $0x22c] sm:$0xf] %vm2825_vm8, %v2781_v49  ;;  %v8614_v62 = vrot.slane %v6450_v36, 4  ;;  %v2016_v39 = vmax.f32 %v6394_v9, %v1872_v10  ;;  %v1873_v56 = vrot.slane %v6435_v57, 1 }
 0x161   : > { %9040 = vst [vmem:[#allocation84_spill] sm:$0xff] %v6454_v23  ;;  %v1874_v51 = vrot.slane %v6439_v8, 1  ;;  %v1876_v17 = vrot.slane %v6454_v23, 1  ;;  %v2081_v55 = vrot.slane %v6435_v57, 2  ;;  %v2082_v16 = vrot.slane %v6439_v8, 2 }
 0x162   : > { %v2084_v20 = vrot.slane %v6454_v23, 2  ;;  %v2782_v1 = vmax.f32 %v2606_v59, %v8614_v62  ;;  %v2224_v33 = vmax.f32 %v2016_v39, %v2080_v38  ;;  %v2289_v7 = vrot.slane %v6435_v57, 3  ;;  %v9041_v62 = vld [vmem:[#allocation42_spill] sm:$0xff] }
 0x163   : > { %v1875_v45 = vsel %vm1038_vm2, %v1873_v56, %v1874_v51  ;;  %v1877_v13 = vsel %vm1038_vm2, %v1874_v51, %v1876_v17  ;;  %v2083_v49 = vsel %vm1215_vm3, %v2081_v55, %v2082_v16  ;;  %v2290_v59 = vrot.slane %v6439_v8, 3 }
 0x164   : > { %v2017_v6 = vmax.f32 %v6435_v57, %v1875_v45  ;;  %v2085_v10 = vsel %vm1215_vm3, %v2082_v16, %v2084_v20  ;;  %4368 = vst.msk [vmem:[%s4833_s17 + $0x22c] sm:$0xf0] %vm2822_vm7, %v2782_v1  ;;  %v2432_v4 = vmax.f32 %v2224_v33, %v2288_v21  ;;  %v2018_v9 = vmax.f32 %v6439_v8, %v1877_v13 }
 0x165   : > { %v2292_v38 = vrot.slane %v6454_v23, 3  ;;  %v2489_v56 = vrot.slane %v6439_v8, 4  ;;  %v2490_v51 = vrot.slane %v6454_v23, 4  ;;  %v6487_v45 = vmax.f32 %v5275_v53, %v9041_v62 }
 0x166   : > { %v2225_v39 = vmax.f32 %v2017_v6, %v2083_v49  ;;  %v6489_v55 = vmax.f32 %v2432_v4, %v2488_v3  ;;  %v2226_v16 = vmax.f32 %v2018_v9, %v2085_v10  ;;  %v2291_v21 = vsel %vm1376_vm1, %v2289_v7, %v2290_v59 }
 0x167   : > { %9042 = vst [vmem:[#allocation85_spill] sm:$0xff] %v6487_v45  ;;  %v2293_v1 = vsel %vm1376_vm1, %v2290_v59, %v2292_v38  ;;  %v2491_v13 = vsel %vm1553_vm4, %v2489_v56, %v2490_v51  ;;  %v1878_v6 = vrot.slane %v6487_v45, 1  ;;  %v2086_v49 = vrot.slane %v6487_v45, 2 }
 0x168   : > { %v2433_v33 = vmax.f32 %v2225_v39, %v2291_v21  ;;  %v8617_v8 = vrot.slane %v6489_v55, 4  ;;  %v2434_v57 = vmax.f32 %v2226_v16, %v2293_v1  ;;  %v2294_v53 = vrot.slane %v6487_v45, 3 }
 0x169   : > { %v2492_v3 = vrot.slane %v6487_v45, 4  ;;  %v1879_v4 = vsel %vm1038_vm2, %v1876_v17, %v1878_v6  ;;  %v2087_v7 = vsel %vm1215_vm3, %v2084_v20, %v2086_v49  ;;  %v6503_v10 = vmax.f32 %v5729_v41, %v5884_v30  ;;  %v9045_v20 = vld [vmem:[#allocation23_spill] sm:$0xff] }
 0x16a   : > { %v2609_v9 = vmax.f32 %v2433_v33, %v2489_v56  ;;  %v2784_v59 = vmax.f32 %v6489_v55, %v8617_v8  ;;  %v6508_v39 = vmax.f32 %v2434_v57, %v2491_v13  ;;  %v2019_v16 = vmax.f32 %v6454_v23, %v1879_v4 }
 0x16b   : > { %9043 = vst [vmem:[#allocation86_spill] sm:$0xff] %v6503_v10  ;;  %v2295_v21 = vsel %vm1376_vm1, %v2292_v38, %v2294_v53  ;;  %v2493_v56 = vsel %vm1553_vm4, %v2490_v51, %v2492_v3  ;;  %v6515_v17 = vmax.f32 %v5719_v46, %v5152_v2  ;;  %v6519_v41 = vmax.f32 %v5315_v0, %v9045_v20 }
 0x16c   : > { %v1880_v1 = vrot.slane %v6503_v10, 1  ;;  %4370 = vst.msk [vmem:[%s4833_s17 + $0x23c] sm:$0xf] %vm2825_vm8, %v2784_v59  ;;  %v8620_v57 = vrot.slane %v6508_v39, 4  ;;  %v2227_v33 = vmax.f32 %v2019_v16, %v2087_v7  ;;  %v2088_v38 = vrot.slane %v6503_v10, 2 }
 0x16d   : > { %9044 = vst [vmem:[#allocation87_spill] sm:$0xff] %v6515_v17  ;;  %9046 = vst [vmem:[#allocation88_spill] sm:$0xff] %v6519_v41  ;;  %v2296_v51 = vrot.slane %v6503_v10, 3  ;;  %v1881_v13 = vrot.slane %v6515_v17, 1  ;;  %v1883_v46 = vrot.slane %v6519_v41, 1  ;;  %v2089_v6 = vrot.slane %v6515_v17, 2 }
 0x16e   : > { %v2091_v0 = vrot.slane %v6519_v41, 2  ;;  %v2785_v49 = vmax.f32 %v2609_v9, %v8620_v57  ;;  %v2435_v53 = vmax.f32 %v2227_v33, %v2295_v21  ;;  %v2297_v3 = vrot.slane %v6515_v17, 3  ;;  %v9047_v57 = vld [vmem:[#allocation43_spill] sm:$0xff] }
 0x16f   : > { %v2299_v4 = vrot.slane %v6519_v41, 3  ;;  %v1882_v7 = vsel %vm1038_vm2, %v1880_v1, %v1881_v13  ;;  %v1884_v59 = vsel %vm1038_vm2, %v1881_v13, %v1883_v46  ;;  %v2090_v16 = vsel %vm1215_vm3, %v2088_v38, %v2089_v6 }
 0x170   : > { %v2092_v8 = vsel %vm1215_vm3, %v2089_v6, %v2091_v0  ;;  %4371 = vst.msk [vmem:[%s4833_s17 + $0x23c] sm:$0xf0] %vm2822_vm7, %v2785_v49  ;;  %v6541_v45 = vmax.f32 %v2435_v53, %v2493_v56  ;;  %v2020_v23 = vmax.f32 %v6503_v10, %v1882_v7  ;;  %v2021_v9 = vmax.f32 %v6515_v17, %v1884_v59  ;;  %v9049_v53 = vld [vmem:[#allocation59_spill] sm:$0xff] }
 0x171   : > { %v2298_v21 = vsel %vm1376_vm1, %v2296_v51, %v2297_v3  ;;  %v2300_v33 = vsel %vm1376_vm1, %v2297_v3, %v2299_v4  ;;  %v2494_v1 = vrot.slane %v6515_v17, 4  ;;  %v2495_v13 = vrot.slane %v6519_v41, 4 }
 0x172   : > { %v6551_v38 = vmax.f32 %v5335_v25, %v9047_v57  ;;  %v8627_v6 = vrot.slane %v6541_v45, 4  ;;  %v2228_v56 = vmax.f32 %v2020_v23, %v2090_v16  ;;  %v2229_v49 = vmax.f32 %v2021_v9, %v2092_v8 }
 0x173   : > { %v6556_v7 = vmax.f32 %v5762_v12, %v9049_v53  ;;  %v2496_v51 = vsel %vm1553_vm4, %v2494_v1, %v2495_v13  ;;  %v6571_v27 = vmax.f32 %v5132_v19, %v5156_v24 }
 0x174   : > { %9048 = vst [vmem:[#allocation89_spill] sm:$0xff] %v6551_v38  ;;  %v1885_v3 = vrot.slane %v6551_v38, 1  ;;  %v2093_v59 = vrot.slane %v6551_v38, 2  ;;  %v2301_v17 = vrot.slane %v6551_v38, 3  ;;  %v2787_v25 = vmax.f32 %v6541_v45, %v8627_v6 }
 0x175   : > { %9050 = vst [vmem:[#allocation90_spill] sm:$0xff] %v6556_v7  ;;  %v2436_v10 = vmax.f32 %v2228_v56, %v2298_v21  ;;  %v2437_v47 = vmax.f32 %v2229_v49, %v2300_v33  ;;  %v2497_v8 = vrot.slane %v6551_v38, 4  ;;  %9051 = vst [vmem:[#allocation91_spill] sm:$0xff] %v6571_v27  ;;  %v9052_v56 = vld [vmem:[#allocation25_spill] sm:$0xff] }
 0x176   : > { %v1886_v23 = vsel %vm1038_vm2, %v1883_v46, %v1885_v3  ;;  %v2094_v16 = vsel %vm1215_vm3, %v2091_v0, %v2093_v59  ;;  %v2302_v9 = vsel %vm1376_vm1, %v2299_v4, %v2301_v17  ;;  %4373 = vst.msk [vmem:[%s4833_s17 + $0x24c] sm:$0xf] %vm2825_vm8, %v2787_v25  ;;  %v6581_v46 = vmax.f32 %v5139_v34, %v9052_v56 }
 0x177   : > { %v2612_v28 = vmax.f32 %v2436_v10, %v2494_v1  ;;  %v6575_v40 = vmax.f32 %v2437_v47, %v2496_v51  ;;  %v2022_v21 = vmax.f32 %v6519_v41, %v1886_v23  ;;  %v2498_v33 = vsel %vm1553_vm4, %v2495_v13, %v2497_v8 }
 0x178   : > { %9053 = vst [vmem:[#allocation92_spill] sm:$0xff] %v6581_v46  ;;  %v1887_v0 = vrot.slane %v6556_v7, 1  ;;  %v1888_v17 = vrot.slane %v6571_v27, 1  ;;  %v2095_v4 = vrot.slane %v6556_v7, 2  ;;  %v2096_v47 = vrot.slane %v6571_v27, 2 }
 0x179   : > { %v8630_v49 = vrot.slane %v6575_v40, 4  ;;  %v2230_v10 = vmax.f32 %v2022_v21, %v2094_v16  ;;  %v2303_v1 = vrot.slane %v6556_v7, 3  ;;  %v1890_v51 = vrot.slane %v6581_v46, 1 }
 0x17a   : > { %v1889_v13 = vsel %vm1038_vm2, %v1887_v0, %v1888_v17  ;;  %v2098_v3 = vrot.slane %v6581_v46, 2  ;;  %v2304_v59 = vrot.slane %v6571_v27, 3  ;;  %v2097_v16 = vsel %vm1215_vm3, %v2095_v4, %v2096_v47 }
 0x17b   : > { %v2788_v25 = vmax.f32 %v2612_v28, %v8630_v49  ;;  %v2438_v8 = vmax.f32 %v2230_v10, %v2302_v9  ;;  %v2023_v23 = vmax.f32 %v6556_v7, %v1889_v13  ;;  %v1891_v21 = vsel %vm1038_vm2, %v1888_v17, %v1890_v51  ;;  %v9054_v17 = vld [vmem:[#allocation44_spill] sm:$0xff] }
 0x17c   : > { %v2099_v6 = vsel %vm1215_vm3, %v2096_v47, %v2098_v3  ;;  %v2305_v0 = vsel %vm1376_vm1, %v2303_v1, %v2304_v59  ;;  %v2306_v38 = vrot.slane %v6581_v46, 3  ;;  %v2024_v54 = vmax.f32 %v6571_v27, %v1891_v21  ;;  %v9056_v1 = vld [vmem:[#allocation60_spill] sm:$0xff] }
 0x17d   : > { %4374 = vst.msk [vmem:[%s4833_s17 + $0x24c] sm:$0xf0] %vm2822_vm7, %v2788_v25  ;;  %v6603_v41 = vmax.f32 %v2438_v8, %v2498_v33  ;;  %v2231_v28 = vmax.f32 %v2023_v23, %v2097_v16  ;;  %v2499_v9 = vrot.slane %v6571_v27, 4  ;;  %v2500_v4 = vrot.slane %v6581_v46, 4  ;;  %v9058_v23 = vld [vmem:[#allocation26_spill] sm:$0xff] }
 0x17e   : > { %v2307_v10 = vsel %vm1376_vm1, %v2304_v59, %v2306_v38  ;;  %v6611_v47 = vmax.f32 %v5357_v48, %v9054_v17  ;;  %v6615_v13 = vmax.f32 %v5825_v26, %v9056_v1  ;;  %v2232_v25 = vmax.f32 %v2024_v54, %v2099_v6 }
 0x17f   : > { %v8637_v33 = vrot.slane %v6603_v41, 4  ;;  %v2439_v8 = vmax.f32 %v2231_v28, %v2305_v0  ;;  %v6620_v16 = vmax.f32 %v5144_v31, %v9058_v23  ;;  %v2501_v59 = vsel %vm1553_vm4, %v2499_v9, %v2500_v4  ;;  %v9060_v31 = vld [vmem:[#allocation27_spill] sm:$0xff] }
 0x180   : > { %9055 = vst [vmem:[#allocation93_spill] sm:$0xff] %v6611_v47  ;;  %9057 = vst [vmem:[#allocation94_spill] sm:$0xff] %v6615_v13  ;;  %v1892_v21 = vrot.slane %v6611_v47, 1  ;;  %v2100_v49 = vrot.slane %v6611_v47, 2  ;;  %v2308_v27 = vrot.slane %v6611_v47, 3  ;;  %v2440_v26 = vmax.f32 %v2232_v25, %v2307_v10 }
 0x181   : > { %9059 = vst [vmem:[#allocation95_spill] sm:$0xff] %v6620_v16  ;;  %v2790_v7 = vmax.f32 %v6603_v41, %v8637_v33  ;;  %v2615_v48 = vmax.f32 %v2439_v8, %v2499_v9  ;;  %v2502_v54 = vrot.slane %v6611_v47, 4  ;;  %v6635_v60 = vmax.f32 %v5146_v37, %v9060_v31 }
 0x182   : > { %v1893_v6 = vsel %vm1038_vm2, %v1890_v51, %v1892_v21  ;;  %v2101_v0 = vsel %vm1215_vm3, %v2098_v3, %v2100_v49  ;;  %v2309_v28 = vsel %vm1376_vm1, %v2306_v38, %v2308_v27  ;;  %v6639_v32 = vmax.f32 %v2440_v26, %v2501_v59 }
 0x183   : > { %9061 = vst [vmem:[#allocation96_spill] sm:$0xff] %v6635_v60  ;;  %4376 = vst.msk [vmem:[%s4833_s17 + $0x25c] sm:$0xf] %vm2825_vm8, %v2790_v7  ;;  %v2025_v33 = vmax.f32 %v6581_v46, %v1893_v6  ;;  %v2503_v9 = vsel %vm1553_vm4, %v2500_v4, %v2502_v54  ;;  %v1894_v10 = vrot.slane %v6615_v13, 1  ;;  %v1895_v51 = vrot.slane %v6620_v16, 1 }
 0x184   : > { %9062 = vst [vmem:[#allocation97_spill] sm:$0xff] %v6639_v32  ;;  %v1897_v49 = vrot.slane %v6635_v60, 1  ;;  %v2102_v27 = vrot.slane %v6615_v13, 2  ;;  %v2103_v38 = vrot.slane %v6620_v16, 2  ;;  %v8642_v3 = vrot.slane %v6639_v32, 4 }
 0x185   : > { %v2233_v7 = vmax.f32 %v2025_v33, %v2101_v0  ;;  %v2105_v26 = vrot.slane %v6635_v60, 2  ;;  %v2310_v25 = vrot.slane %v6615_v13, 3  ;;  %v1896_v4 = vsel %vm1038_vm2, %v1894_v10, %v1895_v51 }
 0x186   : > { %v1898_v8 = vsel %vm1038_vm2, %v1895_v51, %v1897_v49  ;;  %v2104_v59 = vsel %vm1215_vm3, %v2102_v27, %v2103_v38  ;;  %v2311_v21 = vrot.slane %v6620_v16, 3  ;;  %v2791_v54 = vmax.f32 %v2615_v48, %v8642_v3 }
 0x187   : > { %v2441_v6 = vmax.f32 %v2233_v7, %v2309_v28  ;;  %v2026_v47 = vmax.f32 %v6615_v13, %v1896_v4  ;;  %v2027_v33 = vmax.f32 %v6620_v16, %v1898_v8  ;;  %v2106_v0 = vsel %vm1215_vm3, %v2103_v38, %v2105_v26  ;;  %v9063_v7 = vld [vmem:[#allocation45_spill] sm:$0xff]  ;;  %v9067_v8 = vld [vmem:[#allocation28_spill] sm:$0xff] }
 0x188   : > { %v2312_v46 = vsel %vm1376_vm1, %v2310_v25, %v2311_v21  ;;  %v2313_v10 = vrot.slane %v6635_v60, 3  ;;  %v2504_v51 = vrot.slane %v6620_v16, 4  ;;  %4377 = vst.msk [vmem:[%s4833_s17 + $0x25c] sm:$0xf0] %vm2822_vm7, %v2791_v54  ;;  %v2505_v48 = vrot.slane %v6635_v60, 4  ;;  %v9065_v38 = vld [vmem:[#allocation61_spill] sm:$0xff] }
 0x189   : > { %v6665_v27 = vmax.f32 %v2441_v6, %v2503_v9  ;;  %v2234_v37 = vmax.f32 %v2026_v47, %v2104_v59  ;;  %v2235_v43 = vmax.f32 %v2027_v33, %v2106_v0  ;;  %v6671_v4 = vmax.f32 %v9035_v15, %v9063_v7 }
 0x18a   : > { %v2314_v28 = vsel %vm1376_vm1, %v2311_v21, %v2313_v10  ;;  %v6675_v25 = vmax.f32 %v5857_v35, %v9065_v38  ;;  %v6679_v3 = vmax.f32 %v5148_v14, %v9067_v8  ;;  %v2506_v54 = vsel %vm1553_vm4, %v2504_v51, %v2505_v48  ;;  %v9070_v35 = vld [vmem:[#allocation29_spill] sm:$0xff] }
 0x18b   : > { %9064 = vst [vmem:[#allocation98_spill] sm:$0xff] %v6671_v4  ;;  %v8649_v9 = vrot.slane %v6665_v27, 4  ;;  %v2442_v47 = vmax.f32 %v2234_v37, %v2312_v46  ;;  %v2443_v59 = vmax.f32 %v2235_v43, %v2314_v28  ;;  %v1899_v21 = vrot.slane %v6671_v4, 1 }
 0x18c   : > { %9066 = vst [vmem:[#allocation99_spill] sm:$0xff] %v6675_v25  ;;  %9068 = vst [vmem:[#allocation100_spill] sm:$0xff] %v6679_v3  ;;  %v2107_v6 = vrot.slane %v6671_v4, 2  ;;  %v2315_v33 = vrot.slane %v6671_v4, 3  ;;  %v2507_v0 = vrot.slane %v6671_v4, 4  ;;  %v6694_v37 = vmax.f32 %v5150_v63, %v9070_v35 }
 0x18d   : > { %v2793_v16 = vmax.f32 %v6665_v27, %v8649_v9  ;;  %v2618_v13 = vmax.f32 %v2442_v47, %v2504_v51  ;;  %v6690_v14 = vmax.f32 %v2443_v59, %v2506_v54  ;;  %v1900_v43 = vsel %vm1038_vm2, %v1897_v49, %v1899_v21 }
 0x18e   : > { %9071 = vst [vmem:[#allocation102_spill] sm:$0xff] %v6694_v37  ;;  %v2108_v46 = vsel %vm1215_vm3, %v2105_v26, %v2107_v6  ;;  %v2316_v28 = vsel %vm1376_vm1, %v2313_v10, %v2315_v33  ;;  %v2508_v15 = vsel %vm1553_vm4, %v2505_v48, %v2507_v0  ;;  %v2028_v51 = vmax.f32 %v6635_v60, %v1900_v43 }
 0x18f   : > { %9069 = vst [vmem:[#allocation101_spill] sm:$0xff] %v6690_v14  ;;  %4379 = vst.msk [vmem:[%s4833_s17 + $0x26c] sm:$0xf] %vm2825_vm8, %v2793_v16  ;;  %v8652_v4 = vrot.slane %v6690_v14, 4  ;;  %v1901_v47 = vrot.slane %v6675_v25, 1  ;;  %v1902_v59 = vrot.slane %v6679_v3, 1 }
 0x190   : > { %v1904_v54 = vrot.slane %v6694_v37, 1  ;;  %v2109_v49 = vrot.slane %v6675_v25, 2  ;;  %v2110_v26 = vrot.slane %v6679_v3, 2  ;;  %v2112_v10 = vrot.slane %v6694_v37, 2 }
 0x191   : > { %v2794_v16 = vmax.f32 %v2618_v13, %v8652_v4  ;;  %v2236_v48 = vmax.f32 %v2028_v51, %v2108_v46  ;;  %v1903_v21 = vsel %vm1038_vm2, %v1901_v47, %v1902_v59  ;;  %v2317_v6 = vrot.slane %v6675_v25, 3  ;;  %v9072_v4 = vld [vmem:[#allocation46_spill] sm:$0xff] }
 0x192   : > { %v1905_v33 = vsel %vm1038_vm2, %v1902_v59, %v1904_v54  ;;  %v2029_v0 = vmax.f32 %v6675_v25, %v1903_v21  ;;  %v2111_v43 = vsel %vm1215_vm3, %v2109_v49, %v2110_v26  ;;  %v2113_v9 = vsel %vm1215_vm3, %v2110_v26, %v2112_v10 }
 0x193   : > { %4380 = vst.msk [vmem:[%s4833_s17 + $0x26c] sm:$0xf0] %vm2822_vm7, %v2794_v16  ;;  %v2444_v60 = vmax.f32 %v2236_v48, %v2316_v28  ;;  %v2030_v63 = vmax.f32 %v6679_v3, %v1905_v33  ;;  %v2318_v13 = vrot.slane %v6679_v3, 3  ;;  %v2320_v46 = vrot.slane %v6694_v37, 3 }
 0x194   : > { %v2237_v51 = vmax.f32 %v2029_v0, %v2111_v43  ;;  %v2509_v47 = vrot.slane %v6679_v3, 4  ;;  %v2510_v59 = vrot.slane %v6694_v37, 4  ;;  %v6727_v21 = vmax.f32 %v9041_v62, %v9072_v4 }
 0x195   : > { %v6729_v49 = vmax.f32 %v2444_v60, %v2508_v15  ;;  %v2238_v26 = vmax.f32 %v2030_v63, %v2113_v9  ;;  %v2319_v28 = vsel %vm1376_vm1, %v2317_v6, %v2318_v13  ;;  %v2321_v16 = vsel %vm1376_vm1, %v2318_v13, %v2320_v46  ;;  %v9075_v6 = vld [vmem:[#allocation62_spill] sm:$0xff] }
 0x196   : > { %9073 = vst [vmem:[#allocation103_spill] sm:$0xff] %v6727_v21  ;;  %v2445_v48 = vmax.f32 %v2237_v51, %v2319_v28  ;;  %v2511_v33 = vsel %vm1553_vm4, %v2509_v47, %v2510_v59  ;;  %v1906_v0 = vrot.slane %v6727_v21, 1  ;;  %v2114_v43 = vrot.slane %v6727_v21, 2 }
 0x197   : > { %9074 = vst [vmem:[#allocation104_spill] sm:$0xff] %v6729_v49  ;;  %v8656_v3 = vrot.slane %v6729_v49, 4  ;;  %v2446_v25 = vmax.f32 %v2238_v26, %v2321_v16  ;;  %v2322_v62 = vrot.slane %v6727_v21, 3  ;;  %v2512_v60 = vrot.slane %v6727_v21, 4 }
 0x198   : > { %v2621_v63 = vmax.f32 %v2445_v48, %v2509_v47  ;;  %v1907_v15 = vsel %vm1038_vm2, %v1904_v54, %v1906_v0  ;;  %v2115_v9 = vsel %vm1215_vm3, %v2112_v10, %v2114_v43  ;;  %v6743_v13 = vmax.f32 %v5884_v30, %v9075_v6  ;;  %v9078_v48 = vld [vmem:[#allocation30_spill] sm:$0xff]  ;;  %v9080_v10 = vld [vmem:[#allocation31_spill] sm:$0xff] }
 0x199   : > { %v2796_v51 = vmax.f32 %v6729_v49, %v8656_v3  ;;  %v6748_v28 = vmax.f32 %v2446_v25, %v2511_v33  ;;  %v2031_v26 = vmax.f32 %v6694_v37, %v1907_v15  ;;  %v2323_v16 = vsel %vm1376_vm1, %v2320_v46, %v2322_v62 }
 0x19a   : > { %9076 = vst [vmem:[#allocation105_spill] sm:$0xff] %v6743_v13  ;;  %v2513_v47 = vsel %vm1553_vm4, %v2510_v59, %v2512_v60  ;;  %v6755_v54 = vmax.f32 %v5152_v2, %v9078_v48  ;;  %v6759_v0 = vmax.f32 %v9045_v20, %v9080_v10  ;;  %v1908_v43 = vrot.slane %v6743_v13, 1 }
 0x19b   : > { %9077 = vst [vmem:[#allocation106_spill] sm:$0xff] %v6748_v28  ;;  %4382 = vst.msk [vmem:[%s4833_s17 + $0x27c] sm:$0xf] %vm2825_vm8, %v2796_v51  ;;  %v8663_v25 = vrot.slane %v6748_v28, 4  ;;  %v2239_v33 = vmax.f32 %v2031_v26, %v2115_v9  ;;  %v2116_v62 = vrot.slane %v6743_v13, 2  ;;  %v2324_v46 = vrot.slane %v6743_v13, 3 }
 0x19c   : > { %9079 = vst [vmem:[#allocation107_spill] sm:$0xff] %v6755_v54  ;;  %9081 = vst [vmem:[#allocation108_spill] sm:$0xff] %v6759_v0  ;;  %v1909_v59 = vrot.slane %v6755_v54, 1  ;;  %v1911_v60 = vrot.slane %v6759_v0, 1  ;;  %v2117_v15 = vrot.slane %v6755_v54, 2  ;;  %v2119_v3 = vrot.slane %v6759_v0, 2 }
 0x19d   : > { %v2797_v2 = vmax.f32 %v2621_v63, %v8663_v25  ;;  %v2447_v51 = vmax.f32 %v2239_v33, %v2323_v16  ;;  %v2325_v30 = vrot.slane %v6755_v54, 3  ;;  %v2327_v9 = vrot.slane %v6759_v0, 3  ;;  %v9083_v25 = vld [vmem:[#allocation47_spill] sm:$0xff] }
 0x19e   : > { %v1910_v26 = vsel %vm1038_vm2, %v1908_v43, %v1909_v59  ;;  %v1912_v21 = vsel %vm1038_vm2, %v1909_v59, %v1911_v60  ;;  %v2118_v37 = vsel %vm1215_vm3, %v2116_v62, %v2117_v15  ;;  %v2120_v20 = vsel %vm1215_vm3, %v2117_v15, %v2119_v3 }
 0x19f   : > { %4383 = vst.msk [vmem:[%s4833_s17 + $0x27c] sm:$0xf0] %vm2822_vm7, %v2797_v2  ;;  %v6781_v50 = vmax.f32 %v2447_v51, %v2513_v47  ;;  %v2032_v19 = vmax.f32 %v6743_v13, %v1910_v26  ;;  %v2033_v63 = vmax.f32 %v6755_v54, %v1912_v21  ;;  %v2326_v16 = vsel %vm1376_vm1, %v2324_v46, %v2325_v30  ;;  %v9085_v51 = vld [vmem:[#allocation63_spill] sm:$0xff] }
 0x1a0   : > { %v2328_v33 = vsel %vm1376_vm1, %v2325_v30, %v2327_v9  ;;  %v2514_v43 = vrot.slane %v6755_v54, 4  ;;  %v2515_v59 = vrot.slane %v6759_v0, 4  ;;  %v6791_v62 = vmax.f32 %v9047_v57, %v9083_v25 }
 0x1a1   : > { %9082 = vst [vmem:[#allocation109_spill] sm:$0xff] %v6781_v50  ;;  %v8671_v2 = vrot.slane %v6781_v50, 4  ;;  %v2240_v47 = vmax.f32 %v2032_v19, %v2118_v37  ;;  %v2241_v15 = vmax.f32 %v2033_v63, %v2120_v20  ;;  %v6796_v21 = vmax.f32 %v9049_v53, %v9085_v51  ;;  %v9086_v53 = vld [vmem:[#allocation32_spill] sm:$0xff] }
 0x1a2   : > { %9084 = vst [vmem:[#allocation110_spill] sm:$0xff] %v6791_v62  ;;  %v2516_v46 = vsel %vm1553_vm4, %v2514_v43, %v2515_v59  ;;  %v1913_v30 = vrot.slane %v6791_v62, 1  ;;  %v2121_v26 = vrot.slane %v6791_v62, 2  ;;  %v2329_v54 = vrot.slane %v6791_v62, 3 }
 0x1a3   : > { %v2799_v13 = vmax.f32 %v6781_v50, %v8671_v2  ;;  %v2448_v57 = vmax.f32 %v2240_v47, %v2326_v16  ;;  %v2449_v34 = vmax.f32 %v2241_v15, %v2328_v33  ;;  %v2517_v19 = vrot.slane %v6791_v62, 4  ;;  %v9088_v47 = vld [vmem:[#allocation33_spill] sm:$0xff] }
 0x1a4   : > { %v1914_v20 = vsel %vm1038_vm2, %v1911_v60, %v1913_v30  ;;  %v2122_v37 = vsel %vm1215_vm3, %v2119_v3, %v2121_v26  ;;  %v2330_v63 = vsel %vm1376_vm1, %v2327_v9, %v2329_v54  ;;  %v6811_v58 = vmax.f32 %v5156_v24, %v9086_v53 }
 0x1a5   : > { %4385 = vst.msk [vmem:[%s4833_s17 + $0x28c] sm:$0xf] %vm2825_vm8, %v2799_v13  ;;  %v2624_v61 = vmax.f32 %v2448_v57, %v2514_v43  ;;  %v6815_v12 = vmax.f32 %v2449_v34, %v2516_v46  ;;  %v2034_v16 = vmax.f32 %v6759_v0, %v1914_v20  ;;  %v2518_v33 = vsel %vm1553_vm4, %v2515_v59, %v2517_v19 }
 0x1a6   : > { %v6821_v60 = vmax.f32 %v9052_v56, %v9088_v47  ;;  %v1915_v3 = vrot.slane %v6796_v21, 1  ;;  %v1916_v54 = vrot.slane %v6811_v58, 1  ;;  %v2123_v9 = vrot.slane %v6796_v21, 2 }
 0x1a7   : > { %9087 = vst [vmem:[#allocation111_spill] sm:$0xff] %v6815_v12  ;;  %v8675_v15 = vrot.slane %v6815_v12, 4  ;;  %v2242_v57 = vmax.f32 %v2034_v16, %v2122_v37  ;;  %v2124_v34 = vrot.slane %v6811_v58, 2  ;;  %v2331_v13 = vrot.slane %v6796_v21, 3 }
 0x1a8   : > { %9089 = vst [vmem:[#allocation112_spill] sm:$0xff] %v6821_v60  ;;  %v1917_v43 = vsel %vm1038_vm2, %v1915_v3, %v1916_v54  ;;  %v1918_v59 = vrot.slane %v6821_v60, 1  ;;  %v2126_v46 = vrot.slane %v6821_v60, 2  ;;  %v2332_v30 = vrot.slane %v6811_v58, 3 }
 0x1a9   : > { %v2800_v26 = vmax.f32 %v2624_v61, %v8675_v15  ;;  %v2450_v19 = vmax.f32 %v2242_v57, %v2330_v63  ;;  %v2035_v20 = vmax.f32 %v6796_v21, %v1917_v43  ;;  %v2125_v37 = vsel %vm1215_vm3, %v2123_v9, %v2124_v34 }
 0x1aa   : > { %v1919_v16 = vsel %vm1038_vm2, %v1916_v54, %v1918_v59  ;;  %v2127_v2 = vsel %vm1215_vm3, %v2124_v34, %v2126_v46  ;;  %v2333_v3 = vsel %vm1376_vm1, %v2331_v13, %v2332_v30  ;;  %v2334_v24 = vrot.slane %v6821_v60, 3  ;;  %v9091_v54 = vld [vmem:[#allocation48_spill] sm:$0xff] }
 0x1ab   : > { %4386 = vst.msk [vmem:[%s4833_s17 + $0x28c] sm:$0xf0] %vm2822_vm7, %v2800_v26  ;;  %v6843_v62 = vmax.f32 %v2450_v19, %v2518_v33  ;;  %v2036_v0 = vmax.f32 %v6811_v58, %v1919_v16  ;;  %v2243_v61 = vmax.f32 %v2035_v20, %v2125_v37  ;;  %v2519_v63 = vrot.slane %v6811_v58, 4  ;;  %v9093_v13 = vld [vmem:[#allocation64_spill] sm:$0xff]  ;;  %v9094_v20 = vld [vmem:[#allocation35_spill] sm:$0xff] }
 0x1ac   : > { %v2335_v57 = vsel %vm1376_vm1, %v2332_v30, %v2334_v24  ;;  %v2520_v9 = vrot.slane %v6821_v60, 4  ;;  %v6851_v34 = vmax.f32 %v9054_v17, %v9091_v54  ;;  %v6855_v43 = vmax.f32 %v9056_v1, %v9093_v13 }
 0x1ad   : > { %9090 = vst [vmem:[#allocation113_spill] sm:$0xff] %v6843_v62  ;;  %v8685_v33 = vrot.slane %v6843_v62, 4  ;;  %v2244_v26 = vmax.f32 %v2036_v0, %v2127_v2  ;;  %v2451_v19 = vmax.f32 %v2243_v61, %v2333_v3  ;;  %v6860_v37 = vmax.f32 %v9058_v23, %v9094_v20  ;;  %v9095_v23 = vld [vmem:[#allocation39_spill] sm:$0xff] }
 0x1ae   : > { %9092 = vst [vmem:[#allocation48_spill] sm:$0xff] %v6851_v34  ;;  %v2521_v30 = vsel %vm1553_vm4, %v2519_v63, %v2520_v9  ;;  %v1920_v16 = vrot.slane %v6851_v34, 1  ;;  %v2128_v15 = vrot.slane %v6851_v34, 2  ;;  %v2336_v17 = vrot.slane %v6851_v34, 3 }
 0x1af   : > { %v2802_v1 = vmax.f32 %v6843_v62, %v8685_v33  ;;  %v2452_v56 = vmax.f32 %v2244_v26, %v2335_v57  ;;  %v2627_v12 = vmax.f32 %v2451_v19, %v2519_v63  ;;  %v2522_v0 = vrot.slane %v6851_v34, 4 }
 0x1b0   : > { %v1921_v2 = vsel %vm1038_vm2, %v1918_v59, %v1920_v16  ;;  %v2129_v3 = vsel %vm1215_vm3, %v2126_v46, %v2128_v15  ;;  %v2337_v61 = vsel %vm1376_vm1, %v2334_v24, %v2336_v17  ;;  %v6875_v28 = vmax.f32 %v9060_v31, %v9095_v23 }
 0x1b1   : > { %4388 = vst.msk [vmem:[%s4833_s17 + $0x29c] sm:$0xf] %vm2825_vm8, %v2802_v1  ;;  %v6879_v50 = vmax.f32 %v2452_v56, %v2521_v30  ;;  %v2037_v33 = vmax.f32 %v6821_v60, %v1921_v2  ;;  %v2523_v63 = vsel %vm1553_vm4, %v2520_v9, %v2522_v0  ;;  %v1922_v57 = vrot.slane %v6855_v43, 1 }
 0x1b2   : > { %9096 = vst [vmem:[#allocation64_spill] sm:$0xff] %v6875_v28  ;;  %v1923_v59 = vrot.slane %v6860_v37, 1  ;;  %v1925_v15 = vrot.slane %v6875_v28, 1  ;;  %v2130_v24 = vrot.slane %v6855_v43, 2  ;;  %v2131_v17 = vrot.slane %v6860_v37, 2 }
 0x1b3   : > { %9097 = vst [vmem:[#allocation35_spill] sm:$0xff] %v6879_v50  ;;  %v8691_v46 = vrot.slane %v6879_v50, 4  ;;  %v2245_v1 = vmax.f32 %v2037_v33, %v2129_v3  ;;  %v2133_v56 = vrot.slane %v6875_v28, 2  ;;  %v2338_v26 = vrot.slane %v6855_v43, 3 }
 0x1b4   : > { %v1924_v9 = vsel %vm1038_vm2, %v1922_v57, %v1923_v59  ;;  %v1926_v19 = vsel %vm1038_vm2, %v1923_v59, %v1925_v15  ;;  %v2132_v30 = vsel %vm1215_vm3, %v2130_v24, %v2131_v17  ;;  %v2339_v16 = vrot.slane %v6860_v37, 3 }
 0x1b5   : > { %v2803_v0 = vmax.f32 %v2627_v12, %v8691_v46  ;;  %v2453_v2 = vmax.f32 %v2245_v1, %v2337_v61  ;;  %v2038_v34 = vmax.f32 %v6855_v43, %v1924_v9  ;;  %v2039_v33 = vmax.f32 %v6860_v37, %v1926_v19  ;;  %v9099_v1 = vld [vmem:[#allocation49_spill] sm:$0xff] }
 0x1b6   : > { %v2134_v3 = vsel %vm1215_vm3, %v2131_v17, %v2133_v56  ;;  %v2340_v60 = vsel %vm1376_vm1, %v2338_v26, %v2339_v16  ;;  %v2341_v57 = vrot.slane %v6875_v28, 3  ;;  %v2524_v59 = vrot.slane %v6860_v37, 4  ;;  %v9101_v17 = vld [vmem:[#allocation8_spill] sm:$0xff]  ;;  %v9103_v19 = vld [vmem:[#allocation65_spill] sm:$0xff] }
 0x1b7   : > { %4389 = vst.msk [vmem:[%s4833_s17 + $0x29c] sm:$0xf0] %vm2822_vm7, %v2803_v0  ;;  %v6905_v24 = vmax.f32 %v2453_v2, %v2523_v63  ;;  %v2246_v31 = vmax.f32 %v2038_v34, %v2132_v30  ;;  %v2247_v50 = vmax.f32 %v2039_v33, %v2134_v3  ;;  %v2525_v12 = vrot.slane %v6875_v28, 4 }
 0x1b8   : > { %v2342_v61 = vsel %vm1376_vm1, %v2339_v16, %v2341_v57  ;;  %v6911_v9 = vmax.f32 %v9063_v7, %v9099_v1  ;;  %v6915_v26 = vmax.f32 %v9065_v38, %v9101_v17  ;;  %v6919_v46 = vmax.f32 %v9067_v8, %v9103_v19  ;;  %v9106_v38 = vld [vmem:[#allocation50_spill] sm:$0xff] }
 0x1b9   : > { %9098 = vst [vmem:[#allocation39_spill] sm:$0xff] %v6905_v24  ;;  %v8696_v63 = vrot.slane %v6905_v24, 4  ;;  %v2454_v34 = vmax.f32 %v2246_v31, %v2340_v60  ;;  %v2455_v30 = vmax.f32 %v2247_v50, %v2342_v61  ;;  %v2526_v0 = vsel %vm1553_vm4, %v2524_v59, %v2525_v12 }
 0x1ba   : > { %9100 = vst [vmem:[#allocation49_spill] sm:$0xff] %v6911_v9  ;;  %9102 = vst [vmem:[#allocation114_spill] sm:$0xff] %v6915_v26  ;;  %v1927_v16 = vrot.slane %v6911_v9, 1  ;;  %v2135_v2 = vrot.slane %v6911_v9, 2  ;;  %v2343_v33 = vrot.slane %v6911_v9, 3  ;;  %v2527_v3 = vrot.slane %v6911_v9, 4 }
 0x1bb   : > { %9104 = vst [vmem:[#allocation115_spill] sm:$0xff] %v6919_v46  ;;  %v2805_v19 = vmax.f32 %v6905_v24, %v8696_v63  ;;  %v2630_v17 = vmax.f32 %v2454_v34, %v2524_v59  ;;  %v6930_v8 = vmax.f32 %v2455_v30, %v2526_v0  ;;  %v6934_v31 = vmax.f32 %v9070_v35, %v9106_v38 }
 0x1bc   : > { %v1928_v50 = vsel %vm1038_vm2, %v1925_v15, %v1927_v16  ;;  %v2136_v60 = vsel %vm1215_vm3, %v2133_v56, %v2135_v2  ;;  %v2344_v61 = vsel %vm1376_vm1, %v2341_v57, %v2343_v33  ;;  %v2528_v7 = vsel %vm1553_vm4, %v2525_v12, %v2527_v3 }
 0x1bd   : > { %9105 = vst [vmem:[#allocation116_spill] sm:$0xff] %v6930_v8  ;;  %9107 = vst [vmem:[#allocation117_spill] sm:$0xff] %v6934_v31  ;;  %v8698_v9 = vrot.slane %v6930_v8, 4  ;;  %v2040_v59 = vmax.f32 %v6875_v28, %v1928_v50  ;;  %v1929_v34 = vrot.slane %v6915_v26, 1  ;;  %v1930_v30 = vrot.slane %v6919_v46, 1 }
 0x1be   : > { %4391 = vst.msk [vmem:[%s4833_s17 + $0x2ac] sm:$0xf] %vm2825_vm8, %v2805_v19  ;;  %v1932_v0 = vrot.slane %v6934_v31, 1  ;;  %v2137_v15 = vrot.slane %v6915_v26, 2  ;;  %v2138_v56 = vrot.slane %v6919_v46, 2  ;;  %v2140_v57 = vrot.slane %v6934_v31, 2 }
 0x1bf   : > { %v2806_v12 = vmax.f32 %v2630_v17, %v8698_v9  ;;  %v2248_v19 = vmax.f32 %v2040_v59, %v2136_v60  ;;  %v1931_v16 = vsel %vm1038_vm2, %v1929_v34, %v1930_v30  ;;  %v2345_v2 = vrot.slane %v6915_v26, 3  ;;  %v9108_v9 = vld [vmem:[#allocation51_spill] sm:$0xff] }
 0x1c0   : > { %v1933_v33 = vsel %vm1038_vm2, %v1930_v30, %v1932_v0  ;;  %v2041_v3 = vmax.f32 %v6915_v26, %v1931_v16  ;;  %v2139_v50 = vsel %vm1215_vm3, %v2137_v15, %v2138_v56  ;;  %v2141_v63 = vsel %vm1215_vm3, %v2138_v56, %v2140_v57 }
 0x1c1   : > { %4392 = vst.msk [vmem:[%s4833_s17 + $0x2ac] sm:$0xf0] %vm2822_vm7, %v2806_v12  ;;  %v2456_v28 = vmax.f32 %v2248_v19, %v2344_v61  ;;  %v2042_v38 = vmax.f32 %v6919_v46, %v1933_v33  ;;  %v2346_v17 = vrot.slane %v6919_v46, 3  ;;  %v2348_v60 = vrot.slane %v6934_v31, 3 }
 0x1c2   : > { %v2249_v59 = vmax.f32 %v2041_v3, %v2139_v50  ;;  %v2529_v34 = vrot.slane %v6919_v46, 4  ;;  %v2530_v30 = vrot.slane %v6934_v31, 4  ;;  %v6967_v16 = vmax.f32 %v9072_v4, %v9108_v9 }
 0x1c3   : > { %v6971_v12 = vmax.f32 %v2456_v28, %v2528_v7  ;;  %v2250_v61 = vmax.f32 %v2042_v38, %v2141_v63  ;;  %v2347_v19 = vsel %vm1376_vm1, %v2345_v2, %v2346_v17  ;;  %v2349_v3 = vsel %vm1376_vm1, %v2346_v17, %v2348_v60  ;;  %v9113_v2 = vld [vmem:[#allocation67_spill] sm:$0xff] }
 0x1c4   : > { %9109 = vst [vmem:[#allocation118_spill] sm:$0xff] %v6967_v16  ;;  %v2457_v50 = vmax.f32 %v2249_v59, %v2347_v19  ;;  %v1934_v46 = vrot.slane %v6967_v16, 1  ;;  %v2531_v4 = vsel %vm1553_vm4, %v2529_v34, %v2530_v30  ;;  %v2142_v7 = vrot.slane %v6967_v16, 2 }
 0x1c5   : > { %9111 = vst [vmem:[#allocation119_spill] sm:$0xff] %v6971_v12  ;;  %v8704_v35 = vrot.slane %v6971_v12, 4  ;;  %v2458_v9 = vmax.f32 %v2250_v61, %v2349_v3  ;;  %v2350_v28 = vrot.slane %v6967_v16, 3  ;;  %v2532_v63 = vrot.slane %v6967_v16, 4  ;;  %v9118_v16 = vld [vmem:[#allocation52_spill] sm:$0xff] }
 0x1c6   : > { %v1935_v38 = vsel %vm1038_vm2, %v1932_v0, %v1934_v46  ;;  %v6986_v17 = vmax.f32 %v9075_v6, %v9113_v2  ;;  %v2633_v19 = vmax.f32 %v2457_v50, %v2529_v34  ;;  %v2143_v26 = vsel %vm1215_vm3, %v2140_v57, %v2142_v7  ;;  %v9116_v0 = vld [vmem:[#allocation68_spill] sm:$0xff] }
 0x1c7   : > { %v2808_v59 = vmax.f32 %v6971_v12, %v8704_v35  ;;  %v6991_v61 = vmax.f32 %v2458_v9, %v2531_v4  ;;  %v2043_v3 = vmax.f32 %v6934_v31, %v1935_v38  ;;  %v2351_v46 = vsel %vm1376_vm1, %v2348_v60, %v2350_v28 }
 0x1c8   : > { %9114 = vst [vmem:[#allocation120_spill] sm:$0xff] %v6986_v17  ;;  %v6998_v56 = vmax.f32 %v9078_v48, %v9116_v0  ;;  %v7002_v2 = vmax.f32 %v9080_v10, %v9118_v16  ;;  %v2533_v9 = vsel %vm1553_vm4, %v2530_v30, %v2532_v63  ;;  %v1936_v57 = vrot.slane %v6986_v17, 1  ;;  %v7050_v16 = vld [vmem:[#allocation2 + $0x2a8] sm:$0xff] }
 0x1c9   : > { %9115 = vst [vmem:[#allocation121_spill] sm:$0xff] %v6991_v61  ;;  %4394 = vst.msk [vmem:[%s4833_s17 + $0x2bc] sm:$0xf] %vm2825_vm8, %v2808_v59  ;;  %v8707_v34 = vrot.slane %v6991_v61, 4  ;;  %v2251_v4 = vmax.f32 %v2043_v3, %v2143_v26  ;;  %v2144_v35 = vrot.slane %v6986_v17, 2  ;;  %v2352_v3 = vrot.slane %v6986_v17, 3 }
 0x1ca   : > { %9117 = vst [vmem:[#allocation122_spill] sm:$0xff] %v6998_v56  ;;  %9119 = vst [vmem:[#allocation123_spill] sm:$0xff] %v7002_v2  ;;  %v1937_v60 = vrot.slane %v6998_v56, 1  ;;  %v1939_v50 = vrot.slane %v7002_v2, 1  ;;  %v2145_v7 = vrot.slane %v6998_v56, 2  ;;  %v2147_v38 = vrot.slane %v7002_v2, 2 }
 0x1cb   : > { %v2809_v28 = vmax.f32 %v2633_v19, %v8707_v34  ;;  %v2459_v59 = vmax.f32 %v2251_v4, %v2351_v46  ;;  %v2353_v26 = vrot.slane %v6998_v56, 3  ;;  %v2355_v0 = vrot.slane %v7002_v2, 3  ;;  %v9121_v34 = vld [vmem:[#allocation53_spill] sm:$0xff] }
 0x1cc   : > { %v1938_v30 = vsel %vm1038_vm2, %v1936_v57, %v1937_v60  ;;  %v1940_v63 = vsel %vm1038_vm2, %v1937_v60, %v1939_v50  ;;  %v2146_v46 = vsel %vm1215_vm3, %v2144_v35, %v2145_v7  ;;  %v2148_v4 = vsel %vm1215_vm3, %v2145_v7, %v2147_v38 }
 0x1cd   : > { %4395 = vst.msk [vmem:[%s4833_s17 + $0x2bc] sm:$0xf0] %vm2822_vm7, %v2809_v28  ;;  %v7023_v48 = vmax.f32 %v2459_v59, %v2533_v9  ;;  %v2044_v6 = vmax.f32 %v6986_v17, %v1938_v30  ;;  %v2045_v19 = vmax.f32 %v6998_v56, %v1940_v63  ;;  %v2534_v57 = vrot.slane %v6998_v56, 4  ;;  %v4507_v56 = vld [vmem:[#allocation2 + $0x280] sm:$0xff] }
 0x1ce   : > { %v2535_v60 = vrot.slane %v7002_v2, 4  ;;  %v7033_v22 = vmax.f32 %v9083_v25, %v9121_v34  ;;  %v2354_v30 = vsel %vm1376_vm1, %v2352_v3, %v2353_v26  ;;  %v2356_v63 = vsel %vm1376_vm1, %v2353_v26, %v2355_v0  ;;  %v7040_v17 = vld [vmem:[#allocation2 + $0x2a0] sm:$0xff]  ;;  %v4509_v34 = vld [vmem:[#allocation2 + $0x288] sm:$0xff] }
 0x1cf   : > { %9120 = vst [vmem:[#allocation124_spill] sm:$0xff] %v7023_v48  ;;  %v8713_v28 = vrot.slane %v7023_v48, 4  ;;  %v2252_v9 = vmax.f32 %v2044_v6, %v2146_v46  ;;  %v2253_v59 = vmax.f32 %v2045_v19, %v2148_v4  ;;  %v550_v33 = vmax.f32 %v4507_v56, %v7040_v17 }
 0x1d0   : > { %9122 = vst [vmem:[#allocation125_spill] sm:$0xff] %v7033_v22  ;;  %v1941_v35 = vrot.slane %v7033_v22, 1  ;;  %v2149_v7 = vrot.slane %v7033_v22, 2  ;;  %v2357_v3 = vrot.slane %v7033_v22, 3  ;;  %v2536_v26 = vsel %vm1553_vm4, %v2534_v57, %v2535_v60 }
 0x1d1   : > { %v2811_v31 = vmax.f32 %v7023_v48, %v8713_v28  ;;  %v2460_v6 = vmax.f32 %v2252_v9, %v2354_v30  ;;  %v2461_v19 = vmax.f32 %v2253_v59, %v2356_v63  ;;  %v2537_v4 = vrot.slane %v7033_v22, 4  ;;  %v4511_v63 = vld [vmem:[#allocation2 + $0x290] sm:$0xff] }
 0x1d2   : > { %v1942_v46 = vsel %vm1038_vm2, %v1939_v50, %v1941_v35  ;;  %v551_v25 = vmax.f32 %v4509_v34, %v7050_v16  ;;  %v2150_v59 = vsel %vm1215_vm3, %v2147_v38, %v2149_v7  ;;  %v2358_v30 = vsel %vm1376_vm1, %v2355_v0, %v2357_v3  ;;  %v7060_v28 = vld [vmem:[#allocation2 + $0x2b0] sm:$0xff]  ;;  %v7063_v35 = vld [vmem:[#allocation2 + $0x2c0] sm:$0xff]  ;;  %v7066_v34 = vld [vmem:[#allocation2 + $0x2c8] sm:$0xff] }
 0x1d3   : > { %4397 = vst.msk [vmem:[%s4833_s17 + $0x2cc] sm:$0xf] %vm2825_vm8, %v2811_v31  ;;  %v7055_v56 = vmax.f32 %v2461_v19, %v2536_v26  ;;  %v2046_v9 = vmax.f32 %v7002_v2, %v1942_v46  ;;  %v552_v50 = vmax.f32 %v4511_v63, %v7060_v28  ;;  %v646_v22 = vmax.f32 %v550_v33, %v7063_v35  ;;  %v4515_v19 = vld [vmem:[#allocation2 + $0x298] sm:$0xff]  ;;  %v7074_v63 = vld [vmem:[#allocation2 + $0x2d0] sm:$0xff]  ;;  %v7077_v33 = vld [vmem:[#allocation2 + $0x2e0] sm:$0xff] }
 0x1d4   : > { %v647_v31 = vmax.f32 %v551_v25, %v7066_v34  ;;  %v7069_v26 = vld [vmem:[#allocation2 + $0x2b8] sm:$0xff]  ;;  %v2636_v7 = vmax.f32 %v2460_v6, %v2534_v57  ;;  %v2538_v46 = vsel %vm1553_vm4, %v2535_v60, %v2537_v4  ;;  %v7080_v25 = vld [vmem:[#allocation2 + $0x2e8] sm:$0xff]  ;;  %v7088_v4 = vld [vmem:[#allocation2 + $0x300] sm:$0xff] }
 0x1d5   : > { %9123 = vst [vmem:[#allocation126_spill] sm:$0xff] %v7055_v56  ;;  %v553_v38 = vmax.f32 %v4515_v19, %v7069_v26  ;;  %v8718_v0 = vrot.slane %v7055_v56, 4  ;;  %v2254_v3 = vmax.f32 %v2046_v9, %v2150_v59  ;;  %v648_v2 = vmax.f32 %v552_v50, %v7074_v63  ;;  %v7083_v19 = vld [vmem:[#allocation2 + $0x2d8] sm:$0xff]  ;;  %v7090_v9 = vld [vmem:[#allocation2 + $0x308] sm:$0xff]  ;;  %v7096_v50 = vld [vmem:[#allocation2 + $0x2f0] sm:$0xff] }
 0x1d6   : > { %v742_v10 = vmax.f32 %v646_v22, %v7077_v33  ;;  %v743_v11 = vmax.f32 %v647_v31, %v7080_v25  ;;  %v554_v22 = vmax.f32 %v7040_v17, %v7063_v35  ;;  %v555_v59 = vmax.f32 %v7050_v16, %v7066_v34 }
 0x1d7   : > { %v649_v57 = vmax.f32 %v553_v38, %v7083_v19  ;;  %v2812_v60 = vmax.f32 %v2636_v7, %v8718_v0  ;;  %v2462_v6 = vmax.f32 %v2254_v3, %v2358_v30  ;;  %v744_v31 = vmax.f32 %v648_v2, %v7096_v50  ;;  %v7101_v7 = vld [vmem:[#allocation2 + $0x2f8] sm:$0xff]  ;;  %v7104_v3 = vld [vmem:[#allocation2 + $0x310] sm:$0xff] }
 0x1d8   : > { %v838_v38 = vmax.f32 %v742_v10, %v7088_v4  ;;  %v839_v15 = vmax.f32 %v743_v11, %v7090_v9  ;;  %v556_v16 = vmax.f32 %v7060_v28, %v7074_v63  ;;  %v558_v2 = vmax.f32 %v7063_v35, %v7077_v33 }
 0x1d9   : > { %v745_v30 = vmax.f32 %v649_v57, %v7101_v7  ;;  %4398 = vst.msk [vmem:[%s4833_s17 + $0x2cc] sm:$0xf0] %vm2822_vm7, %v2812_v60  ;;  %v7108_v17 = vmax.f32 %v2462_v6, %v2538_v46  ;;  %v559_v10 = vmax.f32 %v7066_v34, %v7080_v25  ;;  %v7117_v11 = vmax.f32 %v744_v31, %v7104_v3  ;;  %v7124_v46 = vld [vmem:[#allocation2 + $0x318] sm:$0xff] }
 0x1da   : > { %v910_v57 = vmax.f32 %v9085_v51, %v838_v38  ;;  %v911_v0 = vmax.f32 %v9086_v53, %v839_v15  ;;  %v7122_v60 = vmax.f32 %v6796_v21, %v838_v38  ;;  %v7128_v35 = vmax.f32 %v6811_v58, %v839_v15 }
 0x1db   : > { %9124 = vst [vmem:[#allocation127_spill] sm:$0xff] %v7108_v17  ;;  %9125 = vst [vmem:[#allocation128_spill] sm:$0xff] %v7117_v11  ;;  %v8730_v28 = vrot.slane %v7108_v17, 4  ;;  %v7131_v34 = vmax.f32 %v745_v30, %v7124_v46  ;;  %v562_v63 = vmax.f32 %v7077_v33, %v7088_v4  ;;  %v912_v6 = vmax.f32 %v9088_v47, %v7117_v11 }
 0x1dc   : > { %9126 = vst [vmem:[#allocation129_spill] sm:$0xff] %v7122_v60  ;;  %9127 = vst [vmem:[#allocation130_spill] sm:$0xff] %v7128_v35  ;;  %v1943_v31 = vrot.slane %v910_v57, 1  ;;  %v1944_v21 = vrot.slane %v911_v0, 1  ;;  %v2151_v38 = vrot.slane %v910_v57, 2  ;;  %v2152_v53 = vrot.slane %v911_v0, 2 }
 0x1dd   : > { %v2814_v60 = vmax.f32 %v7108_v17, %v8730_v28  ;;  %v2359_v51 = vrot.slane %v910_v57, 3  ;;  %v2360_v58 = vrot.slane %v911_v0, 3  ;;  %v1946_v30 = vrot.slane %v912_v6, 1 }
 0x1de   : > { %v1945_v15 = vsel %vm1038_vm2, %v1943_v31, %v1944_v21  ;;  %v2154_v35 = vrot.slane %v912_v6, 2  ;;  %v2362_v56 = vrot.slane %v912_v6, 3  ;;  %v2539_v48 = vrot.slane %v911_v0, 4 }
 0x1df   : > { %4400 = vst.msk [vmem:[%s4833_s17 + $0x2dc] sm:$0xf] %vm2825_vm8, %v2814_v60  ;;  %v2047_v61 = vmax.f32 %v910_v57, %v1945_v15  ;;  %v563_v11 = vmax.f32 %v7080_v25, %v7090_v9  ;;  %v564_v47 = vmax.f32 %v7096_v50, %v7104_v3  ;;  %v1947_v28 = vsel %vm1038_vm2, %v1944_v21, %v1946_v30  ;;  %v7153_v60 = vld [vmem:[#allocation2 + $0x320] sm:$0xff] }
 0x1e0   : > { %v2153_v17 = vsel %vm1215_vm3, %v2151_v38, %v2152_v53  ;;  %v2361_v8 = vsel %vm1376_vm1, %v2359_v51, %v2360_v58  ;;  %v2540_v31 = vrot.slane %v912_v6, 4  ;;  %v2048_v12 = vmax.f32 %v911_v0, %v1947_v28  ;;  %9128 = vst [vmem:[#allocation131_spill] sm:$0xff] %v7153_v60  ;;  %v7159_v0 = vld [vmem:[#allocation2 + $0x328] sm:$0xff] }
 0x1e1   : > { %v2155_v24 = vsel %vm1215_vm3, %v2152_v53, %v2154_v35  ;;  %v2255_v62 = vmax.f32 %v2047_v61, %v2153_v17  ;;  %v913_v57 = vmax.f32 %v9091_v54, %v7131_v34  ;;  %v2363_v15 = vsel %vm1376_vm1, %v2360_v58, %v2362_v56  ;;  %9129 = vst [vmem:[#allocation132_spill] sm:$0xff] %v7159_v0 }
 0x1e2   : > { %v2541_v14 = vsel %vm1553_vm4, %v2539_v48, %v2540_v31  ;;  %v650_v21 = vmax.f32 %v554_v22, %v7077_v33  ;;  %v651_v38 = vmax.f32 %v555_v59, %v7080_v25  ;;  %v2256_v49 = vmax.f32 %v2048_v12, %v2155_v24  ;;  %v460_v59 = vld [vmem:[#allocation2 + $0x330] sm:$0xff] }
 0x1e3   : > { %v2463_v51 = vmax.f32 %v2255_v62, %v2361_v8  ;;  %v1948_v32 = vrot.slane %v913_v57, 1  ;;  %v652_v53 = vmax.f32 %v556_v16, %v7096_v50  ;;  %v2156_v61 = vrot.slane %v913_v57, 2 }
 0x1e4   : > { %v7163_v17 = vmax.f32 %v558_v2, %v7088_v4  ;;  %v7166_v28 = vmax.f32 %v559_v10, %v7090_v9  ;;  %v7169_v58 = vmax.f32 %v562_v63, %v7153_v60  ;;  %v2464_v33 = vmax.f32 %v2256_v49, %v2363_v15 }
 0x1e5   : > { %v1949_v25 = vsel %vm1038_vm2, %v1946_v30, %v1948_v32  ;;  %v2364_v24 = vrot.slane %v913_v57, 3  ;;  %v2542_v8 = vrot.slane %v913_v57, 4  ;;  %v2639_v62 = vmax.f32 %v2463_v51, %v2539_v48  ;;  %v7181_v32 = vld [vmem:[#allocation2 + $0x340] sm:$0xff]  ;;  %v7193_v30 = vld [vmem:[#allocation2 + $0x348] sm:$0xff] }
 0x1e6   : > { %9130 = vst [vmem:[#allocation133_spill] sm:$0xff] %v7166_v28  ;;  %9131 = vst [vmem:[#allocation134_spill] sm:$0xff] %v7169_v58  ;;  %v2049_v12 = vmax.f32 %v912_v6, %v1949_v25  ;;  %v2157_v22 = vsel %vm1215_vm3, %v2154_v35, %v2156_v61  ;;  %v7174_v50 = vmax.f32 %v563_v11, %v7159_v0  ;;  %v9210_v11 = vld [vmem:[#allocation81_spill] sm:$0xff] }
 0x1e7   : > { %v7176_v16 = vmax.f32 %v2464_v33, %v2541_v14  ;;  %v2365_v2 = vsel %vm1376_vm1, %v2362_v56, %v2364_v24  ;;  %v746_v10 = vmax.f32 %v650_v21, %v7088_v4  ;;  %v747_v49 = vmax.f32 %v651_v38, %v7090_v9  ;;  %9133 = vst [vmem:[#allocation136_spill] sm:$0xff] %v7181_v32 }
 0x1e8   : > { %9132 = vst [vmem:[#allocation135_spill] sm:$0xff] %v7174_v50  ;;  %v2257_v63 = vmax.f32 %v2049_v12, %v2157_v22  ;;  %v748_v48 = vmax.f32 %v652_v53, %v7104_v3  ;;  %v2543_v6 = vsel %vm1553_vm4, %v2540_v31, %v2542_v8  ;;  %v7190_v56 = vmax.f32 %v564_v47, %v460_v59  ;;  %v468_v50 = vld [vmem:[#allocation2 + $0x370] sm:$0xff] }
 0x1e9   : > { %v2719_v14 = vrot.slane %v7176_v16, 4  ;;  %v842_v4 = vmax.f32 %v746_v10, %v7153_v60  ;;  %9134 = vst [vmem:[#allocation137_spill] sm:$0xff] %v7193_v30  ;;  %v843_v3 = vmax.f32 %v747_v49, %v7159_v0  ;;  %v557_v15 = vmax.f32 %v7069_v26, %v7083_v19 }
 0x1ea   : > { %v2465_v9 = vmax.f32 %v2257_v63, %v2365_v2  ;;  %v7196_v57 = vmax.f32 %v748_v48, %v460_v59 }
 0x1eb   : > { %v2815_v21 = vmax.f32 %v2639_v62, %v2719_v14  ;;  %v914_v47 = vmax.f32 %v9093_v13, %v842_v4  ;;  %v7206_v38 = vmax.f32 %v6855_v43, %v842_v4  ;;  %v915_v53 = vmax.f32 %v9094_v20, %v843_v3 }
 0x1ec   : > { %v7208_v51 = vmax.f32 %v2465_v9, %v2543_v6  ;;  %v7213_v61 = vmax.f32 %v9095_v23, %v7196_v57  ;;  %v7216_v26 = vmax.f32 %v6860_v37, %v843_v3  ;;  %v653_v43 = vmax.f32 %v557_v15, %v7101_v7 }
 0x1ed   : > { %4401 = vst.msk [vmem:[%s4833_s17 + $0x2dc] sm:$0xf0] %vm2822_vm7, %v2815_v21  ;;  %v1950_v33 = vrot.slane %v914_v47, 1  ;;  %v2158_v25 = vrot.slane %v914_v47, 2  ;;  %v1951_v8 = vrot.slane %v915_v53, 1  ;;  %v2159_v12 = vrot.slane %v915_v53, 2 }
 0x1ee   : > { %v2720_v24 = vrot.slane %v7208_v51, 4  ;;  %v1953_v62 = vrot.slane %v7213_v61, 1  ;;  %v2161_v22 = vrot.slane %v7213_v61, 2  ;;  %v2366_v37 = vrot.slane %v914_v47, 3 }
 0x1ef   : > { %v2367_v59 = vrot.slane %v915_v53, 3  ;;  %v2369_v2 = vrot.slane %v7213_v61, 3  ;;  %v1952_v49 = vsel %vm1038_vm2, %v1950_v33, %v1951_v8  ;;  %v2544_v48 = vrot.slane %v915_v53, 4 }
 0x1f0   : > { %v2817_v10 = vmax.f32 %v7208_v51, %v2720_v24  ;;  %v1954_v63 = vsel %vm1038_vm2, %v1951_v8, %v1953_v62  ;;  %v2050_v6 = vmax.f32 %v914_v47, %v1952_v49  ;;  %v2160_v9 = vsel %vm1215_vm3, %v2158_v25, %v2159_v12  ;;  %v7240_v47 = vld [vmem:[#allocation2 + $0x338] sm:$0xff] }
 0x1f1   : > { %v2051_v4 = vmax.f32 %v915_v53, %v1954_v63  ;;  %v2162_v3 = vsel %vm1215_vm3, %v2159_v12, %v2161_v22  ;;  %v2368_v15 = vsel %vm1376_vm1, %v2366_v37, %v2367_v59  ;;  %v2370_v21 = vsel %vm1376_vm1, %v2367_v59, %v2369_v2 }
 0x1f2   : > { %4403 = vst.msk [vmem:[%s4833_s17 + $0x2ec] sm:$0xf] %vm2825_vm8, %v2817_v10  ;;  %v2545_v19 = vrot.slane %v7213_v61, 4  ;;  %v749_v33 = vmax.f32 %v653_v43, %v7124_v46  ;;  %v2258_v8 = vmax.f32 %v2050_v6, %v2160_v9  ;;  %v9135_v53 = vrot.slane %v6315_v42, 4 }
 0x1f3   : > { %v2259_v31 = vmax.f32 %v2051_v4, %v2162_v3  ;;  %v9136_v25 = vrot.slane %v6272_v5, 4  ;;  %v9137_v37 = vrot.slane %v6375_v44, 4  ;;  %v9138_v59 = vrot.slane %v6336_v18, 4 }
 0x1f4   : > { %v2546_v43 = vsel %vm1553_vm4, %v2544_v48, %v2545_v19  ;;  %v7256_v49 = vmax.f32 %v749_v33, %v7240_v47  ;;  %v2466_v6 = vmax.f32 %v2258_v8, %v2368_v15  ;;  %v9139_v9 = vrot.slane %v6425_v52, 4 }
 0x1f5   : > { %v2679_v12 = vsel %vm1553_vm4, %v9136_v25, %v9135_v53  ;;  %v2682_v10 = vsel %vm1553_vm4, %v9138_v59, %v9137_v37  ;;  %v2467_v4 = vmax.f32 %v2259_v31, %v2370_v21  ;;  %v9140_v44 = vrot.slane %v6386_v29, 4 }
 0x1f6   : > { %v2774_v63 = vmax.f32 %v6272_v5, %v2679_v12  ;;  %v2777_v42 = vmax.f32 %v6336_v18, %v2682_v10  ;;  %v9141_v53 = vrot.slane %v6489_v55, 4  ;;  %v9142_v25 = vrot.slane %v6450_v36, 4 }
 0x1f7   : > { %v2685_v3 = vsel %vm1553_vm4, %v9140_v44, %v9139_v9  ;;  %v917_v5 = vmax.f32 %v9099_v1, %v7256_v49  ;;  %v9143_v55 = vrot.slane %v6541_v45, 4  ;;  %v9144_v31 = vrot.slane %v6508_v39, 4 }
 0x1f8   : > { %v2688_v33 = vsel %vm1553_vm4, %v9142_v25, %v9141_v53  ;;  %4360 = vst.msk [vmem:[%s4833_s17 + $0x204] sm:$0xff] %vm180_vm0, %v2774_v63  ;;  %4363 = vst.msk [vmem:[%s4833_s17 + $0x214] sm:$0xff] %vm180_vm0, %v2777_v42  ;;  %v2780_v52 = vmax.f32 %v6386_v29, %v2685_v3  ;;  %v7283_v21 = vmax.f32 %v2467_v4, %v2546_v43  ;;  %v9145_v37 = vrot.slane %v6603_v41, 4  ;;  %v9150_v42 = vld [vmem:[#allocation104_spill] sm:$0xff]  ;;  %v9152_v4 = vld [vmem:[#allocation101_spill] sm:$0xff] }
 0x1f9   : > { %v2783_v18 = vmax.f32 %v6450_v36, %v2688_v33  ;;  %v2691_v15 = vsel %vm1553_vm4, %v9144_v31, %v9143_v55  ;;  %v565_v8 = vmax.f32 %v7101_v7, %v7124_v46  ;;  %v9146_v59 = vrot.slane %v6575_v40, 4  ;;  %v9148_v7 = vld [vmem:[#allocation97_spill] sm:$0xff] }
 0x1fa   : > { %v2786_v12 = vmax.f32 %v6508_v39, %v2691_v15  ;;  %v2642_v36 = vmax.f32 %v2466_v6, %v2544_v48  ;;  %v1955_v10 = vrot.slane %v917_v5, 1  ;;  %v2163_v45 = vrot.slane %v917_v5, 2  ;;  %4366 = vst.msk [vmem:[%s4833_s17 + $0x224] sm:$0xff] %vm180_vm0, %v2780_v52  ;;  %v9154_v55 = vld [vmem:[#allocation109_spill] sm:$0xff] }
 0x1fb   : > { %v2694_v29 = vsel %vm1553_vm4, %v9146_v59, %v9145_v37  ;;  %v2371_v63 = vrot.slane %v917_v5, 3  ;;  %4369 = vst.msk [vmem:[%s4833_s17 + $0x234] sm:$0xff] %vm180_vm0, %v2783_v18  ;;  %v2722_v43 = vrot.slane %v7283_v21, 4  ;;  %v9147_v41 = vrot.slane %v6665_v27, 4 }
 0x1fc   : > { %4372 = vst.msk [vmem:[%s4833_s17 + $0x244] sm:$0xff] %vm180_vm0, %v2786_v12  ;;  %v2789_v39 = vmax.f32 %v6575_v40, %v2694_v29  ;;  %v9149_v46 = vrot.slane %v9148_v7, 4  ;;  %v9151_v6 = vrot.slane %v9150_v42, 4  ;;  %v9153_v9 = vrot.slane %v9152_v4, 4  ;;  %v9158_v12 = vld [vmem:[#allocation113_spill] sm:$0xff]  ;;  %v9162_v29 = vld [vmem:[#allocation39_spill] sm:$0xff] }
 0x1fd   : > { %v1956_v3 = vsel %vm1038_vm2, %v1953_v62, %v1955_v10  ;;  %v2164_v53 = vsel %vm1215_vm3, %v2161_v22, %v2163_v45  ;;  %v2372_v40 = vsel %vm1376_vm1, %v2369_v2, %v2371_v63  ;;  %v2547_v27 = vrot.slane %v917_v5, 4  ;;  %v9156_v62 = vld [vmem:[#allocation106_spill] sm:$0xff]  ;;  %v9160_v5 = vld [vmem:[#allocation111_spill] sm:$0xff] }
 0x1fe   : > { %v2697_v48 = vsel %vm1553_vm4, %v9149_v46, %v9147_v41  ;;  %v2700_v44 = vsel %vm1553_vm4, %v9153_v9, %v9151_v6  ;;  %v2818_v25 = vmax.f32 %v2642_v36, %v2722_v43  ;;  %v2052_v33 = vmax.f32 %v7213_v61, %v1956_v3  ;;  %4375 = vst.msk [vmem:[%s4833_s17 + $0x254] sm:$0xff] %vm180_vm0, %v2789_v39  ;;  %v9164_v10 = vld [vmem:[#allocation35_spill] sm:$0xff]  ;;  %v365_v3 = vld [vmem:[#allocation2 + $0x38] sm:$0xff] }
 0x1ff   : > { %v2792_v52 = vmax.f32 %v9148_v7, %v2697_v48  ;;  %v2795_v18 = vmax.f32 %v9152_v4, %v2700_v44  ;;  %v9155_v31 = vrot.slane %v9154_v55, 4  ;;  %v9157_v15 = vrot.slane %v9156_v62, 4  ;;  %v9166_v39 = vld [vmem:[#allocation119_spill] sm:$0xff]  ;;  %v9168_v7 = vld [vmem:[#allocation116_spill] sm:$0xff]  ;;  %v361_v44 = vld [vmem:[#allocation2 + $0x18] sm:$0xff] }
 0x200   : > { %v9159_v2 = vrot.slane %v9158_v12, 4  ;;  %v9161_v37 = vrot.slane %v9160_v5, 4  ;;  %v9163_v36 = vrot.slane %v9162_v29, 4  ;;  %v9165_v45 = vrot.slane %v9164_v10, 4  ;;  %4404 = vst.msk [vmem:[%s4833_s17 + $0x2ec] sm:$0xf0] %vm2822_vm7, %v2818_v25 }
 0x201   : > { %v2703_v22 = vsel %vm1553_vm4, %v9157_v15, %v9155_v31  ;;  %v9167_v41 = vrot.slane %v9166_v39, 4  ;;  %v9169_v46 = vrot.slane %v9168_v7, 4  ;;  %v2260_v42 = vmax.f32 %v2052_v33, %v2164_v53  ;;  %4378 = vst.msk [vmem:[%s4833_s17 + $0x264] sm:$0xff] %vm180_vm0, %v2792_v52  ;;  %4381 = vst.msk [vmem:[%s4833_s17 + $0x274] sm:$0xff] %vm180_vm0, %v2795_v18  ;;  %v9170_v31 = vld [vmem:[#allocation124_spill] sm:$0xff]  ;;  %v9172_v25 = vld [vmem:[#allocation121_spill] sm:$0xff] }
 0x202   : > { %v2706_v59 = vsel %vm1553_vm4, %v9161_v37, %v9159_v2  ;;  %v2709_v63 = vsel %vm1553_vm4, %v9165_v45, %v9163_v36  ;;  %v2798_v6 = vmax.f32 %v9156_v62, %v2703_v22  ;;  %v9171_v15 = vrot.slane %v9170_v31, 4  ;;  %v9174_v33 = vld [vmem:[#allocation127_spill] sm:$0xff]  ;;  %v9176_v18 = vld [vmem:[#allocation126_spill] sm:$0xff]  ;;  %v9179_v45 = vld [vmem:[#allocation9_spill] sm:$0xff] }
 0x203   : > { %v2712_v48 = vsel %vm1553_vm4, %v9169_v46, %v9167_v41  ;;  %v2801_v4 = vmax.f32 %v9160_v5, %v2706_v59  ;;  %v2804_v9 = vmax.f32 %v9164_v10, %v2709_v63  ;;  %v9173_v12 = vrot.slane %v9172_v25, 4  ;;  %v9178_v29 = vld [vmem:[#allocation10_spill] sm:$0xff]  ;;  %v7381_v10 = vld [vmem:[#allocation2 + $0x68] sm:$0xff]  ;;  %v9181_v61 = vld [vmem:[#allocation11_spill] sm:$0xff] }
 0x204   : > { %v2807_v55 = vmax.f32 %v9168_v7, %v2712_v48  ;;  %v9175_v52 = vrot.slane %v9174_v33, 4  ;;  %v9177_v2 = vrot.slane %v9176_v18, 4  ;;  %v2721_v22 = vsel %vm1553_vm4, %v2719_v14, %v2720_v24  ;;  %4384 = vst.msk [vmem:[%s4833_s17 + $0x284] sm:$0xff] %vm180_vm0, %v2798_v6  ;;  %v4525_v46 = vld [vmem:[#allocation2 + $0x58] sm:$0xff]  ;;  %v4526_v6 = vld [vmem:[#allocation2 + $0x90] sm:$0xff] }
 0x205   : > { %v2715_v53 = vsel %vm1553_vm4, %v9173_v12, %v9171_v15  ;;  %v2468_v5 = vmax.f32 %v2260_v42, %v2372_v40  ;;  %4387 = vst.msk [vmem:[%s4833_s17 + $0x294] sm:$0xff] %vm180_vm0, %v2801_v4  ;;  %4390 = vst.msk [vmem:[%s4833_s17 + $0x2a4] sm:$0xff] %vm180_vm0, %v2804_v9  ;;  %v2816_v51 = vmax.f32 %v7176_v16, %v2721_v22  ;;  %v4523_v40 = vld [vmem:[#allocation2 + $0x70] sm:$0xff]  ;;  %v9180_v16 = vld [vmem:[#allocation55_spill] sm:$0xff] }
 0x206   : > { %v2718_v62 = vsel %vm1553_vm4, %v9177_v2, %v9175_v52  ;;  %v2810_v37 = vmax.f32 %v9172_v25, %v2715_v53  ;;  %v2548_v14 = vsel %vm1553_vm4, %v2545_v19, %v2547_v27  ;;  %4393 = vst.msk [vmem:[%s4833_s17 + $0x2b4] sm:$0xff] %vm180_vm0, %v2807_v55  ;;  %v473_v24 = vmax.f32 %v361_v44, %v365_v3  ;;  %v9182_v19 = vld [vmem:[#allocation37_spill] sm:$0xff]  ;;  %v9184_v44 = vld [vmem:[#allocation12_spill] sm:$0xff]  ;;  %v4528_v53 = vld [vmem:[#allocation2 + $0x78] sm:$0xff] }
 0x207   : > { %v2813_v59 = vmax.f32 %v9176_v18, %v2718_v62  ;;  %v664_v36 = vmax.f32 %v9178_v29, %v4523_v40  ;;  %v663_v63 = vmax.f32 %v9179_v45, %v7381_v10  ;;  %v7386_v39 = vmax.f32 %v565_v8, %v7240_v47  ;;  %4402 = vst.msk [vmem:[%s4833_s17 + $0x2e4] sm:$0xff] %vm180_vm0, %v2816_v51  ;;  %v7400_v8 = vld [vmem:[#allocation2 + $0x88] sm:$0xff]  ;;  %v9186_v18 = vld [vmem:[#allocation13_spill] sm:$0xff] }
 0x208   : > { %v2644_v41 = vmax.f32 %v2468_v5, %v2548_v14  ;;  %4396 = vst.msk [vmem:[%s4833_s17 + $0x2c4] sm:$0xff] %vm180_vm0, %v2810_v37  ;;  %v9183_v27 = vmax.f32 %v9181_v61, %v9182_v19  ;;  %v477_v48 = vmax.f32 %v365_v3, %v4525_v46  ;;  %v569_v42 = vmax.f32 %v473_v24, %v4525_v46  ;;  %v9185_v3 = vld [vmem:[#allocation14_spill] sm:$0xff]  ;;  %v9187_v29 = vld [vmem:[#allocation17_spill] sm:$0xff]  ;;  %v9188_v45 = vld [vmem:[#allocation16_spill] sm:$0xff] }
 0x209   : > { %4399 = vst.msk [vmem:[%s4833_s17 + $0x2d4] sm:$0xff] %vm180_vm0, %v2813_v59  ;;  %v760_v4 = vmax.f32 %v664_v36, %v4526_v6  ;;  %v759_v9 = vmax.f32 %v663_v63, %v7400_v8  ;;  %v668_v55 = vmax.f32 %v9184_v44, %v4526_v6  ;;  %v4529_v59 = vld [vmem:[#allocation2 + $0xb0] sm:$0xff]  ;;  %v4530_v24 = vld [vmem:[#allocation2 + $0x98] sm:$0xff] }
 0x20a   : > { %v7398_v7 = vmax.f32 %v9183_v27, %v9180_v16  ;;  %v2723_v31 = vrot.slane %v2644_v41, 4  ;;  %v665_v33 = vmax.f32 %v569_v42, %v4528_v53  ;;  %v573_v37 = vmax.f32 %v477_v48, %v4528_v53  ;;  %v9189_v61 = vld [vmem:[#allocation34_spill] sm:$0xff]  ;;  %v9190_v19 = vld [vmem:[#allocation21_spill] sm:$0xff] }
 0x20b   : > { %v920_v52 = vmax.f32 %v760_v4, %v9185_v3  ;;  %v919_v2 = vmax.f32 %v759_v9, %v9186_v18  ;;  %v764_v51 = vmax.f32 %v668_v55, %v4529_v59  ;;  %v9191_v27 = vld [vmem:[#allocation69_spill] sm:$0xff]  ;;  %v9193_v48 = vld [vmem:[#allocation70_spill] sm:$0xff]  ;;  %v9195_v3 = vld [vmem:[#allocation40_spill] sm:$0xff] }
 0x20c   : > { %v2936_v15 = vrot.slane %v7398_v7, 1  ;;  %v3176_v25 = vrot.slane %v7398_v7, 2  ;;  %v3416_v12 = vrot.slane %v7398_v7, 3  ;;  %v3656_v62 = vrot.slane %v7398_v7, 4 }
 0x20d   : > { %v2820_v22 = vmax.f32 %v2644_v41, %v2723_v31  ;;  %v2724_v5 = vsel %vm1553_vm4, %v2722_v43, %v2723_v31  ;;  %v761_v40 = vmax.f32 %v665_v33, %v4530_v24  ;;  %v928_v36 = vmax.f32 %v920_v52, %v9187_v29  ;;  %v9192_v43 = vld [vmem:[#allocation42_spill] sm:$0xff] }
 0x20e   : > { %v2819_v14 = vmax.f32 %v7283_v21, %v2724_v5  ;;  %v927_v63 = vmax.f32 %v919_v2, %v9188_v45  ;;  %v669_v16 = vmax.f32 %v573_v37, %v4530_v24  ;;  %v924_v41 = vmax.f32 %v764_v51, %v9189_v61  ;;  %v9194_v21 = vld [vmem:[#allocation36_spill] sm:$0xff]  ;;  %v4531_v2 = vld [vmem:[#allocation2 + $0xb8] sm:$0xff]  ;;  %v9196_v5 = vld [vmem:[#allocation19_spill] sm:$0xff] }
 0x20f   : > { %4406 = vst.msk [vmem:[%s4833_s17 + $0x2fc] sm:$0xf] %vm2825_vm8, %v2820_v22  ;;  %v7421_v46 = vmax.f32 %v9191_v27, %v9190_v19  ;;  %v7425_v42 = vmax.f32 %v9193_v48, %v9192_v43  ;;  %v921_v6 = vmax.f32 %v761_v40, %v9194_v21  ;;  %v2939_v4 = vrot.slane %v928_v36, 1 }
 0x210   : > { %4405 = vst.msk [vmem:[%s4833_s17 + $0x2f4] sm:$0xff] %vm180_vm0, %v2819_v14  ;;  %v3179_v9 = vrot.slane %v928_v36, 2  ;;  %v3419_v44 = vrot.slane %v928_v36, 3  ;;  %v3659_v55 = vrot.slane %v928_v36, 4  ;;  %v2937_v31 = vrot.slane %v927_v63, 1 }
 0x211   : > { %v3177_v53 = vrot.slane %v927_v63, 2  ;;  %v3417_v33 = vrot.slane %v927_v63, 3  ;;  %v929_v52 = vmax.f32 %v921_v6, %v9195_v3  ;;  %v3657_v18 = vrot.slane %v927_v63, 4 }
 0x212   : > { %v765_v22 = vmax.f32 %v669_v16, %v4531_v2  ;;  %v7432_v37 = vmax.f32 %v924_v41, %v9196_v5  ;;  %v2938_v59 = vsel %vm1038_vm2, %v2936_v15, %v2937_v31  ;;  %v2940_v51 = vsel %vm1038_vm2, %v2937_v31, %v2939_v4 }
 0x213   : > { %v3178_v14 = vsel %vm1215_vm3, %v3176_v25, %v3177_v53  ;;  %v3180_v24 = vsel %vm1215_vm3, %v3177_v53, %v3179_v9  ;;  %v2941_v40 = vrot.slane %v929_v52, 1  ;;  %v3181_v29 = vrot.slane %v929_v52, 2 }
 0x214   : > { %v3421_v45 = vrot.slane %v929_v52, 3  ;;  %v3661_v61 = vrot.slane %v929_v52, 4  ;;  %v3112_v19 = vmax.f32 %v7398_v7, %v2938_v59  ;;  %v3113_v27 = vmax.f32 %v927_v63, %v2940_v51 }
 0x215   : > { %v3418_v16 = vsel %vm1376_vm1, %v3416_v12, %v3417_v33  ;;  %v3420_v41 = vsel %vm1376_vm1, %v3417_v33, %v3419_v44  ;;  %v2942_v43 = vsel %vm1038_vm2, %v2939_v4, %v2941_v40  ;;  %v3115_v15 = vmax.f32 %v929_v52, %v2941_v40  ;;  %v9197_v12 = vld [vmem:[#allocation38_spill] sm:$0xff] }
 0x216   : > { %v3182_v48 = vsel %vm1215_vm3, %v3179_v9, %v3181_v29  ;;  %v3422_v25 = vsel %vm1376_vm1, %v3419_v44, %v3421_v45  ;;  %v3114_v21 = vmax.f32 %v928_v36, %v2942_v43  ;;  %v3662_v6 = vsel %vm1553_vm4, %v3659_v55, %v3661_v61  ;;  %v9198_v36 = vld [vmem:[#allocation41_spill] sm:$0xff] }
 0x217   : > { %v3352_v31 = vmax.f32 %v3112_v19, %v3178_v14  ;;  %v3353_v53 = vmax.f32 %v3113_v27, %v3180_v24  ;;  %v3355_v3 = vmax.f32 %v3115_v15, %v3181_v29  ;;  %v3658_v7 = vsel %vm1553_vm4, %v3656_v62, %v3657_v18 }
 0x218   : > { %v3660_v63 = vsel %vm1553_vm4, %v3657_v18, %v3659_v55  ;;  %v925_v2 = vmax.f32 %v765_v22, %v9197_v12  ;;  %v3354_v33 = vmax.f32 %v3114_v21, %v3182_v48  ;;  %v8788_v9 = vrot.slane %v7432_v37, 1 }
 0x219   : > { %v3592_v5 = vmax.f32 %v3352_v31, %v3418_v16  ;;  %v3593_v4 = vmax.f32 %v3353_v53, %v3420_v41  ;;  %v3595_v52 = vmax.f32 %v3355_v3, %v3421_v45  ;;  %v8779_v59 = vrot.slane %v7432_v37, 2 }
 0x21a   : > { %v933_v44 = vmax.f32 %v925_v2, %v9198_v36  ;;  %v8777_v51 = vrot.slane %v7432_v37, 3  ;;  %v3594_v14 = vmax.f32 %v3354_v33, %v3422_v25  ;;  %v8770_v55 = vrot.slane %v7432_v37, 4 }
 0x21b   : > { %v3832_v62 = vmax.f32 %v3592_v5, %v3658_v7  ;;  %v3833_v24 = vmax.f32 %v3593_v4, %v3660_v63  ;;  %v3835_v18 = vmax.f32 %v3595_v52, %v3661_v61  ;;  %v8798_v3 = vrot.slane %v7421_v46, 1 }
 0x21c   : > { %v2948_v22 = vrot.slane %v933_v44, 1  ;;  %v3188_v40 = vrot.slane %v933_v44, 2  ;;  %v3428_v29 = vrot.slane %v933_v44, 3  ;;  %v3834_v19 = vmax.f32 %v3594_v14, %v3662_v6 }
 0x21d   : > { %v3944_v27 = vrot.slane %v3832_v62, 4  ;;  %v3945_v16 = vrot.slane %v3833_v24, 4  ;;  %v3668_v45 = vrot.slane %v933_v44, 4  ;;  %v2955_v7 = vrot.slane %v7425_v42, 1 }
 0x21e   : > { %v2949_v41 = vsel %vm1038_vm2, %v8788_v9, %v2948_v22  ;;  %v3119_v43 = vmax.f32 %v933_v44, %v2948_v22  ;;  %v3189_v15 = vsel %vm1215_vm3, %v8779_v59, %v3188_v40  ;;  %v3429_v61 = vsel %vm1376_vm1, %v8777_v51, %v3428_v29 }
 0x21f   : > { %v3947_v48 = vrot.slane %v3834_v19, 4  ;;  %v3946_v25 = vsel %vm1553_vm4, %v3944_v27, %v3945_v16  ;;  %v3118_v21 = vmax.f32 %v7432_v37, %v2949_v41  ;;  %v3669_v6 = vsel %vm1553_vm4, %v8770_v55, %v3668_v45 }
 0x220   : > { %v4072_v31 = vmax.f32 %v3832_v62, %v3946_v25  ;;  %v3359_v53 = vmax.f32 %v3119_v43, %v3188_v40  ;;  %v8769_v33 = vrot.slane %v7421_v46, 2  ;;  %v2956_v36 = vsel %vm1038_vm2, %v8798_v3, %v2955_v7  ;;  %v9201_v25 = vld [vmem:[#allocation43_spill] sm:$0xff]  ;;  %v4534_v3 = vld [vmem:[#allocation2 + $0x2d8] sm:$0xff] }
 0x221   : > { %v4074_v63 = vmax.f32 %v3834_v19, %v3947_v48  ;;  %v3948_v12 = vsel %vm1553_vm4, %v3945_v16, %v3947_v48  ;;  %v3358_v2 = vmax.f32 %v3118_v21, %v3189_v15  ;;  %v3122_v62 = vmax.f32 %v7421_v46, %v2956_v36  ;;  %v9199_v15 = vld [vmem:[#allocation23_spill] sm:$0xff]  ;;  %v9202_v21 = vld [vmem:[#allocation76_spill] sm:$0xff] }
 0x222   : > { %v4120_v5 = vmax.f32 %v4072_v31, %v3833_v24  ;;  %v4073_v4 = vmax.f32 %v3833_v24, %v3948_v12  ;;  %v3599_v52 = vmax.f32 %v3359_v53, %v3428_v29  ;;  %v3123_v22 = vmax.f32 %v7425_v42, %v2955_v7 }
 0x223   : > { %v4122_v44 = vmax.f32 %v4074_v63, %v3835_v18  ;;  %v3598_v14 = vmax.f32 %v3358_v2, %v3429_v61  ;;  %v3195_v16 = vrot.slane %v7425_v42, 2  ;;  %v8762_v24 = vrot.slane %v7421_v46, 3  ;;  %v9200_v61 = vld [vmem:[#allocation74_spill] sm:$0xff] }
 0x224   : > { %4407 = vst.msk [vmem:[%s4833_s17 + $0x2fe] sm:$0xfc] %vm4169_vm9, %v4120_v5  ;;  %v4121_v40 = vmax.f32 %v4073_v4, %v3834_v19  ;;  %v3839_v27 = vmax.f32 %v3599_v52, %v3668_v45  ;;  %v3435_v41 = vrot.slane %v7425_v42, 3  ;;  %v8761_v18 = vrot.slane %v7421_v46, 4 }
 0x225   : > { %4409 = vst.msk [vmem:[%s4833_s17 + $0x30e] sm:$0x3] %vm4172_vm10, %v4122_v44  ;;  %v7482_v29 = vmax.f32 %v3598_v14, %v3669_v6  ;;  %v3675_v43 = vrot.slane %v7425_v42, 4  ;;  %v3196_v19 = vsel %vm1215_vm3, %v8769_v33, %v3195_v16  ;;  %v3363_v45 = vmax.f32 %v3123_v22, %v3195_v16 }
 0x226   : > { %4408 = vst.msk [vmem:[%s4833_s17 + $0x306] sm:$0xff] %vm180_vm0, %v4121_v40  ;;  %v7494_v48 = vmax.f32 %v9200_v61, %v9199_v15  ;;  %v941_v6 = vmax.f32 %v9202_v21, %v9201_v25  ;;  %v3362_v53 = vmax.f32 %v3122_v62, %v3196_v19  ;;  %v3436_v42 = vsel %vm1376_vm1, %v8762_v24, %v3435_v41 }
 0x227   : > { %v8760_v31 = vrot.slane %v7482_v29, 4  ;;  %v3676_v7 = vsel %vm1553_vm4, %v8761_v18, %v3675_v43  ;;  %v3603_v63 = vmax.f32 %v3363_v45, %v3435_v41 }
 0x228   : > { %v8752_v12 = vrot.slane %v7494_v48, 1  ;;  %v2962_v2 = vrot.slane %v941_v6, 1  ;;  %v8748_v5 = vrot.slane %v7494_v48, 2  ;;  %v3602_v52 = vmax.f32 %v3362_v53, %v3436_v42  ;;  %v9203_v53 = vld [vmem:[#allocation25_spill] sm:$0xff]  ;;  %v9204_v42 = vld [vmem:[#allocation75_spill] sm:$0xff] }
 0x229   : > { %v4077_v4 = vmax.f32 %v7482_v29, %v8760_v31  ;;  %v3202_v36 = vrot.slane %v941_v6, 2  ;;  %v8746_v44 = vrot.slane %v7494_v48, 3  ;;  %v3843_v14 = vmax.f32 %v3603_v63, %v3675_v43  ;;  %v9205_v63 = vld [vmem:[#allocation44_spill] sm:$0xff] }
 0x22a   : > { %v2963_v62 = vsel %vm1038_vm2, %v8752_v12, %v2962_v2  ;;  %v3127_v22 = vmax.f32 %v941_v6, %v2962_v2  ;;  %v3442_v40 = vrot.slane %v941_v6, 3  ;;  %v7514_v41 = vmax.f32 %v3602_v52, %v3676_v7  ;;  %v9206_v2 = vld [vmem:[#allocation77_spill] sm:$0xff]  ;;  %v9212_v12 = vld [vmem:[#allocation84_spill] sm:$0xff] }
 0x22b   : > { %v4125_v16 = vmax.f32 %v4077_v4, %v3839_v27  ;;  %v3126_v19 = vmax.f32 %v7494_v48, %v2963_v62  ;;  %v3203_v45 = vsel %vm1215_vm3, %v8748_v5, %v3202_v36  ;;  %v8742_v61 = vrot.slane %v7494_v48, 4  ;;  %v9207_v62 = vld [vmem:[#allocation27_spill] sm:$0xff] }
 0x22c   : > { %v3367_v15 = vmax.f32 %v3127_v22, %v3202_v36  ;;  %v3443_v43 = vsel %vm1376_vm1, %v8746_v44, %v3442_v40  ;;  %v3682_v25 = vrot.slane %v941_v6, 4  ;;  %v8747_v27 = vrot.slane %v7514_v41, 4  ;;  %v9208_v22 = vld [vmem:[#allocation80_spill] sm:$0xff] }
 0x22d   : > { %4412 = vst.msk [vmem:[%s4833_s17 + $0x31e] sm:$0x3] %vm4172_vm10, %v4125_v16  ;;  %v3366_v21 = vmax.f32 %v3126_v19, %v3203_v45  ;;  %v7529_v7 = vmax.f32 %v9204_v42, %v9203_v53  ;;  %v945_v4 = vmax.f32 %v9206_v2, %v9205_v63  ;;  %v7538_v6 = vmax.f32 %v9208_v22, %v9207_v62  ;;  %v9209_v16 = vld [vmem:[#allocation45_spill] sm:$0xff] }
 0x22e   : > { %v3607_v52 = vmax.f32 %v3367_v15, %v3442_v40  ;;  %v3683_v36 = vsel %vm1553_vm4, %v8742_v61, %v3682_v25  ;;  %v949_v35 = vmax.f32 %v9210_v11, %v9209_v16  ;;  %v4080_v19 = vmax.f32 %v7514_v41, %v8747_v27 }
 0x22f   : > { %v3606_v45 = vmax.f32 %v3366_v21, %v3443_v43  ;;  %v8743_v53 = vrot.slane %v7529_v7, 1  ;;  %v2969_v40 = vrot.slane %v945_v4, 1  ;;  %v8744_v42 = vrot.slane %v7529_v7, 2 }
 0x230   : > { %v3847_v15 = vmax.f32 %v3607_v52, %v3682_v25  ;;  %v3209_v63 = vrot.slane %v945_v4, 2  ;;  %v8745_v2 = vrot.slane %v7529_v7, 3  ;;  %v4128_v62 = vmax.f32 %v4080_v19, %v3843_v14 }
 0x231   : > { %v7548_v22 = vmax.f32 %v3606_v45, %v3683_v36  ;;  %v2970_v11 = vsel %vm1038_vm2, %v8743_v53, %v2969_v40  ;;  %v3131_v16 = vmax.f32 %v945_v4, %v2969_v40  ;;  %v3449_v25 = vrot.slane %v945_v4, 3 }
 0x232   : > { %v3130_v61 = vmax.f32 %v7529_v7, %v2970_v11  ;;  %v3210_v43 = vsel %vm1215_vm3, %v8744_v42, %v3209_v63  ;;  %v8749_v21 = vrot.slane %v7529_v7, 4  ;;  %4415 = vst.msk [vmem:[%s4833_s17 + $0x32e] sm:$0x3] %vm4172_vm10, %v4128_v62  ;;  %v3689_v36 = vrot.slane %v945_v4, 4 }
 0x233   : > { %v8750_v14 = vrot.slane %v7548_v22, 4  ;;  %v3371_v52 = vmax.f32 %v3131_v16, %v3209_v63  ;;  %v8751_v19 = vrot.slane %v7538_v6, 1  ;;  %v3450_v40 = vsel %vm1376_vm1, %v8745_v2, %v3449_v25 }
 0x234   : > { %v3370_v45 = vmax.f32 %v3130_v61, %v3210_v43  ;;  %v2976_v11 = vrot.slane %v949_v35, 1  ;;  %v8753_v53 = vrot.slane %v7538_v6, 2  ;;  %v3690_v4 = vsel %vm1553_vm4, %v8749_v21, %v3689_v36 }
 0x235   : > { %v4083_v42 = vmax.f32 %v7548_v22, %v8750_v14  ;;  %v3611_v62 = vmax.f32 %v3371_v52, %v3449_v25  ;;  %v3216_v63 = vrot.slane %v949_v35, 2  ;;  %v8755_v2 = vrot.slane %v7538_v6, 3 }
 0x236   : > { %v3610_v16 = vmax.f32 %v3370_v45, %v3450_v40  ;;  %v2977_v61 = vsel %vm1038_vm2, %v8751_v19, %v2976_v11  ;;  %v3135_v43 = vmax.f32 %v949_v35, %v2976_v11  ;;  %v3456_v14 = vrot.slane %v949_v35, 3  ;;  %v9211_v19 = vld [vmem:[#allocation29_spill] sm:$0xff] }
 0x237   : > { %v4131_v44 = vmax.f32 %v4083_v42, %v3847_v15  ;;  %v3851_v27 = vmax.f32 %v3611_v62, %v3689_v36  ;;  %v3134_v5 = vmax.f32 %v7538_v6, %v2977_v61  ;;  %v3217_v25 = vsel %vm1215_vm3, %v8753_v53, %v3216_v63  ;;  %v9213_v42 = vld [vmem:[#allocation46_spill] sm:$0xff]  ;;  %v9214_v36 = vld [vmem:[#allocation85_spill] sm:$0xff] }
 0x238   : > { %v7580_v52 = vmax.f32 %v3610_v16, %v3690_v4  ;;  %v3375_v21 = vmax.f32 %v3135_v43, %v3216_v63  ;;  %v8754_v45 = vrot.slane %v7538_v6, 4  ;;  %v3696_v11 = vrot.slane %v949_v35, 4  ;;  %v9215_v16 = vld [vmem:[#allocation31_spill] sm:$0xff]  ;;  %v9216_v43 = vld [vmem:[#allocation88_spill] sm:$0xff] }
 0x239   : > { %4418 = vst.msk [vmem:[%s4833_s17 + $0x33e] sm:$0x3] %vm4172_vm10, %v4131_v44  ;;  %v3374_v40 = vmax.f32 %v3134_v5, %v3217_v25  ;;  %v7587_v15 = vmax.f32 %v9212_v12, %v9211_v19  ;;  %v953_v62 = vmax.f32 %v9214_v36, %v9213_v42  ;;  %v3457_v4 = vsel %vm1376_vm1, %v8755_v2, %v3456_v14 }
 0x23a   : > { %v8757_v61 = vrot.slane %v7580_v52, 4  ;;  %v3615_v63 = vmax.f32 %v3375_v21, %v3456_v14  ;;  %v7597_v53 = vmax.f32 %v9216_v43, %v9215_v16  ;;  %v3697_v35 = vsel %vm1553_vm4, %v8754_v45, %v3696_v11 }
 0x23b   : > { %v3614_v5 = vmax.f32 %v3374_v40, %v3457_v4  ;;  %v8756_v12 = vrot.slane %v7587_v15, 1  ;;  %v2983_v44 = vrot.slane %v953_v62, 1  ;;  %v8758_v21 = vrot.slane %v7587_v15, 2 }
 0x23c   : > { %v4086_v19 = vmax.f32 %v7580_v52, %v8757_v61  ;;  %v3855_v25 = vmax.f32 %v3615_v63, %v3696_v11  ;;  %v3223_v14 = vrot.slane %v953_v62, 2  ;;  %v8759_v4 = vrot.slane %v7587_v15, 3 }
 0x23d   : > { %v7607_v42 = vmax.f32 %v3614_v5, %v3697_v35  ;;  %v2984_v40 = vsel %vm1038_vm2, %v8756_v12, %v2983_v44  ;;  %v3139_v36 = vmax.f32 %v953_v62, %v2983_v44  ;;  %v3463_v11 = vrot.slane %v953_v62, 3  ;;  %v9217_v44 = vld [vmem:[#allocation47_spill] sm:$0xff] }
 0x23e   : > { %v4134_v16 = vmax.f32 %v4086_v19, %v3851_v27  ;;  %v3138_v43 = vmax.f32 %v7587_v15, %v2984_v40  ;;  %v3224_v45 = vsel %vm1215_vm3, %v8758_v21, %v3223_v14  ;;  %v8764_v5 = vrot.slane %v7587_v15, 4  ;;  %v9218_v19 = vld [vmem:[#allocation89_spill] sm:$0xff] }
 0x23f   : > { %v8768_v63 = vrot.slane %v7607_v42, 4  ;;  %v3379_v2 = vmax.f32 %v3139_v36, %v3223_v14  ;;  %v3703_v35 = vrot.slane %v953_v62, 4  ;;  %v3464_v27 = vsel %vm1376_vm1, %v8759_v4, %v3463_v11 }
 0x240   : > { %4421 = vst.msk [vmem:[%s4833_s17 + $0x34e] sm:$0x3] %vm4172_vm10, %v4134_v16  ;;  %v3378_v12 = vmax.f32 %v3138_v43, %v3224_v45  ;;  %v957_v40 = vmax.f32 %v9218_v19, %v9217_v44  ;;  %v8763_v61 = vrot.slane %v7597_v53, 1  ;;  %v8765_v45 = vrot.slane %v7597_v53, 2 }
 0x241   : > { %v4089_v21 = vmax.f32 %v7607_v42, %v8768_v63  ;;  %v3619_v14 = vmax.f32 %v3379_v2, %v3463_v11  ;;  %v3704_v62 = vsel %vm1553_vm4, %v8764_v5, %v3703_v35  ;;  %v8766_v4 = vrot.slane %v7597_v53, 3 }
 0x242   : > { %v3618_v36 = vmax.f32 %v3378_v12, %v3464_v27  ;;  %v2990_v16 = vrot.slane %v957_v40, 1  ;;  %v3230_v43 = vrot.slane %v957_v40, 2  ;;  %v3470_v31 = vrot.slane %v957_v40, 3 }
 0x243   : > { %v4137_v44 = vmax.f32 %v4089_v21, %v3855_v25  ;;  %v3859_v19 = vmax.f32 %v3619_v14, %v3703_v35  ;;  %v8767_v18 = vrot.slane %v7597_v53, 4  ;;  %v3710_v21 = vrot.slane %v957_v40, 4  ;;  %v9219_v35 = vld [vmem:[#allocation33_spill] sm:$0xff]  ;;  %v9220_v14 = vld [vmem:[#allocation92_spill] sm:$0xff] }
 0x244   : > { %v7636_v24 = vmax.f32 %v3618_v36, %v3704_v62  ;;  %v2991_v2 = vsel %vm1038_vm2, %v8763_v61, %v2990_v16  ;;  %v3143_v11 = vmax.f32 %v957_v40, %v2990_v16  ;;  %v3231_v12 = vsel %vm1215_vm3, %v8765_v45, %v3230_v43  ;;  %v9221_v61 = vld [vmem:[#allocation93_spill] sm:$0xff]  ;;  %v9222_v45 = vld [vmem:[#allocation96_spill] sm:$0xff] }
 0x245   : > { %4424 = vst.msk [vmem:[%s4833_s17 + $0x35e] sm:$0x3] %vm4172_vm10, %v4137_v44  ;;  %v3142_v27 = vmax.f32 %v7597_v53, %v2991_v2  ;;  %v3471_v25 = vsel %vm1376_vm1, %v8766_v4, %v3470_v31  ;;  %v7652_v62 = vmax.f32 %v9220_v14, %v9219_v35  ;;  %v961_v5 = vmax.f32 %v9221_v61, %v9091_v54 }
 0x246   : > { %v8771_v36 = vrot.slane %v7636_v24, 4  ;;  %v3383_v16 = vmax.f32 %v3143_v11, %v3230_v43  ;;  %v7659_v44 = vmax.f32 %v9222_v45, %v9095_v23  ;;  %v3711_v4 = vsel %vm1553_vm4, %v8767_v18, %v3710_v21 }
 0x247   : > { %v3382_v2 = vmax.f32 %v3142_v27, %v3231_v12  ;;  %v8776_v40 = vrot.slane %v7652_v62, 1  ;;  %v8774_v35 = vrot.slane %v7652_v62, 2  ;;  %v2997_v54 = vrot.slane %v961_v5, 1 }
 0x248   : > { %v4092_v43 = vmax.f32 %v7636_v24, %v8771_v36  ;;  %v3623_v11 = vmax.f32 %v3383_v16, %v3470_v31  ;;  %v3237_v61 = vrot.slane %v961_v5, 2  ;;  %v8772_v23 = vrot.slane %v7652_v62, 3  ;;  %v9223_v16 = vld [vmem:[#allocation98_spill] sm:$0xff] }
 0x249   : > { %v3622_v14 = vmax.f32 %v3382_v2, %v3471_v25  ;;  %v3477_v45 = vrot.slane %v961_v5, 3  ;;  %v8773_v12 = vrot.slane %v7652_v62, 4  ;;  %v2998_v63 = vsel %vm1038_vm2, %v8776_v40, %v2997_v54  ;;  %v9225_v40 = vld [vmem:[#allocation102_spill] sm:$0xff] }
 0x24a   : > { %v4140_v27 = vmax.f32 %v4092_v43, %v3859_v19  ;;  %v3863_v18 = vmax.f32 %v3623_v11, %v3710_v21  ;;  %v3147_v33 = vmax.f32 %v961_v5, %v2997_v54  ;;  %v3146_v36 = vmax.f32 %v7652_v62, %v2998_v63 }
 0x24b   : > { %v7674_v55 = vmax.f32 %v3622_v14, %v3711_v4  ;;  %v3238_v31 = vsel %vm1215_vm3, %v8774_v35, %v3237_v61  ;;  %v3478_v25 = vsel %vm1376_vm1, %v8772_v23, %v3477_v45  ;;  %v3717_v21 = vrot.slane %v961_v5, 4 }
 0x24c   : > { %4427 = vst.msk [vmem:[%s4833_s17 + $0x36e] sm:$0x3] %vm4172_vm10, %v4140_v27  ;;  %v3387_v19 = vmax.f32 %v3147_v33, %v3237_v61  ;;  %v965_v2 = vmax.f32 %v9223_v16, %v9099_v1  ;;  %v8778_v4 = vrot.slane %v7659_v44, 1  ;;  %v3386_v63 = vmax.f32 %v3146_v36, %v3238_v31 }
 0x24d   : > { %v8775_v43 = vrot.slane %v7674_v55, 4  ;;  %v8780_v11 = vrot.slane %v7659_v44, 2  ;;  %v8781_v54 = vrot.slane %v7659_v44, 3  ;;  %v3718_v23 = vsel %vm1553_vm4, %v8773_v12, %v3717_v21 }
 0x24e   : > { %v3627_v14 = vmax.f32 %v3387_v19, %v3477_v45  ;;  %v3004_v27 = vrot.slane %v965_v2, 1  ;;  %v3244_v33 = vrot.slane %v965_v2, 2  ;;  %v3626_v5 = vmax.f32 %v3386_v63, %v3478_v25 }
 0x24f   : > { %v4095_v1 = vmax.f32 %v7674_v55, %v8775_v43  ;;  %v3484_v61 = vrot.slane %v965_v2, 3  ;;  %v8782_v36 = vrot.slane %v7659_v44, 4 }
 0x250   : > { %v3867_v31 = vmax.f32 %v3627_v14, %v3717_v21  ;;  %v3005_v45 = vsel %vm1038_vm2, %v8778_v4, %v3004_v27  ;;  %v3151_v19 = vmax.f32 %v965_v2, %v3004_v27  ;;  %v3245_v16 = vsel %vm1215_vm3, %v8780_v11, %v3244_v33  ;;  %v9224_v14 = vld [vmem:[#allocation50_spill] sm:$0xff]  ;;  %v9226_v27 = vld [vmem:[#allocation51_spill] sm:$0xff]  ;;  %v9230_v11 = vld [vmem:[#allocation53_spill] sm:$0xff] }
 0x251   : > { %v4143_v12 = vmax.f32 %v4095_v1, %v3863_v18  ;;  %v7704_v35 = vmax.f32 %v3626_v5, %v3718_v23  ;;  %v3150_v43 = vmax.f32 %v7659_v44, %v3005_v45  ;;  %v3485_v25 = vsel %vm1376_vm1, %v8781_v54, %v3484_v61  ;;  %v9227_v4 = vld [vmem:[#allocation103_spill] sm:$0xff]  ;;  %v9228_v1 = vld [vmem:[#allocation52_spill] sm:$0xff]  ;;  %v9231_v54 = vld [vmem:[#allocation110_spill] sm:$0xff] }
 0x252   : > { %v3391_v63 = vmax.f32 %v3151_v19, %v3244_v33  ;;  %v3724_v21 = vrot.slane %v965_v2, 4  ;;  %v7712_v51 = vmax.f32 %v9225_v40, %v9224_v14  ;;  %v969_v59 = vmax.f32 %v9227_v4, %v9226_v27  ;;  %v9229_v5 = vld [vmem:[#allocation108_spill] sm:$0xff] }
 0x253   : > { %4430 = vst.msk [vmem:[%s4833_s17 + $0x37e] sm:$0x3] %vm4172_vm10, %v4143_v12  ;;  %v8787_v18 = vrot.slane %v7704_v35, 4  ;;  %v3390_v23 = vmax.f32 %v3150_v43, %v3245_v16  ;;  %v7721_v45 = vmax.f32 %v9229_v5, %v9228_v1  ;;  %v973_v33 = vmax.f32 %v9231_v54, %v9230_v11 }
 0x254   : > { %v3631_v2 = vmax.f32 %v3391_v63, %v3484_v61  ;;  %v3725_v40 = vsel %vm1553_vm4, %v8782_v36, %v3724_v21  ;;  %v8783_v19 = vrot.slane %v7712_v51, 1  ;;  %v3011_v4 = vrot.slane %v969_v59, 1 }
 0x255   : > { %v4098_v12 = vmax.f32 %v7704_v35, %v8787_v18  ;;  %v3630_v43 = vmax.f32 %v3390_v23, %v3485_v25  ;;  %v8786_v16 = vrot.slane %v7712_v51, 2  ;;  %v3251_v14 = vrot.slane %v969_v59, 2 }
 0x256   : > { %v3871_v27 = vmax.f32 %v3631_v2, %v3724_v21  ;;  %v3012_v11 = vsel %vm1038_vm2, %v8783_v19, %v3011_v4  ;;  %v3155_v54 = vmax.f32 %v969_v59, %v3011_v4  ;;  %v8784_v61 = vrot.slane %v7712_v51, 3 }
 0x257   : > { %v4146_v63 = vmax.f32 %v4098_v12, %v3867_v31  ;;  %v7737_v1 = vmax.f32 %v3630_v43, %v3725_v40  ;;  %v3154_v5 = vmax.f32 %v7712_v51, %v3012_v11  ;;  %v3252_v25 = vsel %vm1215_vm3, %v8786_v16, %v3251_v14 }
 0x258   : > { %v3395_v23 = vmax.f32 %v3155_v54, %v3251_v14  ;;  %v3491_v36 = vrot.slane %v969_v59, 3  ;;  %v8785_v21 = vrot.slane %v7712_v51, 4  ;;  %v3731_v2 = vrot.slane %v969_v59, 4 }
 0x259   : > { %4433 = vst.msk [vmem:[%s4833_s17 + $0x38e] sm:$0x3] %vm4172_vm10, %v4146_v63  ;;  %v8789_v4 = vrot.slane %v7737_v1, 4  ;;  %v3394_v19 = vmax.f32 %v3154_v5, %v3252_v25  ;;  %v8790_v31 = vrot.slane %v7721_v45, 1  ;;  %v3018_v40 = vrot.slane %v973_v33, 1 }
 0x25a   : > { %v3492_v12 = vsel %vm1376_vm1, %v8784_v61, %v3491_v36  ;;  %v3635_v43 = vmax.f32 %v3395_v23, %v3491_v36  ;;  %v3732_v14 = vsel %vm1553_vm4, %v8785_v21, %v3731_v2  ;;  %v8793_v11 = vrot.slane %v7721_v45, 2 }
 0x25b   : > { %v4101_v59 = vmax.f32 %v7737_v1, %v8789_v4  ;;  %v3634_v54 = vmax.f32 %v3394_v19, %v3492_v12  ;;  %v3019_v63 = vsel %vm1038_vm2, %v8790_v31, %v3018_v40  ;;  %v3159_v5 = vmax.f32 %v973_v33, %v3018_v40  ;;  %v9232_v31 = vld [vmem:[#allocation128_spill] sm:$0xff] }
 0x25c   : > { %v3875_v25 = vmax.f32 %v3635_v43, %v3731_v2  ;;  %v3158_v36 = vmax.f32 %v7721_v45, %v3019_v63  ;;  %v3258_v23 = vrot.slane %v973_v33, 2  ;;  %v8792_v61 = vrot.slane %v7721_v45, 3  ;;  %v9233_v40 = vld [vmem:[#allocation112_spill] sm:$0xff] }
 0x25d   : > { %v4149_v21 = vmax.f32 %v4101_v59, %v3871_v27  ;;  %v7763_v16 = vmax.f32 %v3634_v54, %v3732_v14  ;;  %v3498_v18 = vrot.slane %v973_v33, 3  ;;  %v8791_v9 = vrot.slane %v7721_v45, 4  ;;  %v9234_v59 = vld [vmem:[#allocation48_spill] sm:$0xff] }
 0x25e   : > { %v3259_v19 = vsel %vm1215_vm3, %v8793_v11, %v3258_v23  ;;  %v3399_v12 = vmax.f32 %v3159_v5, %v3258_v23  ;;  %v3738_v4 = vrot.slane %v973_v33, 4  ;;  %v7771_v2 = vmax.f32 %v9233_v40, %v9232_v31 }
 0x25f   : > { %4436 = vst.msk [vmem:[%s4833_s17 + $0x39e] sm:$0x3] %vm4172_vm10, %v4149_v21  ;;  %v8794_v43 = vrot.slane %v7763_v16, 4  ;;  %v3398_v27 = vmax.f32 %v3158_v36, %v3259_v19  ;;  %v3499_v14 = vsel %vm1376_vm1, %v8792_v61, %v3498_v18  ;;  %v977_v54 = vmax.f32 %v9234_v59, %v7131_v34 }
 0x260   : > { %v3639_v63 = vmax.f32 %v3399_v12, %v3498_v18  ;;  %v3739_v33 = vsel %vm1553_vm4, %v8791_v9, %v3738_v4  ;;  %v8796_v31 = vrot.slane %v7771_v2, 1  ;;  %v8795_v5 = vrot.slane %v7771_v2, 2 }
 0x261   : > { %v4104_v21 = vmax.f32 %v7763_v16, %v8794_v43  ;;  %v3638_v36 = vmax.f32 %v3398_v27, %v3499_v14  ;;  %v3025_v23 = vrot.slane %v977_v54, 1  ;;  %v3265_v19 = vrot.slane %v977_v54, 2 }
 0x262   : > { %v3879_v40 = vmax.f32 %v3639_v63, %v3738_v4  ;;  %v8797_v34 = vrot.slane %v7771_v2, 3  ;;  %v3505_v18 = vrot.slane %v977_v54, 3  ;;  %v8800_v12 = vrot.slane %v7771_v2, 4 }
 0x263   : > { %v4152_v59 = vmax.f32 %v4104_v21, %v3875_v25  ;;  %v7791_v9 = vmax.f32 %v3638_v36, %v3739_v33  ;;  %v3026_v61 = vsel %vm1038_vm2, %v8796_v31, %v3025_v23  ;;  %v3163_v11 = vmax.f32 %v977_v54, %v3025_v23  ;;  %v9235_v33 = vld [vmem:[#allocation64_spill] sm:$0xff]  ;;  %v4532_v31 = vld [vmem:[#allocation2 + $0x2d0] sm:$0xff] }
 0x264   : > { %v3162_v43 = vmax.f32 %v7771_v2, %v3026_v61  ;;  %v3266_v27 = vsel %vm1215_vm3, %v8795_v5, %v3265_v19  ;;  %v3506_v4 = vsel %vm1376_vm1, %v8797_v34, %v3505_v18  ;;  %v3745_v14 = vrot.slane %v977_v54, 4  ;;  %v9236_v61 = vld [vmem:[#allocation49_spill] sm:$0xff] }
 0x265   : > { %4439 = vst.msk [vmem:[%s4833_s17 + $0x3ae] sm:$0x3] %vm4172_vm10, %v4152_v59  ;;  %v8801_v25 = vrot.slane %v7791_v9, 4  ;;  %v3403_v63 = vmax.f32 %v3163_v11, %v3265_v19  ;;  %v7808_v21 = vmax.f32 %v9235_v33, %v7196_v57  ;;  %v981_v36 = vmax.f32 %v9236_v61, %v7256_v49  ;;  %v4533_v34 = vld [vmem:[#allocation2 + $0x2f0] sm:$0xff]  ;;  %v4535_v59 = vld [vmem:[#allocation2 + $0x2f8] sm:$0xff] }
 0x266   : > { %v3402_v23 = vmax.f32 %v3162_v43, %v3266_v27  ;;  %v3746_v5 = vsel %vm1553_vm4, %v8800_v12, %v3745_v14  ;;  %v560_v54 = vmax.f32 %v4532_v31, %v4533_v34  ;;  %v561_v30 = vmax.f32 %v4534_v3, %v4535_v59 }
 0x267   : > { %v4107_v11 = vmax.f32 %v7791_v9, %v8801_v25  ;;  %v3643_v57 = vmax.f32 %v3403_v63, %v3505_v18  ;;  %v8802_v19 = vrot.slane %v7808_v21, 1  ;;  %v3032_v49 = vrot.slane %v981_v36, 1 }
 0x268   : > { %v3642_v43 = vmax.f32 %v3402_v23, %v3506_v4  ;;  %v8803_v27 = vrot.slane %v7808_v21, 2  ;;  %v3272_v33 = vrot.slane %v981_v36, 2  ;;  %v8807_v61 = vrot.slane %v7808_v21, 3  ;;  %v464_v23 = vld [vmem:[#allocation2 + $0x350] sm:$0xff] }
 0x269   : > { %v4155_v12 = vmax.f32 %v4107_v11, %v3879_v40  ;;  %v3883_v31 = vmax.f32 %v3643_v57, %v3745_v14  ;;  %v3033_v3 = vsel %vm1038_vm2, %v8802_v19, %v3032_v49  ;;  %v3167_v34 = vmax.f32 %v981_v36, %v3032_v49  ;;  %v465_v11 = vld [vmem:[#allocation2 + $0x358] sm:$0xff]  ;;  %v4536_v57 = vld [vmem:[#allocation2 + $0x310] sm:$0xff] }
 0x26a   : > { %v7824_v59 = vmax.f32 %v3642_v43, %v3746_v5  ;;  %v3166_v18 = vmax.f32 %v7808_v21, %v3033_v3  ;;  %v3273_v4 = vsel %vm1215_vm3, %v8803_v27, %v3272_v33  ;;  %v3512_v63 = vrot.slane %v981_v36, 3  ;;  %v4537_v3 = vld [vmem:[#allocation2 + $0x318] sm:$0xff] }
 0x26b   : > { %4442 = vst.msk [vmem:[%s4833_s17 + $0x3be] sm:$0x3] %vm4172_vm10, %v4155_v12  ;;  %v3407_v25 = vmax.f32 %v3167_v34, %v3272_v33  ;;  %v8806_v40 = vrot.slane %v7808_v21, 4  ;;  %v3752_v14 = vrot.slane %v981_v36, 4  ;;  %v656_v19 = vmax.f32 %v560_v54, %v4536_v57  ;;  %v4538_v33 = vld [vmem:[#allocation2 + $0x330] sm:$0xff]  ;;  %v469_v34 = vld [vmem:[#allocation2 + $0x378] sm:$0xff] }
 0x26c   : > { %v8811_v5 = vrot.slane %v7824_v59, 4  ;;  %v3406_v49 = vmax.f32 %v3166_v18, %v3273_v4  ;;  %v3513_v43 = vsel %vm1376_vm1, %v8807_v61, %v3512_v63  ;;  %v657_v27 = vmax.f32 %v561_v30, %v4537_v3  ;;  %v9238_v61 = vld [vmem:[#allocation6_spill] sm:$0xff] }
 0x26d   : > { %v3647_v32 = vmax.f32 %v3407_v25, %v3512_v63  ;;  %v3753_v12 = vsel %vm1553_vm4, %v8806_v40, %v3752_v14  ;;  %v752_v36 = vmax.f32 %v656_v19, %v4538_v33  ;;  %v756_v54 = vmax.f32 %v7190_v56, %v464_v23  ;;  %v9237_v40 = vld [vmem:[#allocation3_spill] sm:$0xff] }
 0x26e   : > { %v4110_v18 = vmax.f32 %v7824_v59, %v8811_v5  ;;  %v3646_v4 = vmax.f32 %v3406_v49, %v3513_v43  ;;  %v753_v57 = vmax.f32 %v657_v27, %v7240_v47  ;;  %v757_v30 = vmax.f32 %v7386_v39, %v465_v11  ;;  %v9240_v5 = vld [vmem:[#allocation117_spill] sm:$0xff]  ;;  %v9242_v49 = vld [vmem:[#allocation123_spill] sm:$0xff]  ;;  %v9244_v39 = vld [vmem:[#allocation56_spill] sm:$0xff] }
 0x26f   : > { %v3887_v25 = vmax.f32 %v3647_v32, %v3752_v14  ;;  %v848_v63 = vmax.f32 %v752_v36, %v464_v23  ;;  %v852_v3 = vmax.f32 %v756_v54, %v468_v50  ;;  %v9239_v19 = vmax.f32 %v9237_v40, %v9238_v61  ;;  %v9245_v50 = vld [vmem:[#allocation66_spill] sm:$0xff]  ;;  %v9249_v40 = vld [vmem:[#allocation125_spill] sm:$0xff]  ;;  %v9251_v43 = vld [vmem:[#allocation4_spill] sm:$0xff] }
 0x270   : > { %v4158_v58 = vmax.f32 %v4110_v18, %v3883_v31  ;;  %v7850_v56 = vmax.f32 %v3646_v4, %v3753_v12  ;;  %v849_v0 = vmax.f32 %v753_v57, %v465_v11  ;;  %v853_v28 = vmax.f32 %v757_v30, %v469_v34  ;;  %v9246_v27 = vld [vmem:[#allocation54_spill] sm:$0xff] }
 0x271   : > { %v571_v33 = vmax.f32 %v9239_v19, %v7381_v10  ;;  %v7853_v60 = vmax.f32 %v9240_v5, %v848_v63  ;;  %v7856_v47 = vmax.f32 %v9242_v49, %v852_v3  ;;  %v9247_v23 = vmax.f32 %v9245_v50, %v9246_v27  ;;  %v9248_v61 = vld [vmem:[#allocation118_spill] sm:$0xff]  ;;  %v9250_v5 = vld [vmem:[#allocation57_spill] sm:$0xff] }
 0x272   : > { %4445 = vst.msk [vmem:[%s4833_s17 + $0x3ce] sm:$0x3] %vm4172_vm10, %v4158_v58  ;;  %v8822_v10 = vrot.slane %v7850_v56, 4  ;;  %v985_v31 = vmax.f32 %v9248_v61, %v849_v0  ;;  %v989_v11 = vmax.f32 %v9249_v40, %v853_v28  ;;  %v7872_v12 = vmax.f32 %v9251_v43, %v9250_v5 }
 0x273   : > { %9241 = vst [vmem:[#allocation97_spill] sm:$0xff] %v7853_v60  ;;  %9243 = vst [vmem:[#allocation104_spill] sm:$0xff] %v7856_v47  ;;  %v667_v32 = vmax.f32 %v571_v33, %v7400_v8  ;;  %v7863_v14 = vmax.f32 %v9247_v23, %v9244_v39  ;;  %v8821_v8 = vrot.slane %v7853_v60, 1  ;;  %v8816_v36 = vrot.slane %v7853_v60, 2 }
 0x274   : > { %v8814_v34 = vrot.slane %v7853_v60, 3  ;;  %v8813_v54 = vrot.slane %v7853_v60, 4  ;;  %v4113_v58 = vmax.f32 %v7850_v56, %v8822_v10  ;;  %v3039_v0 = vrot.slane %v985_v31, 1 }
 0x275   : > { %v3279_v18 = vrot.slane %v985_v31, 2  ;;  %v3519_v28 = vrot.slane %v985_v31, 3  ;;  %v3759_v4 = vrot.slane %v985_v31, 4  ;;  %v8815_v57 = vrot.slane %v7856_v47, 1 }
 0x276   : > { %v3046_v30 = vrot.slane %v989_v11, 1  ;;  %v8819_v63 = vrot.slane %v7856_v47, 2  ;;  %v4161_v3 = vmax.f32 %v4113_v58, %v3887_v25  ;;  %v3040_v19 = vsel %vm1038_vm2, %v8821_v8, %v3039_v0 }
 0x277   : > { %v3171_v33 = vmax.f32 %v985_v31, %v3039_v0  ;;  %v3280_v49 = vsel %vm1215_vm3, %v8816_v36, %v3279_v18  ;;  %v3170_v39 = vmax.f32 %v7853_v60, %v3040_v19  ;;  %v3520_v50 = vsel %vm1376_vm1, %v8814_v34, %v3519_v28 }
 0x278   : > { %v3760_v27 = vsel %vm1553_vm4, %v8813_v54, %v3759_v4  ;;  %v3047_v25 = vsel %vm1038_vm2, %v8815_v57, %v3046_v30  ;;  %4448 = vst.msk [vmem:[%s4833_s17 + $0x3de] sm:$0x3] %vm4172_vm10, %v4161_v3  ;;  %v3175_v31 = vmax.f32 %v989_v11, %v3046_v30  ;;  %v3286_v40 = vrot.slane %v989_v11, 2  ;;  %v4539_v30 = vld [vmem:[#allocation2 + $0xa8] sm:$0xff] }
 0x279   : > { %v3411_v23 = vmax.f32 %v3171_v33, %v3279_v18  ;;  %v3174_v61 = vmax.f32 %v7856_v47, %v3047_v25  ;;  %v3410_v5 = vmax.f32 %v3170_v39, %v3280_v49  ;;  %v8818_v43 = vrot.slane %v7856_v47, 3 }
 0x27a   : > { %v3526_v58 = vrot.slane %v989_v11, 3  ;;  %v8817_v0 = vrot.slane %v7856_v47, 4  ;;  %v3287_v54 = vsel %vm1215_vm3, %v8819_v63, %v3286_v40  ;;  %v3415_v34 = vmax.f32 %v3175_v31, %v3286_v40 }
 0x27b   : > { %v3651_v19 = vmax.f32 %v3411_v23, %v3519_v28  ;;  %v3766_v57 = vrot.slane %v989_v11, 4  ;;  %v3650_v36 = vmax.f32 %v3410_v5, %v3520_v50  ;;  %v3414_v3 = vmax.f32 %v3174_v61, %v3287_v54  ;;  %v9253_v11 = vld [vmem:[#allocation15_spill] sm:$0xff] }
 0x27c   : > { %v3527_v18 = vsel %vm1376_vm1, %v8818_v43, %v3526_v58  ;;  %v763_v33 = vmax.f32 %v667_v32, %v4539_v30  ;;  %v3655_v39 = vmax.f32 %v3415_v34, %v3526_v58  ;;  %v2943_v25 = vrot.slane %v7863_v14, 1  ;;  %v9255_v34 = vld [vmem:[#allocation7_spill] sm:$0xff]  ;;  %v9256_v30 = vld [vmem:[#allocation18_spill] sm:$0xff] }
 0x27d   : > { %v3891_v49 = vmax.f32 %v3651_v19, %v3759_v4  ;;  %v3767_v28 = vsel %vm1553_vm4, %v8817_v0, %v3766_v57  ;;  %v7914_v23 = vmax.f32 %v3650_v36, %v3760_v27  ;;  %v3654_v31 = vmax.f32 %v3414_v3, %v3527_v18  ;;  %v9254_v4 = vld [vmem:[#allocation20_spill] sm:$0xff] }
 0x27e   : > { %v923_v50 = vmax.f32 %v763_v33, %v9253_v11  ;;  %v3183_v54 = vrot.slane %v7863_v14, 2  ;;  %v3895_v61 = vmax.f32 %v3655_v39, %v3766_v57  ;;  %v3423_v40 = vrot.slane %v7863_v14, 3 }
 0x27f   : > { %9252 = vst [vmem:[#allocation101_spill] sm:$0xff] %v7914_v23  ;;  %v3663_v32 = vrot.slane %v7863_v14, 4  ;;  %v935_v5 = vmax.f32 %v9255_v34, %v9254_v4  ;;  %v8820_v58 = vrot.slane %v7914_v23, 4  ;;  %v7923_v19 = vmax.f32 %v3654_v31, %v3767_v28 }
 0x280   : > { %v931_v36 = vmax.f32 %v923_v50, %v9256_v30  ;;  %v2950_v27 = vrot.slane %v7872_v12, 1  ;;  %v3190_v18 = vrot.slane %v7872_v12, 2  ;;  %v3430_v57 = vrot.slane %v7872_v12, 3 }
 0x281   : > { %v2951_v3 = vrot.slane %v935_v5, 1  ;;  %v3191_v33 = vrot.slane %v935_v5, 2  ;;  %v4116_v39 = vmax.f32 %v7914_v23, %v8820_v58  ;;  %v4022_v11 = vrot.slane %v7923_v19, 4 }
 0x282   : > { %v2944_v4 = vrot.slane %v931_v36, 1  ;;  %v3184_v28 = vrot.slane %v931_v36, 2  ;;  %v3424_v31 = vrot.slane %v931_v36, 3  ;;  %v3664_v34 = vrot.slane %v931_v36, 4 }
 0x283   : > { %v2952_v50 = vsel %vm1038_vm2, %v2950_v27, %v2951_v3  ;;  %v9257_v30 = vrot.slane %v7421_v46, 1  ;;  %v4164_v43 = vmax.f32 %v4116_v39, %v3891_v49  ;;  %v4119_v63 = vmax.f32 %v7923_v19, %v4022_v11 }
 0x284   : > { %v2945_v58 = vsel %vm1038_vm2, %v2943_v25, %v2944_v4  ;;  %v9258_v8 = vrot.slane %v7432_v37, 1  ;;  %v3185_v27 = vsel %vm1215_vm3, %v3183_v54, %v3184_v28  ;;  %v9259_v60 = vrot.slane %v7432_v37, 2 }
 0x285   : > { %v2954_v0 = vsel %vm1038_vm2, %v2951_v3, %v9257_v30  ;;  %v3116_v23 = vmax.f32 %v7863_v14, %v2945_v58  ;;  %4451 = vst.msk [vmem:[%s4833_s17 + $0x3ee] sm:$0x3] %vm4172_vm10, %v4164_v43  ;;  %v4167_v3 = vmax.f32 %v4119_v63, %v3895_v61  ;;  %v3425_v39 = vsel %vm1376_vm1, %v3423_v40, %v3424_v31 }
 0x286   : > { %v2947_v10 = vsel %vm1038_vm2, %v2944_v4, %v9258_v8  ;;  %v3187_v49 = vsel %vm1215_vm3, %v3184_v28, %v9259_v60  ;;  %v9260_v25 = vrot.slane %v7432_v37, 3  ;;  %v3665_v8 = vsel %vm1553_vm4, %v3663_v32, %v3664_v34 }
 0x287   : > { %v3117_v47 = vmax.f32 %v931_v36, %v2947_v10  ;;  %v3356_v4 = vmax.f32 %v3116_v23, %v3185_v27  ;;  %v9261_v10 = vrot.slane %v7432_v37, 4  ;;  %v3120_v58 = vmax.f32 %v7872_v12, %v2952_v50  ;;  %4454 = vst.msk [vmem:[%s4833_s17 + $0x3fe] sm:$0x3] %vm4172_vm10, %v4167_v3  ;;  %v9265_v3 = vld [vmem:[#allocation72_spill] sm:$0xff] }
 0x288   : > { %v3427_v30 = vsel %vm1376_vm1, %v3424_v31, %v9260_v25  ;;  %v3121_v60 = vmax.f32 %v935_v5, %v2954_v0  ;;  %v3192_v63 = vsel %vm1215_vm3, %v3190_v18, %v3191_v33  ;;  %v9262_v43 = vrot.slane %v7421_v46, 2 }
 0x289   : > { %v3357_v14 = vmax.f32 %v3117_v47, %v3187_v49  ;;  %v3667_v54 = vsel %vm1553_vm4, %v3664_v34, %v9261_v10  ;;  %v3431_v40 = vrot.slane %v935_v5, 3  ;;  %v3596_v36 = vmax.f32 %v3356_v4, %v3425_v39  ;;  %v9264_v49 = vld [vmem:[#allocation58_spill] sm:$0xff] }
 0x28a   : > { %v3194_v61 = vsel %vm1215_vm3, %v3191_v33, %v9262_v43  ;;  %v3360_v23 = vmax.f32 %v3120_v58, %v3192_v63  ;;  %v3670_v47 = vrot.slane %v7872_v12, 4  ;;  %v9263_v31 = vrot.slane %v7421_v46, 3  ;;  %v9267_v4 = vld [vmem:[#allocation22_spill] sm:$0xff] }
 0x28b   : > { %v3597_v32 = vmax.f32 %v3357_v14, %v3427_v30  ;;  %v3361_v37 = vmax.f32 %v3121_v60, %v3194_v61  ;;  %v3432_v28 = vsel %vm1376_vm1, %v3430_v57, %v3431_v40  ;;  %v3671_v0 = vrot.slane %v935_v5, 4  ;;  %v9268_v57 = vld [vmem:[#allocation73_spill] sm:$0xff] }
 0x28c   : > { %v3434_v34 = vsel %vm1376_vm1, %v3431_v40, %v9263_v31  ;;  %v3836_v50 = vmax.f32 %v3596_v36, %v3665_v8  ;;  %v3600_v27 = vmax.f32 %v3360_v23, %v3432_v28  ;;  %v938_v33 = vmax.f32 %v9265_v3, %v9264_v49 }
 0x28d   : > { %v3837_v18 = vmax.f32 %v3597_v32, %v3667_v54  ;;  %v3601_v25 = vmax.f32 %v3361_v37, %v3434_v34  ;;  %v3672_v39 = vsel %vm1553_vm4, %v3670_v47, %v3671_v0  ;;  %v9266_v30 = vrot.slane %v7421_v46, 4 }
 0x28e   : > { %v939_v14 = vmax.f32 %v9268_v57, %v9267_v4  ;;  %v3949_v10 = vrot.slane %v3836_v50, 4  ;;  %v3840_v60 = vmax.f32 %v3600_v27, %v3672_v39  ;;  %v2957_v5 = vrot.slane %v938_v33, 1 }
 0x28f   : > { %v3674_v12 = vsel %vm1553_vm4, %v3671_v0, %v9266_v30  ;;  %v3950_v58 = vrot.slane %v3837_v18, 4  ;;  %v3197_v63 = vrot.slane %v938_v33, 2  ;;  %v9269_v40 = vrot.slane %v7482_v29, 4 }
 0x290   : > { %v3841_v8 = vmax.f32 %v3601_v25, %v3674_v12  ;;  %v2958_v54 = vrot.slane %v939_v14, 1  ;;  %v3198_v43 = vrot.slane %v939_v14, 2  ;;  %v3954_v46 = vrot.slane %v3840_v60, 4 }
 0x291   : > { %v3951_v61 = vsel %vm1553_vm4, %v3949_v10, %v3950_v58  ;;  %v3953_v36 = vsel %vm1553_vm4, %v3950_v58, %v9269_v40  ;;  %v3437_v32 = vrot.slane %v938_v33, 3  ;;  %v9270_v31 = vrot.slane %v7494_v48, 1 }
 0x292   : > { %v4075_v23 = vmax.f32 %v3836_v50, %v3951_v61  ;;  %v4076_v47 = vmax.f32 %v3837_v18, %v3953_v36  ;;  %v3955_v37 = vrot.slane %v3841_v8, 4  ;;  %v2959_v28 = vsel %vm1038_vm2, %v2957_v5, %v2958_v54 }
 0x293   : > { %v2961_v34 = vsel %vm1038_vm2, %v2958_v54, %v9270_v31  ;;  %v3124_v0 = vmax.f32 %v938_v33, %v2959_v28  ;;  %v3199_v27 = vsel %vm1215_vm3, %v3197_v63, %v3198_v43  ;;  %v9271_v49 = vrot.slane %v7494_v48, 2  ;;  %v9274_v63 = vld [vmem:[#allocation5_spill] sm:$0xff] }
 0x294   : > { %v4123_v25 = vmax.f32 %v4075_v23, %v3837_v18  ;;  %v4124_v50 = vmax.f32 %v4076_v47, %v7482_v29  ;;  %v3956_v39 = vsel %vm1553_vm4, %v3954_v46, %v3955_v37  ;;  %v9272_v30 = vrot.slane %v7514_v41, 4  ;;  %v9273_v29 = vld [vmem:[#allocation59_spill] sm:$0xff] }
 0x295   : > { %v3201_v3 = vsel %vm1215_vm3, %v3198_v43, %v9271_v49  ;;  %v4078_v4 = vmax.f32 %v3840_v60, %v3956_v39  ;;  %v3125_v10 = vmax.f32 %v939_v14, %v2961_v34  ;;  %v3364_v58 = vmax.f32 %v3124_v0, %v3199_v27  ;;  %v9275_v60 = vld [vmem:[#allocation24_spill] sm:$0xff]  ;;  %v9276_v46 = vld [vmem:[#allocation71_spill] sm:$0xff] }
 0x296   : > { %v3958_v12 = vsel %vm1553_vm4, %v3955_v37, %v9272_v30  ;;  %4410 = vst.msk [vmem:[%s4833_s17 + $0x30e] sm:$0xfc] %vm4169_vm9, %v4123_v25  ;;  %v3438_v5 = vrot.slane %v939_v14, 3  ;;  %v3677_v18 = vrot.slane %v938_v33, 4  ;;  %v3678_v54 = vrot.slane %v939_v14, 4 }
 0x297   : > { %v4079_v57 = vmax.f32 %v3841_v8, %v3958_v12  ;;  %4411 = vst.msk [vmem:[%s4833_s17 + $0x316] sm:$0xff] %vm180_vm0, %v4124_v50  ;;  %v942_v43 = vmax.f32 %v9274_v63, %v9273_v29  ;;  %v4126_v61 = vmax.f32 %v4078_v4, %v3841_v8  ;;  %v3365_v36 = vmax.f32 %v3125_v10, %v3201_v3 }
 0x298   : > { %v943_v23 = vmax.f32 %v9276_v46, %v9275_v60  ;;  %v3439_v47 = vsel %vm1376_vm1, %v3437_v32, %v3438_v5  ;;  %v9277_v37 = vrot.slane %v7494_v48, 3  ;;  %v3679_v31 = vsel %vm1553_vm4, %v3677_v18, %v3678_v54 }
 0x299   : > { %v4127_v40 = vmax.f32 %v4079_v57, %v7514_v41  ;;  %v9278_v33 = vrot.slane %v7494_v48, 4  ;;  %4413 = vst.msk [vmem:[%s4833_s17 + $0x31e] sm:$0xfc] %vm4169_vm9, %v4126_v61  ;;  %v3604_v41 = vmax.f32 %v3364_v58, %v3439_v47  ;;  %v2964_v34 = vrot.slane %v942_v43, 1 }
 0x29a   : > { %v3441_v28 = vsel %vm1376_vm1, %v3438_v5, %v9277_v37  ;;  %v2965_v0 = vrot.slane %v943_v23, 1  ;;  %v3204_v27 = vrot.slane %v942_v43, 2  ;;  %v3205_v32 = vrot.slane %v943_v23, 2 }
 0x29b   : > { %v3681_v14 = vsel %vm1553_vm4, %v3678_v54, %v9278_v33  ;;  %4414 = vst.msk [vmem:[%s4833_s17 + $0x326] sm:$0xff] %vm180_vm0, %v4127_v40  ;;  %v3605_v8 = vmax.f32 %v3365_v36, %v3441_v28  ;;  %v3444_v49 = vrot.slane %v942_v43, 3  ;;  %v3445_v3 = vrot.slane %v943_v23, 3  ;;  %v9283_v28 = vld [vmem:[#allocation60_spill] sm:$0xff] }
 0x29c   : > { %v3844_v25 = vmax.f32 %v3604_v41, %v3679_v31  ;;  %v2966_v39 = vsel %vm1038_vm2, %v2964_v34, %v2965_v0  ;;  %v9279_v48 = vrot.slane %v7529_v7, 1  ;;  %v3206_v57 = vsel %vm1215_vm3, %v3204_v27, %v3205_v32  ;;  %v9284_v31 = vld [vmem:[#allocation78_spill] sm:$0xff]  ;;  %v9286_v41 = vld [vmem:[#allocation79_spill] sm:$0xff] }
 0x29d   : > { %v3845_v50 = vmax.f32 %v3605_v8, %v3681_v14  ;;  %v3128_v12 = vmax.f32 %v942_v43, %v2966_v39  ;;  %v9280_v10 = vrot.slane %v7529_v7, 2  ;;  %v3446_v54 = vsel %vm1376_vm1, %v3444_v49, %v3445_v3  ;;  %v9285_v14 = vld [vmem:[#allocation26_spill] sm:$0xff] }
 0x29e   : > { %v2968_v30 = vsel %vm1038_vm2, %v2965_v0, %v9279_v48  ;;  %v3959_v5 = vrot.slane %v3844_v25, 4  ;;  %v9281_v29 = vrot.slane %v7529_v7, 3  ;;  %v3684_v36 = vrot.slane %v942_v43, 4 }
 0x29f   : > { %v3129_v4 = vmax.f32 %v943_v23, %v2968_v30  ;;  %v3208_v58 = vsel %vm1215_vm3, %v3205_v32, %v9280_v10  ;;  %v3960_v18 = vrot.slane %v3845_v50, 4  ;;  %v3368_v61 = vmax.f32 %v3128_v12, %v3206_v57 }
 0x2a0   : > { %v3448_v63 = vsel %vm1376_vm1, %v3445_v3, %v9281_v29  ;;  %v3685_v60 = vrot.slane %v943_v23, 4  ;;  %v9282_v47 = vrot.slane %v7548_v22, 4  ;;  %v946_v33 = vmax.f32 %v9284_v31, %v9283_v28 }
 0x2a1   : > { %v3369_v40 = vmax.f32 %v3129_v4, %v3208_v58  ;;  %v3961_v46 = vsel %vm1553_vm4, %v3959_v5, %v3960_v18  ;;  %v947_v8 = vmax.f32 %v9286_v41, %v9285_v14  ;;  %v3608_v27 = vmax.f32 %v3368_v61, %v3446_v54 }
 0x2a2   : > { %v3963_v37 = vsel %vm1553_vm4, %v3960_v18, %v9282_v47  ;;  %v4081_v34 = vmax.f32 %v3844_v25, %v3961_v46  ;;  %v3686_v43 = vsel %vm1553_vm4, %v3684_v36, %v3685_v60  ;;  %v9287_v23 = vrot.slane %v7529_v7, 4 }
 0x2a3   : > { %v4082_v0 = vmax.f32 %v3845_v50, %v3963_v37  ;;  %v3609_v32 = vmax.f32 %v3369_v40, %v3448_v63  ;;  %v2971_v3 = vrot.slane %v946_v33, 1  ;;  %v2972_v39 = vrot.slane %v947_v8, 1 }
 0x2a4   : > { %v3688_v49 = vsel %vm1553_vm4, %v3685_v60, %v9287_v23  ;;  %v4129_v48 = vmax.f32 %v4081_v34, %v3845_v50  ;;  %v3848_v12 = vmax.f32 %v3608_v27, %v3686_v43  ;;  %v9288_v57 = vrot.slane %v7538_v6, 1 }
 0x2a5   : > { %v4130_v30 = vmax.f32 %v4082_v0, %v7548_v22  ;;  %v3849_v4 = vmax.f32 %v3609_v32, %v3688_v49  ;;  %v2973_v25 = vsel %vm1038_vm2, %v2971_v3, %v2972_v39  ;;  %v3211_v58 = vrot.slane %v946_v33, 2  ;;  %v9292_v3 = vld [vmem:[#allocation61_spill] sm:$0xff] }
 0x2a6   : > { %v2975_v10 = vsel %vm1038_vm2, %v2972_v39, %v9288_v57  ;;  %v3212_v5 = vrot.slane %v947_v8, 2  ;;  %4416 = vst.msk [vmem:[%s4833_s17 + $0x32e] sm:$0xfc] %vm4169_vm9, %v4129_v48  ;;  %v3964_v7 = vrot.slane %v3848_v12, 4  ;;  %v3132_v54 = vmax.f32 %v946_v33, %v2973_v25  ;;  %v9293_v39 = vld [vmem:[#allocation82_spill] sm:$0xff] }
 0x2a7   : > { %4417 = vst.msk [vmem:[%s4833_s17 + $0x336] sm:$0xff] %vm180_vm0, %v4130_v30  ;;  %v3965_v18 = vrot.slane %v3849_v4, 4  ;;  %v3133_v50 = vmax.f32 %v947_v8, %v2975_v10  ;;  %v9289_v29 = vrot.slane %v7538_v6, 2  ;;  %v3451_v61 = vrot.slane %v946_v33, 3  ;;  %v9294_v30 = vld [vmem:[#allocation28_spill] sm:$0xff] }
 0x2a8   : > { %v3213_v22 = vsel %vm1215_vm3, %v3211_v58, %v3212_v5  ;;  %v3452_v40 = vrot.slane %v947_v8, 3  ;;  %v9290_v60 = vrot.slane %v7580_v52, 4  ;;  %v9291_v41 = vrot.slane %v7538_v6, 3 }
 0x2a9   : > { %v3215_v63 = vsel %vm1215_vm3, %v3212_v5, %v9289_v29  ;;  %v3966_v36 = vsel %vm1553_vm4, %v3964_v7, %v3965_v18  ;;  %v3372_v47 = vmax.f32 %v3132_v54, %v3213_v22  ;;  %v3691_v32 = vrot.slane %v946_v33, 4  ;;  %v9297_v5 = vld [vmem:[#allocation62_spill] sm:$0xff] }
 0x2aa   : > { %v3968_v46 = vsel %vm1553_vm4, %v3965_v18, %v9290_v60  ;;  %v3373_v37 = vmax.f32 %v3133_v50, %v3215_v63  ;;  %v4084_v28 = vmax.f32 %v3848_v12, %v3966_v36  ;;  %v3453_v14 = vsel %vm1376_vm1, %v3451_v61, %v3452_v40  ;;  %v9295_v12 = vld [vmem:[#allocation83_spill] sm:$0xff]  ;;  %v9298_v7 = vld [vmem:[#allocation86_spill] sm:$0xff] }
 0x2ab   : > { %v4085_v31 = vmax.f32 %v3849_v4, %v3968_v46  ;;  %v3455_v34 = vsel %vm1376_vm1, %v3452_v40, %v9291_v41  ;;  %v3612_v0 = vmax.f32 %v3372_v47, %v3453_v14  ;;  %v3692_v43 = vrot.slane %v947_v8, 4  ;;  %v9299_v33 = vld [vmem:[#allocation30_spill] sm:$0xff]  ;;  %v9300_v8 = vld [vmem:[#allocation87_spill] sm:$0xff] }
 0x2ac   : > { %v3613_v27 = vmax.f32 %v3373_v37, %v3455_v34  ;;  %v4132_v23 = vmax.f32 %v4084_v28, %v3849_v4  ;;  %v950_v48 = vmax.f32 %v9293_v39, %v9292_v3  ;;  %v951_v25 = vmax.f32 %v9295_v12, %v9294_v30 }
 0x2ad   : > { %v4133_v49 = vmax.f32 %v4085_v31, %v7580_v52  ;;  %v3693_v57 = vsel %vm1553_vm4, %v3691_v32, %v3692_v43  ;;  %v9296_v10 = vrot.slane %v7538_v6, 4  ;;  %v8073_v18 = vmax.f32 %v9298_v7, %v9297_v5 }
 0x2ae   : > { %v8077_v4 = vmax.f32 %v9300_v8, %v9299_v33  ;;  %4419 = vst.msk [vmem:[%s4833_s17 + $0x33e] sm:$0xfc] %vm4169_vm9, %v4132_v23  ;;  %v3852_v52 = vmax.f32 %v3612_v0, %v3693_v57  ;;  %v2978_v50 = vrot.slane %v950_v48, 1  ;;  %v2979_v22 = vrot.slane %v951_v25, 1 }
 0x2af   : > { %v3695_v58 = vsel %vm1553_vm4, %v3692_v43, %v9296_v10  ;;  %4420 = vst.msk [vmem:[%s4833_s17 + $0x346] sm:$0xff] %vm180_vm0, %v4133_v49  ;;  %v3218_v29 = vrot.slane %v950_v48, 2  ;;  %v3219_v6 = vrot.slane %v951_v25, 2  ;;  %v3458_v63 = vrot.slane %v950_v48, 3 }
 0x2b0   : > { %v3853_v54 = vmax.f32 %v3613_v27, %v3695_v58  ;;  %v3459_v61 = vrot.slane %v951_v25, 3  ;;  %v3969_v40 = vrot.slane %v3852_v52, 4  ;;  %v2980_v60 = vsel %vm1038_vm2, %v2978_v50, %v2979_v22 }
 0x2b1   : > { %v9301_v46 = vrot.slane %v7587_v15, 1  ;;  %v3136_v37 = vmax.f32 %v950_v48, %v2980_v60  ;;  %v3220_v31 = vsel %vm1215_vm3, %v3218_v29, %v3219_v6  ;;  %v9302_v14 = vrot.slane %v7587_v15, 2 }
 0x2b2   : > { %v3970_v36 = vrot.slane %v3853_v54, 4  ;;  %v9303_v0 = vrot.slane %v7607_v42, 4  ;;  %v3460_v32 = vsel %vm1376_vm1, %v3458_v63, %v3459_v61  ;;  %v9304_v43 = vrot.slane %v7587_v15, 3 }
 0x2b3   : > { %v2982_v47 = vsel %vm1038_vm2, %v2979_v22, %v9301_v46  ;;  %v3222_v41 = vsel %vm1215_vm3, %v3219_v6, %v9302_v14  ;;  %v3376_v39 = vmax.f32 %v3136_v37, %v3220_v31  ;;  %v3698_v12 = vrot.slane %v950_v48, 4 }
 0x2b4   : > { %v3137_v28 = vmax.f32 %v951_v25, %v2982_v47  ;;  %v3971_v34 = vsel %vm1553_vm4, %v3969_v40, %v3970_v36  ;;  %v3973_v27 = vsel %vm1553_vm4, %v3970_v36, %v9303_v0  ;;  %v3462_v23 = vsel %vm1376_vm1, %v3459_v61, %v9304_v43 }
 0x2b5   : > { %v4087_v49 = vmax.f32 %v3852_v52, %v3971_v34  ;;  %v4088_v3 = vmax.f32 %v3853_v54, %v3973_v27  ;;  %v3699_v57 = vrot.slane %v951_v25, 4  ;;  %v2985_v10 = vrot.slane %v8073_v18, 1 }
 0x2b6   : > { %v3377_v30 = vmax.f32 %v3137_v28, %v3222_v41  ;;  %v2986_v58 = vrot.slane %v8077_v4, 1  ;;  %v3616_v33 = vmax.f32 %v3376_v39, %v3460_v32  ;;  %v9305_v52 = vrot.slane %v7587_v15, 4 }
 0x2b7   : > { %v4135_v5 = vmax.f32 %v4087_v49, %v3853_v54  ;;  %v4136_v7 = vmax.f32 %v4088_v3, %v7607_v42  ;;  %v3700_v50 = vsel %vm1553_vm4, %v3698_v12, %v3699_v57  ;;  %v9306_v48 = vrot.slane %v7597_v53, 1 }
 0x2b8   : > { %v3617_v8 = vmax.f32 %v3377_v30, %v3462_v23  ;;  %v3702_v22 = vsel %vm1553_vm4, %v3699_v57, %v9305_v52  ;;  %v2987_v29 = vsel %vm1038_vm2, %v2985_v10, %v2986_v58  ;;  %v3856_v54 = vmax.f32 %v3616_v33, %v3700_v50  ;;  %v9311_v10 = vld [vmem:[#allocation63_spill] sm:$0xff] }
 0x2b9   : > { %v2989_v25 = vsel %vm1038_vm2, %v2986_v58, %v9306_v48  ;;  %4422 = vst.msk [vmem:[%s4833_s17 + $0x34e] sm:$0xfc] %vm4169_vm9, %v4135_v5  ;;  %v3140_v6 = vmax.f32 %v8073_v18, %v2987_v29  ;;  %v3225_v15 = vrot.slane %v8073_v18, 2  ;;  %v3226_v61 = vrot.slane %v8077_v4, 2  ;;  %v9312_v58 = vld [vmem:[#allocation90_spill] sm:$0xff]  ;;  %v9314_v33 = vld [vmem:[#allocation91_spill] sm:$0xff] }
 0x2ba   : > { %4423 = vst.msk [vmem:[%s4833_s17 + $0x356] sm:$0xff] %vm180_vm0, %v4136_v7  ;;  %v3857_v42 = vmax.f32 %v3617_v8, %v3702_v22  ;;  %v3141_v63 = vmax.f32 %v8077_v4, %v2989_v25  ;;  %v3465_v40 = vrot.slane %v8073_v18, 3  ;;  %v3466_v36 = vrot.slane %v8077_v4, 3  ;;  %v9313_v7 = vld [vmem:[#allocation32_spill] sm:$0xff]  ;;  %v9315_v22 = vld [vmem:[#allocation94_spill] sm:$0xff]  ;;  %v9316_v48 = vld [vmem:[#allocation95_spill] sm:$0xff] }
 0x2bb   : > { %v3974_v60 = vrot.slane %v3856_v54, 4  ;;  %v3705_v47 = vrot.slane %v8073_v18, 4  ;;  %v3706_v37 = vrot.slane %v8077_v4, 4  ;;  %v3227_v28 = vsel %vm1215_vm3, %v3225_v15, %v3226_v61 }
 0x2bc   : > { %v3975_v46 = vrot.slane %v3857_v42, 4  ;;  %v9307_v31 = vrot.slane %v7597_v53, 2  ;;  %v3467_v41 = vsel %vm1376_vm1, %v3465_v40, %v3466_v36  ;;  %v9308_v34 = vrot.slane %v7597_v53, 3 }
 0x2bd   : > { %v9309_v32 = vrot.slane %v7636_v24, 4  ;;  %v3380_v43 = vmax.f32 %v3140_v6, %v3227_v28  ;;  %v3707_v3 = vsel %vm1553_vm4, %v3705_v47, %v3706_v37  ;;  %v9310_v39 = vrot.slane %v7597_v53, 4 }
 0x2be   : > { %v3229_v14 = vsel %vm1215_vm3, %v3226_v61, %v9307_v31  ;;  %v3469_v0 = vsel %vm1376_vm1, %v3466_v36, %v9308_v34  ;;  %v3976_v27 = vsel %vm1553_vm4, %v3974_v60, %v3975_v46  ;;  %v958_v5 = vmax.f32 %v9312_v58, %v9311_v10 }
 0x2bf   : > { %v3978_v18 = vsel %vm1553_vm4, %v3975_v46, %v9309_v32  ;;  %v3381_v4 = vmax.f32 %v3141_v63, %v3229_v14  ;;  %v4090_v23 = vmax.f32 %v3856_v54, %v3976_v27  ;;  %v3709_v30 = vsel %vm1553_vm4, %v3706_v37, %v9310_v39 }
 0x2c0   : > { %v4091_v49 = vmax.f32 %v3857_v42, %v3978_v18  ;;  %v3620_v12 = vmax.f32 %v3380_v43, %v3467_v41  ;;  %v959_v8 = vmax.f32 %v9314_v33, %v9313_v7  ;;  %v8145_v29 = vmax.f32 %v9315_v22, %v9093_v13 }
 0x2c1   : > { %v3621_v57 = vmax.f32 %v3381_v4, %v3469_v0  ;;  %v4138_v50 = vmax.f32 %v4090_v23, %v3857_v42  ;;  %v8149_v53 = vmax.f32 %v9316_v48, %v9094_v20  ;;  %v2992_v6 = vrot.slane %v958_v5, 1 }
 0x2c2   : > { %v4139_v52 = vmax.f32 %v4091_v49, %v7636_v24  ;;  %v3860_v25 = vmax.f32 %v3620_v12, %v3707_v3  ;;  %v2993_v63 = vrot.slane %v959_v8, 1  ;;  %v3232_v15 = vrot.slane %v958_v5, 2 }
 0x2c3   : > { %v3861_v54 = vmax.f32 %v3621_v57, %v3709_v30  ;;  %4425 = vst.msk [vmem:[%s4833_s17 + $0x35e] sm:$0xfc] %vm4169_vm9, %v4138_v50  ;;  %v3233_v42 = vrot.slane %v959_v8, 2  ;;  %v3472_v61 = vrot.slane %v958_v5, 3  ;;  %v3473_v24 = vrot.slane %v959_v8, 3 }
 0x2c4   : > { %4426 = vst.msk [vmem:[%s4833_s17 + $0x366] sm:$0xff] %vm180_vm0, %v4139_v52  ;;  %v3979_v40 = vrot.slane %v3860_v25, 4  ;;  %v2994_v13 = vsel %vm1038_vm2, %v2992_v6, %v2993_v63  ;;  %v9317_v60 = vrot.slane %v7652_v62, 1  ;;  %v9318_v28 = vrot.slane %v7652_v62, 2 }
 0x2c5   : > { %v3980_v36 = vrot.slane %v3861_v54, 4  ;;  %v3144_v46 = vmax.f32 %v958_v5, %v2994_v13  ;;  %v3234_v37 = vsel %vm1215_vm3, %v3232_v15, %v3233_v42  ;;  %v9319_v41 = vrot.slane %v7674_v55, 4 }
 0x2c6   : > { %v2996_v20 = vsel %vm1038_vm2, %v2993_v63, %v9317_v60  ;;  %v3236_v31 = vsel %vm1215_vm3, %v3233_v42, %v9318_v28  ;;  %v3474_v0 = vsel %vm1376_vm1, %v3472_v61, %v3473_v24  ;;  %v9320_v27 = vrot.slane %v7652_v62, 3 }
 0x2c7   : > { %v3145_v47 = vmax.f32 %v959_v8, %v2996_v20  ;;  %v3981_v14 = vsel %vm1553_vm4, %v3979_v40, %v3980_v36  ;;  %v3983_v34 = vsel %vm1553_vm4, %v3980_v36, %v9319_v41  ;;  %v3384_v4 = vmax.f32 %v3144_v46, %v3234_v37 }
 0x2c8   : > { %v3476_v32 = vsel %vm1376_vm1, %v3473_v24, %v9320_v27  ;;  %v4093_v18 = vmax.f32 %v3860_v25, %v3981_v14  ;;  %v4094_v43 = vmax.f32 %v3861_v54, %v3983_v34  ;;  %v3712_v49 = vrot.slane %v958_v5, 4 }
 0x2c9   : > { %v3385_v23 = vmax.f32 %v3145_v47, %v3236_v31  ;;  %v3713_v3 = vrot.slane %v959_v8, 4  ;;  %v2999_v39 = vrot.slane %v8145_v29, 1  ;;  %v3000_v30 = vrot.slane %v8149_v53, 1 }
 0x2ca   : > { %v4141_v12 = vmax.f32 %v4093_v18, %v3861_v54  ;;  %v4142_v57 = vmax.f32 %v4094_v43, %v7674_v55  ;;  %v3624_v10 = vmax.f32 %v3384_v4, %v3474_v0  ;;  %v9321_v33 = vrot.slane %v7652_v62, 4  ;;  %v9327_v18 = vld [vmem:[#allocation8_spill] sm:$0xff]  ;;  %v9328_v43 = vld [vmem:[#allocation99_spill] sm:$0xff] }
 0x2cb   : > { %v3625_v58 = vmax.f32 %v3385_v23, %v3476_v32  ;;  %v3714_v7 = vsel %vm1553_vm4, %v3712_v49, %v3713_v3  ;;  %v3001_v52 = vsel %vm1038_vm2, %v2999_v39, %v3000_v30  ;;  %v9322_v5 = vrot.slane %v7659_v44, 1  ;;  %v9329_v23 = vld [vmem:[#allocation65_spill] sm:$0xff]  ;;  %v9330_v49 = vld [vmem:[#allocation100_spill] sm:$0xff] }
 0x2cc   : > { %v3716_v50 = vsel %vm1553_vm4, %v3713_v3, %v9321_v33  ;;  %4428 = vst.msk [vmem:[%s4833_s17 + $0x36e] sm:$0xfc] %vm4169_vm9, %v4141_v12  ;;  %v3864_v22 = vmax.f32 %v3624_v10, %v3714_v7  ;;  %v3148_v48 = vmax.f32 %v8145_v29, %v3001_v52  ;;  %v3239_v62 = vrot.slane %v8145_v29, 2  ;;  %v9331_v12 = vld [vmem:[#allocation67_spill] sm:$0xff] }
 0x2cd   : > { %v3003_v8 = vsel %vm1038_vm2, %v3000_v30, %v9322_v5  ;;  %4429 = vst.msk [vmem:[%s4833_s17 + $0x376] sm:$0xff] %vm180_vm0, %v4142_v57  ;;  %v3865_v55 = vmax.f32 %v3625_v58, %v3716_v50  ;;  %v3240_v54 = vrot.slane %v8149_v53, 2  ;;  %v3479_v6 = vrot.slane %v8145_v29, 3  ;;  %v9332_v57 = vld [vmem:[#allocation105_spill] sm:$0xff]  ;;  %v9333_v58 = vld [vmem:[#allocation68_spill] sm:$0xff]  ;;  %v9334_v7 = vld [vmem:[#allocation107_spill] sm:$0xff] }
 0x2ce   : > { %v3149_v25 = vmax.f32 %v8149_v53, %v3003_v8  ;;  %v3480_v63 = vrot.slane %v8149_v53, 3  ;;  %v3984_v15 = vrot.slane %v3864_v22, 4  ;;  %v3719_v61 = vrot.slane %v8145_v29, 4 }
 0x2cf   : > { %v3985_v42 = vrot.slane %v3865_v55, 4  ;;  %v3720_v24 = vrot.slane %v8149_v53, 4  ;;  %v3241_v40 = vsel %vm1215_vm3, %v3239_v62, %v3240_v54  ;;  %v9323_v36 = vrot.slane %v7659_v44, 2 }
 0x2d0   : > { %v3481_v60 = vsel %vm1376_vm1, %v3479_v6, %v3480_v63  ;;  %v9324_v20 = vrot.slane %v7659_v44, 3  ;;  %v9325_v37 = vrot.slane %v7704_v35, 4  ;;  %v3388_v28 = vmax.f32 %v3148_v48, %v3241_v40 }
 0x2d1   : > { %v3243_v13 = vsel %vm1215_vm3, %v3240_v54, %v9323_v36  ;;  %v3986_v47 = vsel %vm1553_vm4, %v3984_v15, %v3985_v42  ;;  %v3721_v41 = vsel %vm1553_vm4, %v3719_v61, %v3720_v24  ;;  %v9326_v34 = vrot.slane %v7659_v44, 4 }
 0x2d2   : > { %v3483_v46 = vsel %vm1376_vm1, %v3480_v63, %v9324_v20  ;;  %v3988_v29 = vsel %vm1553_vm4, %v3985_v42, %v9325_v37  ;;  %v3389_v53 = vmax.f32 %v3149_v25, %v3243_v13  ;;  %v4096_v31 = vmax.f32 %v3864_v22, %v3986_v47 }
 0x2d3   : > { %v4097_v14 = vmax.f32 %v3865_v55, %v3988_v29  ;;  %v3723_v0 = vsel %vm1553_vm4, %v3720_v24, %v9326_v34  ;;  %v3628_v27 = vmax.f32 %v3388_v28, %v3481_v60  ;;  %v966_v4 = vmax.f32 %v9328_v43, %v9327_v18 }
 0x2d4   : > { %v3629_v32 = vmax.f32 %v3389_v53, %v3483_v46  ;;  %v967_v3 = vmax.f32 %v9330_v49, %v9329_v23  ;;  %v4144_v39 = vmax.f32 %v4096_v31, %v3865_v55  ;;  %v8217_v10 = vmax.f32 %v9332_v57, %v9331_v12 }
 0x2d5   : > { %v4145_v30 = vmax.f32 %v4097_v14, %v7704_v35  ;;  %v8221_v44 = vmax.f32 %v9334_v7, %v9333_v58  ;;  %v3868_v33 = vmax.f32 %v3628_v27, %v3721_v41  ;;  %v3006_v52 = vrot.slane %v966_v4, 1 }
 0x2d6   : > { %v3869_v50 = vmax.f32 %v3629_v32, %v3723_v0  ;;  %v3007_v5 = vrot.slane %v967_v3, 1  ;;  %4431 = vst.msk [vmem:[%s4833_s17 + $0x37e] sm:$0xfc] %vm4169_vm9, %v4144_v39  ;;  %v3246_v8 = vrot.slane %v966_v4, 2  ;;  %v3247_v22 = vrot.slane %v967_v3, 2 }
 0x2d7   : > { %4432 = vst.msk [vmem:[%s4833_s17 + $0x386] sm:$0xff] %vm180_vm0, %v4145_v30  ;;  %v3486_v55 = vrot.slane %v966_v4, 3  ;;  %v3487_v35 = vrot.slane %v967_v3, 3  ;;  %v3989_v48 = vrot.slane %v3868_v33, 4  ;;  %v9335_v54 = vrot.slane %v7712_v51, 1 }
 0x2d8   : > { %v3990_v25 = vrot.slane %v3869_v50, 4  ;;  %v3008_v62 = vsel %vm1038_vm2, %v3006_v52, %v3007_v5  ;;  %v3248_v42 = vsel %vm1215_vm3, %v3246_v8, %v3247_v22  ;;  %v9336_v61 = vrot.slane %v7712_v51, 2 }
 0x2d9   : > { %v3010_v6 = vsel %vm1038_vm2, %v3007_v5, %v9335_v54  ;;  %v3152_v63 = vmax.f32 %v966_v4, %v3008_v62  ;;  %v9337_v36 = vrot.slane %v7737_v1, 4  ;;  %v3488_v60 = vsel %vm1376_vm1, %v3486_v55, %v3487_v35 }
 0x2da   : > { %v3153_v15 = vmax.f32 %v967_v3, %v3010_v6  ;;  %v3250_v24 = vsel %vm1215_vm3, %v3247_v22, %v9336_v61  ;;  %v3991_v40 = vsel %vm1553_vm4, %v3989_v48, %v3990_v25  ;;  %v9338_v20 = vrot.slane %v7712_v51, 3 }
 0x2db   : > { %v3993_v13 = vsel %vm1553_vm4, %v3990_v25, %v9337_v36  ;;  %v4099_v47 = vmax.f32 %v3868_v33, %v3991_v40  ;;  %v3392_v29 = vmax.f32 %v3152_v63, %v3248_v42  ;;  %v3726_v53 = vrot.slane %v966_v4, 4 }
 0x2dc   : > { %v3490_v46 = vsel %vm1376_vm1, %v3487_v35, %v9338_v20  ;;  %v4100_v37 = vmax.f32 %v3869_v50, %v3993_v13  ;;  %v3393_v28 = vmax.f32 %v3153_v15, %v3250_v24  ;;  %v3727_v31 = vrot.slane %v967_v3, 4  ;;  %v9345_v13 = vld [vmem:[#allocation129_spill] sm:$0xff]  ;;  %v9346_v20 = vld [vmem:[#allocation130_spill] sm:$0xff] }
 0x2dd   : > { %v3013_v14 = vrot.slane %v8217_v10, 1  ;;  %v3014_v41 = vrot.slane %v8221_v44, 1  ;;  %v4147_v34 = vmax.f32 %v4099_v47, %v3869_v50  ;;  %v3632_v27 = vmax.f32 %v3392_v29, %v3488_v60 }
 0x2de   : > { %v4148_v0 = vmax.f32 %v4100_v37, %v7737_v1  ;;  %v3633_v32 = vmax.f32 %v3393_v28, %v3490_v46  ;;  %v3728_v18 = vsel %vm1553_vm4, %v3726_v53, %v3727_v31  ;;  %v9339_v43 = vrot.slane %v7712_v51, 4 }
 0x2df   : > { %v3015_v49 = vsel %vm1038_vm2, %v3013_v14, %v3014_v41  ;;  %v9340_v4 = vrot.slane %v7721_v45, 1  ;;  %4434 = vst.msk [vmem:[%s4833_s17 + $0x38e] sm:$0xfc] %vm4169_vm9, %v4147_v34  ;;  %v3872_v39 = vmax.f32 %v3632_v27, %v3728_v18  ;;  %v3253_v51 = vrot.slane %v8217_v10, 2 }
 0x2e0   : > { %v3730_v23 = vsel %vm1553_vm4, %v3727_v31, %v9339_v43  ;;  %4435 = vst.msk [vmem:[%s4833_s17 + $0x396] sm:$0xff] %vm180_vm0, %v4148_v0  ;;  %v3156_v30 = vmax.f32 %v8217_v10, %v3015_v49  ;;  %v3254_v57 = vrot.slane %v8221_v44, 2  ;;  %v3493_v58 = vrot.slane %v8217_v10, 3 }
 0x2e1   : > { %v3017_v3 = vsel %vm1038_vm2, %v3014_v41, %v9340_v4  ;;  %v3873_v1 = vmax.f32 %v3633_v32, %v3730_v23  ;;  %v3494_v7 = vrot.slane %v8221_v44, 3  ;;  %v3994_v33 = vrot.slane %v3872_v39, 4 }
 0x2e2   : > { %v3157_v12 = vmax.f32 %v8221_v44, %v3017_v3  ;;  %v3733_v52 = vrot.slane %v8217_v10, 4  ;;  %v3734_v5 = vrot.slane %v8221_v44, 4  ;;  %v3255_v8 = vsel %vm1215_vm3, %v3253_v51, %v3254_v57 }
 0x2e3   : > { %v3995_v50 = vrot.slane %v3873_v1, 4  ;;  %v9341_v22 = vrot.slane %v7721_v45, 2  ;;  %v3495_v35 = vsel %vm1376_vm1, %v3493_v58, %v3494_v7  ;;  %v9342_v48 = vrot.slane %v7721_v45, 3 }
 0x2e4   : > { %v9343_v54 = vrot.slane %v7763_v16, 4  ;;  %v3396_v6 = vmax.f32 %v3156_v30, %v3255_v8  ;;  %v3735_v42 = vsel %vm1553_vm4, %v3733_v52, %v3734_v5  ;;  %v9344_v61 = vrot.slane %v7721_v45, 4 }
 0x2e5   : > { %v3257_v55 = vsel %vm1215_vm3, %v3254_v57, %v9341_v22  ;;  %v3497_v25 = vsel %vm1376_vm1, %v3494_v7, %v9342_v48  ;;  %v3996_v62 = vsel %vm1553_vm4, %v3994_v33, %v3995_v50  ;;  %v3020_v60 = vrot.slane %v9345_v13, 1 }
 0x2e6   : > { %v3998_v10 = vsel %vm1553_vm4, %v3995_v50, %v9343_v54  ;;  %v3397_v44 = vmax.f32 %v3157_v12, %v3257_v55  ;;  %v4102_v63 = vmax.f32 %v3872_v39, %v3996_v62  ;;  %v3737_v24 = vsel %vm1553_vm4, %v3734_v5, %v9344_v61 }
 0x2e7   : > { %v4103_v15 = vmax.f32 %v3873_v1, %v3998_v10  ;;  %v3636_v40 = vmax.f32 %v3396_v6, %v3495_v35  ;;  %v3021_v46 = vrot.slane %v9346_v20, 1  ;;  %v3260_v29 = vrot.slane %v9345_v13, 2 }
 0x2e8   : > { %v3637_v36 = vmax.f32 %v3397_v44, %v3497_v25  ;;  %v4150_v47 = vmax.f32 %v4102_v63, %v3873_v1  ;;  %v3261_v28 = vrot.slane %v9346_v20, 2  ;;  %v9347_v45 = vrot.slane %v7771_v2, 1 }
 0x2e9   : > { %v4151_v37 = vmax.f32 %v4103_v15, %v7763_v16  ;;  %v3876_v53 = vmax.f32 %v3636_v40, %v3735_v42  ;;  %v3022_v14 = vsel %vm1038_vm2, %v3020_v60, %v3021_v46  ;;  %v9348_v27 = vrot.slane %v7771_v2, 2 }
 0x2ea   : > { %v3877_v31 = vmax.f32 %v3637_v36, %v3737_v24  ;;  %v3024_v41 = vsel %vm1038_vm2, %v3021_v46, %v9347_v45  ;;  %4437 = vst.msk [vmem:[%s4833_s17 + $0x39e] sm:$0xfc] %vm4169_vm9, %v4150_v47  ;;  %v3160_v34 = vmax.f32 %v9345_v13, %v3022_v14  ;;  %v3262_v0 = vsel %vm1215_vm3, %v3260_v29, %v3261_v28 }
 0x2eb   : > { %4438 = vst.msk [vmem:[%s4833_s17 + $0x3a6] sm:$0xff] %vm180_vm0, %v4151_v37  ;;  %v3161_v16 = vmax.f32 %v9346_v20, %v3024_v41  ;;  %v3264_v32 = vsel %vm1215_vm3, %v3261_v28, %v9348_v27  ;;  %v3999_v18 = vrot.slane %v3876_v53, 4  ;;  %v3500_v23 = vrot.slane %v9345_v13, 3 }
 0x2ec   : > { %v4000_v43 = vrot.slane %v3877_v31, 4  ;;  %v3501_v49 = vrot.slane %v9346_v20, 3  ;;  %v3400_v4 = vmax.f32 %v3160_v34, %v3262_v0  ;;  %v3740_v39 = vrot.slane %v9345_v13, 4  ;;  %v466_v34 = vld [vmem:[#allocation2 + $0x360] sm:$0xff] }
 0x2ed   : > { %v3401_v3 = vmax.f32 %v3161_v16, %v3264_v32  ;;  %v3741_v1 = vrot.slane %v9346_v20, 4  ;;  %v9349_v12 = vrot.slane %v7791_v9, 4  ;;  %v9350_v58 = vrot.slane %v7771_v2, 3  ;;  %v467_v16 = vld [vmem:[#allocation2 + $0x368] sm:$0xff] }
 0x2ee   : > { %v4001_v30 = vsel %vm1553_vm4, %v3999_v18, %v4000_v43  ;;  %v3502_v57 = vsel %vm1376_vm1, %v3500_v23, %v3501_v49  ;;  %v9351_v22 = vrot.slane %v7771_v2, 4  ;;  %v3027_v35 = vrot.slane %v7206_v38, 1 }
 0x2ef   : > { %v4003_v51 = vsel %vm1553_vm4, %v4000_v43, %v9349_v12  ;;  %v3504_v7 = vsel %vm1376_vm1, %v3501_v49, %v9350_v58  ;;  %v4105_v33 = vmax.f32 %v3876_v53, %v4001_v30  ;;  %v3640_v52 = vmax.f32 %v3400_v4, %v3502_v57  ;;  %v4540_v49 = vld [vmem:[#allocation2 + $0x340] sm:$0xff]  ;;  %v9358_v30 = vld [vmem:[#allocation133_spill] sm:$0xff]  ;;  %v9359_v12 = vld [vmem:[#allocation132_spill] sm:$0xff] }
 0x2f0   : > { %v4106_v50 = vmax.f32 %v3877_v31, %v4003_v51  ;;  %v3641_v5 = vmax.f32 %v3401_v3, %v3504_v7  ;;  %v3742_v8 = vsel %vm1553_vm4, %v3740_v39, %v3741_v1  ;;  %v3744_v55 = vsel %vm1553_vm4, %v3741_v1, %v9351_v22  ;;  %v9356_v4 = vld [vmem:[#allocation131_spill] sm:$0xff]  ;;  %v4541_v1 = vld [vmem:[#allocation2 + $0x348] sm:$0xff] }
 0x2f1   : > { %v3028_v48 = vrot.slane %v7216_v26, 1  ;;  %v4153_v25 = vmax.f32 %v4105_v33, %v3877_v31  ;;  %v3880_v54 = vmax.f32 %v3640_v52, %v3742_v8  ;;  %v9352_v44 = vrot.slane %v7808_v21, 1  ;;  %v9363_v33 = vld [vmem:[#allocation136_spill] sm:$0xff]  ;;  %v9365_v52 = vld [vmem:[#allocation135_spill] sm:$0xff] }
 0x2f2   : > { %v4154_v62 = vmax.f32 %v4106_v50, %v7791_v9  ;;  %v3881_v10 = vmax.f32 %v3641_v5, %v3744_v55  ;;  %v3267_v15 = vrot.slane %v7206_v38, 2  ;;  %v3268_v2 = vrot.slane %v7216_v26, 2  ;;  %v9366_v5 = vld [vmem:[#allocation137_spill] sm:$0xff] }
 0x2f3   : > { %v3029_v6 = vsel %vm1038_vm2, %v3027_v35, %v3028_v48  ;;  %v3031_v63 = vsel %vm1038_vm2, %v3028_v48, %v9352_v44  ;;  %4440 = vst.msk [vmem:[%s4833_s17 + $0x3ae] sm:$0xfc] %vm4169_vm9, %v4153_v25  ;;  %v4004_v42 = vrot.slane %v3880_v54, 4  ;;  %v9353_v36 = vrot.slane %v7808_v21, 2  ;;  %v9368_v35 = vld [vmem:[#allocation114_spill] sm:$0xff]  ;;  %v9369_v25 = vld [vmem:[#allocation115_spill] sm:$0xff] }
 0x2f4   : > { %4441 = vst.msk [vmem:[%s4833_s17 + $0x3b6] sm:$0xff] %vm180_vm0, %v4154_v62  ;;  %v4005_v61 = vrot.slane %v3881_v10, 4  ;;  %v3164_v9 = vmax.f32 %v7206_v38, %v3029_v6  ;;  %v3165_v24 = vmax.f32 %v7216_v26, %v3031_v63  ;;  %v3269_v40 = vsel %vm1215_vm3, %v3267_v15, %v3268_v2  ;;  %v9370_v62 = vld [vmem:[#allocation120_spill] sm:$0xff] }
 0x2f5   : > { %v3271_v13 = vsel %vm1215_vm3, %v3268_v2, %v9353_v36  ;;  %v3507_v60 = vrot.slane %v7206_v38, 3  ;;  %v3508_v20 = vrot.slane %v7216_v26, 3  ;;  %v9354_v47 = vrot.slane %v7824_v59, 4 }
 0x2f6   : > { %v4006_v46 = vsel %vm1553_vm4, %v4004_v42, %v4005_v61  ;;  %v3404_v29 = vmax.f32 %v3164_v9, %v3269_v40  ;;  %v3405_v28 = vmax.f32 %v3165_v24, %v3271_v13  ;;  %v9355_v45 = vrot.slane %v7808_v21, 3 }
 0x2f7   : > { %v4008_v37 = vsel %vm1553_vm4, %v4005_v61, %v9354_v47  ;;  %v4108_v53 = vmax.f32 %v3880_v54, %v4006_v46  ;;  %v3509_v14 = vsel %vm1376_vm1, %v3507_v60, %v3508_v20  ;;  %v3747_v32 = vrot.slane %v7206_v38, 4 }
 0x2f8   : > { %v4109_v31 = vmax.f32 %v3881_v10, %v4008_v37  ;;  %v3511_v41 = vsel %vm1376_vm1, %v3508_v20, %v9355_v45  ;;  %v3644_v0 = vmax.f32 %v3404_v29, %v3509_v14  ;;  %v3748_v18 = vrot.slane %v7216_v26, 4  ;;  %v9362_v26 = vld [vmem:[#allocation134_spill] sm:$0xff]  ;;  %v9373_v20 = vld [vmem:[#allocation97_spill] sm:$0xff] }
 0x2f9   : > { %v3645_v27 = vmax.f32 %v3405_v28, %v3511_v41  ;;  %v4156_v43 = vmax.f32 %v4108_v53, %v3881_v10  ;;  %v9357_v3 = vmax.f32 %v7163_v17, %v9356_v4  ;;  %v9360_v51 = vmax.f32 %v9358_v30, %v9359_v12  ;;  %v9371_v10 = vld [vmem:[#allocation122_spill] sm:$0xff] }
 0x2fa   : > { %v4157_v23 = vmax.f32 %v4109_v31, %v7824_v59  ;;  %v3749_v58 = vsel %vm1553_vm4, %v3747_v32, %v3748_v18  ;;  %v9361_v7 = vrot.slane %v7808_v21, 4  ;;  %v9364_v50 = vmax.f32 %v9362_v26, %v9363_v33 }
 0x2fb   : > { %v846_v39 = vmax.f32 %v9357_v3, %v4540_v49  ;;  %v847_v57 = vmax.f32 %v9360_v51, %v4541_v1  ;;  %v9367_v8 = vmax.f32 %v9365_v52, %v9366_v5  ;;  %4443 = vst.msk [vmem:[%s4833_s17 + $0x3be] sm:$0xfc] %vm4169_vm9, %v4156_v43  ;;  %v3884_v22 = vmax.f32 %v3644_v0, %v3749_v58  ;;  %v9378_v58 = vld [vmem:[#allocation104_spill] sm:$0xff] }
 0x2fc   : > { %v3751_v38 = vsel %vm1553_vm4, %v3748_v18, %v9361_v7  ;;  %v850_v59 = vmax.f32 %v9364_v50, %v466_v34  ;;  %4444 = vst.msk [vmem:[%s4833_s17 + $0x3c6] sm:$0xff] %vm180_vm0, %v4157_v23  ;;  %v9372_v36 = vrot.slane %v7850_v56, 4  ;;  %v9374_v46 = vrot.slane %v9373_v20, 1 }
 0x2fd   : > { %v851_v17 = vmax.f32 %v9367_v8, %v467_v16  ;;  %v3885_v55 = vmax.f32 %v3645_v27, %v3751_v38  ;;  %v982_v48 = vmax.f32 %v9368_v35, %v846_v39  ;;  %v983_v21 = vmax.f32 %v9369_v25, %v847_v57 }
 0x2fe   : > { %v8372_v54 = vmax.f32 %v9370_v62, %v850_v59  ;;  %v4009_v44 = vrot.slane %v3884_v22, 4  ;;  %v9375_v14 = vrot.slane %v9373_v20, 2  ;;  %v9376_v34 = vrot.slane %v9373_v20, 3 }
 0x2ff   : > { %v8375_v6 = vmax.f32 %v9371_v10, %v851_v17  ;;  %v4010_v63 = vrot.slane %v3885_v55, 4  ;;  %v3034_v15 = vrot.slane %v982_v48, 1  ;;  %v3035_v2 = vrot.slane %v983_v21, 1 }
 0x300   : > { %v3274_v42 = vrot.slane %v982_v48, 2  ;;  %v3275_v61 = vrot.slane %v983_v21, 2  ;;  %v3514_v9 = vrot.slane %v982_v48, 3  ;;  %v3515_v24 = vrot.slane %v983_v21, 3 }
 0x301   : > { %v4011_v40 = vsel %vm1553_vm4, %v4009_v44, %v4010_v63  ;;  %v4013_v13 = vsel %vm1553_vm4, %v4010_v63, %v9372_v36  ;;  %v3036_v60 = vsel %vm1038_vm2, %v3034_v15, %v3035_v2  ;;  %v3038_v47 = vsel %vm1038_vm2, %v3035_v2, %v9374_v46  ;;  %v9382_v2 = vld [vmem:[#allocation101_spill] sm:$0xff] }
 0x302   : > { %v4111_v37 = vmax.f32 %v3884_v22, %v4011_v40  ;;  %v4112_v29 = vmax.f32 %v3885_v55, %v4013_v13  ;;  %v3168_v28 = vmax.f32 %v982_v48, %v3036_v60  ;;  %v3169_v53 = vmax.f32 %v983_v21, %v3038_v47 }
 0x303   : > { %v3276_v31 = vsel %vm1215_vm3, %v3274_v42, %v3275_v61  ;;  %v3278_v45 = vsel %vm1215_vm3, %v3275_v61, %v9375_v14  ;;  %v3516_v41 = vsel %vm1376_vm1, %v3514_v9, %v3515_v24  ;;  %v3518_v16 = vsel %vm1376_vm1, %v3515_v24, %v9376_v34 }
 0x304   : > { %v4159_v0 = vmax.f32 %v4111_v37, %v3885_v55  ;;  %v4160_v27 = vmax.f32 %v4112_v29, %v7850_v56  ;;  %v3408_v32 = vmax.f32 %v3168_v28, %v3276_v31  ;;  %v3409_v18 = vmax.f32 %v3169_v53, %v3278_v45 }
 0x305   : > { %v3754_v43 = vrot.slane %v982_v48, 4  ;;  %v3755_v23 = vrot.slane %v983_v21, 4  ;;  %v3041_v49 = vrot.slane %v8372_v54, 1  ;;  %v3042_v4 = vrot.slane %v8375_v6, 1 }
 0x306   : > { %4446 = vst.msk [vmem:[%s4833_s17 + $0x3ce] sm:$0xfc] %vm4169_vm9, %v4159_v0  ;;  %v3648_v3 = vmax.f32 %v3408_v32, %v3516_v41  ;;  %v3649_v39 = vmax.f32 %v3409_v18, %v3518_v16  ;;  %v3281_v1 = vrot.slane %v8372_v54, 2  ;;  %v3282_v30 = vrot.slane %v8375_v6, 2 }
 0x307   : > { %4447 = vst.msk [vmem:[%s4833_s17 + $0x3d6] sm:$0xff] %vm180_vm0, %v4160_v27  ;;  %v3756_v56 = vsel %vm1553_vm4, %v3754_v43, %v3755_v23  ;;  %v9377_v12 = vrot.slane %v9373_v20, 4  ;;  %v3043_v57 = vsel %vm1038_vm2, %v3041_v49, %v3042_v4  ;;  %v9379_v7 = vrot.slane %v9378_v58, 1 }
 0x308   : > { %v3888_v26 = vmax.f32 %v3648_v3, %v3756_v56  ;;  %v3172_v50 = vmax.f32 %v8372_v54, %v3043_v57  ;;  %v3283_v52 = vsel %vm1215_vm3, %v3281_v1, %v3282_v30  ;;  %v9380_v5 = vrot.slane %v9378_v58, 2 }
 0x309   : > { %v3758_v51 = vsel %vm1553_vm4, %v3755_v23, %v9377_v12  ;;  %v3045_v38 = vsel %vm1038_vm2, %v3042_v4, %v9379_v7  ;;  %v3521_v17 = vrot.slane %v8372_v54, 3  ;;  %v3522_v22 = vrot.slane %v8375_v6, 3 }
 0x30a   : > { %v3889_v33 = vmax.f32 %v3649_v39, %v3758_v51  ;;  %v3173_v59 = vmax.f32 %v8375_v6, %v3045_v38  ;;  %v3285_v8 = vsel %vm1215_vm3, %v3282_v30, %v9380_v5  ;;  %v4014_v55 = vrot.slane %v3888_v26, 4 }
 0x30b   : > { %v3412_v48 = vmax.f32 %v3172_v50, %v3283_v52  ;;  %v3523_v21 = vsel %vm1376_vm1, %v3521_v17, %v3522_v22  ;;  %v9381_v62 = vrot.slane %v9378_v58, 3  ;;  %v3761_v44 = vrot.slane %v8372_v54, 4 }
 0x30c   : > { %v4015_v35 = vrot.slane %v3889_v33, 4  ;;  %v3413_v25 = vmax.f32 %v3173_v59, %v3285_v8  ;;  %v3762_v63 = vrot.slane %v8375_v6, 4  ;;  %v9383_v42 = vrot.slane %v9382_v2, 4 }
 0x30d   : > { %v3525_v10 = vsel %vm1376_vm1, %v3522_v22, %v9381_v62  ;;  %v3652_v9 = vmax.f32 %v3412_v48, %v3523_v21  ;;  %v9384_v60 = vrot.slane %v9378_v58, 4 }
 0x30e   : > { %v4016_v15 = vsel %vm1553_vm4, %v4014_v55, %v4015_v35  ;;  %v4018_v61 = vsel %vm1553_vm4, %v4015_v35, %v9383_v42  ;;  %v3653_v24 = vmax.f32 %v3413_v25, %v3525_v10  ;;  %v3763_v13 = vsel %vm1553_vm4, %v3761_v44, %v3762_v63 }
 0x30f   : > { %v4114_v40 = vmax.f32 %v3888_v26, %v4016_v15  ;;  %v4115_v36 = vmax.f32 %v3889_v33, %v4018_v61  ;;  %v3765_v54 = vsel %vm1553_vm4, %v3762_v63, %v9384_v60  ;;  %v3892_v6 = vmax.f32 %v3652_v9, %v3763_v13 }
 0x310   : > { %v3893_v20 = vmax.f32 %v3653_v24, %v3765_v54 }
 0x311   : > { %v4162_v46 = vmax.f32 %v4114_v40, %v3889_v33  ;;  %v4163_v47 = vmax.f32 %v4115_v36, %v9382_v2  ;;  %v4019_v37 = vrot.slane %v3892_v6, 4 }
 0x312   : > { %v4020_v29 = vrot.slane %v3893_v20, 4 }
 0x313   : > { %4449 = vst.msk [vmem:[%s4833_s17 + $0x3de] sm:$0xfc] %vm4169_vm9, %v4162_v46 }
 0x314   : > { %4450 = vst.msk [vmem:[%s4833_s17 + $0x3e6] sm:$0xff] %vm180_vm0, %v4163_v47  ;;  %v4021_v28 = vsel %vm1553_vm4, %v4019_v37, %v4020_v29  ;;  %v4023_v53 = vsel %vm1553_vm4, %v4020_v29, %v4022_v11 }
 0x315   : > { %v4117_v31 = vmax.f32 %v3892_v6, %v4021_v28  ;;  %v4118_v14 = vmax.f32 %v3893_v20, %v4023_v53 }
 0x317   : > { %v4165_v45 = vmax.f32 %v4117_v31, %v3893_v20  ;;  %v4166_v41 = vmax.f32 %v4118_v14, %v7923_v19 }
 0x319   : > { %4452 = vst.msk [vmem:[%s4833_s17 + $0x3ee] sm:$0xfc] %vm4169_vm9, %v4165_v45 }
 0x31a   : > { %4453 = vst.msk [vmem:[%s4833_s17 + $0x3f6] sm:$0xff] %vm180_vm0, %v4166_v41 }
 0x31b PF: > { %s11_s8 = sadd.s32 1, %s4564_s8   ;;  %s9385_s6 = smov %s4560_s7 }
 0x31c   : > { %p8_p5 = scmp.ge.s32.totalorder %s11_s8, 4   ;;  %s9386_s7 = smov %s9388_s9 }
 0x31e   :  { %10 = sbr.rel (!%p8_p5) target bundleno = 2 (0x2), region = 58 }

</bundles_post_ra>
